<compile_context>
chip_gen: v6e
topology: v6e:2x2x1
jax: 0.10.0
libtpu: 0.0.40
codegen_flags: <defaults>
</compile_context>

<pallas_src>
import functools
import math

import jax
import jax.numpy as jnp
from jax.experimental import pallas as pl
from jax.experimental.pallas import tpu as pltpu

N_DENSE_STEPS = 8      # produces x2 .. x9
LANE = 128             # TPU lane width
GRANULE = 256          # row-tile granularity (MXU pass granularity)


def _round_up(v, m):
    return ((v + m - 1) // m) * m


def _pad2(a, rows, cols):
    return jnp.pad(a, ((0, rows - a.shape[0]), (0, cols - a.shape[1])))


def dense_mlp_kernel(nclass, x_ref, w1_ref, b1_ref, w2_ref, b2_ref,
                     w10_ref, b10_ref, out_ref):
    w1 = w1_ref[...]                     # (F_PAD, H_PAD)   bf16
    w2 = w2_ref[...]                     # (H_PAD, H_PAD)   bf16
    w10 = w10_ref[...]                   # (H_PAD, C_PAD)   bf16

    tile_n = x_ref.shape[0]
    half = tile_n // 2                   # tile_n is a multiple of 256 -> half >= 128
    h_pad = w1.shape[1]
    c_pad = w10.shape[1]

    # Hoist bias broadcasts once per tile (JAX does not CSE broadcast_in_dim;
    # the same half-shaped broadcast feeds both chains).
    b1 = jnp.broadcast_to(b1_ref[...], (half, h_pad))     # f32
    b2 = jnp.broadcast_to(b2_ref[...], (half, h_pad))     # f32
    b10 = jnp.broadcast_to(b10_ref[...], (half, c_pad))   # f32

    # Two independent row half-tiles -> two independent dependency chains the
    # scheduler can interleave (MXU of one chain under VPU of the other).
    xa = x_ref[0:half, :]                # bf16
    xb = x_ref[half:tile_n, :]           # bf16

    # x1 = relu(fc1(x)); bf16 operands, f32 accumulation on the MXU.
    x1a = jnp.maximum(
        jnp.dot(xa, w1, preferred_element_type=jnp.float32) + b1, 0.0)
    x1b = jnp.maximum(
        jnp.dot(xb, w1, preferred_element_type=jnp.float32) + b1, 0.0)

    # Dense accumulation: xk = relu(fc2(x_{k-1})) + sum_{j<k} xj
    # Residual sums kept in f32; only the matmul operand is cast to bf16.
    acc_a, prev_a = x1a, x1a
    acc_b, prev_b = x1b, x1b
    for _ in range(N_DENSE_STEPS):       # static unroll: x2 .. x9, 2 chains
        ha = jnp.dot(prev_a.astype(jnp.bfloat16), w2,
                     preferred_element_type=jnp.float32)
        hb = jnp.dot(prev_b.astype(jnp.bfloat16), w2,
                     preferred_element_type=jnp.float32)
        cur_a = jnp.maximum(ha + b2, 0.0) + acc_a
        cur_b = jnp.maximum(hb + b2, 0.0) + acc_b
        acc_a = acc_a + cur_a
        acc_b = acc_b + cur_b
        prev_a, prev_b = cur_a, cur_b

    logits_a = jnp.dot(prev_a.astype(jnp.bfloat16), w10,
                       preferred_element_type=jnp.float32) + b10
    logits_b = jnp.dot(prev_b.astype(jnp.bfloat16), w10,
                       preferred_element_type=jnp.float32) + b10

    def log_softmax(logits):
        if nclass < c_pad:
            col = jax.lax.broadcasted_iota(jnp.int32, (half, c_pad), 1)
            logits = jnp.where(col < nclass, logits, -1e30)
        m = jnp.max(logits, axis=1, keepdims=True)
        shifted = logits - m
        lse = jnp.log(jnp.sum(jnp.exp(shifted), axis=1, keepdims=True))
        return shifted - lse

    # Lane-dense bf16 stores (padded class columns sliced away in the wrapper).
    out_ref[0:half, :] = log_softmax(logits_a).astype(out_ref.dtype)
    out_ref[half:tile_n, :] = log_softmax(logits_b).astype(out_ref.dtype)


def dense_mlp_forward(x, params, *, tile_n=512):
    """Runs the DenseMLP forward pass with a row-tiled Pallas kernel.

    x: (N, nfeat) f32.  params: (w1, b1, w2, b2, w10, b10) with weights stored
    (in, out) in f32; padding/casting to lane-dense bf16 is done here.
    """
    w1, b1, w2, b2, w10, b10 = params
    n, nfeat = x.shape
    nhid = w2.shape[0]
    nclass = w10.shape[1]

    f_pad = _round_up(nfeat, LANE)
    h_pad = _round_up(nhid, LANE)
    c_pad = _round_up(nclass, LANE)

    # Per-chip VMEM capacity (v7x: 64 MiB/TC, v5e/v6e: 128 MiB).
    try:
        vmem_cap = int(getattr(pltpu.get_tpu_info(), "vmem_capacity_bytes",
                               64 << 20))
    except Exception:
        vmem_cap = 64 << 20

    # Row tile: round UP to the MXU-pass granule, clamp to the (granule-
    # rounded) batch, then shrink until the VMEM estimate fits the budget.
    tile_n = _round_up(max(int(tile_n), GRANULE), GRANULE)
    tile_n = min(tile_n, _round_up(n, GRANULE))

    def vmem_estimate(t):
        return (
            2 * t * f_pad * 2                 # x tiles (bf16), double-buffered
            + 2 * t * c_pad * 2               # out tiles (bf16), double-buffered
            + 2 * (f_pad * h_pad + h_pad * h_pad + h_pad * c_pad) * 2
            #                                  ^ weights bf16, 2 pipeline bufs
            #                                    (conservative even w/ Buffered(1))
            + 2 * (2 * h_pad + c_pad) * 4     # biases (f32), 2 pipeline bufs
            + 8 * t * h_pad * 4               # live f32 temporaries (2 chains)
            + 2 * t * c_pad * 4               # f32 logits for both halves
        )

    budget = int(0.6 * vmem_cap)
    while tile_n > GRANULE and vmem_estimate(tile_n) > budget:
        tile_n -= GRANULE

    n_pad = _round_up(n, tile_n)
    grid = (n_pad // tile_n,)

    # Pad everything to lane width; zero padding is exact for this network.
    xb = jnp.pad(x, ((0, n_pad - n), (0, f_pad - nfeat))).astype(jnp.bfloat16)
    w1p = _pad2(w1, f_pad, h_pad).astype(jnp.bfloat16)
    b1p = _pad2(b1, 1, h_pad).astype(jnp.float32)
    w2p = _pad2(w2, h_pad, h_pad).astype(jnp.bfloat16)
    b2p = _pad2(b2, 1, h_pad).astype(jnp.float32)
    w10p = _pad2(w10, h_pad, c_pad).astype(jnp.bfloat16)
    b10p = _pad2(b10, 1, c_pad).astype(jnp.float32)

    vmem_limit = max(8 << 20, min(int(1.5 * vmem_estimate(tile_n)),
                                  int(0.9 * vmem_cap)))

    flops = 2 * n_pad * (f_pad * h_pad
                         + N_DENSE_STEPS * h_pad * h_pad
                         + h_pad * c_pad)
    bytes_accessed = (n_pad * f_pad * 2 + n_pad * c_pad * 2
                      + (f_pad * h_pad + h_pad * h_pad + h_pad * c_pad) * 2
                      + (2 * h_pad + c_pad) * 4)
    cost = pl.CostEstimate(flops=int(flops),
                           transcendentals=int(n_pad * (c_pad + 1)),
                           bytes_accessed=int(bytes_accessed))

    const = lambda i: (0, 0)            # weights/biases resident across tiles

    def build_and_call(buffer_weights_once):
        # Constant-index weights never get re-fetched after step 0; Buffered(1)
        # reclaims their second pipeline buffer (largest win on v7x's 64 MiB).
        wkw = ({"pipeline_mode": pl.Buffered(buffer_count=1)}
               if buffer_weights_once else {})
        in_specs = [
            pl.BlockSpec((tile_n, f_pad), lambda i: (i, 0)),        # x (streamed)
            pl.BlockSpec((f_pad, h_pad), const, **wkw),             # W1
            pl.BlockSpec((1, h_pad), const, **wkw),                 # b1
            pl.BlockSpec((h_pad, h_pad), const, **wkw),             # W2
            pl.BlockSpec((1, h_pad), const, **wkw),                 # b2
            pl.BlockSpec((h_pad, c_pad), const, **wkw),             # W10
            pl.BlockSpec((1, c_pad), const, **wkw),                 # b10
        ]
        grid_spec = pltpu.PrefetchScalarGridSpec(
            num_scalar_prefetch=0,
            grid=grid,
            in_specs=in_specs,
            out_specs=pl.BlockSpec((tile_n, c_pad), lambda i: (i, 0)),
        )
        # TODO(synk): on v7x, verify in xprof that the batch axis actually
        # shards across both TensorCores; if not, switch to CORE_PARALLEL or
        # pl.core_map with an explicit per-core row split.
        return pl.pallas_call(
            functools.partial(dense_mlp_kernel, nclass),
            out_shape=jax.ShapeDtypeStruct((n_pad, c_pad), jnp.bfloat16),
            grid_spec=grid_spec,
            compiler_params=pltpu.CompilerParams(
                dimension_semantics=("parallel",),
                vmem_limit_bytes=int(vmem_limit),
            ),
            cost_estimate=cost,
        )(xb, w1p, b1p, w2p, b2p, w10p, b10p)

    try:
        out = build_and_call(True)
    except Exception:
        # Older JAX without BlockSpec.pipeline_mode / Buffered(1) support.
        out = build_and_call(False)

    return out[:n, :nclass].astype(jnp.float32)


def init_params(key, nfeat, nhid, nclass):
    """Deterministic PyTorch-Linear-style uniform init; weights stored (in, out)."""
    def linear(key, fan_in, fan_out):
        kw, kb = jax.random.split(key)
        bound = 1.0 / math.sqrt(fan_in)
        w = jax.random.uniform(kw, (fan_in, fan_out), jnp.float32, -bound, bound)
        b = jax.random.uniform(kb, (1, fan_out), jnp.float32, -bound, bound)
        return w, b

    k1, k2, k10 = jax.random.split(key, 3)
    w1, b1 = linear(k1, nfeat, nhid)
    w2, b2 = linear(k2, nhid, nhid)
    w10, b10 = linear(k10, nhid, nclass)
    return (w1, b1, w2, b2, w10, b10)


def reference_forward(x, params):
    """Pure-JAX reference mirroring the kernel's bf16-operand / f32-accum matmuls."""
    w1, b1, w2, b2, w10, b10 = params

    def mm(a, w):
        return jnp.dot(a.astype(jnp.bfloat16), w.astype(jnp.bfloat16),
                       preferred_element_type=jnp.float32)

    x1 = jax.nn.relu(mm(x, w1) + b1)
    acc, prev = x1, x1
    for _ in range(N_DENSE_STEPS):
        cur = jax.nn.relu(mm(prev, w2) + b2) + acc
        acc = acc + cur
        prev = cur
    logits = mm(prev, w10) + b10
    return jax.nn.log_softmax(logits, axis=1)


if __name__ == "__main__":
    key = jax.random.PRNGKey(0)
    k_x, k_p = jax.random.split(key)

    # Small demo shapes; batch chosen non-multiple of the tile so the row grid
    # (2 tiles of 256) and tail-row padding are exercised.
    batch, nfeat, nhid, nclass = 300, 16, 32, 8
    x = jax.random.normal(k_x, (batch, nfeat), jnp.float32)
    params = init_params(k_p, nfeat, nhid, nclass)

    out = dense_mlp_forward(x, params, tile_n=256)
    out = jax.block_until_ready(out)

    ref = reference_forward(x, params)
    assert out.shape == (batch, nclass)
    assert jnp.allclose(out, ref, atol=2e-2, rtol=1e-2), (
        float(jnp.max(jnp.abs(out - ref))))

    print("KERNEL_OK")
</pallas_src>

<mosaic_0001>
module attributes {stable_mosaic.version = 11 : i64} {
  func.func @dense_mlp_kernel(%arg0: i32, %arg1: memref<256x128xbf16, #tpu.memory_space<vmem>>, %arg2: memref<128x128xbf16, #tpu.memory_space<vmem>>, %arg3: memref<1x128xf32, #tpu.memory_space<vmem>>, %arg4: memref<128x128xbf16, #tpu.memory_space<vmem>>, %arg5: memref<1x128xf32, #tpu.memory_space<vmem>>, %arg6: memref<128x128xbf16, #tpu.memory_space<vmem>>, %arg7: memref<1x128xf32, #tpu.memory_space<vmem>>, %arg8: memref<256x128xbf16, #tpu.memory_space<vmem>>) attributes {dimension_semantics = [#tpu.dimension_semantics<parallel>], iteration_bounds = array<i64: 2>, scalar_prefetch = 0 : i64, scratch_operands = 0 : i64, tpu.core_type = #tpu.core_type<tc>, window_params = [{transform_indices = @transform_0, window_bounds = array<i64: 256, 128>}, {pipeline_mode = #tpu.pipeline_mode<synchronous>, transform_indices = @transform_1, window_bounds = array<i64: 128, 128>}, {pipeline_mode = #tpu.pipeline_mode<synchronous>, transform_indices = @transform_2, window_bounds = array<i64: 1, 128>}, {pipeline_mode = #tpu.pipeline_mode<synchronous>, transform_indices = @transform_3, window_bounds = array<i64: 128, 128>}, {pipeline_mode = #tpu.pipeline_mode<synchronous>, transform_indices = @transform_4, window_bounds = array<i64: 1, 128>}, {pipeline_mode = #tpu.pipeline_mode<synchronous>, transform_indices = @transform_5, window_bounds = array<i64: 128, 128>}, {pipeline_mode = #tpu.pipeline_mode<synchronous>, transform_indices = @transform_6, window_bounds = array<i64: 1, 128>}, {transform_indices = @transform_7, window_bounds = array<i64: 256, 128>}]} {
    %c0 = arith.constant 0 : index
    %c0_0 = arith.constant 0 : index
    %0 = vector.load %arg2[%c0, %c0_0] : memref<128x128xbf16, #tpu.memory_space<vmem>>, vector<128x128xbf16>
    %c0_1 = arith.constant 0 : index
    %c0_2 = arith.constant 0 : index
    %1 = vector.load %arg4[%c0_1, %c0_2] : memref<128x128xbf16, #tpu.memory_space<vmem>>, vector<128x128xbf16>
    %c0_3 = arith.constant 0 : index
    %c0_4 = arith.constant 0 : index
    %2 = vector.load %arg6[%c0_3, %c0_4] : memref<128x128xbf16, #tpu.memory_space<vmem>>, vector<128x128xbf16>
    %c0_5 = arith.constant 0 : index
    %c0_6 = arith.constant 0 : index
    %3 = vector.load %arg3[%c0_5, %c0_6] : memref<1x128xf32, #tpu.memory_space<vmem>>, vector<1x128xf32>
    %4 = vector.shape_cast %3 : vector<1x128xf32> to vector<1x128xf32>
    %5 = vector.broadcast %4 : vector<1x128xf32> to vector<128x128xf32>
    %c0_7 = arith.constant 0 : index
    %c0_8 = arith.constant 0 : index
    %6 = vector.load %arg5[%c0_7, %c0_8] : memref<1x128xf32, #tpu.memory_space<vmem>>, vector<1x128xf32>
    %7 = vector.shape_cast %6 : vector<1x128xf32> to vector<1x128xf32>
    %8 = vector.broadcast %7 : vector<1x128xf32> to vector<128x128xf32>
    %c0_9 = arith.constant 0 : index
    %c0_10 = arith.constant 0 : index
    %9 = vector.load %arg7[%c0_9, %c0_10] : memref<1x128xf32, #tpu.memory_space<vmem>>, vector<1x128xf32>
    %10 = vector.shape_cast %9 : vector<1x128xf32> to vector<1x128xf32>
    %11 = vector.broadcast %10 : vector<1x128xf32> to vector<128x128xf32>
    %c0_11 = arith.constant 0 : index
    %c0_12 = arith.constant 0 : index
    %12 = vector.load %arg1[%c0_11, %c0_12] : memref<256x128xbf16, #tpu.memory_space<vmem>>, vector<128x128xbf16>
    %c128 = arith.constant 128 : index
    %c0_13 = arith.constant 0 : index
    %13 = vector.load %arg1[%c128, %c0_13] : memref<256x128xbf16, #tpu.memory_space<vmem>>, vector<128x128xbf16>
    %cst = arith.constant dense<0.000000e+00> : vector<128x128xf32>
    %14 = tpu.matmul %12, %0, %cst {dimension_numbers = #tpu.dot_dimension_numbers<[1], [0], [0], [1], [0, 0, 1, 1], [], []>} : vector<128x128xbf16>, vector<128x128xbf16>, vector<128x128xf32> -> vector<128x128xf32>
    %15 = arith.addf %14, %5 : vector<128x128xf32>
    %cst_14 = arith.constant 0.000000e+00 : f32
    %16 = vector.broadcast %cst_14 : f32 to vector<128x128xf32>
    %17 = arith.maximumf %15, %16 : vector<128x128xf32>
    %cst_15 = arith.constant dense<0.000000e+00> : vector<128x128xf32>
    %18 = tpu.matmul %13, %0, %cst_15 {dimension_numbers = #tpu.dot_dimension_numbers<[1], [0], [0], [1], [0, 0, 1, 1], [], []>} : vector<128x128xbf16>, vector<128x128xbf16>, vector<128x128xf32> -> vector<128x128xf32>
    %19 = arith.addf %18, %5 : vector<128x128xf32>
    %cst_16 = arith.constant 0.000000e+00 : f32
    %20 = vector.broadcast %cst_16 : f32 to vector<128x128xf32>
    %21 = arith.maximumf %19, %20 : vector<128x128xf32>
    %22 = arith.truncf %17 : vector<128x128xf32> to vector<128x128xbf16>
    %cst_17 = arith.constant dense<0.000000e+00> : vector<128x128xf32>
    %23 = tpu.matmul %22, %1, %cst_17 {dimension_numbers = #tpu.dot_dimension_numbers<[1], [0], [0], [1], [0, 0, 1, 1], [], []>} : vector<128x128xbf16>, vector<128x128xbf16>, vector<128x128xf32> -> vector<128x128xf32>
    %24 = arith.truncf %21 : vector<128x128xf32> to vector<128x128xbf16>
    %cst_18 = arith.constant dense<0.000000e+00> : vector<128x128xf32>
    %25 = tpu.matmul %24, %1, %cst_18 {dimension_numbers = #tpu.dot_dimension_numbers<[1], [0], [0], [1], [0, 0, 1, 1], [], []>} : vector<128x128xbf16>, vector<128x128xbf16>, vector<128x128xf32> -> vector<128x128xf32>
    %26 = arith.addf %23, %8 : vector<128x128xf32>
    %cst_19 = arith.constant 0.000000e+00 : f32
    %27 = vector.broadcast %cst_19 : f32 to vector<128x128xf32>
    %28 = arith.maximumf %26, %27 : vector<128x128xf32>
    %29 = arith.addf %28, %17 : vector<128x128xf32>
    %30 = arith.addf %25, %8 : vector<128x128xf32>
    %cst_20 = arith.constant 0.000000e+00 : f32
    %31 = vector.broadcast %cst_20 : f32 to vector<128x128xf32>
    %32 = arith.maximumf %30, %31 : vector<128x128xf32>
    %33 = arith.addf %32, %21 : vector<128x128xf32>
    %34 = arith.addf %17, %29 : vector<128x128xf32>
    %35 = arith.addf %21, %33 : vector<128x128xf32>
    %36 = arith.truncf %29 : vector<128x128xf32> to vector<128x128xbf16>
    %cst_21 = arith.constant dense<0.000000e+00> : vector<128x128xf32>
    %37 = tpu.matmul %36, %1, %cst_21 {dimension_numbers = #tpu.dot_dimension_numbers<[1], [0], [0], [1], [0, 0, 1, 1], [], []>} : vector<128x128xbf16>, vector<128x128xbf16>, vector<128x128xf32> -> vector<128x128xf32>
    %38 = arith.truncf %33 : vector<128x128xf32> to vector<128x128xbf16>
    %cst_22 = arith.constant dense<0.000000e+00> : vector<128x128xf32>
    %39 = tpu.matmul %38, %1, %cst_22 {dimension_numbers = #tpu.dot_dimension_numbers<[1], [0], [0], [1], [0, 0, 1, 1], [], []>} : vector<128x128xbf16>, vector<128x128xbf16>, vector<128x128xf32> -> vector<128x128xf32>
    %40 = arith.addf %37, %8 : vector<128x128xf32>
    %cst_23 = arith.constant 0.000000e+00 : f32
    %41 = vector.broadcast %cst_23 : f32 to vector<128x128xf32>
    %42 = arith.maximumf %40, %41 : vector<128x128xf32>
    %43 = arith.addf %42, %34 : vector<128x128xf32>
    %44 = arith.addf %39, %8 : vector<128x128xf32>
    %cst_24 = arith.constant 0.000000e+00 : f32
    %45 = vector.broadcast %cst_24 : f32 to vector<128x128xf32>
    %46 = arith.maximumf %44, %45 : vector<128x128xf32>
    %47 = arith.addf %46, %35 : vector<128x128xf32>
    %48 = arith.addf %34, %43 : vector<128x128xf32>
    %49 = arith.addf %35, %47 : vector<128x128xf32>
    %50 = arith.truncf %43 : vector<128x128xf32> to vector<128x128xbf16>
    %cst_25 = arith.constant dense<0.000000e+00> : vector<128x128xf32>
    %51 = tpu.matmul %50, %1, %cst_25 {dimension_numbers = #tpu.dot_dimension_numbers<[1], [0], [0], [1], [0, 0, 1, 1], [], []>} : vector<128x128xbf16>, vector<128x128xbf16>, vector<128x128xf32> -> vector<128x128xf32>
    %52 = arith.truncf %47 : vector<128x128xf32> to vector<128x128xbf16>
    %cst_26 = arith.constant dense<0.000000e+00> : vector<128x128xf32>
    %53 = tpu.matmul %52, %1, %cst_26 {dimension_numbers = #tpu.dot_dimension_numbers<[1], [0], [0], [1], [0, 0, 1, 1], [], []>} : vector<128x128xbf16>, vector<128x128xbf16>, vector<128x128xf32> -> vector<128x128xf32>
    %54 = arith.addf %51, %8 : vector<128x128xf32>
    %cst_27 = arith.constant 0.000000e+00 : f32
    %55 = vector.broadcast %cst_27 : f32 to vector<128x128xf32>
    %56 = arith.maximumf %54, %55 : vector<128x128xf32>
    %57 = arith.addf %56, %48 : vector<128x128xf32>
    %58 = arith.addf %53, %8 : vector<128x128xf32>
    %cst_28 = arith.constant 0.000000e+00 : f32
    %59 = vector.broadcast %cst_28 : f32 to vector<128x128xf32>
    %60 = arith.maximumf %58, %59 : vector<128x128xf32>
    %61 = arith.addf %60, %49 : vector<128x128xf32>
    %62 = arith.addf %48, %57 : vector<128x128xf32>
    %63 = arith.addf %49, %61 : vector<128x128xf32>
    %64 = arith.truncf %57 : vector<128x128xf32> to vector<128x128xbf16>
    %cst_29 = arith.constant dense<0.000000e+00> : vector<128x128xf32>
    %65 = tpu.matmul %64, %1, %cst_29 {dimension_numbers = #tpu.dot_dimension_numbers<[1], [0], [0], [1], [0, 0, 1, 1], [], []>} : vector<128x128xbf16>, vector<128x128xbf16>, vector<128x128xf32> -> vector<128x128xf32>
    %66 = arith.truncf %61 : vector<128x128xf32> to vector<128x128xbf16>
    %cst_30 = arith.constant dense<0.000000e+00> : vector<128x128xf32>
    %67 = tpu.matmul %66, %1, %cst_30 {dimension_numbers = #tpu.dot_dimension_numbers<[1], [0], [0], [1], [0, 0, 1, 1], [], []>} : vector<128x128xbf16>, vector<128x128xbf16>, vector<128x128xf32> -> vector<128x128xf32>
    %68 = arith.addf %65, %8 : vector<128x128xf32>
    %cst_31 = arith.constant 0.000000e+00 : f32
    %69 = vector.broadcast %cst_31 : f32 to vector<128x128xf32>
    %70 = arith.maximumf %68, %69 : vector<128x128xf32>
    %71 = arith.addf %70, %62 : vector<128x128xf32>
    %72 = arith.addf %67, %8 : vector<128x128xf32>
    %cst_32 = arith.constant 0.000000e+00 : f32
    %73 = vector.broadcast %cst_32 : f32 to vector<128x128xf32>
    %74 = arith.maximumf %72, %73 : vector<128x128xf32>
    %75 = arith.addf %74, %63 : vector<128x128xf32>
    %76 = arith.addf %62, %71 : vector<128x128xf32>
    %77 = arith.addf %63, %75 : vector<128x128xf32>
    %78 = arith.truncf %71 : vector<128x128xf32> to vector<128x128xbf16>
    %cst_33 = arith.constant dense<0.000000e+00> : vector<128x128xf32>
    %79 = tpu.matmul %78, %1, %cst_33 {dimension_numbers = #tpu.dot_dimension_numbers<[1], [0], [0], [1], [0, 0, 1, 1], [], []>} : vector<128x128xbf16>, vector<128x128xbf16>, vector<128x128xf32> -> vector<128x128xf32>
    %80 = arith.truncf %75 : vector<128x128xf32> to vector<128x128xbf16>
    %cst_34 = arith.constant dense<0.000000e+00> : vector<128x128xf32>
    %81 = tpu.matmul %80, %1, %cst_34 {dimension_numbers = #tpu.dot_dimension_numbers<[1], [0], [0], [1], [0, 0, 1, 1], [], []>} : vector<128x128xbf16>, vector<128x128xbf16>, vector<128x128xf32> -> vector<128x128xf32>
    %82 = arith.addf %79, %8 : vector<128x128xf32>
    %cst_35 = arith.constant 0.000000e+00 : f32
    %83 = vector.broadcast %cst_35 : f32 to vector<128x128xf32>
    %84 = arith.maximumf %82, %83 : vector<128x128xf32>
    %85 = arith.addf %84, %76 : vector<128x128xf32>
    %86 = arith.addf %81, %8 : vector<128x128xf32>
    %cst_36 = arith.constant 0.000000e+00 : f32
    %87 = vector.broadcast %cst_36 : f32 to vector<128x128xf32>
    %88 = arith.maximumf %86, %87 : vector<128x128xf32>
    %89 = arith.addf %88, %77 : vector<128x128xf32>
    %90 = arith.addf %76, %85 : vector<128x128xf32>
    %91 = arith.addf %77, %89 : vector<128x128xf32>
    %92 = arith.truncf %85 : vector<128x128xf32> to vector<128x128xbf16>
    %cst_37 = arith.constant dense<0.000000e+00> : vector<128x128xf32>
    %93 = tpu.matmul %92, %1, %cst_37 {dimension_numbers = #tpu.dot_dimension_numbers<[1], [0], [0], [1], [0, 0, 1, 1], [], []>} : vector<128x128xbf16>, vector<128x128xbf16>, vector<128x128xf32> -> vector<128x128xf32>
    %94 = arith.truncf %89 : vector<128x128xf32> to vector<128x128xbf16>
    %cst_38 = arith.constant dense<0.000000e+00> : vector<128x128xf32>
    %95 = tpu.matmul %94, %1, %cst_38 {dimension_numbers = #tpu.dot_dimension_numbers<[1], [0], [0], [1], [0, 0, 1, 1], [], []>} : vector<128x128xbf16>, vector<128x128xbf16>, vector<128x128xf32> -> vector<128x128xf32>
    %96 = arith.addf %93, %8 : vector<128x128xf32>
    %cst_39 = arith.constant 0.000000e+00 : f32
    %97 = vector.broadcast %cst_39 : f32 to vector<128x128xf32>
    %98 = arith.maximumf %96, %97 : vector<128x128xf32>
    %99 = arith.addf %98, %90 : vector<128x128xf32>
    %100 = arith.addf %95, %8 : vector<128x128xf32>
    %cst_40 = arith.constant 0.000000e+00 : f32
    %101 = vector.broadcast %cst_40 : f32 to vector<128x128xf32>
    %102 = arith.maximumf %100, %101 : vector<128x128xf32>
    %103 = arith.addf %102, %91 : vector<128x128xf32>
    %104 = arith.addf %90, %99 : vector<128x128xf32>
    %105 = arith.addf %91, %103 : vector<128x128xf32>
    %106 = arith.truncf %99 : vector<128x128xf32> to vector<128x128xbf16>
    %cst_41 = arith.constant dense<0.000000e+00> : vector<128x128xf32>
    %107 = tpu.matmul %106, %1, %cst_41 {dimension_numbers = #tpu.dot_dimension_numbers<[1], [0], [0], [1], [0, 0, 1, 1], [], []>} : vector<128x128xbf16>, vector<128x128xbf16>, vector<128x128xf32> -> vector<128x128xf32>
    %108 = arith.truncf %103 : vector<128x128xf32> to vector<128x128xbf16>
    %cst_42 = arith.constant dense<0.000000e+00> : vector<128x128xf32>
    %109 = tpu.matmul %108, %1, %cst_42 {dimension_numbers = #tpu.dot_dimension_numbers<[1], [0], [0], [1], [0, 0, 1, 1], [], []>} : vector<128x128xbf16>, vector<128x128xbf16>, vector<128x128xf32> -> vector<128x128xf32>
    %110 = arith.addf %107, %8 : vector<128x128xf32>
    %cst_43 = arith.constant 0.000000e+00 : f32
    %111 = vector.broadcast %cst_43 : f32 to vector<128x128xf32>
    %112 = arith.maximumf %110, %111 : vector<128x128xf32>
    %113 = arith.addf %112, %104 : vector<128x128xf32>
    %114 = arith.addf %109, %8 : vector<128x128xf32>
    %cst_44 = arith.constant 0.000000e+00 : f32
    %115 = vector.broadcast %cst_44 : f32 to vector<128x128xf32>
    %116 = arith.maximumf %114, %115 : vector<128x128xf32>
    %117 = arith.addf %116, %105 : vector<128x128xf32>
    %118 = arith.addf %104, %113 : vector<128x128xf32>
    %119 = arith.addf %105, %117 : vector<128x128xf32>
    %120 = arith.truncf %113 : vector<128x128xf32> to vector<128x128xbf16>
    %cst_45 = arith.constant dense<0.000000e+00> : vector<128x128xf32>
    %121 = tpu.matmul %120, %1, %cst_45 {dimension_numbers = #tpu.dot_dimension_numbers<[1], [0], [0], [1], [0, 0, 1, 1], [], []>} : vector<128x128xbf16>, vector<128x128xbf16>, vector<128x128xf32> -> vector<128x128xf32>
    %122 = arith.truncf %117 : vector<128x128xf32> to vector<128x128xbf16>
    %cst_46 = arith.constant dense<0.000000e+00> : vector<128x128xf32>
    %123 = tpu.matmul %122, %1, %cst_46 {dimension_numbers = #tpu.dot_dimension_numbers<[1], [0], [0], [1], [0, 0, 1, 1], [], []>} : vector<128x128xbf16>, vector<128x128xbf16>, vector<128x128xf32> -> vector<128x128xf32>
    %124 = arith.addf %121, %8 : vector<128x128xf32>
    %cst_47 = arith.constant 0.000000e+00 : f32
    %125 = vector.broadcast %cst_47 : f32 to vector<128x128xf32>
    %126 = arith.maximumf %124, %125 : vector<128x128xf32>
    %127 = arith.addf %126, %118 : vector<128x128xf32>
    %128 = arith.addf %123, %8 : vector<128x128xf32>
    %cst_48 = arith.constant 0.000000e+00 : f32
    %129 = vector.broadcast %cst_48 : f32 to vector<128x128xf32>
    %130 = arith.maximumf %128, %129 : vector<128x128xf32>
    %131 = arith.addf %130, %119 : vector<128x128xf32>
    %132 = arith.truncf %127 : vector<128x128xf32> to vector<128x128xbf16>
    %cst_49 = arith.constant dense<0.000000e+00> : vector<128x128xf32>
    %133 = tpu.matmul %132, %2, %cst_49 {dimension_numbers = #tpu.dot_dimension_numbers<[1], [0], [0], [1], [0, 0, 1, 1], [], []>} : vector<128x128xbf16>, vector<128x128xbf16>, vector<128x128xf32> -> vector<128x128xf32>
    %134 = arith.addf %133, %11 : vector<128x128xf32>
    %135 = arith.truncf %131 : vector<128x128xf32> to vector<128x128xbf16>
    %cst_50 = arith.constant dense<0.000000e+00> : vector<128x128xf32>
    %136 = tpu.matmul %135, %2, %cst_50 {dimension_numbers = #tpu.dot_dimension_numbers<[1], [0], [0], [1], [0, 0, 1, 1], [], []>} : vector<128x128xbf16>, vector<128x128xbf16>, vector<128x128xf32> -> vector<128x128xf32>
    %137 = arith.addf %136, %11 : vector<128x128xf32>
    %138 = tpu.iota {dimensions = array<i32: 1>} : vector<128x128xi32>
    %c8_i32 = arith.constant 8 : i32
    %139 = vector.broadcast %c8_i32 : i32 to vector<128x128xi32>
    %140 = arith.cmpi slt, %138, %139 : vector<128x128xi32>
    %cst_51 = arith.constant -1.000000e+30 : f32
    %141 = vector.broadcast %cst_51 : f32 to vector<128x128xf32>
    %142 = arith.select %140, %134, %141 : vector<128x128xi1>, vector<128x128xf32>
    %cst_52 = arith.constant dense<0xFF800000> : vector<128xf32>
    %143 = vector.multi_reduction <maximumf>, %142, %cst_52 [1] : vector<128x128xf32> to vector<128xf32>
    %144 = vector.shape_cast %143 : vector<128xf32> to vector<128x1xf32>
    %145 = vector.broadcast %144 : vector<128x1xf32> to vector<128x128xf32>
    %146 = arith.subf %142, %145 : vector<128x128xf32>
    %147 = math.exp %146 : vector<128x128xf32>
    %cst_53 = arith.constant dense<0.000000e+00> : vector<128xf32>
    %148 = vector.multi_reduction <add>, %147, %cst_53 [1] : vector<128x128xf32> to vector<128xf32>
    %149 = vector.shape_cast %148 : vector<128xf32> to vector<128x1xf32>
    %150 = math.log %149 : vector<128x1xf32>
    %151 = vector.broadcast %150 : vector<128x1xf32> to vector<128x128xf32>
    %152 = arith.subf %146, %151 : vector<128x128xf32>
    %153 = arith.truncf %152 : vector<128x128xf32> to vector<128x128xbf16>
    %c0_54 = arith.constant 0 : index
    %c0_55 = arith.constant 0 : index
    %154 = vector.load %arg8[%c0_54, %c0_55] : memref<256x128xbf16, #tpu.memory_space<vmem>>, vector<128x128xbf16>
    tpu.vector_store %arg8[%c0_54, %c0_55], %153 {strides = array<i32>} : memref<256x128xbf16, #tpu.memory_space<vmem>>, vector<128x128xbf16>,
    %155 = tpu.iota {dimensions = array<i32: 1>} : vector<128x128xi32>
    %c8_i32_56 = arith.constant 8 : i32
    %156 = vector.broadcast %c8_i32_56 : i32 to vector<128x128xi32>
    %157 = arith.cmpi slt, %155, %156 : vector<128x128xi32>
    %cst_57 = arith.constant -1.000000e+30 : f32
    %158 = vector.broadcast %cst_57 : f32 to vector<128x128xf32>
    %159 = arith.select %157, %137, %158 : vector<128x128xi1>, vector<128x128xf32>
    %cst_58 = arith.constant dense<0xFF800000> : vector<128xf32>
    %160 = vector.multi_reduction <maximumf>, %159, %cst_58 [1] : vector<128x128xf32> to vector<128xf32>
    %161 = vector.shape_cast %160 : vector<128xf32> to vector<128x1xf32>
    %162 = vector.broadcast %161 : vector<128x1xf32> to vector<128x128xf32>
    %163 = arith.subf %159, %162 : vector<128x128xf32>
    %164 = math.exp %163 : vector<128x128xf32>
    %cst_59 = arith.constant dense<0.000000e+00> : vector<128xf32>
    %165 = vector.multi_reduction <add>, %164, %cst_59 [1] : vector<128x128xf32> to vector<128xf32>
    %166 = vector.shape_cast %165 : vector<128xf32> to vector<128x1xf32>
    %167 = math.log %166 : vector<128x1xf32>
    %168 = vector.broadcast %167 : vector<128x1xf32> to vector<128x128xf32>
    %169 = arith.subf %163, %168 : vector<128x128xf32>
    %170 = arith.truncf %169 : vector<128x128xf32> to vector<128x128xbf16>
    %c128_60 = arith.constant 128 : index
    %c0_61 = arith.constant 0 : index
    %171 = vector.load %arg8[%c128_60, %c0_61] : memref<256x128xbf16, #tpu.memory_space<vmem>>, vector<128x128xbf16>
    tpu.vector_store %arg8[%c128_60, %c0_61], %170 {strides = array<i32>} : memref<256x128xbf16, #tpu.memory_space<vmem>>, vector<128x128xbf16>,
    return
  }
  func.func @transform_0(%arg0: i32) -> (i32, i32) {
    %c0_i32 = arith.constant 0 : i32
    %c0_i32_0 = arith.constant 0 : i32
    return %arg0, %c0_i32 : i32, i32
  }
  func.func @transform_1(%arg0: i32) -> (i32, i32) {
    %c0_i32 = arith.constant 0 : i32
    %c0_i32_0 = arith.constant 0 : i32
    %c0_i32_1 = arith.constant 0 : i32
    return %c0_i32, %c0_i32_0 : i32, i32
  }
  func.func @transform_2(%arg0: i32) -> (i32, i32) {
    %c0_i32 = arith.constant 0 : i32
    %c0_i32_0 = arith.constant 0 : i32
    %c0_i32_1 = arith.constant 0 : i32
    return %c0_i32, %c0_i32_0 : i32, i32
  }
  func.func @transform_3(%arg0: i32) -> (i32, i32) {
    %c0_i32 = arith.constant 0 : i32
    %c0_i32_0 = arith.constant 0 : i32
    %c0_i32_1 = arith.constant 0 : i32
    return %c0_i32, %c0_i32_0 : i32, i32
  }
  func.func @transform_4(%arg0: i32) -> (i32, i32) {
    %c0_i32 = arith.constant 0 : i32
    %c0_i32_0 = arith.constant 0 : i32
    %c0_i32_1 = arith.constant 0 : i32
    return %c0_i32, %c0_i32_0 : i32, i32
  }
  func.func @transform_5(%arg0: i32) -> (i32, i32) {
    %c0_i32 = arith.constant 0 : i32
    %c0_i32_0 = arith.constant 0 : i32
    %c0_i32_1 = arith.constant 0 : i32
    return %c0_i32, %c0_i32_0 : i32, i32
  }
  func.func @transform_6(%arg0: i32) -> (i32, i32) {
    %c0_i32 = arith.constant 0 : i32
    %c0_i32_0 = arith.constant 0 : i32
    %c0_i32_1 = arith.constant 0 : i32
    return %c0_i32, %c0_i32_0 : i32, i32
  }
  func.func @transform_7(%arg0: i32) -> (i32, i32) {
    %c0_i32 = arith.constant 0 : i32
    %c0_i32_0 = arith.constant 0 : i32
    return %arg0, %c0_i32 : i32, i32
  }
}

module attributes {stable_mosaic.version = 11 : i64} {
  func.func @dense_mlp_kernel(%arg0: i32, %arg1: memref<256x128xbf16, #tpu.memory_space<vmem>>, %arg2: memref<128x128xbf16, #tpu.memory_space<vmem>>, %arg3: memref<1x128xf32, #tpu.memory_space<vmem>>, %arg4: memref<128x128xbf16, #tpu.memory_space<vmem>>, %arg5: memref<1x128xf32, #tpu.memory_space<vmem>>, %arg6: memref<128x128xbf16, #tpu.memory_space<vmem>>, %arg7: memref<1x128xf32, #tpu.memory_space<vmem>>, %arg8: memref<256x128xbf16, #tpu.memory_space<vmem>>) attributes {dimension_semantics = [#tpu.dimension_semantics<parallel>], iteration_bounds = array<i64: 2>, scalar_prefetch = 0 : i64, scratch_operands = 0 : i64, tpu.core_type = #tpu.core_type<tc>, window_params = [{transform_indices = @transform_0, window_bounds = array<i64: 256, 128>}, {pipeline_mode = #tpu.pipeline_mode<synchronous>, transform_indices = @transform_1, window_bounds = array<i64: 128, 128>}, {pipeline_mode = #tpu.pipeline_mode<synchronous>, transform_indices = @transform_2, window_bounds = array<i64: 1, 128>}, {pipeline_mode = #tpu.pipeline_mode<synchronous>, transform_indices = @transform_3, window_bounds = array<i64: 128, 128>}, {pipeline_mode = #tpu.pipeline_mode<synchronous>, transform_indices = @transform_4, window_bounds = array<i64: 1, 128>}, {pipeline_mode = #tpu.pipeline_mode<synchronous>, transform_indices = @transform_5, window_bounds = array<i64: 128, 128>}, {pipeline_mode = #tpu.pipeline_mode<synchronous>, transform_indices = @transform_6, window_bounds = array<i64: 1, 128>}, {transform_indices = @transform_7, window_bounds = array<i64: 256, 128>}]} {
    %c0 = arith.constant 0 : index
    %c0_0 = arith.constant 0 : index
    %0 = vector.load %arg2[%c0, %c0_0] : memref<128x128xbf16, #tpu.memory_space<vmem>>, vector<128x128xbf16>
    %c0_1 = arith.constant 0 : index
    %c0_2 = arith.constant 0 : index
    %1 = vector.load %arg4[%c0_1, %c0_2] : memref<128x128xbf16, #tpu.memory_space<vmem>>, vector<128x128xbf16>
    %c0_3 = arith.constant 0 : index
    %c0_4 = arith.constant 0 : index
    %2 = vector.load %arg6[%c0_3, %c0_4] : memref<128x128xbf16, #tpu.memory_space<vmem>>, vector<128x128xbf16>
    %c0_5 = arith.constant 0 : index
    %c0_6 = arith.constant 0 : index
    %3 = vector.load %arg3[%c0_5, %c0_6] : memref<1x128xf32, #tpu.memory_space<vmem>>, vector<1x128xf32>
    %4 = vector.shape_cast %3 : vector<1x128xf32> to vector<1x128xf32>
    %5 = vector.broadcast %4 : vector<1x128xf32> to vector<128x128xf32>
    %c0_7 = arith.constant 0 : index
    %c0_8 = arith.constant 0 : index
    %6 = vector.load %arg5[%c0_7, %c0_8] : memref<1x128xf32, #tpu.memory_space<vmem>>, vector<1x128xf32>
    %7 = vector.shape_cast %6 : vector<1x128xf32> to vector<1x128xf32>
    %8 = vector.broadcast %7 : vector<1x128xf32> to vector<128x128xf32>
    %c0_9 = arith.constant 0 : index
    %c0_10 = arith.constant 0 : index
    %9 = vector.load %arg7[%c0_9, %c0_10] : memref<1x128xf32, #tpu.memory_space<vmem>>, vector<1x128xf32>
    %10 = vector.shape_cast %9 : vector<1x128xf32> to vector<1x128xf32>
    %11 = vector.broadcast %10 : vector<1x128xf32> to vector<128x128xf32>
    %c0_11 = arith.constant 0 : index
    %c0_12 = arith.constant 0 : index
    %12 = vector.load %arg1[%c0_11, %c0_12] : memref<256x128xbf16, #tpu.memory_space<vmem>>, vector<128x128xbf16>
    %c128 = arith.constant 128 : index
    %c0_13 = arith.constant 0 : index
    %13 = vector.load %arg1[%c128, %c0_13] : memref<256x128xbf16, #tpu.memory_space<vmem>>, vector<128x128xbf16>
    %cst = arith.constant dense<0.000000e+00> : vector<128x128xf32>
    %14 = tpu.matmul %12, %0, %cst {dimension_numbers = #tpu.dot_dimension_numbers<[1], [0], [0], [1], [0, 0, 1, 1], [], []>} : vector<128x128xbf16>, vector<128x128xbf16>, vector<128x128xf32> -> vector<128x128xf32>
    %15 = arith.addf %14, %5 : vector<128x128xf32>
    %cst_14 = arith.constant 0.000000e+00 : f32
    %16 = vector.broadcast %cst_14 : f32 to vector<128x128xf32>
    %17 = arith.maximumf %15, %16 : vector<128x128xf32>
    %cst_15 = arith.constant dense<0.000000e+00> : vector<128x128xf32>
    %18 = tpu.matmul %13, %0, %cst_15 {dimension_numbers = #tpu.dot_dimension_numbers<[1], [0], [0], [1], [0, 0, 1, 1], [], []>} : vector<128x128xbf16>, vector<128x128xbf16>, vector<128x128xf32> -> vector<128x128xf32>
    %19 = arith.addf %18, %5 : vector<128x128xf32>
    %cst_16 = arith.constant 0.000000e+00 : f32
    %20 = vector.broadcast %cst_16 : f32 to vector<128x128xf32>
    %21 = arith.maximumf %19, %20 : vector<128x128xf32>
    %22 = arith.truncf %17 : vector<128x128xf32> to vector<128x128xbf16>
    %cst_17 = arith.constant dense<0.000000e+00> : vector<128x128xf32>
    %23 = tpu.matmul %22, %1, %cst_17 {dimension_numbers = #tpu.dot_dimension_numbers<[1], [0], [0], [1], [0, 0, 1, 1], [], []>} : vector<128x128xbf16>, vector<128x128xbf16>, vector<128x128xf32> -> vector<128x128xf32>
    %24 = arith.truncf %21 : vector<128x128xf32> to vector<128x128xbf16>
    %cst_18 = arith.constant dense<0.000000e+00> : vector<128x128xf32>
    %25 = tpu.matmul %24, %1, %cst_18 {dimension_numbers = #tpu.dot_dimension_numbers<[1], [0], [0], [1], [0, 0, 1, 1], [], []>} : vector<128x128xbf16>, vector<128x128xbf16>, vector<128x128xf32> -> vector<128x128xf32>
    %26 = arith.addf %23, %8 : vector<128x128xf32>
    %cst_19 = arith.constant 0.000000e+00 : f32
    %27 = vector.broadcast %cst_19 : f32 to vector<128x128xf32>
    %28 = arith.maximumf %26, %27 : vector<128x128xf32>
    %29 = arith.addf %28, %17 : vector<128x128xf32>
    %30 = arith.addf %25, %8 : vector<128x128xf32>
    %cst_20 = arith.constant 0.000000e+00 : f32
    %31 = vector.broadcast %cst_20 : f32 to vector<128x128xf32>
    %32 = arith.maximumf %30, %31 : vector<128x128xf32>
    %33 = arith.addf %32, %21 : vector<128x128xf32>
    %34 = arith.addf %17, %29 : vector<128x128xf32>
    %35 = arith.addf %21, %33 : vector<128x128xf32>
    %36 = arith.truncf %29 : vector<128x128xf32> to vector<128x128xbf16>
    %cst_21 = arith.constant dense<0.000000e+00> : vector<128x128xf32>
    %37 = tpu.matmul %36, %1, %cst_21 {dimension_numbers = #tpu.dot_dimension_numbers<[1], [0], [0], [1], [0, 0, 1, 1], [], []>} : vector<128x128xbf16>, vector<128x128xbf16>, vector<128x128xf32> -> vector<128x128xf32>
    %38 = arith.truncf %33 : vector<128x128xf32> to vector<128x128xbf16>
    %cst_22 = arith.constant dense<0.000000e+00> : vector<128x128xf32>
    %39 = tpu.matmul %38, %1, %cst_22 {dimension_numbers = #tpu.dot_dimension_numbers<[1], [0], [0], [1], [0, 0, 1, 1], [], []>} : vector<128x128xbf16>, vector<128x128xbf16>, vector<128x128xf32> -> vector<128x128xf32>
    %40 = arith.addf %37, %8 : vector<128x128xf32>
    %cst_23 = arith.constant 0.000000e+00 : f32
    %41 = vector.broadcast %cst_23 : f32 to vector<128x128xf32>
    %42 = arith.maximumf %40, %41 : vector<128x128xf32>
    %43 = arith.addf %42, %34 : vector<128x128xf32>
    %44 = arith.addf %39, %8 : vector<128x128xf32>
    %cst_24 = arith.constant 0.000000e+00 : f32
    %45 = vector.broadcast %cst_24 : f32 to vector<128x128xf32>
    %46 = arith.maximumf %44, %45 : vector<128x128xf32>
    %47 = arith.addf %46, %35 : vector<128x128xf32>
    %48 = arith.addf %34, %43 : vector<128x128xf32>
    %49 = arith.addf %35, %47 : vector<128x128xf32>
    %50 = arith.truncf %43 : vector<128x128xf32> to vector<128x128xbf16>
    %cst_25 = arith.constant dense<0.000000e+00> : vector<128x128xf32>
    %51 = tpu.matmul %50, %1, %cst_25 {dimension_numbers = #tpu.dot_dimension_numbers<[1], [0], [0], [1], [0, 0, 1, 1], [], []>} : vector<128x128xbf16>, vector<128x128xbf16>, vector<128x128xf32> -> vector<128x128xf32>
    %52 = arith.truncf %47 : vector<128x128xf32> to vector<128x128xbf16>
    %cst_26 = arith.constant dense<0.000000e+00> : vector<128x128xf32>
    %53 = tpu.matmul %52, %1, %cst_26 {dimension_numbers = #tpu.dot_dimension_numbers<[1], [0], [0], [1], [0, 0, 1, 1], [], []>} : vector<128x128xbf16>, vector<128x128xbf16>, vector<128x128xf32> -> vector<128x128xf32>
    %54 = arith.addf %51, %8 : vector<128x128xf32>
    %cst_27 = arith.constant 0.000000e+00 : f32
    %55 = vector.broadcast %cst_27 : f32 to vector<128x128xf32>
    %56 = arith.maximumf %54, %55 : vector<128x128xf32>
    %57 = arith.addf %56, %48 : vector<128x128xf32>
    %58 = arith.addf %53, %8 : vector<128x128xf32>
    %cst_28 = arith.constant 0.000000e+00 : f32
    %59 = vector.broadcast %cst_28 : f32 to vector<128x128xf32>
    %60 = arith.maximumf %58, %59 : vector<128x128xf32>
    %61 = arith.addf %60, %49 : vector<128x128xf32>
    %62 = arith.addf %48, %57 : vector<128x128xf32>
    %63 = arith.addf %49, %61 : vector<128x128xf32>
    %64 = arith.truncf %57 : vector<128x128xf32> to vector<128x128xbf16>
    %cst_29 = arith.constant dense<0.000000e+00> : vector<128x128xf32>
    %65 = tpu.matmul %64, %1, %cst_29 {dimension_numbers = #tpu.dot_dimension_numbers<[1], [0], [0], [1], [0, 0, 1, 1], [], []>} : vector<128x128xbf16>, vector<128x128xbf16>, vector<128x128xf32> -> vector<128x128xf32>
    %66 = arith.truncf %61 : vector<128x128xf32> to vector<128x128xbf16>
    %cst_30 = arith.constant dense<0.000000e+00> : vector<128x128xf32>
    %67 = tpu.matmul %66, %1, %cst_30 {dimension_numbers = #tpu.dot_dimension_numbers<[1], [0], [0], [1], [0, 0, 1, 1], [], []>} : vector<128x128xbf16>, vector<128x128xbf16>, vector<128x128xf32> -> vector<128x128xf32>
    %68 = arith.addf %65, %8 : vector<128x128xf32>
    %cst_31 = arith.constant 0.000000e+00 : f32
    %69 = vector.broadcast %cst_31 : f32 to vector<128x128xf32>
    %70 = arith.maximumf %68, %69 : vector<128x128xf32>
    %71 = arith.addf %70, %62 : vector<128x128xf32>
    %72 = arith.addf %67, %8 : vector<128x128xf32>
    %cst_32 = arith.constant 0.000000e+00 : f32
    %73 = vector.broadcast %cst_32 : f32 to vector<128x128xf32>
    %74 = arith.maximumf %72, %73 : vector<128x128xf32>
    %75 = arith.addf %74, %63 : vector<128x128xf32>
    %76 = arith.addf %62, %71 : vector<128x128xf32>
    %77 = arith.addf %63, %75 : vector<128x128xf32>
    %78 = arith.truncf %71 : vector<128x128xf32> to vector<128x128xbf16>
    %cst_33 = arith.constant dense<0.000000e+00> : vector<128x128xf32>
    %79 = tpu.matmul %78, %1, %cst_33 {dimension_numbers = #tpu.dot_dimension_numbers<[1], [0], [0], [1], [0, 0, 1, 1], [], []>} : vector<128x128xbf16>, vector<128x128xbf16>, vector<128x128xf32> -> vector<128x128xf32>
    %80 = arith.truncf %75 : vector<128x128xf32> to vector<128x128xbf16>
    %cst_34 = arith.constant dense<0.000000e+00> : vector<128x128xf32>
    %81 = tpu.matmul %80, %1, %cst_34 {dimension_numbers = #tpu.dot_dimension_numbers<[1], [0], [0], [1], [0, 0, 1, 1], [], []>} : vector<128x128xbf16>, vector<128x128xbf16>, vector<128x128xf32> -> vector<128x128xf32>
    %82 = arith.addf %79, %8 : vector<128x128xf32>
    %cst_35 = arith.constant 0.000000e+00 : f32
    %83 = vector.broadcast %cst_35 : f32 to vector<128x128xf32>
    %84 = arith.maximumf %82, %83 : vector<128x128xf32>
    %85 = arith.addf %84, %76 : vector<128x128xf32>
    %86 = arith.addf %81, %8 : vector<128x128xf32>
    %cst_36 = arith.constant 0.000000e+00 : f32
    %87 = vector.broadcast %cst_36 : f32 to vector<128x128xf32>
    %88 = arith.maximumf %86, %87 : vector<128x128xf32>
    %89 = arith.addf %88, %77 : vector<128x128xf32>
    %90 = arith.addf %76, %85 : vector<128x128xf32>
    %91 = arith.addf %77, %89 : vector<128x128xf32>
    %92 = arith.truncf %85 : vector<128x128xf32> to vector<128x128xbf16>
    %cst_37 = arith.constant dense<0.000000e+00> : vector<128x128xf32>
    %93 = tpu.matmul %92, %1, %cst_37 {dimension_numbers = #tpu.dot_dimension_numbers<[1], [0], [0], [1], [0, 0, 1, 1], [], []>} : vector<128x128xbf16>, vector<128x128xbf16>, vector<128x128xf32> -> vector<128x128xf32>
    %94 = arith.truncf %89 : vector<128x128xf32> to vector<128x128xbf16>
    %cst_38 = arith.constant dense<0.000000e+00> : vector<128x128xf32>
    %95 = tpu.matmul %94, %1, %cst_38 {dimension_numbers = #tpu.dot_dimension_numbers<[1], [0], [0], [1], [0, 0, 1, 1], [], []>} : vector<128x128xbf16>, vector<128x128xbf16>, vector<128x128xf32> -> vector<128x128xf32>
    %96 = arith.addf %93, %8 : vector<128x128xf32>
    %cst_39 = arith.constant 0.000000e+00 : f32
    %97 = vector.broadcast %cst_39 : f32 to vector<128x128xf32>
    %98 = arith.maximumf %96, %97 : vector<128x128xf32>
    %99 = arith.addf %98, %90 : vector<128x128xf32>
    %100 = arith.addf %95, %8 : vector<128x128xf32>
    %cst_40 = arith.constant 0.000000e+00 : f32
    %101 = vector.broadcast %cst_40 : f32 to vector<128x128xf32>
    %102 = arith.maximumf %100, %101 : vector<128x128xf32>
    %103 = arith.addf %102, %91 : vector<128x128xf32>
    %104 = arith.addf %90, %99 : vector<128x128xf32>
    %105 = arith.addf %91, %103 : vector<128x128xf32>
    %106 = arith.truncf %99 : vector<128x128xf32> to vector<128x128xbf16>
    %cst_41 = arith.constant dense<0.000000e+00> : vector<128x128xf32>
    %107 = tpu.matmul %106, %1, %cst_41 {dimension_numbers = #tpu.dot_dimension_numbers<[1], [0], [0], [1], [0, 0, 1, 1], [], []>} : vector<128x128xbf16>, vector<128x128xbf16>, vector<128x128xf32> -> vector<128x128xf32>
    %108 = arith.truncf %103 : vector<128x128xf32> to vector<128x128xbf16>
    %cst_42 = arith.constant dense<0.000000e+00> : vector<128x128xf32>
    %109 = tpu.matmul %108, %1, %cst_42 {dimension_numbers = #tpu.dot_dimension_numbers<[1], [0], [0], [1], [0, 0, 1, 1], [], []>} : vector<128x128xbf16>, vector<128x128xbf16>, vector<128x128xf32> -> vector<128x128xf32>
    %110 = arith.addf %107, %8 : vector<128x128xf32>
    %cst_43 = arith.constant 0.000000e+00 : f32
    %111 = vector.broadcast %cst_43 : f32 to vector<128x128xf32>
    %112 = arith.maximumf %110, %111 : vector<128x128xf32>
    %113 = arith.addf %112, %104 : vector<128x128xf32>
    %114 = arith.addf %109, %8 : vector<128x128xf32>
    %cst_44 = arith.constant 0.000000e+00 : f32
    %115 = vector.broadcast %cst_44 : f32 to vector<128x128xf32>
    %116 = arith.maximumf %114, %115 : vector<128x128xf32>
    %117 = arith.addf %116, %105 : vector<128x128xf32>
    %118 = arith.addf %104, %113 : vector<128x128xf32>
    %119 = arith.addf %105, %117 : vector<128x128xf32>
    %120 = arith.truncf %113 : vector<128x128xf32> to vector<128x128xbf16>
    %cst_45 = arith.constant dense<0.000000e+00> : vector<128x128xf32>
    %121 = tpu.matmul %120, %1, %cst_45 {dimension_numbers = #tpu.dot_dimension_numbers<[1], [0], [0], [1], [0, 0, 1, 1], [], []>} : vector<128x128xbf16>, vector<128x128xbf16>, vector<128x128xf32> -> vector<128x128xf32>
    %122 = arith.truncf %117 : vector<128x128xf32> to vector<128x128xbf16>
    %cst_46 = arith.constant dense<0.000000e+00> : vector<128x128xf32>
    %123 = tpu.matmul %122, %1, %cst_46 {dimension_numbers = #tpu.dot_dimension_numbers<[1], [0], [0], [1], [0, 0, 1, 1], [], []>} : vector<128x128xbf16>, vector<128x128xbf16>, vector<128x128xf32> -> vector<128x128xf32>
    %124 = arith.addf %121, %8 : vector<128x128xf32>
    %cst_47 = arith.constant 0.000000e+00 : f32
    %125 = vector.broadcast %cst_47 : f32 to vector<128x128xf32>
    %126 = arith.maximumf %124, %125 : vector<128x128xf32>
    %127 = arith.addf %126, %118 : vector<128x128xf32>
    %128 = arith.addf %123, %8 : vector<128x128xf32>
    %cst_48 = arith.constant 0.000000e+00 : f32
    %129 = vector.broadcast %cst_48 : f32 to vector<128x128xf32>
    %130 = arith.maximumf %128, %129 : vector<128x128xf32>
    %131 = arith.addf %130, %119 : vector<128x128xf32>
    %132 = arith.truncf %127 : vector<128x128xf32> to vector<128x128xbf16>
    %cst_49 = arith.constant dense<0.000000e+00> : vector<128x128xf32>
    %133 = tpu.matmul %132, %2, %cst_49 {dimension_numbers = #tpu.dot_dimension_numbers<[1], [0], [0], [1], [0, 0, 1, 1], [], []>} : vector<128x128xbf16>, vector<128x128xbf16>, vector<128x128xf32> -> vector<128x128xf32>
    %134 = arith.addf %133, %11 : vector<128x128xf32>
    %135 = arith.truncf %131 : vector<128x128xf32> to vector<128x128xbf16>
    %cst_50 = arith.constant dense<0.000000e+00> : vector<128x128xf32>
    %136 = tpu.matmul %135, %2, %cst_50 {dimension_numbers = #tpu.dot_dimension_numbers<[1], [0], [0], [1], [0, 0, 1, 1], [], []>} : vector<128x128xbf16>, vector<128x128xbf16>, vector<128x128xf32> -> vector<128x128xf32>
    %137 = arith.addf %136, %11 : vector<128x128xf32>
    %138 = tpu.iota {dimensions = array<i32: 1>} : vector<128x128xi32>
    %c8_i32 = arith.constant 8 : i32
    %139 = vector.broadcast %c8_i32 : i32 to vector<128x128xi32>
    %140 = arith.cmpi slt, %138, %139 : vector<128x128xi32>
    %cst_51 = arith.constant -1.000000e+30 : f32
    %141 = vector.broadcast %cst_51 : f32 to vector<128x128xf32>
    %142 = arith.select %140, %134, %141 : vector<128x128xi1>, vector<128x128xf32>
    %cst_52 = arith.constant dense<0xFF800000> : vector<128xf32>
    %143 = vector.multi_reduction <maximumf>, %142, %cst_52 [1] : vector<128x128xf32> to vector<128xf32>
    %144 = vector.shape_cast %143 : vector<128xf32> to vector<128x1xf32>
    %145 = vector.broadcast %144 : vector<128x1xf32> to vector<128x128xf32>
    %146 = arith.subf %142, %145 : vector<128x128xf32>
    %147 = math.exp %146 : vector<128x128xf32>
    %cst_53 = arith.constant dense<0.000000e+00> : vector<128xf32>
    %148 = vector.multi_reduction <add>, %147, %cst_53 [1] : vector<128x128xf32> to vector<128xf32>
    %149 = vector.shape_cast %148 : vector<128xf32> to vector<128x1xf32>
    %150 = math.log %149 : vector<128x1xf32>
    %151 = vector.broadcast %150 : vector<128x1xf32> to vector<128x128xf32>
    %152 = arith.subf %146, %151 : vector<128x128xf32>
    %153 = arith.truncf %152 : vector<128x128xf32> to vector<128x128xbf16>
    %c0_54 = arith.constant 0 : index
    %c0_55 = arith.constant 0 : index
    %154 = vector.load %arg8[%c0_54, %c0_55] : memref<256x128xbf16, #tpu.memory_space<vmem>>, vector<128x128xbf16>
    tpu.vector_store %arg8[%c0_54, %c0_55], %153 {strides = array<i32>} : memref<256x128xbf16, #tpu.memory_space<vmem>>, vector<128x128xbf16>,
    %155 = tpu.iota {dimensions = array<i32: 1>} : vector<128x128xi32>
    %c8_i32_56 = arith.constant 8 : i32
    %156 = vector.broadcast %c8_i32_56 : i32 to vector<128x128xi32>
    %157 = arith.cmpi slt, %155, %156 : vector<128x128xi32>
    %cst_57 = arith.constant -1.000000e+30 : f32
    %158 = vector.broadcast %cst_57 : f32 to vector<128x128xf32>
    %159 = arith.select %157, %137, %158 : vector<128x128xi1>, vector<128x128xf32>
    %cst_58 = arith.constant dense<0xFF800000> : vector<128xf32>
    %160 = vector.multi_reduction <maximumf>, %159, %cst_58 [1] : vector<128x128xf32> to vector<128xf32>
    %161 = vector.shape_cast %160 : vector<128xf32> to vector<128x1xf32>
    %162 = vector.broadcast %161 : vector<128x1xf32> to vector<128x128xf32>
    %163 = arith.subf %159, %162 : vector<128x128xf32>
    %164 = math.exp %163 : vector<128x128xf32>
    %cst_59 = arith.constant dense<0.000000e+00> : vector<128xf32>
    %165 = vector.multi_reduction <add>, %164, %cst_59 [1] : vector<128x128xf32> to vector<128xf32>
    %166 = vector.shape_cast %165 : vector<128xf32> to vector<128x1xf32>
    %167 = math.log %166 : vector<128x1xf32>
    %168 = vector.broadcast %167 : vector<128x1xf32> to vector<128x128xf32>
    %169 = arith.subf %163, %168 : vector<128x128xf32>
    %170 = arith.truncf %169 : vector<128x128xf32> to vector<128x128xbf16>
    %c128_60 = arith.constant 128 : index
    %c0_61 = arith.constant 0 : index
    %171 = vector.load %arg8[%c128_60, %c0_61] : memref<256x128xbf16, #tpu.memory_space<vmem>>, vector<128x128xbf16>
    tpu.vector_store %arg8[%c128_60, %c0_61], %170 {strides = array<i32>} : memref<256x128xbf16, #tpu.memory_space<vmem>>, vector<128x128xbf16>,
    return
  }
  func.func @transform_0(%arg0: i32) -> (i32, i32) {
    %c0_i32 = arith.constant 0 : i32
    %c0_i32_0 = arith.constant 0 : i32
    return %arg0, %c0_i32 : i32, i32
  }
  func.func @transform_1(%arg0: i32) -> (i32, i32) {
    %c0_i32 = arith.constant 0 : i32
    %c0_i32_0 = arith.constant 0 : i32
    %c0_i32_1 = arith.constant 0 : i32
    return %c0_i32, %c0_i32_0 : i32, i32
  }
  func.func @transform_2(%arg0: i32) -> (i32, i32) {
    %c0_i32 = arith.constant 0 : i32
    %c0_i32_0 = arith.constant 0 : i32
    %c0_i32_1 = arith.constant 0 : i32
    return %c0_i32, %c0_i32_0 : i32, i32
  }
  func.func @transform_3(%arg0: i32) -> (i32, i32) {
    %c0_i32 = arith.constant 0 : i32
    %c0_i32_0 = arith.constant 0 : i32
    %c0_i32_1 = arith.constant 0 : i32
    return %c0_i32, %c0_i32_0 : i32, i32
  }
  func.func @transform_4(%arg0: i32) -> (i32, i32) {
    %c0_i32 = arith.constant 0 : i32
    %c0_i32_0 = arith.constant 0 : i32
    %c0_i32_1 = arith.constant 0 : i32
    return %c0_i32, %c0_i32_0 : i32, i32
  }
  func.func @transform_5(%arg0: i32) -> (i32, i32) {
    %c0_i32 = arith.constant 0 : i32
    %c0_i32_0 = arith.constant 0 : i32
    %c0_i32_1 = arith.constant 0 : i32
    return %c0_i32, %c0_i32_0 : i32, i32
  }
  func.func @transform_6(%arg0: i32) -> (i32, i32) {
    %c0_i32 = arith.constant 0 : i32
    %c0_i32_0 = arith.constant 0 : i32
    %c0_i32_1 = arith.constant 0 : i32
    return %c0_i32, %c0_i32_0 : i32, i32
  }
  func.func @transform_7(%arg0: i32) -> (i32, i32) {
    %c0_i32 = arith.constant 0 : i32
    %c0_i32_0 = arith.constant 0 : i32
    return %arg0, %c0_i32 : i32, i32
  }
}

</mosaic_0001>

<bundles_post_ra>
// kernel: tpu_custom_call.1
= control target key start
LH: loop header
LB: loop body
LE: loop exit
PB: predicated region body
PF: predicated region fallthrough
CT: control target
= control target key end

     0   :  { %s8353_s0 = inlined_call_operand.hbm [shape: bf16[512,128], index: 0, kind: input, shape index: {}]   ;;  %s8354_s1 = inlined_call_operand.hbm [shape: bf16[128,128], index: 1, kind: input, shape index: {}]   ;;  %s8355_s2 = inlined_call_operand.vmem [shape: f32[1,128], index: 2, kind: input, shape index: {}]   ;;  %s8356_s3 = inlined_call_operand.hbm [shape: bf16[128,128], index: 3, kind: input, shape index: {}]   ;;  %s8357_s4 = inlined_call_operand.vmem [shape: f32[1,128], index: 4, kind: input, shape index: {}]   ;;  %s8358_s5 = inlined_call_operand.hbm [shape: bf16[128,128], index: 5, kind: input, shape index: {}]   ;;  %s8359_s6 = inlined_call_operand.vmem [shape: f32[1,128], index: 6, kind: input, shape index: {}]   ;;  %s8360_s7 = inlined_call_operand.hbm [shape: bf16[512,128], index: 7, kind: output, shape index: {}]  }
   0x1   :  { %8397 = sst [smem:[#allocation34_spill]] %s8354_s1 }
   0x2   :  { %12 = vsyncpa [#allocation3], 0 }
   0x3   :  { %14 = vsyncpa [#allocation3 + $0x1], 0 }
   0x4   :  { %15 = vsyncpa [#allocation6], 0 }
   0x5   :  { %16 = vsyncpa [#allocation9], 0 }
   0x6   :  { %17 = vsyncpa [#allocation4], 0 }
   0x7   :  { %19 = vsyncpa [#allocation4 + $0x1], 0  ;;  %s5849_s24 = smov 0   ;;  %s5851_s25 = smov 0  }
   0x8   :  { %s5853_s26 = smov 0   ;;  %s5855_s27 = smov 0  }
   0x9 LB: > { %s5870_s28 = sadd.s32 4294967295, %s5798_s27   ;;  %s4168_s29 = sadd.s32 4294967294, %s5798_s27   ;;  %s5798_s27 = sphi %s5855_s27, %s8472_s27   ;;  %s5794_s26 = sphi %s5853_s26, %s8471_s26   ;;  %s5790_s25 = sphi %s5851_s25, %s8470_s25   ;;  %s5786_s24 = sphi %s5849_s24, %s8469_s24  }
   0xa   : > { %p45_p0 = scmp.ne.s32.totalorder %s5790_s25, %s5786_s24  ;;  %p8361_p1 = scmp.eq.s32.totalorder %s5870_s28, 0 }
   0xb   : > { %p195_p2 = scmp.eq.s32.totalorder %s5870_s28, 1  ;;  %p201_p3 = scmp.eq.s32.totalorder %s4168_s29, 1 }
   0xc   : > { %p5879_p4 = por %p8361_p1, %p45_p0  ;;  %p4169_p5 = scmp.ge.s32.totalorder %s5798_s27, 1 }
   0xd   : > { %p5884_p6 = por %p201_p3, %p45_p0  ;;  %p208_p7 = scmp.lt.s32.totalorder %s5798_s27, 3 }
   0xe   : > { %s8398_s30 = scalar_select %p5879_p4, 1, 0 }
   0xf   : > { %s8399_s8 = scalar_select %p5884_p6, 1, 0 }
  0x10   : > { %p5889_p8 = pnand %p4169_p5, %p208_p7  ;;  %s5800_s10 = smov [#allocation5]  }
  0x11   : > { %s220_s11 = sshll.u32 %s5800_s10, 4  ;;  %s5801_s13 = smov [#allocation7]   ;;  %s221_s11 = int_to_ptr.vmem [resolvable:$true] %s220_s11 }
  0x12   : > { %s8400_s9 = scalar_select %p5889_p8, 1, 0 }
  0x13   : > { %p5368_p9 = pneg %p5889_p8  ;;  %s236_s14 = sshll.u32 %s5801_s13, 4  ;;  %s237_s14 = int_to_ptr.vmem [resolvable:$true] %s236_s14 }
  0x14   : > { %s5802_s15 = smov [#allocation8]   ;;  %s5631_s17 = scalar_lea.vmem %s221_s11, 1024 }
  0x15   : > { %p5898_p11 = pnand %p5368_p9, %p8361_p1  ;;  %s252_s16 = sshll.u32 %s5802_s15, 4  ;;  %s253_s16 = int_to_ptr.vmem [resolvable:$true] %s252_s16 }
  0x16   : > { %p5632_p13 = scmp.ne.s32.totalorder %s221_s11, %s5631_s17  ;;  %p5639_p5 = scmp.lt.s32.totalorder %s221_s11, %s221_s11 }
  0x17   : > { %p5622_p12 = pneg %p5898_p11  ;;  %p5640_p7 = scmp.lt.s32.totalorder %s5631_s17, %s5631_s17 }
  0x19   : > { %p5634_p0 = pnand %p5632_p13, %p5622_p12  ;;  %p5641_p9 = por %p5640_p7, %p5639_p5 }
  0x1b   : > { %p5635_p3 = pneg %p5634_p0 }
  0x1d   : > { %p5642_p10 = pnand %p5641_p9, %p5635_p3 }
  0x1f   : > { %5645 = shalt.err (!%p5642_p10)
}
  0x20   : > { %s8362_s18 = smov 64   ;;  %s8363_s19 = smov 4  }
  0x21   : > { %s8402_s1 = sld [smem:[#allocation34_spill]]  ;;  %s5657_s22 = scalar_lea.vmem %s237_s14, 1024 }
  0x22   : > { %p5658_p13 = scmp.ne.s32.totalorder %s237_s14, %s5657_s22  ;;  %p5665_p3 = scmp.lt.s32.totalorder %s237_s14, %s237_s14 }
  0x23   : > { %p5666_p10 = scmp.lt.s32.totalorder %s5657_s22, %s5657_s22 }
  0x24   : > { %p5660_p0 = pnand %p5658_p13, %p5622_p12 }
  0x25   : > { %p5667_p7 = por %p5666_p10, %p5665_p3 }
  0x26   : > { %p5661_p5 = pneg %p5660_p0 }
  0x27   : > { %5371 = dma.hbm_to_vmem [thread:$0]  (!%p5898_p11), %s8402_s1, 1024, %s221_s11, [#allocation6], %s8362_s18, %s8362_s18, %s8363_s19  }
  0x28   : > { %p5668_p9 = pnand %p5667_p7, %p5661_p5 }
  0x2a   : > { %5671 = shalt.err (!%p5668_p9)
}
  0x2b   : > { %5374 = dma.hbm_to_vmem [thread:$0]  (!%p5898_p11), %s8356_s3, 1024, %s237_s14, [#allocation6], %s8362_s18, %s8362_s18, %s8363_s19  }
  0x2c   : > { %s5683_s10 = scalar_lea.vmem %s253_s16, 1024  ;;  %p5691_p3 = scmp.lt.s32.totalorder %s253_s16, %s253_s16 }
  0x2d   : > { %p5684_p1 = scmp.ne.s32.totalorder %s253_s16, %s5683_s10  ;;  %p5692_p5 = scmp.lt.s32.totalorder %s5683_s10, %s5683_s10 }
  0x2f   : > { %p5686_p13 = pnand %p5684_p1, %p5622_p12  ;;  %p5693_p10 = por %p5692_p5, %p5691_p3 }
  0x31   : > { %p5687_p0 = pneg %p5686_p13 }
  0x33   : > { %p5694_p7 = pnand %p5693_p10, %p5687_p0 }
  0x35   : > { %5697 = shalt.err (!%p5694_p7)
}
  0x36   : > { %5377 = dma.hbm_to_vmem [thread:$0]  (!%p5898_p11), %s8358_s5, 1024, %s253_s16, [#allocation9], %s8362_s18, %s8362_s18, %s8363_s19  }
  0x37   : > { %s5938_s14 = sadd.s32 1, %s5798_s27   ;;  %s32_s15 = sadd.s32 1, %s5794_s26 }
  0x38   : > { %s29_s12 = ssub.s32 %s5798_s27, %s5938_s14  ;;  %p39_p12 = scmp.ne.s32.totalorder %s5794_s26, %s5790_s25 }
  0x39   : > { %p30_p1 = scmp.eq.s32.totalorder %s29_s12, 0  ;;  %p40_p9 = scmp.eq.s32.totalorder %s5798_s27, 0 }
  0x3a   : > { %p5389_p13 = scmp.lt.s32.totalorder %s5798_s27, 2  ;;  %p5952_p3 = por %p195_p2, %p39_p12 }
  0x3b   : > { %s5948_s17 = scalar_select %p30_p1, %s5794_s26, %s32_s15  }
  0x3c   : > { %p41_p0 = por %p40_p9, %p39_p12  ;;  %s269_s21 = sand.u32 1, %s5794_s26  }
  0x3d   : > { %s8403_s20 = scalar_select %p5952_p3, 1, 0 }
  0x3e   : > { %s4263_s22 = sshll.u32 %s5798_s27, 11  ;;  %s4174_s16 = sshll.u32 %s269_s21, 7 }
  0x3f   : > { %s5961_s10 = scalar_lea.hbm %s8353_s0, %s4263_s22  ;;  %s273_s11 = scalar_lea.vmem [#allocation2], %s4174_s16 }
  0x40   : > { %s280_s13 = sshll.u32 %s273_s11, 4  ;;  %p5963_p11 = pnand %p5389_p13, %p41_p0  ;;  %s5967_s13 = int_to_ptr.vmem [resolvable:$true] %s280_s13 }
  0x41   : > { %s5969_s15 = scalar_lea.sflag [#allocation3], %s269_s21  ;;  %s5698_s18 = scalar_lea.hbm %s5961_s10, 2048 }
  0x42   : > { %p5699_p2 = scmp.ne.s32.totalorder %s5961_s10, %s5698_s18  ;;  %p5700_p5 = pneg %p5963_p11 }
  0x43   : > { %s5703_s16 = scalar_lea.hbm %s8353_s0, 4096  ;;  %p5704_p1 = scmp.lt.s32.totalorder %s5961_s10, %s8353_s0 }
  0x44   : > { %p5701_p10 = pnand %p5700_p5, %p5699_p2  ;;  %p5705_p12 = scmp.lt.s32.totalorder %s5703_s16, %s5698_s18 }
  0x46   : > { %p5702_p7 = pneg %p5701_p10  ;;  %p5706_p9 = por %p5705_p12, %p5704_p1 }
  0x48   : > { %p5707_p13 = pnand %p5706_p9, %p5702_p7 }
  0x4a   : > { %5710 = shalt.err (!%p5707_p13)
}
  0x4b   : > { %s5711_s21 = scalar_lea.vmem %s5967_s13, 2048  ;;  %s5805_s19 = smov [#allocation2]  }
  0x4c   : > { %p5712_p0 = scmp.ne.s32.totalorder %s5967_s13, %s5711_s21  ;;  %s5716_s1 = sshll.u32 %s5805_s19, 4  ;;  %s5717_s1 = int_to_ptr.vmem [resolvable:$false] %s5716_s1 }
  0x4d   : > { %s5718_s22 = scalar_lea.vmem %s5717_s1, 4096  ;;  %p5719_p10 = scmp.lt.s32.totalorder %s5967_s13, %s5717_s1 }
  0x4e   : > { %p5714_p6 = pnand %p5712_p0, %p5700_p5  ;;  %p5720_p3 = scmp.lt.s32.totalorder %s5718_s22, %s5711_s21 }
  0x50   : > { %p5715_p2 = pneg %p5714_p6  ;;  %p5721_p4 = por %p5720_p3, %p5719_p10 }
  0x52   : > { %p5722_p8 = pnand %p5721_p4, %p5715_p2 }
  0x54   : > { %5725 = shalt.err (!%p5722_p8)
}
  0x55   : > { %s8405_s18 = smov 4   ;;  %s8406_s23 = smov 64  }
  0x56   : > { %5381 = dma.hbm_to_vmem [thread:$0]  (!%p5963_p11), %s5961_s10, 2048, %s5967_s13, %s5969_s15, %s8406_s23, %s8406_s23, %s8405_s18  }
  0x57   : > { %p8407_p6 = scmp.ne.s32.totalorder %s8400_s9, 0 }
  0x59   : > { %292 = sbr.rel (%p8407_p6) target bundleno = 2596 (0xa24), region = 48 }
  0x5e   : > { %s5996_s19 = sand.u32 1, %s5790_s25   ;;  %p8408_p4 = scmp.ne.s32.totalorder %s8398_s30, 0 }
  0x5f   : > { %s4178_s1 = sshll.u32 %s5996_s19, 7  ;;  %s295_s16 = scalar_lea.sflag [#allocation3], %s5996_s19 }
  0x60   : > { %s6002_s12 = scalar_lea.vmem [#allocation2], %s4178_s1 }
  0x61   : > { %5769 = dma.done.wait (%p8408_p4), %s295_s16, 2048  }
  0x62   : > { %5771 = vsyncadd (%p8408_p4), %s295_s16, 4294965248  ;;  %p8409_p8 = scmp.eq.s32.totalorder %s5870_s28, 0 }
  0x64   : > { %5773 = dma.done.wait (%p8409_p8), [#allocation6], 2048   ;;  %p8410_p3 = pmov %p8409_p8 }
  0x66   : > { %5775 = vsyncadd (%p8410_p3), [#allocation6], 4294965248  ;;  %p8411_p11 = pmov %p8410_p3 }
  0x67   : > { %p8412_p5 = pmov %p8410_p3 }
  0x68   : > { %5777 = dma.done.wait (%p8411_p11), [#allocation9], 1024  }
  0x69   : > { %5779 = vsyncadd (%p8412_p5), [#allocation9], 4294966272  ;;  %v5433_v0 = vld [vmem:[#allocation5 + $0x38] sm:$0xff]   ;;  %v5434_v1 = vld [vmem:[#allocation5 + $0x30] sm:$0xff]   ;;  %s4053_s15 = scalar_lea.sflag [#allocation4], %s5996_s19  ;;  %p8466_p1 = scmp.ne.s32.totalorder %s8403_s20, 0 }
  0x6a   : > { %4712 = vmatprep.subr.bf16.mxu0 %v5433_v0  ;;  %4744 = vmatprep.subr.bf16.mxu1 %v5433_v0  ;;  %v5435_v2 = vld [vmem:[#allocation5 + $0x28] sm:$0xff]   ;;  %v5436_v3 = vld [vmem:[#allocation5 + $0x20] sm:$0xff]   ;;  %v5437_v6 = vld [vmem:[#allocation5 + $0x18] sm:$0xff]   ;;  %s5806_s29 = smov [#allocation10]  }
  0x6b   : > { %4713 = vmatpush3.bf16.msra.mxu0 %v5433_v0  ;;  %4745 = vmatpush3.bf16.msra.mxu1 %v5433_v0  ;;  %v5441_v4 = vld [vmem:[%s6002_s12] sm:$0xff]   ;;  %v5438_v7 = vld [vmem:[#allocation5 + $0x10] sm:$0xff]   ;;  %v5439_v8 = vld [vmem:[#allocation5 + $0x8] sm:$0xff]   ;;  %s5730_s11 = sshll.u32 %s5806_s29, 4  ;;  %s5731_s11 = int_to_ptr.vmem [resolvable:$false] %s5730_s11 }
  0x6c   : > { %4714 = vmatprep.subr.bf16.mxu0 %v5434_v1  ;;  %4746 = vmatprep.subr.bf16.mxu1 %v5434_v1  ;;  %v5442_v5 = vld [vmem:[%s6002_s12 + $0x40] sm:$0xff]   ;;  %v5443_v10 = vld [vmem:[%s6002_s12 + $0x8] sm:$0xff]   ;;  %v6020_v12 = vld [vmem:[#allocation7 + $0x38] sm:$0xff]   ;;  %s5732_s21 = scalar_lea.vmem %s5731_s11, 4096 }
  0x6d   : > { %4728 = vmatprep.mubr.bf16.mxu0 %v5441_v4  ;;  %4760 = vmatprep.mubr.bf16.mxu1 %v5442_v5  ;;  %v5440_v9 = vld [vmem:[#allocation5] sm:$0xff]   ;;  %v5444_v11 = vld [vmem:[%s6002_s12 + $0x48] sm:$0xff]   ;;  %v5445_v13 = vld [vmem:[%s6002_s12 + $0x10] sm:$0xff]  }
  0x6e   : > { %v5446_v14 = vld [vmem:[%s6002_s12 + $0x50] sm:$0xff]   ;;  %v6032_v16 = vld [vmem:[#allocation7 + $0x28] sm:$0xff]   ;;  %v5447_v17 = vld [vmem:[%s6002_s12 + $0x18] sm:$0xff]  }
  0x6f   : > { %4715 = vmatpush3.bf16.msra.mxu0 %v5434_v1  ;;  %4747 = vmatpush3.bf16.msra.mxu1 %v5434_v1  ;;  %v6024_v15 = vld [vmem:[#allocation7 + $0x30] sm:$0xff]   ;;  %v5448_v18 = vld [vmem:[%s6002_s12 + $0x58] sm:$0xff]   ;;  %v5449_v19 = vld [vmem:[%s6002_s12 + $0x20] sm:$0xff]  }
  0x70   : > { %4716 = vmatprep.subr.bf16.mxu0 %v5435_v2  ;;  %4748 = vmatprep.subr.bf16.mxu1 %v5435_v2  ;;  %v5450_v20 = vld [vmem:[%s6002_s12 + $0x60] sm:$0xff]   ;;  %v6048_v22 = vld [vmem:[#allocation7 + $0x18] sm:$0xff]   ;;  %v5451_v23 = vld [vmem:[%s6002_s12 + $0x28] sm:$0xff]  }
  0x71   : > { %v6042_v21 = vld [vmem:[#allocation7 + $0x20] sm:$0xff]   ;;  %v5452_v24 = vld [vmem:[%s6002_s12 + $0x68] sm:$0xff]   ;;  %v5453_v25 = vld [vmem:[%s6002_s12 + $0x30] sm:$0xff]  }
  0x72   : > { %v5454_v26 = vld [vmem:[%s6002_s12 + $0x70] sm:$0xff]   ;;  %v5455_v27 = vld [vmem:[%s6002_s12 + $0x38] sm:$0xff]   ;;  %v6068_v30 = vld [vmem:[#allocation7 + $0x8] sm:$0xff]  }
  0x73   : > { %4717 = vmatpush3.bf16.msra.mxu0 %v5435_v2  ;;  %4749 = vmatpush3.bf16.msra.mxu1 %v5435_v2  ;;  %v5456_v28 = vld [vmem:[%s6002_s12 + $0x78] sm:$0xff]   ;;  %v6062_v29 = vld [vmem:[#allocation7 + $0x10] sm:$0xff]   ;;  %v6074_v31 = vld [vmem:[#allocation7] sm:$0xff]   ;;  %s8255_s12 = scalar_lea.vmem [#allocation10], %s4178_s1  ;;  %s4296_s1 = sshll.u32 %s5870_s28, 11 }
  0x74   : > { %4718 = vmatprep.subr.bf16.mxu0 %v5436_v3  ;;  %4750 = vmatprep.subr.bf16.mxu1 %v5436_v3  ;;  %v6085_v36 = vld [vmem:[%s8355_s2] ss:$0 sm:$0xff]  ;;  %s4066_s30 = sshll.u32 %s8255_s12, 4  ;;  %s8307_s13 = scalar_lea.hbm %s8360_s7, %s4296_s1  ;;  %s8309_s30 = int_to_ptr.vmem [resolvable:$true] %s4066_s30 }
  0x75   : > { %s5726_s28 = scalar_lea.vmem %s8309_s30, 2048  ;;  %p5733_p13 = scmp.lt.s32.totalorder %s8309_s30, %s5731_s11 }
  0x76   : > { %p5727_p7 = scmp.ne.s32.totalorder %s8309_s30, %s5726_s28  ;;  %p5734_p0 = scmp.lt.s32.totalorder %s5732_s21, %s5726_s28 }
  0x77   : > { %4719 = vmatpush3.bf16.msra.mxu0 %v5436_v3  ;;  %4751 = vmatpush3.bf16.msra.mxu1 %v5436_v3 }
  0x78   : > { %4720 = vmatprep.subr.bf16.mxu0 %v5437_v6  ;;  %4752 = vmatprep.subr.bf16.mxu1 %v5437_v6  ;;  %p5728_p12 = pnand %p5727_p7, %p8466_p1  ;;  %p5735_p2 = por %p5734_p0, %p5733_p13 }
  0x7a   : > { %p5729_p9 = pneg %p5728_p12 }
  0x7b   : > { %4721 = vmatpush3.bf16.msra.mxu0 %v5437_v6  ;;  %4753 = vmatpush3.bf16.msra.mxu1 %v5437_v6 }
  0x7c   : > { %4722 = vmatprep.subr.bf16.mxu0 %v5438_v7  ;;  %4754 = vmatprep.subr.bf16.mxu1 %v5438_v7  ;;  %p5736_p10 = pnand %p5735_p2, %p5729_p9 }
  0x7f   : > { %4723 = vmatpush3.bf16.msra.mxu0 %v5438_v7  ;;  %4755 = vmatpush3.bf16.msra.mxu1 %v5438_v7 }
  0x80   : > { %4724 = vmatprep.subr.bf16.mxu0 %v5439_v8  ;;  %4756 = vmatprep.subr.bf16.mxu1 %v5439_v8 }
  0x83   : > { %4725 = vmatpush3.bf16.msra.mxu0 %v5439_v8  ;;  %4757 = vmatpush3.bf16.msra.mxu1 %v5439_v8 }
  0x84   : > { %4726 = vmatprep.subr.bf16.mxu0 %v5440_v9  ;;  %4758 = vmatprep.subr.bf16.mxu1 %v5440_v9 }
  0x87   : > { %4727 = vmatpush3.bf16.msra.mxu0 %v5440_v9  ;;  %4759 = vmatpush3.bf16.msra.mxu1 %v5440_v9 }
  0x88   : > { %4776 = vmatprep.subr.bf16.mxu0 %v6020_v12  ;;  %4808 = vmatprep.subr.bf16.mxu1 %v6020_v12 }
  0x8a   : > { %4729 = vmatmul.mubr.bf16.vlgmr.msra.gmra.mxu0 %v5443_v10  ;;  %4761 = vmatmul.mubr.bf16.vlgmr.msra.gmra.mxu1 %v5444_v11 }
  0x8b   : > { %4732 = vmatprep.mubr.bf16.mxu0 %v5445_v13  ;;  %4764 = vmatprep.mubr.bf16.mxu1 %v5446_v14 }
  0x8c   : > { %4777 = vmatpush3.bf16.msra.mxu0 %v6020_v12  ;;  %4809 = vmatpush3.bf16.msra.mxu1 %v6020_v12 }
  0x8d   : > { %4778 = vmatprep.subr.bf16.mxu0 %v6024_v15  ;;  %4810 = vmatprep.subr.bf16.mxu1 %v6024_v15 }
  0x90   : > { %4779 = vmatpush3.bf16.msra.mxu0 %v6024_v15  ;;  %4811 = vmatpush3.bf16.msra.mxu1 %v6024_v15 }
  0x91   : > { %4780 = vmatprep.subr.bf16.mxu0 %v6032_v16  ;;  %4812 = vmatprep.subr.bf16.mxu1 %v6032_v16 }
  0x92   : > { %4733 = vmatmul.mubr.bf16.gmra.mxu0 %v5447_v17  ;;  %4765 = vmatmul.mubr.bf16.gmra.mxu1 %v5448_v18 }
  0x93   : > { %4736 = vmatprep.mubr.bf16.mxu0 %v5449_v19  ;;  %4768 = vmatprep.mubr.bf16.mxu1 %v5450_v20 }
  0x94   : > { %4781 = vmatpush3.bf16.msra.mxu0 %v6032_v16  ;;  %4813 = vmatpush3.bf16.msra.mxu1 %v6032_v16 }
  0x95   : > { %4782 = vmatprep.subr.bf16.mxu0 %v6042_v21  ;;  %4814 = vmatprep.subr.bf16.mxu1 %v6042_v21 }
  0x98   : > { %4783 = vmatpush3.bf16.msra.mxu0 %v6042_v21  ;;  %4815 = vmatpush3.bf16.msra.mxu1 %v6042_v21 }
  0x99   : > { %4784 = vmatprep.subr.bf16.mxu0 %v6048_v22  ;;  %4816 = vmatprep.subr.bf16.mxu1 %v6048_v22 }
  0x9a   : > { %4737 = vmatmul.mubr.bf16.gmra.mxu0 %v5451_v23  ;;  %4769 = vmatmul.mubr.bf16.gmra.mxu1 %v5452_v24 }
  0x9b   : > { %4740 = vmatprep.mubr.bf16.mxu0 %v5453_v25  ;;  %4772 = vmatprep.mubr.bf16.mxu1 %v5454_v26 }
  0x9c   : > { %4785 = vmatpush3.bf16.msra.mxu0 %v6048_v22  ;;  %4817 = vmatpush3.bf16.msra.mxu1 %v6048_v22 }
  0x9d   : > { %4786 = vmatprep.subr.bf16.mxu0 %v6062_v29  ;;  %4818 = vmatprep.subr.bf16.mxu1 %v6062_v29 }
  0xa0   : > { %4787 = vmatpush3.bf16.msra.mxu0 %v6062_v29  ;;  %4819 = vmatpush3.bf16.msra.mxu1 %v6062_v29 }
  0xa1   : > { %4788 = vmatprep.subr.bf16.mxu0 %v6068_v30  ;;  %4820 = vmatprep.subr.bf16.mxu1 %v6068_v30 }
  0xa2   : > { %4741 = vmatmul.mubr.bf16.gmra.mxu0 %v5455_v27  ;;  %4773 = vmatmul.mubr.bf16.gmra.mxu1 %v5456_v28 }
  0xa4   : > { %4789 = vmatpush3.bf16.msra.mxu0 %v6068_v30  ;;  %4821 = vmatpush3.bf16.msra.mxu1 %v6068_v30 }
  0xa5   : > { %4790 = vmatprep.subr.bf16.mxu0 %v6074_v31  ;;  %4822 = vmatprep.subr.bf16.mxu1 %v6074_v31 }
  0xa8   : > { %4791 = vmatpush3.bf16.msra.mxu0 %v6074_v31  ;;  %4823 = vmatpush3.bf16.msra.mxu1 %v6074_v31 }
  0xa9   : > { %4840 = vmatprep.subr.bf16.mxu0 %v6020_v12  ;;  %4872 = vmatprep.subr.bf16.mxu1 %v6020_v12 }
 0x14a   : > { %v4730_v32 = vpop.f32.mrf.mxu0  ;;  %v4762_v33 = vpop.f32.mrf.mxu1 }
 0x14b   : > { %v584_v43 = vadd.f32 %v4730_v32, %v6085_v36  ;;  %v745_v44 = vadd.f32 %v4762_v33, %v6085_v36 }
 0x14c   : > { %v575_v34 = vpop.f32.mrf.mxu0  ;;  %v736_v35 = vpop.f32.mrf.mxu1 }
 0x14d   : > { %v576_v39 = vadd.f32 %v6085_v36, %v575_v34  ;;  %v737_v40 = vadd.f32 %v6085_v36, %v736_v35  ;;  %v6107_v57 = vmax.f32 %v584_v43, 0.0  ;;  %v6109_v58 = vmax.f32 %v745_v44, 0.0 }
 0x14e   : > { %v4731_v37 = vpop.f32.mrf.mxu0  ;;  %v4763_v38 = vpop.f32.mrf.mxu1 }
 0x14f   : > { %v587_v41 = vadd.f32 %v4731_v37, %v6085_v36  ;;  %v748_v42 = vadd.f32 %v4763_v38, %v6085_v36  ;;  %v6099_v53 = vmax.f32 %v576_v39, 0.0  ;;  %v6101_v54 = vmax.f32 %v737_v40, 0.0 }
 0x150   : > { %v578_v45 = vpop.f32.mrf.mxu0  ;;  %v739_v46 = vpop.f32.mrf.mxu1 }
 0x151   : > { %v579_v47 = vadd.f32 %v6085_v36, %v578_v45  ;;  %v740_v48 = vadd.f32 %v6085_v36, %v739_v46  ;;  %v6095_v49 = vmax.f32 %v587_v41, 0.0  ;;  %v6097_v50 = vmax.f32 %v748_v42, 0.0 }
 0x152   : > { %v4734_v51 = vpop.f32.mrf.mxu0  ;;  %v4766_v52 = vpop.f32.mrf.mxu1 }
 0x153   : > { %8413 = vst [vmem:[#allocation15_spill] sm:$0xff] %v6095_v49  ;;  %8414 = vst [vmem:[#allocation16_spill] sm:$0xff] %v6097_v50  ;;  %v6103_v55 = vmax.f32 %v579_v47, 0.0  ;;  %v6105_v56 = vmax.f32 %v740_v48, 0.0  ;;  %v600_v59 = vadd.f32 %v4734_v51, %v6085_v36  ;;  %v761_v60 = vadd.f32 %v4766_v52, %v6085_v36 }
 0x154   : > { %v591_v61 = vpop.f32.mrf.mxu0  ;;  %v752_v62 = vpop.f32.mrf.mxu1  ;;  %v816_v1 = vpack.c.bf16 %v6095_v49, %v6107_v57  ;;  %v824_v2 = vpack.c.bf16 %v6097_v50, %v6109_v58 }
 0x155   : > { %8415 = vst [vmem:[#allocation17_spill] sm:$0xff] %v6103_v55  ;;  %8416 = vst [vmem:[#allocation18_spill] sm:$0xff] %v6105_v56  ;;  %v815_v63 = vpack.c.bf16 %v6103_v55, %v6099_v53  ;;  %v823_v0 = vpack.c.bf16 %v6105_v56, %v6101_v54  ;;  %v592_v3 = vadd.f32 %v6085_v36, %v591_v61  ;;  %v6125_v9 = vmax.f32 %v600_v59, 0.0 }
 0x156   : > { %v753_v4 = vadd.f32 %v6085_v36, %v752_v62  ;;  %v4735_v5 = vpop.f32.mrf.mxu0  ;;  %v4767_v6 = vpop.f32.mrf.mxu1  ;;  %v6127_v10 = vmax.f32 %v761_v60, 0.0 }
 0x157   : > { %v603_v7 = vadd.f32 %v4735_v5, %v6085_v36  ;;  %v764_v8 = vadd.f32 %v4767_v6, %v6085_v36  ;;  %4792 = vmatprep.mubr.bf16.mxu0 %v815_v63  ;;  %4824 = vmatprep.mubr.bf16.mxu1 %v823_v0  ;;  %v6137_v20 = vmax.f32 %v592_v3, 0.0 }
 0x158   : > { %v594_v11 = vpop.f32.mrf.mxu0  ;;  %v755_v13 = vpop.f32.mrf.mxu1  ;;  %4793 = vmatmul.mubr.bf16.vlgmr.msra.gmra.mxu0 %v816_v1  ;;  %4825 = vmatmul.mubr.bf16.vlgmr.msra.gmra.mxu1 %v824_v2  ;;  %v6139_v23 = vmax.f32 %v753_v4, 0.0 }
 0x159   : > { %v6129_v14 = vmax.f32 %v603_v7, 0.0  ;;  %v6131_v17 = vmax.f32 %v764_v8, 0.0  ;;  %v595_v18 = vadd.f32 %v6085_v36, %v594_v11  ;;  %v756_v19 = vadd.f32 %v6085_v36, %v755_v13  ;;  %4841 = vmatpush3.bf16.msra.mxu0 %v6020_v12  ;;  %4873 = vmatpush3.bf16.msra.mxu1 %v6020_v12 }
 0x15a   : > { %v4738_v24 = vpop.f32.mrf.mxu0  ;;  %v4770_v25 = vpop.f32.mrf.mxu1  ;;  %4842 = vmatprep.subr.bf16.mxu0 %v6024_v15  ;;  %4874 = vmatprep.subr.bf16.mxu1 %v6024_v15 }
 0x15b   : > { %8417 = vst [vmem:[#allocation19_spill] sm:$0xff] %v6131_v17  ;;  %v6143_v26 = vmax.f32 %v595_v18, 0.0  ;;  %v6145_v27 = vmax.f32 %v756_v19, 0.0  ;;  %v616_v28 = vadd.f32 %v4738_v24, %v6085_v36  ;;  %v777_v32 = vadd.f32 %v4770_v25, %v6085_v36 }
 0x15c   : > { %v607_v33 = vpop.f32.mrf.mxu0  ;;  %v768_v34 = vpop.f32.mrf.mxu1  ;;  %v818_v37 = vpack.c.bf16 %v6129_v14, %v6125_v9  ;;  %v826_v38 = vpack.c.bf16 %v6131_v17, %v6127_v10 }
 0x15d   : > { %8418 = vst [vmem:[#allocation20_spill] sm:$0xff] %v6143_v26  ;;  %8419 = vst [vmem:[#allocation21_spill] sm:$0xff] %v6145_v27  ;;  %v608_v35 = vadd.f32 %v6085_v36, %v607_v33  ;;  %4843 = vmatpush3.bf16.msra.mxu0 %v6024_v15  ;;  %4875 = vmatpush3.bf16.msra.mxu1 %v6024_v15  ;;  %v769_v39 = vadd.f32 %v6085_v36, %v768_v34  ;;  %v6165_v46 = vmax.f32 %v616_v28, 0.0 }
 0x15e   : > { %v4739_v40 = vpop.f32.mrf.mxu0  ;;  %v4771_v41 = vpop.f32.mrf.mxu1  ;;  %v817_v42 = vpack.c.bf16 %v6143_v26, %v6137_v20  ;;  %v825_v43 = vpack.c.bf16 %v6145_v27, %v6139_v23  ;;  %4844 = vmatprep.subr.bf16.mxu0 %v6032_v16  ;;  %4876 = vmatprep.subr.bf16.mxu1 %v6032_v16  ;;  %v6167_v47 = vmax.f32 %v777_v32, 0.0 }
 0x15f   : > { %v619_v44 = vadd.f32 %v4739_v40, %v6085_v36  ;;  %v780_v45 = vadd.f32 %v4771_v41, %v6085_v36  ;;  %v6175_v62 = vmax.f32 %v608_v35, 0.0  ;;  %v6177_v63 = vmax.f32 %v769_v39, 0.0 }
 0x160   : > { %4796 = vmatprep.mubr.bf16.mxu0 %v817_v42  ;;  %4828 = vmatprep.mubr.bf16.mxu1 %v825_v43  ;;  %v610_v48 = vpop.f32.mrf.mxu0  ;;  %v771_v51 = vpop.f32.mrf.mxu1 }
 0x161   : > { %v6169_v52 = vmax.f32 %v619_v44, 0.0  ;;  %v6171_v59 = vmax.f32 %v780_v45, 0.0  ;;  %v611_v60 = vadd.f32 %v6085_v36, %v610_v48  ;;  %v772_v61 = vadd.f32 %v6085_v36, %v771_v51  ;;  %4797 = vmatmul.mubr.bf16.gmra.mxu0 %v818_v37  ;;  %4829 = vmatmul.mubr.bf16.gmra.mxu1 %v826_v38 }
 0x162   : > { %v4742_v0 = vpop.f32.mrf.mxu0  ;;  %v4774_v1 = vpop.f32.mrf.mxu1  ;;  %4845 = vmatpush3.bf16.msra.mxu0 %v6032_v16  ;;  %4877 = vmatpush3.bf16.msra.mxu1 %v6032_v16 }
 0x163   : > { %8420 = vst [vmem:[#allocation22_spill] sm:$0xff] %v6171_v59  ;;  %v6181_v2 = vmax.f32 %v611_v60, 0.0  ;;  %v6183_v3 = vmax.f32 %v772_v61, 0.0  ;;  %4846 = vmatprep.subr.bf16.mxu0 %v6042_v21  ;;  %4878 = vmatprep.subr.bf16.mxu1 %v6042_v21  ;;  %v632_v4 = vadd.f32 %v4742_v0, %v6085_v36  ;;  %v793_v5 = vadd.f32 %v4774_v1, %v6085_v36 }
 0x164   : > { %v623_v6 = vpop.f32.mrf.mxu0  ;;  %v784_v7 = vpop.f32.mrf.mxu1  ;;  %v820_v13 = vpack.c.bf16 %v6169_v52, %v6165_v46  ;;  %v828_v18 = vpack.c.bf16 %v6171_v59, %v6167_v47 }
 0x165   : > { %8421 = vst [vmem:[#allocation23_spill] sm:$0xff] %v6181_v2  ;;  %8422 = vst [vmem:[#allocation24_spill] sm:$0xff] %v6183_v3  ;;  %v624_v8 = vadd.f32 %v6085_v36, %v623_v6  ;;  %v785_v11 = vadd.f32 %v6085_v36, %v784_v7  ;;  %v819_v25 = vpack.c.bf16 %v6181_v2, %v6175_v62  ;;  %v6205_v34 = vmax.f32 %v632_v4, 0.0  ;;  %v6250_v4 = vld [vmem:[%s8357_s4] ss:$0 sm:$0xff] }
 0x166   : > { %v4743_v19 = vpop.f32.mrf.mxu0  ;;  %v4775_v24 = vpop.f32.mrf.mxu1  ;;  %v827_v28 = vpack.c.bf16 %v6183_v3, %v6177_v63  ;;  %4847 = vmatpush3.bf16.msra.mxu0 %v6042_v21  ;;  %4879 = vmatpush3.bf16.msra.mxu1 %v6042_v21  ;;  %v6207_v35 = vmax.f32 %v793_v5, 0.0 }
 0x167   : > { %v635_v32 = vadd.f32 %v4743_v19, %v6085_v36  ;;  %v796_v33 = vadd.f32 %v4775_v24, %v6085_v36  ;;  %4848 = vmatprep.subr.bf16.mxu0 %v6048_v22  ;;  %4880 = vmatprep.subr.bf16.mxu1 %v6048_v22  ;;  %v6209_v37 = vmax.f32 %v624_v8, 0.0  ;;  %v6211_v38 = vmax.f32 %v785_v11, 0.0 }
 0x168   : > { %4800 = vmatprep.mubr.bf16.mxu0 %v819_v25  ;;  %4832 = vmatprep.mubr.bf16.mxu1 %v827_v28  ;;  %v626_v39 = vpop.f32.mrf.mxu0  ;;  %v787_v40 = vpop.f32.mrf.mxu1 }
 0x169   : > { %v6213_v41 = vmax.f32 %v635_v32, 0.0  ;;  %v6215_v42 = vmax.f32 %v796_v33, 0.0  ;;  %v627_v43 = vadd.f32 %v6085_v36, %v626_v39  ;;  %v788_v44 = vadd.f32 %v6085_v36, %v787_v40  ;;  %4801 = vmatmul.mubr.bf16.gmra.mxu0 %v820_v13  ;;  %4833 = vmatmul.mubr.bf16.gmra.mxu1 %v828_v18 }
 0x16a   : > { %4849 = vmatpush3.bf16.msra.mxu0 %v6048_v22  ;;  %4881 = vmatpush3.bf16.msra.mxu1 %v6048_v22 }
 0x16b   : > { %v6221_v45 = vmax.f32 %v627_v43, 0.0  ;;  %v6223_v48 = vmax.f32 %v788_v44, 0.0  ;;  %4850 = vmatprep.subr.bf16.mxu0 %v6062_v29  ;;  %4882 = vmatprep.subr.bf16.mxu1 %v6062_v29  ;;  %v822_v60 = vpack.c.bf16 %v6213_v41, %v6205_v34  ;;  %v830_v61 = vpack.c.bf16 %v6215_v42, %v6207_v35 }
 0x16d   : > { %v821_v51 = vpack.c.bf16 %v6221_v45, %v6209_v37  ;;  %v829_v36 = vpack.c.bf16 %v6223_v48, %v6211_v38 }
 0x16e   : > { %4851 = vmatpush3.bf16.msra.mxu0 %v6062_v29  ;;  %4883 = vmatpush3.bf16.msra.mxu1 %v6062_v29 }
 0x16f   : > { %4804 = vmatprep.mubr.bf16.mxu0 %v821_v51  ;;  %4836 = vmatprep.mubr.bf16.mxu1 %v829_v36 }
 0x170   : > { %4852 = vmatprep.subr.bf16.mxu0 %v6068_v30  ;;  %4884 = vmatprep.subr.bf16.mxu1 %v6068_v30 }
 0x171   : > { %4805 = vmatmul.mubr.bf16.gmra.mxu0 %v822_v60  ;;  %4837 = vmatmul.mubr.bf16.gmra.mxu1 %v830_v61 }
 0x172   : > { %4853 = vmatpush3.bf16.msra.mxu0 %v6068_v30  ;;  %4885 = vmatpush3.bf16.msra.mxu1 %v6068_v30 }
 0x173   : > { %4854 = vmatprep.subr.bf16.mxu0 %v6074_v31  ;;  %4886 = vmatprep.subr.bf16.mxu1 %v6074_v31 }
 0x176   : > { %4855 = vmatpush3.bf16.msra.mxu0 %v6074_v31  ;;  %4887 = vmatpush3.bf16.msra.mxu1 %v6074_v31 }
 0x177   : > { %4904 = vmatprep.subr.bf16.mxu0 %v6020_v12  ;;  %4936 = vmatprep.subr.bf16.mxu1 %v6020_v12 }
 0x218   : > { %v4794_v0 = vpop.f32.mrf.mxu0  ;;  %v4826_v1 = vpop.f32.mrf.mxu1 }
 0x219   : > { %v922_v11 = vadd.f32 %v4794_v0, %v6250_v4  ;;  %v1051_v13 = vadd.f32 %v4826_v1, %v6250_v4 }
 0x21a   : > { %v913_v5 = vpop.f32.mrf.mxu0  ;;  %v1042_v6 = vpop.f32.mrf.mxu1 }
 0x21b   : > { %v914_v7 = vadd.f32 %v6250_v4, %v913_v5  ;;  %v1043_v8 = vadd.f32 %v6250_v4, %v1042_v6  ;;  %v978_v44 = vmax.f32 %v922_v11, 0.0  ;;  %v1107_v51 = vmax.f32 %v1051_v13, 0.0 }
 0x21c   : > { %v4795_v18 = vpop.f32.mrf.mxu0  ;;  %v4827_v19 = vpop.f32.mrf.mxu1 }
 0x21d   : > { %v976_v24 = vmax.f32 %v914_v7, 0.0  ;;  %v925_v25 = vadd.f32 %v4795_v18, %v6250_v4  ;;  %v1054_v28 = vadd.f32 %v4827_v19, %v6250_v4  ;;  %v1105_v39 = vmax.f32 %v1043_v8, 0.0 }
 0x21e   : > { %v916_v32 = vpop.f32.mrf.mxu0  ;;  %v1045_v33 = vpop.f32.mrf.mxu1 }
 0x21f   : > { %v917_v40 = vadd.f32 %v6250_v4, %v916_v32  ;;  %v1046_v43 = vadd.f32 %v6250_v4, %v1045_v33  ;;  %v979_v36 = vmax.f32 %v925_v25, 0.0  ;;  %v1108_v60 = vmax.f32 %v1054_v28, 0.0 }
 0x220   : > { %v6261_v6 = vadd.f32 %v976_v24, %v6099_v53  ;;  %v6270_v18 = vadd.f32 %v1105_v39, %v6101_v54  ;;  %v6280_v28 = vadd.f32 %v978_v44, %v6107_v57  ;;  %v6283_v32 = vadd.f32 %v1107_v51, %v6109_v58 }
 0x221   : > { %v977_v61 = vmax.f32 %v917_v40, 0.0  ;;  %v1106_v0 = vmax.f32 %v1046_v43, 0.0  ;;  %v4798_v1 = vpop.f32.mrf.mxu0  ;;  %v4830_v5 = vpop.f32.mrf.mxu1  ;;  %v6264_v7 = vadd.f32 %v979_v36, %v6095_v49  ;;  %v6267_v8 = vadd.f32 %v1108_v60, %v6097_v50 }
 0x222   : > { %v938_v19 = vadd.f32 %v4798_v1, %v6250_v4  ;;  %v1067_v33 = vadd.f32 %v4830_v5, %v6250_v4 }
 0x223   : > { %8423 = vst [vmem:[#allocation25_spill] sm:$0xff] %v6264_v7  ;;  %8424 = vst [vmem:[#allocation26_spill] sm:$0xff] %v6267_v8  ;;  %v6273_v11 = vadd.f32 %v977_v61, %v6103_v55  ;;  %v6276_v13 = vadd.f32 %v1106_v0, %v6105_v56  ;;  %v929_v25 = vpop.f32.mrf.mxu0  ;;  %v1058_v24 = vpop.f32.mrf.mxu1  ;;  %v1170_v44 = vpack.c.bf16 %v6264_v7, %v6280_v28 }
 0x224   : > { %v930_v39 = vadd.f32 %v6250_v4, %v929_v25  ;;  %v1059_v40 = vadd.f32 %v6250_v4, %v1058_v24  ;;  %v1178_v51 = vpack.c.bf16 %v6267_v8, %v6283_v32  ;;  %v982_v5 = vmax.f32 %v938_v19, 0.0 }
 0x225   : > { %8425 = vst [vmem:[#allocation27_spill] sm:$0xff] %v6273_v11  ;;  %8426 = vst [vmem:[#allocation28_spill] sm:$0xff] %v6276_v13  ;;  %v4799_v43 = vpop.f32.mrf.mxu0  ;;  %v4831_v36 = vpop.f32.mrf.mxu1  ;;  %v1169_v60 = vpack.c.bf16 %v6273_v11, %v6261_v6  ;;  %v1177_v61 = vpack.c.bf16 %v6276_v13, %v6270_v18  ;;  %v1111_v19 = vmax.f32 %v1067_v33, 0.0 }
 0x226   : > { %v941_v0 = vadd.f32 %v4799_v43, %v6250_v4  ;;  %v1070_v1 = vadd.f32 %v4831_v36, %v6250_v4  ;;  %v980_v50 = vmax.f32 %v930_v39, 0.0  ;;  %v1109_v7 = vmax.f32 %v1059_v40, 0.0 }
 0x227   : > { %v932_v25 = vpop.f32.mrf.mxu0  ;;  %v1061_v24 = vpop.f32.mrf.mxu1  ;;  %4856 = vmatprep.mubr.bf16.mxu0 %v1169_v60  ;;  %4888 = vmatprep.mubr.bf16.mxu1 %v1177_v61  ;;  %v6305_v60 = vadd.f32 %v982_v5, %v6125_v9 }
 0x228   : > { %v983_v56 = vmax.f32 %v941_v0, 0.0  ;;  %v1112_v11 = vmax.f32 %v1070_v1, 0.0  ;;  %v933_v55 = vadd.f32 %v6250_v4, %v932_v25  ;;  %v1062_v13 = vadd.f32 %v6250_v4, %v1061_v24  ;;  %4857 = vmatmul.mubr.bf16.vlgmr.msra.gmra.mxu0 %v1170_v44  ;;  %4889 = vmatmul.mubr.bf16.vlgmr.msra.gmra.mxu1 %v1178_v51 }
 0x229   : > { %v4802_v8 = vpop.f32.mrf.mxu0  ;;  %v4834_v49 = vpop.f32.mrf.mxu1  ;;  %4905 = vmatpush3.bf16.msra.mxu0 %v6020_v12  ;;  %4937 = vmatpush3.bf16.msra.mxu1 %v6020_v12 }
 0x22a   : > { %v981_v43 = vmax.f32 %v933_v55, 0.0  ;;  %v1110_v36 = vmax.f32 %v1062_v13, 0.0  ;;  %4906 = vmatprep.subr.bf16.mxu0 %v6024_v15  ;;  %4938 = vmatprep.subr.bf16.mxu1 %v6024_v15  ;;  %v6308_v61 = vadd.f32 %v983_v56, %v6129_v14  ;;  %v954_v39 = vadd.f32 %v4802_v8, %v6250_v4 }
 0x22b   : > { %v1083_v40 = vadd.f32 %v4834_v49, %v6250_v4  ;;  %v945_v44 = vpop.f32.mrf.mxu0  ;;  %v1074_v51 = vpop.f32.mrf.mxu1  ;;  %v6313_v33 = vadd.f32 %v1112_v11, %v6131_v17  ;;  %v6323_v56 = vadd.f32 %v980_v50, %v6137_v20  ;;  %v6326_v8 = vadd.f32 %v1109_v7, %v6139_v23 }
 0x22c   : > { %v6316_v55 = vadd.f32 %v981_v43, %v6143_v26  ;;  %v6319_v13 = vadd.f32 %v1110_v36, %v6145_v27  ;;  %v946_v0 = vadd.f32 %v6250_v4, %v945_v44  ;;  %v1075_v49 = vadd.f32 %v6250_v4, %v1074_v51 }
 0x22d   : > { %8427 = vst [vmem:[#allocation29_spill] sm:$0xff] %v6313_v33  ;;  %v4803_v1 = vpop.f32.mrf.mxu0  ;;  %v4835_v5 = vpop.f32.mrf.mxu1  ;;  %4907 = vmatpush3.bf16.msra.mxu0 %v6024_v15  ;;  %4939 = vmatpush3.bf16.msra.mxu1 %v6024_v15  ;;  %v6332_v11 = vadd.f32 %v1111_v19, %v6127_v10  ;;  %v986_v25 = vmax.f32 %v954_v39, 0.0  ;;  %v1115_v7 = vmax.f32 %v1083_v40, 0.0  ;;  %v1172_v39 = vpack.c.bf16 %v6308_v61, %v6305_v60 }
 0x22e   : > { %8428 = vst [vmem:[#allocation30_spill] sm:$0xff] %v6316_v55  ;;  %8429 = vst [vmem:[#allocation31_spill] sm:$0xff] %v6319_v13  ;;  %v957_v24 = vadd.f32 %v4803_v1, %v6250_v4  ;;  %v1086_v50 = vadd.f32 %v4835_v5, %v6250_v4  ;;  %4908 = vmatprep.subr.bf16.mxu0 %v6032_v16  ;;  %4940 = vmatprep.subr.bf16.mxu1 %v6032_v16  ;;  %v984_v43 = vmax.f32 %v946_v0, 0.0 }
 0x22f   : > { %v948_v36 = vpop.f32.mrf.mxu0  ;;  %v1077_v44 = vpop.f32.mrf.mxu1  ;;  %v1171_v51 = vpack.c.bf16 %v6316_v55, %v6323_v56  ;;  %v1179_v15 = vpack.c.bf16 %v6319_v13, %v6326_v8  ;;  %v1180_v1 = vpack.c.bf16 %v6313_v33, %v6332_v11  ;;  %v1113_v5 = vmax.f32 %v1075_v49, 0.0 }
 0x230   : > { %v987_v19 = vmax.f32 %v957_v24, 0.0  ;;  %v1116_v27 = vmax.f32 %v1086_v50, 0.0  ;;  %v949_v40 = vadd.f32 %v6250_v4, %v948_v36  ;;  %v1078_v0 = vadd.f32 %v6250_v4, %v1077_v44 }
 0x231   : > { %4860 = vmatprep.mubr.bf16.mxu0 %v1171_v51  ;;  %4892 = vmatprep.mubr.bf16.mxu1 %v1179_v15  ;;  %v4806_v26 = vpop.f32.mrf.mxu0  ;;  %v4838_v55 = vpop.f32.mrf.mxu1  ;;  %v6349_v17 = vadd.f32 %v986_v25, %v6165_v46  ;;  %v6352_v24 = vadd.f32 %v1115_v7, %v6167_v47  ;;  %v6355_v13 = vadd.f32 %v984_v43, %v6175_v62 }
 0x232   : > { %4861 = vmatmul.mubr.bf16.gmra.mxu0 %v1172_v39  ;;  %v985_v49 = vmax.f32 %v949_v40, 0.0  ;;  %v1114_v50 = vmax.f32 %v1078_v0, 0.0  ;;  %4893 = vmatmul.mubr.bf16.gmra.mxu1 %v1180_v1  ;;  %v6359_v44 = vadd.f32 %v987_v19, %v6169_v52  ;;  %v6366_v7 = vadd.f32 %v1113_v5, %v6177_v63 }
 0x233   : > { %v961_v36 = vpop.f32.mrf.mxu0  ;;  %v1090_v33 = vpop.f32.mrf.mxu1  ;;  %4909 = vmatpush3.bf16.msra.mxu0 %v6032_v16  ;;  %4941 = vmatpush3.bf16.msra.mxu1 %v6032_v16  ;;  %v6369_v43 = vadd.f32 %v1116_v27, %v6171_v59  ;;  %v970_v16 = vadd.f32 %v4806_v26, %v6250_v4 }
 0x234   : > { %v962_v25 = vadd.f32 %v6250_v4, %v961_v36  ;;  %v1091_v51 = vadd.f32 %v6250_v4, %v1090_v33  ;;  %4910 = vmatprep.subr.bf16.mxu0 %v6042_v21  ;;  %v6372_v15 = vadd.f32 %v985_v49, %v6181_v2  ;;  %v6375_v19 = vadd.f32 %v1114_v50, %v6183_v3 }
 0x235   : > { %v4807_v39 = vpop.f32.mrf.mxu0  ;;  %v4839_v1 = vpop.f32.mrf.mxu1  ;;  %4942 = vmatprep.subr.bf16.mxu1 %v6042_v21  ;;  %v1099_v33 = vadd.f32 %v4838_v55, %v6250_v4 }
 0x236   : > { %8430 = vst [vmem:[#allocation32_spill] sm:$0xff] %v6372_v15  ;;  %8431 = vst [vmem:[#allocation33_spill] sm:$0xff] %v6375_v19  ;;  %v988_v40 = vmax.f32 %v962_v25, 0.0  ;;  %v1117_v5 = vmax.f32 %v1091_v51, 0.0  ;;  %v973_v0 = vadd.f32 %v4807_v39, %v6250_v4  ;;  %v1102_v27 = vadd.f32 %v4839_v1, %v6250_v4 }
 0x237   : > { %v964_v36 = vpop.f32.mrf.mxu0  ;;  %v1093_v49 = vpop.f32.mrf.mxu1  ;;  %v1173_v50 = vpack.c.bf16 %v6372_v15, %v6355_v13  ;;  %v1181_v3 = vpack.c.bf16 %v6375_v19, %v6366_v7  ;;  %4911 = vmatpush3.bf16.msra.mxu0 %v6042_v21  ;;  %v1174_v25 = vpack.c.bf16 %v6359_v44, %v6349_v17  ;;  %4943 = vmatpush3.bf16.msra.mxu1 %v6042_v21  ;;  %v990_v15 = vmax.f32 %v970_v16, 0.0 }
 0x238   : > { %v965_v26 = vadd.f32 %v6250_v4, %v964_v36  ;;  %v1094_v55 = vadd.f32 %v6250_v4, %v1093_v49  ;;  %v991_v51 = vmax.f32 %v973_v0, 0.0  ;;  %v1120_v39 = vmax.f32 %v1102_v27, 0.0  ;;  %4912 = vmatprep.subr.bf16.mxu0 %v6048_v22  ;;  %4944 = vmatprep.subr.bf16.mxu1 %v6048_v22 }
 0x239   : > { %4864 = vmatprep.mubr.bf16.mxu0 %v1173_v50  ;;  %4896 = vmatprep.mubr.bf16.mxu1 %v1181_v3  ;;  %v1182_v1 = vpack.c.bf16 %v6369_v43, %v6352_v24  ;;  %v1119_v36 = vmax.f32 %v1099_v33, 0.0  ;;  %v6396_v49 = vadd.f32 %v988_v40, %v6209_v37  ;;  %v6399_v59 = vadd.f32 %v1117_v5, %v6211_v38  ;;  %v8432_v50 = vld [vmem:[#allocation15_spill] sm:$0xff] }
 0x23a   : > { %v989_v19 = vmax.f32 %v965_v26, 0.0  ;;  %v1118_v2 = vmax.f32 %v1094_v55, 0.0  ;;  %4865 = vmatmul.mubr.bf16.gmra.mxu0 %v1174_v25  ;;  %v6403_v21 = vadd.f32 %v991_v51, %v6213_v41  ;;  %v6414_v33 = vadd.f32 %v1120_v39, %v6215_v42  ;;  %v8433_v26 = vld [vmem:[#allocation25_spill] sm:$0xff]  ;;  %v8435_v25 = vld [vmem:[#allocation26_spill] sm:$0xff]  ;;  %v8437_v39 = vld [vmem:[#allocation27_spill] sm:$0xff] }
 0x23b   : > { %4897 = vmatmul.mubr.bf16.gmra.mxu1 %v1182_v1  ;;  %4913 = vmatpush3.bf16.msra.mxu0 %v6048_v22  ;;  %v1006_v40 = vadd.f32 %v990_v15, %v6205_v34  ;;  %v1135_v5 = vadd.f32 %v1119_v36, %v6207_v35  ;;  %v1155_v15 = vadd.f32 %v6283_v32, %v6109_v58  ;;  %v8439_v58 = vld [vmem:[#allocation28_spill] sm:$0xff] }
 0x23c   : > { %v6406_v3 = vadd.f32 %v989_v19, %v6221_v45  ;;  %v6409_v16 = vadd.f32 %v1118_v2, %v6223_v48  ;;  %4945 = vmatpush3.bf16.msra.mxu1 %v6048_v22  ;;  %4914 = vmatprep.subr.bf16.mxu0 %v6062_v29  ;;  %v1153_v27 = vadd.f32 %v6270_v18, %v6101_v54 }
 0x23d   : > { %4946 = vmatprep.subr.bf16.mxu1 %v6062_v29  ;;  %v1176_v22 = vpack.c.bf16 %v6403_v21, %v1006_v40  ;;  %v1184_v0 = vpack.c.bf16 %v6414_v33, %v1135_v5  ;;  %v6448_v55 = vadd.f32 %v8433_v26, %v8432_v50  ;;  %v6468_v54 = vadd.f32 %v6332_v11, %v6127_v10  ;;  %v8442_v10 = vld [vmem:[#allocation20_spill] sm:$0xff]  ;;  %v8443_v11 = vld [vmem:[#allocation30_spill] sm:$0xff] }
 0x23e   : > { %v1175_v19 = vpack.c.bf16 %v6406_v3, %v6396_v49  ;;  %v1183_v2 = vpack.c.bf16 %v6409_v16, %v6399_v59  ;;  %v6476_v18 = vadd.f32 %v6326_v8, %v6139_v23 }
 0x23f   : > { %4915 = vmatpush3.bf16.msra.mxu0 %v6062_v29 }
 0x240   : > { %4868 = vmatprep.mubr.bf16.mxu0 %v1175_v19  ;;  %4900 = vmatprep.mubr.bf16.mxu1 %v1183_v2  ;;  %v6480_v19 = vadd.f32 %v6308_v61, %v6129_v14  ;;  %v6498_v14 = vadd.f32 %v6349_v17, %v6165_v46  ;;  %v6502_v61 = vadd.f32 %v6352_v24, %v6167_v47  ;;  %v8446_v17 = vld [vmem:[#allocation22_spill] sm:$0xff] }
 0x241   : > { %4947 = vmatpush3.bf16.msra.mxu1 %v6062_v29  ;;  %4916 = vmatprep.subr.bf16.mxu0 %v6068_v30  ;;  %v1139_v29 = vadd.f32 %v6280_v28, %v6107_v57  ;;  %v8438_v28 = vld [vmem:[#allocation18_spill] sm:$0xff]  ;;  %v6518_v46 = vadd.f32 %v6369_v43, %v8446_v17  ;;  %v6534_v43 = vadd.f32 %v1135_v5, %v6207_v35 }
 0x242   : > { %4869 = vmatmul.mubr.bf16.gmra.mxu0 %v1176_v22  ;;  %4948 = vmatprep.subr.bf16.mxu1 %v6068_v30  ;;  %v6460_v32 = vadd.f32 %v8439_v58, %v8438_v28  ;;  %v6488_v22 = vadd.f32 %v8443_v11, %v8442_v10  ;;  %v8447_v58 = vld [vmem:[#allocation23_spill] sm:$0xff] }
 0x243   : > { %4901 = vmatmul.mubr.bf16.gmra.mxu1 %v1184_v0  ;;  %4917 = vmatpush3.bf16.msra.mxu0 %v6068_v30 }
 0x244   : > { %4918 = vmatprep.subr.bf16.mxu0 %v6074_v31 }
 0x245   : > { %4949 = vmatpush3.bf16.msra.mxu1 %v6068_v30  ;;  %v1137_v30 = vadd.f32 %v6261_v6, %v6099_v53  ;;  %v6464_v53 = vadd.f32 %v6305_v60, %v6125_v9  ;;  %v6472_v6 = vadd.f32 %v6323_v56, %v6137_v20  ;;  %v8440_v9 = vld [vmem:[#allocation19_spill] sm:$0xff]  ;;  %v8441_v60 = vld [vmem:[#allocation29_spill] sm:$0xff] }
 0x246   : > { %4950 = vmatprep.subr.bf16.mxu1 %v6074_v31  ;;  %v6484_v2 = vadd.f32 %v8441_v60, %v8440_v9  ;;  %v8444_v20 = vld [vmem:[#allocation21_spill] sm:$0xff]  ;;  %v8445_v56 = vld [vmem:[#allocation31_spill] sm:$0xff] }
 0x247   : > { %4919 = vmatpush3.bf16.msra.mxu0 %v6074_v31  ;;  %v6492_v0 = vadd.f32 %v8445_v56, %v8444_v20 }
 0x248   : > { %4968 = vmatprep.subr.bf16.mxu0 %v6020_v12 }
 0x249   : > { %4951 = vmatpush3.bf16.msra.mxu1 %v6074_v31  ;;  %v8434_v31 = vld [vmem:[#allocation16_spill] sm:$0xff] }
 0x24a   : > { %5000 = vmatprep.subr.bf16.mxu1 %v6020_v12  ;;  %v6452_v51 = vadd.f32 %v8435_v25, %v8434_v31  ;;  %v8436_v12 = vld [vmem:[#allocation17_spill] sm:$0xff]  ;;  %v6506_v31 = vadd.f32 %v6355_v13, %v6175_v62  ;;  %v6510_v25 = vadd.f32 %v6366_v7, %v6177_v63  ;;  %v8449_v7 = vld [vmem:[#allocation24_spill] sm:$0xff] }
 0x24b   : > { %v6456_v57 = vadd.f32 %v8437_v39, %v8436_v12  ;;  %v6514_v12 = vadd.f32 %v6359_v44, %v6169_v52  ;;  %v6531_v44 = vadd.f32 %v1006_v40, %v6205_v34  ;;  %v6544_v34 = vadd.f32 %v6399_v59, %v6211_v38 }
 0x2e8   : > { %v4858_v1 = vpop.f32.mrf.mxu0  ;;  %v4890_v36 = vpop.f32.mrf.mxu1 }
 0x2e9   : > { %v1228_v23 = vadd.f32 %v4858_v1, %v6250_v4  ;;  %v1357_v8 = vadd.f32 %v4890_v36, %v6250_v4  ;;  %v8448_v1 = vld [vmem:[#allocation32_spill] sm:$0xff]  ;;  %v8450_v36 = vld [vmem:[#allocation33_spill] sm:$0xff] }
 0x2ea   : > { %v1219_v50 = vpop.f32.mrf.mxu0  ;;  %v1348_v26 = vpop.f32.mrf.mxu1  ;;  %v6524_v63 = vadd.f32 %v8448_v1, %v8447_v58  ;;  %v6528_v52 = vadd.f32 %v8450_v36, %v8449_v7  ;;  %v6560_v58 = vadd.f32 %v6403_v21, %v6213_v41  ;;  %v6571_v7 = vadd.f32 %v6406_v3, %v6221_v45 }
 0x2eb   : > { %v1284_v47 = vmax.f32 %v1228_v23, 0.0  ;;  %v1413_v24 = vmax.f32 %v1357_v8, 0.0  ;;  %v1220_v39 = vadd.f32 %v6250_v4, %v1219_v50  ;;  %v1349_v28 = vadd.f32 %v6250_v4, %v1348_v26 }
 0x2ec   : > { %v4859_v62 = vpop.f32.mrf.mxu0  ;;  %v4891_v13 = vpop.f32.mrf.mxu1  ;;  %v6540_v50 = vadd.f32 %v6396_v49, %v6209_v37 }
 0x2ed   : > { %v1300_v9 = vadd.f32 %v1284_v47, %v1139_v29  ;;  %v1429_v60 = vadd.f32 %v1413_v24, %v1155_v15  ;;  %v1282_v10 = vmax.f32 %v1220_v39, 0.0  ;;  %v1411_v11 = vmax.f32 %v1349_v28, 0.0 }
 0x2ee   : > { %v1231_v20 = vadd.f32 %v4859_v62, %v6250_v4  ;;  %v1360_v56 = vadd.f32 %v4891_v13, %v6250_v4  ;;  %v1222_v23 = vpop.f32.mrf.mxu0  ;;  %v1351_v8 = vpop.f32.mrf.mxu1 }
 0x2ef   : > { %v1298_v35 = vadd.f32 %v1282_v10, %v1137_v30  ;;  %v1427_v40 = vadd.f32 %v1411_v11, %v1153_v27  ;;  %v1223_v5 = vadd.f32 %v6250_v4, %v1222_v23  ;;  %v1352_v26 = vadd.f32 %v6250_v4, %v1351_v8 }
 0x2f0   : > { %v1285_v17 = vmax.f32 %v1231_v20, 0.0  ;;  %v1414_v47 = vmax.f32 %v1360_v56, 0.0  ;;  %v6548_v24 = vadd.f32 %v1300_v9, %v1139_v29  ;;  %v6550_v39 = vadd.f32 %v1429_v60, %v1155_v15 }
 0x2f1   : > { %v1283_v28 = vmax.f32 %v1223_v5, 0.0  ;;  %v1412_v62 = vmax.f32 %v1352_v26, 0.0  ;;  %v6552_v37 = vadd.f32 %v1298_v35, %v1137_v30  ;;  %v6554_v49 = vadd.f32 %v1427_v40, %v1153_v27 }
 0x2f2   : > { %v1301_v59 = vadd.f32 %v1285_v17, %v6448_v55  ;;  %v1430_v38 = vadd.f32 %v1414_v47, %v6452_v51  ;;  %v4862_v13 = vpop.f32.mrf.mxu0  ;;  %v6564_v29 = vadd.f32 %v6414_v33, %v6215_v42  ;;  %v4894_v1 = vpop.f32.mrf.mxu1 }
 0x2f3   : > { %v1299_v15 = vadd.f32 %v1283_v28, %v6456_v57  ;;  %v1428_v30 = vadd.f32 %v1412_v62, %v6460_v32  ;;  %v1244_v27 = vadd.f32 %v4862_v13, %v6250_v4  ;;  %v1373_v41 = vadd.f32 %v4894_v1, %v6250_v4  ;;  %v6602_v13 = vld [vmem:[#allocation7 + $0x38] sm:$0xff]   ;;  %v6612_v1 = vld [vmem:[#allocation7 + $0x30] sm:$0xff]  }
 0x2f4   : > { %v1476_v36 = vpack.c.bf16 %v1301_v59, %v1300_v9  ;;  %v1484_v10 = vpack.c.bf16 %v1430_v38, %v1429_v60  ;;  %v1235_v21 = vpop.f32.mrf.mxu0  ;;  %v6575_v11 = vadd.f32 %v1301_v59, %v6448_v55  ;;  %v1364_v20 = vpop.f32.mrf.mxu1  ;;  %v6580_v45 = vadd.f32 %v1430_v38, %v6452_v51  ;;  %8451 = vst [vmem:[#allocation15_spill] sm:$0xff] %v6612_v1 }
 0x2f5   : > { %v1288_v42 = vmax.f32 %v1244_v27, 0.0  ;;  %v1236_v33 = vadd.f32 %v6250_v4, %v1235_v21  ;;  %v1475_v56 = vpack.c.bf16 %v1299_v15, %v1298_v35  ;;  %v1483_v23 = vpack.c.bf16 %v1428_v30, %v1427_v40 }
 0x2f6   : > { %v1417_v8 = vmax.f32 %v1373_v41, 0.0  ;;  %v1365_v5 = vadd.f32 %v6250_v4, %v1364_v20  ;;  %v4863_v26 = vpop.f32.mrf.mxu0  ;;  %v6583_v3 = vadd.f32 %v1299_v15, %v6456_v57  ;;  %v4895_v17 = vpop.f32.mrf.mxu1  ;;  %v6590_v35 = vadd.f32 %v1428_v30, %v6460_v32 }
 0x2f7   : > { %v6586_v9 = vadd.f32 %v1288_v42, %v6464_v53  ;;  %v1286_v55 = vmax.f32 %v1236_v33, 0.0  ;;  %v1247_v60 = vadd.f32 %v4863_v26, %v6250_v4  ;;  %4920 = vmatprep.mubr.bf16.mxu0 %v1475_v56  ;;  %4952 = vmatprep.mubr.bf16.mxu1 %v1483_v23  ;;  %v1376_v47 = vadd.f32 %v4895_v17, %v6250_v4 }
 0x2f8   : > { %v6593_v40 = vadd.f32 %v1417_v8, %v6468_v54  ;;  %v1415_v51 = vmax.f32 %v1365_v5, 0.0  ;;  %v1238_v57 = vpop.f32.mrf.mxu0  ;;  %4921 = vmatmul.mubr.bf16.vlgmr.msra.gmra.mxu0 %v1476_v36  ;;  %4953 = vmatmul.mubr.bf16.vlgmr.msra.gmra.mxu1 %v1484_v10  ;;  %v6598_v28 = vadd.f32 %v6409_v16, %v6223_v48  ;;  %v1367_v32 = vpop.f32.mrf.mxu1 }
 0x2f9   : > { %v1302_v62 = vadd.f32 %v1286_v55, %v6472_v6  ;;  %v1289_v59 = vmax.f32 %v1247_v60, 0.0  ;;  %v1239_v38 = vadd.f32 %v6250_v4, %v1238_v57  ;;  %4969 = vmatpush3.bf16.msra.mxu0 %v6602_v13  ;;  %5001 = vmatpush3.bf16.msra.mxu1 %v6602_v13  ;;  %v6608_v15 = vadd.f32 %v6586_v9, %v6464_v53  ;;  %v6638_v57 = vld [vmem:[#allocation7 + $0x28] sm:$0xff]  }
 0x2fa   : > { %v1431_v30 = vadd.f32 %v1415_v51, %v6476_v18  ;;  %v1418_v48 = vmax.f32 %v1376_v47, 0.0  ;;  %v1368_v16 = vadd.f32 %v6250_v4, %v1367_v32  ;;  %v4866_v27 = vpop.f32.mrf.mxu0  ;;  %4970 = vmatprep.subr.bf16.mxu0 %v6612_v1  ;;  %5002 = vmatprep.subr.bf16.mxu1 %v6612_v1  ;;  %v6618_v36 = vadd.f32 %v6593_v40, %v6468_v54 }
 0x2fb   : > { %v1305_v10 = vadd.f32 %v1289_v59, %v6480_v19  ;;  %v1287_v53 = vmax.f32 %v1239_v38, 0.0  ;;  %v1260_v41 = vadd.f32 %v4866_v27, %v6250_v4  ;;  %v4898_v21 = vpop.f32.mrf.mxu1  ;;  %v6623_v42 = vadd.f32 %v1302_v62, %v6472_v6  ;;  %8452 = vst [vmem:[#allocation25_spill] sm:$0xff] %v6638_v57 }
 0x2fc   : > { %v1434_v33 = vadd.f32 %v1418_v48, %v6484_v2  ;;  %v1416_v20 = vmax.f32 %v1368_v16, 0.0  ;;  %v1389_v56 = vadd.f32 %v4898_v21, %v6250_v4  ;;  %v1251_v23 = vpop.f32.mrf.mxu0  ;;  %v6628_v8 = vadd.f32 %v1431_v30, %v6476_v18 }
 0x2fd   : > { %v1303_v54 = vadd.f32 %v1287_v53, %v6488_v22  ;;  %v1292_v5 = vmax.f32 %v1260_v41, 0.0  ;;  %v1252_v26 = vadd.f32 %v6250_v4, %v1251_v23  ;;  %v1380_v55 = vpop.f32.mrf.mxu1  ;;  %v1478_v60 = vpack.c.bf16 %v1305_v10, %v6586_v9  ;;  %4971 = vmatpush3.bf16.msra.mxu0 %v6612_v1  ;;  %5003 = vmatpush3.bf16.msra.mxu1 %v6612_v1 }
 0x2fe   : > { %v1432_v6 = vadd.f32 %v1416_v20, %v6492_v0  ;;  %v1421_v17 = vmax.f32 %v1389_v56, 0.0  ;;  %v1381_v51 = vadd.f32 %v6250_v4, %v1380_v55  ;;  %v4867_v47 = vpop.f32.mrf.mxu0  ;;  %v1486_v18 = vpack.c.bf16 %v1434_v33, %v6593_v40  ;;  %4972 = vmatprep.subr.bf16.mxu0 %v6638_v57  ;;  %5004 = vmatprep.subr.bf16.mxu1 %v6638_v57 }
 0x2ff   : > { %v6643_v9 = vadd.f32 %v1292_v5, %v6498_v14  ;;  %v1290_v59 = vmax.f32 %v1252_v26, 0.0  ;;  %v1263_v38 = vadd.f32 %v4867_v47, %v6250_v4  ;;  %v4899_v32 = vpop.f32.mrf.mxu1  ;;  %v1477_v48 = vpack.c.bf16 %v1303_v54, %v1302_v62 }
 0x300   : > { %v6647_v16 = vadd.f32 %v1421_v17, %v6502_v61  ;;  %v1419_v27 = vmax.f32 %v1381_v51, 0.0  ;;  %v1392_v40 = vadd.f32 %v4899_v32, %v6250_v4  ;;  %v1254_v53 = vpop.f32.mrf.mxu0  ;;  %v1485_v41 = vpack.c.bf16 %v1432_v6, %v1431_v30 }
 0x301   : > { %v6651_v21 = vadd.f32 %v1290_v59, %v6506_v31  ;;  %v1293_v20 = vmax.f32 %v1263_v38, 0.0  ;;  %v1255_v56 = vadd.f32 %v6250_v4, %v1254_v53  ;;  %v1383_v23 = vpop.f32.mrf.mxu1  ;;  %4924 = vmatprep.mubr.bf16.mxu0 %v1477_v48  ;;  %4973 = vmatpush3.bf16.msra.mxu0 %v6638_v57  ;;  %v6656_v62 = vadd.f32 %v1305_v10, %v6480_v19  ;;  %v6669_v10 = vld [vmem:[#allocation7 + $0x20] sm:$0xff]  }
 0x302   : > { %v6659_v5 = vadd.f32 %v1419_v27, %v6510_v25  ;;  %v1422_v26 = vmax.f32 %v1392_v40, 0.0  ;;  %v1384_v55 = vadd.f32 %v6250_v4, %v1383_v23  ;;  %4956 = vmatprep.mubr.bf16.mxu1 %v1485_v41  ;;  %v4870_v30 = vpop.f32.mrf.mxu0  ;;  %4925 = vmatmul.mubr.bf16.gmra.mxu0 %v1478_v60  ;;  %v6663_v17 = vadd.f32 %v1434_v33, %v6484_v2 }
 0x303   : > { %v6666_v51 = vadd.f32 %v1293_v20, %v6514_v12  ;;  %v1291_v47 = vmax.f32 %v1255_v56, 0.0  ;;  %v1276_v59 = vadd.f32 %v4870_v30, %v6250_v4  ;;  %v4902_v19 = vpop.f32.mrf.mxu1  ;;  %4957 = vmatmul.mubr.bf16.gmra.mxu1 %v1486_v18  ;;  %4974 = vmatprep.subr.bf16.mxu0 %v6669_v10  ;;  %v6673_v38 = vadd.f32 %v1303_v54, %v6488_v22  ;;  %v6690_v56 = vld [vmem:[#allocation7 + $0x18] sm:$0xff]  }
 0x304   : > { %v1438_v60 = vadd.f32 %v1422_v26, %v6518_v46  ;;  %v1420_v32 = vmax.f32 %v1384_v55, 0.0  ;;  %v1405_v2 = vadd.f32 %v4902_v19, %v6250_v4  ;;  %v1267_v33 = vpop.f32.mrf.mxu0  ;;  %5005 = vmatpush3.bf16.msra.mxu1 %v6638_v57  ;;  %v6679_v48 = vadd.f32 %v1432_v6, %v6492_v0 }
 0x305   : > { %v1307_v18 = vadd.f32 %v1291_v47, %v6524_v63  ;;  %v1296_v27 = vmax.f32 %v1276_v59, 0.0  ;;  %v1268_v40 = vadd.f32 %v6250_v4, %v1267_v33  ;;  %v1396_v53 = vpop.f32.mrf.mxu1  ;;  %v1480_v22 = vpack.c.bf16 %v6666_v51, %v6643_v9  ;;  %5006 = vmatprep.subr.bf16.mxu1 %v6669_v10  ;;  %4975 = vmatpush3.bf16.msra.mxu0 %v6669_v10 }
 0x306   : > { %v1436_v54 = vadd.f32 %v1420_v32, %v6528_v52  ;;  %v1425_v41 = vmax.f32 %v1405_v2, 0.0  ;;  %v1397_v20 = vadd.f32 %v6250_v4, %v1396_v53  ;;  %v4871_v0 = vpop.f32.mrf.mxu0  ;;  %v1488_v6 = vpack.c.bf16 %v1438_v60, %v6647_v16  ;;  %4976 = vmatprep.subr.bf16.mxu0 %v6690_v56 }
 0x307   : > { %v1312_v23 = vadd.f32 %v1296_v27, %v6531_v44  ;;  %v1294_v26 = vmax.f32 %v1268_v40, 0.0  ;;  %v1279_v55 = vadd.f32 %v4871_v0, %v6250_v4  ;;  %v4903_v30 = vpop.f32.mrf.mxu1  ;;  %v1479_v47 = vpack.c.bf16 %v1307_v18, %v6651_v21 }
 0x308   : > { %v1441_v59 = vadd.f32 %v1425_v41, %v6534_v43  ;;  %v1423_v19 = vmax.f32 %v1397_v20, 0.0  ;;  %v1408_v32 = vadd.f32 %v4903_v30, %v6250_v4  ;;  %v1270_v2 = vpop.f32.mrf.mxu0  ;;  %v1487_v33 = vpack.c.bf16 %v1436_v54, %v6659_v5  ;;  %5007 = vmatpush3.bf16.msra.mxu1 %v6669_v10 }
 0x309   : > { %v1310_v53 = vadd.f32 %v1294_v26, %v6540_v50  ;;  %v1297_v57 = vmax.f32 %v1279_v55, 0.0  ;;  %v1271_v27 = vadd.f32 %v6250_v4, %v1270_v2  ;;  %v1399_v40 = vpop.f32.mrf.mxu1  ;;  %4928 = vmatprep.mubr.bf16.mxu0 %v1479_v47  ;;  %5008 = vmatprep.subr.bf16.mxu1 %v6690_v56  ;;  %v6705_v41 = vadd.f32 %v6643_v9, %v6498_v14 }
 0x30a   : > { %v1439_v20 = vadd.f32 %v1423_v19, %v6544_v34  ;;  %v1426_v0 = vmax.f32 %v1408_v32, 0.0  ;;  %v1400_v30 = vadd.f32 %v6250_v4, %v1399_v40  ;;  %4960 = vmatprep.mubr.bf16.mxu1 %v1487_v33  ;;  %4929 = vmatmul.mubr.bf16.gmra.mxu0 %v1480_v22  ;;  %v6711_v26 = vadd.f32 %v6647_v16, %v6502_v61  ;;  %v6725_v61 = vld [vmem:[#allocation7 + $0x10] sm:$0xff]  }
 0x30b   : > { %v1313_v55 = vadd.f32 %v1297_v57, %v6560_v58  ;;  %v1295_v47 = vmax.f32 %v1271_v27, 0.0  ;;  %4961 = vmatmul.mubr.bf16.gmra.mxu1 %v1488_v6  ;;  %4977 = vmatpush3.bf16.msra.mxu0 %v6690_v56  ;;  %v6717_v14 = vadd.f32 %v6651_v21, %v6506_v31  ;;  %v6721_v9 = vadd.f32 %v6659_v5, %v6510_v25 }
 0x30c   : > { %v1442_v22 = vadd.f32 %v1426_v0, %v6564_v29  ;;  %v1424_v19 = vmax.f32 %v1400_v30, 0.0  ;;  %5009 = vmatpush3.bf16.msra.mxu1 %v6690_v56  ;;  %4978 = vmatprep.subr.bf16.mxu0 %v6725_v61  ;;  %v6730_v57 = vadd.f32 %v6666_v51, %v6514_v12  ;;  %v6733_v31 = vadd.f32 %v1438_v60, %v6518_v46 }
 0x30d   : > { %v1311_v16 = vadd.f32 %v1295_v47, %v6571_v7  ;;  %v1482_v25 = vpack.c.bf16 %v1313_v55, %v1312_v23  ;;  %5010 = vmatprep.subr.bf16.mxu1 %v6725_v61  ;;  %v6738_v21 = vadd.f32 %v1307_v18, %v6524_v63  ;;  %v6741_v5 = vadd.f32 %v1436_v54, %v6528_v52 }
 0x30e   : > { %v1440_v6 = vadd.f32 %v1424_v19, %v6598_v28  ;;  %v1490_v32 = vpack.c.bf16 %v1442_v22, %v1441_v59  ;;  %v6745_v12 = vadd.f32 %v1312_v23, %v6531_v44  ;;  %v6748_v46 = vadd.f32 %v1441_v59, %v6534_v43  ;;  %v6761_v44 = vld [vmem:[#allocation7 + $0x8] sm:$0xff]  }
 0x30f   : > { %v1481_v51 = vpack.c.bf16 %v1311_v16, %v1310_v53  ;;  %4979 = vmatpush3.bf16.msra.mxu0 %v6725_v61  ;;  %v6752_v60 = vadd.f32 %v1310_v53, %v6540_v50  ;;  %v6755_v63 = vadd.f32 %v1439_v20, %v6544_v34  ;;  %v6758_v52 = vadd.f32 %v1313_v55, %v6560_v58  ;;  %v6776_v34 = vld [vmem:[#allocation7] sm:$0xff]  }
 0x310   : > { %v1489_v18 = vpack.c.bf16 %v1440_v6, %v1439_v20  ;;  %5011 = vmatpush3.bf16.msra.mxu1 %v6725_v61  ;;  %4980 = vmatprep.subr.bf16.mxu0 %v6761_v44  ;;  %v6765_v43 = vadd.f32 %v1442_v22, %v6564_v29  ;;  %v6768_v54 = vadd.f32 %v1311_v16, %v6571_v7 }
 0x311   : > { %4932 = vmatprep.mubr.bf16.mxu0 %v1481_v51  ;;  %5012 = vmatprep.subr.bf16.mxu1 %v6761_v44  ;;  %v6772_v50 = vadd.f32 %v1440_v6, %v6598_v28 }
 0x312   : > { %4964 = vmatprep.mubr.bf16.mxu1 %v1489_v18  ;;  %4933 = vmatmul.mubr.bf16.gmra.mxu0 %v1482_v25 }
 0x313   : > { %4965 = vmatmul.mubr.bf16.gmra.mxu1 %v1490_v32  ;;  %4981 = vmatpush3.bf16.msra.mxu0 %v6761_v44 }
 0x314   : > { %5013 = vmatpush3.bf16.msra.mxu1 %v6761_v44  ;;  %4982 = vmatprep.subr.bf16.mxu0 %v6776_v34 }
 0x315   : > { %5014 = vmatprep.subr.bf16.mxu1 %v6776_v34 }
 0x317   : > { %4983 = vmatpush3.bf16.msra.mxu0 %v6776_v34 }
 0x318   : > { %5015 = vmatpush3.bf16.msra.mxu1 %v6776_v34  ;;  %5032 = vmatprep.subr.bf16.mxu0 %v6602_v13 }
 0x319   : > { %5064 = vmatprep.subr.bf16.mxu1 %v6602_v13 }
 0x3b8   : > { %v4922_v58 = vpop.f32.mrf.mxu0  ;;  %v4954_v29 = vpop.f32.mrf.mxu1 }
 0x3b9   : > { %v1534_v7 = vadd.f32 %v4922_v58, %v6250_v4  ;;  %v1663_v28 = vadd.f32 %v4954_v29, %v6250_v4 }
 0x3ba   : > { %v1525_v23 = vpop.f32.mrf.mxu0  ;;  %v1654_v59 = vpop.f32.mrf.mxu1 }
 0x3bb   : > { %v1590_v2 = vmax.f32 %v1534_v7, 0.0  ;;  %v1719_v33 = vmax.f32 %v1663_v28, 0.0  ;;  %v1526_v53 = vadd.f32 %v6250_v4, %v1525_v23  ;;  %v1655_v27 = vadd.f32 %v6250_v4, %v1654_v59 }
 0x3bc   : > { %v4923_v40 = vpop.f32.mrf.mxu0  ;;  %v4955_v20 = vpop.f32.mrf.mxu1 }
 0x3bd   : > { %v1606_v0 = vadd.f32 %v1590_v2, %v6548_v24  ;;  %v1735_v30 = vadd.f32 %v1719_v33, %v6550_v39  ;;  %v1588_v55 = vmax.f32 %v1526_v53, 0.0  ;;  %v1717_v47 = vmax.f32 %v1655_v27, 0.0 }
 0x3be   : > { %v1537_v22 = vadd.f32 %v4923_v40, %v6250_v4  ;;  %v1666_v19 = vadd.f32 %v4955_v20, %v6250_v4  ;;  %v1528_v16 = vpop.f32.mrf.mxu0  ;;  %v1657_v25 = vpop.f32.mrf.mxu1 }
 0x3bf   : > { %v1604_v6 = vadd.f32 %v1588_v55, %v6552_v37  ;;  %v1733_v32 = vadd.f32 %v1717_v47, %v6554_v49  ;;  %v1529_v51 = vadd.f32 %v6250_v4, %v1528_v16  ;;  %v1658_v18 = vadd.f32 %v6250_v4, %v1657_v25 }
 0x3c0   : > { %v1591_v58 = vmax.f32 %v1537_v22, 0.0  ;;  %v1720_v29 = vmax.f32 %v1666_v19, 0.0  ;;  %v6797_v7 = vadd.f32 %v1606_v0, %v6548_v24  ;;  %v6800_v28 = vadd.f32 %v1735_v30, %v6550_v39 }
 0x3c1   : > { %v1589_v23 = vmax.f32 %v1529_v51, 0.0  ;;  %v1718_v59 = vmax.f32 %v1658_v18, 0.0  ;;  %v6803_v2 = vadd.f32 %v1604_v6, %v6552_v37  ;;  %v6806_v33 = vadd.f32 %v1733_v32, %v6554_v49 }
 0x3c2   : > { %v1607_v53 = vadd.f32 %v1591_v58, %v6575_v11  ;;  %v1736_v27 = vadd.f32 %v1720_v29, %v6580_v45  ;;  %v4926_v40 = vpop.f32.mrf.mxu0 }
 0x3c3   : > { %v1605_v20 = vadd.f32 %v1589_v23, %v6583_v3  ;;  %v1734_v24 = vadd.f32 %v1718_v59, %v6590_v35  ;;  %v1550_v39 = vadd.f32 %v4926_v40, %v6250_v4  ;;  %v4958_v55 = vpop.f32.mrf.mxu1 }
 0x3c4   : > { %v1782_v47 = vpack.c.bf16 %v1607_v53, %v1606_v0  ;;  %v1790_v22 = vpack.c.bf16 %v1736_v27, %v1735_v30  ;;  %v1679_v37 = vadd.f32 %v4958_v55, %v6250_v4  ;;  %v1541_v19 = vpop.f32.mrf.mxu0  ;;  %v6815_v49 = vadd.f32 %v1607_v53, %v6575_v11 }
 0x3c5   : > { %v1594_v16 = vmax.f32 %v1550_v39, 0.0  ;;  %v1542_v25 = vadd.f32 %v6250_v4, %v1541_v19  ;;  %v1670_v51 = vpop.f32.mrf.mxu1  ;;  %v1781_v18 = vpack.c.bf16 %v1605_v20, %v1604_v6  ;;  %v1789_v58 = vpack.c.bf16 %v1734_v24, %v1733_v32 }
 0x3c6   : > { %v1723_v29 = vmax.f32 %v1679_v37, 0.0  ;;  %v1671_v23 = vadd.f32 %v6250_v4, %v1670_v51  ;;  %v4927_v59 = vpop.f32.mrf.mxu0  ;;  %v6820_v40 = vadd.f32 %v1736_v27, %v6580_v45  ;;  %v6823_v0 = vadd.f32 %v1605_v20, %v6583_v3  ;;  %v6840_v37 = vld [vmem:[%s8357_s4] ss:$0 sm:$0xff] }
 0x3c7   : > { %v6826_v30 = vadd.f32 %v1594_v16, %v6608_v15  ;;  %v1592_v11 = vmax.f32 %v1542_v25, 0.0  ;;  %v1553_v53 = vadd.f32 %v4927_v59, %v6250_v4  ;;  %v4959_v39 = vpop.f32.mrf.mxu1  ;;  %4984 = vmatprep.mubr.bf16.mxu0 %v1781_v18  ;;  %5016 = vmatprep.mubr.bf16.mxu1 %v1789_v58  ;;  %v6830_v6 = vadd.f32 %v1734_v24, %v6590_v35 }
 0x3c8   : > { %v6833_v32 = vadd.f32 %v1723_v29, %v6618_v36  ;;  %v1721_v45 = vmax.f32 %v1671_v23, 0.0  ;;  %v1682_v27 = vadd.f32 %v4959_v39, %v6250_v4  ;;  %v1544_v3 = vpop.f32.mrf.mxu0  ;;  %4985 = vmatmul.mubr.bf16.vlgmr.msra.gmra.mxu0 %v1782_v47  ;;  %5017 = vmatmul.mubr.bf16.vlgmr.msra.gmra.mxu1 %v1790_v22 }
 0x3c9   : > { %v1608_v20 = vadd.f32 %v1592_v11, %v6623_v42  ;;  %v1595_v55 = vmax.f32 %v1553_v53, 0.0  ;;  %v1545_v35 = vadd.f32 %v6840_v37, %v1544_v3  ;;  %v1673_v24 = vpop.f32.mrf.mxu1  ;;  %5033 = vmatpush3.bf16.msra.mxu0 %v6602_v13  ;;  %5065 = vmatpush3.bf16.msra.mxu1 %v6602_v13  ;;  %v6847_v4 = vadd.f32 %v6826_v30, %v6608_v15 }
 0x3ca   : > { %v1737_v47 = vadd.f32 %v1721_v45, %v6628_v8  ;;  %v1724_v22 = vmax.f32 %v1682_v27, 0.0  ;;  %v1674_v19 = vadd.f32 %v6840_v37, %v1673_v24  ;;  %v4930_v16 = vpop.f32.mrf.mxu0  ;;  %5034 = vmatprep.subr.bf16.mxu0 %v6612_v1  ;;  %5066 = vmatprep.subr.bf16.mxu1 %v6612_v1  ;;  %v6855_v25 = vadd.f32 %v6833_v32, %v6618_v36 }
 0x3cb   : > { %v1611_v51 = vadd.f32 %v1595_v55, %v6656_v62  ;;  %v1593_v18 = vmax.f32 %v1545_v35, 0.0  ;;  %v1566_v15 = vadd.f32 %v6840_v37, %v4930_v16  ;;  %v4962_v58 = vpop.f32.mrf.mxu1  ;;  %v6860_v29 = vadd.f32 %v1608_v20, %v6623_v42 }
 0x3cc   : > { %v1740_v23 = vadd.f32 %v1724_v22, %v6663_v17  ;;  %v1722_v59 = vmax.f32 %v1674_v19, 0.0  ;;  %v1695_v11 = vadd.f32 %v6840_v37, %v4962_v58  ;;  %v1557_v53 = vpop.f32.mrf.mxu0  ;;  %v6865_v39 = vadd.f32 %v1737_v47, %v6628_v8  ;;  %v8455_v19 = vld [vmem:[#allocation25_spill] sm:$0xff] }
 0x3cd   : > { %8453 = vst [vmem:[#allocation16_spill] sm:$0xff] %v6860_v29  ;;  %v1609_v36 = vadd.f32 %v1593_v18, %v6673_v38  ;;  %v1598_v45 = vmax.f32 %v1566_v15, 0.0  ;;  %v1558_v27 = vadd.f32 %v6840_v37, %v1557_v53  ;;  %v1686_v3 = vpop.f32.mrf.mxu1  ;;  %v1784_v55 = vpack.c.bf16 %v1611_v51, %v6826_v30  ;;  %5035 = vmatpush3.bf16.msra.mxu0 %v6612_v1 }
 0x3ce   : > { %8454 = vst [vmem:[#allocation26_spill] sm:$0xff] %v6865_v39  ;;  %5067 = vmatpush3.bf16.msra.mxu1 %v6612_v1  ;;  %v1738_v42 = vadd.f32 %v1722_v59, %v6679_v48  ;;  %v1727_v35 = vmax.f32 %v1695_v11, 0.0  ;;  %v1687_v24 = vadd.f32 %v6840_v37, %v1686_v3  ;;  %v4931_v22 = vpop.f32.mrf.mxu0  ;;  %v1792_v8 = vpack.c.bf16 %v1740_v23, %v6833_v32 }
 0x3cf   : > { %5036 = vmatprep.subr.bf16.mxu0 %v8455_v19  ;;  %5068 = vmatprep.subr.bf16.mxu1 %v8455_v19  ;;  %v6878_v16 = vadd.f32 %v1598_v45, %v6705_v41  ;;  %v1596_v30 = vmax.f32 %v1558_v27, 0.0  ;;  %v1569_v18 = vadd.f32 %v6840_v37, %v4931_v22  ;;  %v4963_v15 = vpop.f32.mrf.mxu1  ;;  %v1783_v58 = vpack.c.bf16 %v1609_v36, %v1608_v20 }
 0x3d0   : > { %v6882_v59 = vadd.f32 %v1727_v35, %v6711_v26  ;;  %v1725_v11 = vmax.f32 %v1687_v24, 0.0  ;;  %v1698_v53 = vadd.f32 %v6840_v37, %v4963_v15  ;;  %v1560_v3 = vpop.f32.mrf.mxu0  ;;  %v1791_v32 = vpack.c.bf16 %v1738_v42, %v1737_v47 }
 0x3d1   : > { %v6886_v1 = vadd.f32 %v1596_v30, %v6717_v14  ;;  %v1599_v39 = vmax.f32 %v1569_v18, 0.0  ;;  %v1561_v45 = vadd.f32 %v6840_v37, %v1560_v3  ;;  %v1689_v29 = vpop.f32.mrf.mxu1  ;;  %4988 = vmatprep.mubr.bf16.mxu0 %v1783_v58  ;;  %5037 = vmatpush3.bf16.msra.mxu0 %v8455_v19  ;;  %v6891_v20 = vadd.f32 %v1611_v51, %v6656_v62 }
 0x3d2   : > { %v1741_v27 = vadd.f32 %v1725_v11, %v6721_v9  ;;  %v1728_v35 = vmax.f32 %v1698_v53, 0.0  ;;  %v1690_v24 = vadd.f32 %v6840_v37, %v1689_v29  ;;  %5020 = vmatprep.mubr.bf16.mxu1 %v1791_v32  ;;  %v4934_v47 = vpop.f32.mrf.mxu0  ;;  %4989 = vmatmul.mubr.bf16.gmra.mxu0 %v1784_v55  ;;  %v6896_v22 = vadd.f32 %v1740_v23, %v6663_v17 }
 0x3d3   : > { %v1615_v30 = vadd.f32 %v1599_v39, %v6730_v57  ;;  %v1597_v18 = vmax.f32 %v1561_v45, 0.0  ;;  %v1582_v15 = vadd.f32 %v6840_v37, %v4934_v47  ;;  %v4966_v58 = vpop.f32.mrf.mxu1  ;;  %5021 = vmatmul.mubr.bf16.gmra.mxu1 %v1792_v8  ;;  %5038 = vmatprep.subr.bf16.mxu0 %v6669_v10  ;;  %v6902_v62 = vadd.f32 %v1609_v36, %v6673_v38 }
 0x3d4   : > { %v1744_v51 = vadd.f32 %v1728_v35, %v6733_v31  ;;  %v1726_v29 = vmax.f32 %v1690_v24, 0.0  ;;  %v1711_v55 = vadd.f32 %v6840_v37, %v4966_v58  ;;  %v1573_v11 = vpop.f32.mrf.mxu0  ;;  %5069 = vmatpush3.bf16.msra.mxu1 %v8455_v19  ;;  %v6908_v17 = vadd.f32 %v1738_v42, %v6679_v48 }
 0x3d5   : > { %v1613_v23 = vadd.f32 %v1597_v18, %v6738_v21  ;;  %v1602_v39 = vmax.f32 %v1582_v15, 0.0  ;;  %v1574_v8 = vadd.f32 %v6840_v37, %v1573_v11  ;;  %v1702_v53 = vpop.f32.mrf.mxu1  ;;  %v1786_v38 = vpack.c.bf16 %v1615_v30, %v6878_v16  ;;  %5070 = vmatprep.subr.bf16.mxu1 %v6669_v10  ;;  %5039 = vmatpush3.bf16.msra.mxu0 %v6669_v10 }
 0x3d6   : > { %v1742_v36 = vadd.f32 %v1726_v29, %v6741_v5  ;;  %v1731_v3 = vmax.f32 %v1711_v55, 0.0  ;;  %v1703_v32 = vadd.f32 %v6840_v37, %v1702_v53  ;;  %v4935_v45 = vpop.f32.mrf.mxu0  ;;  %v1794_v48 = vpack.c.bf16 %v1744_v51, %v6882_v59  ;;  %5040 = vmatprep.subr.bf16.mxu0 %v6690_v56 }
 0x3d7   : > { %v1618_v42 = vadd.f32 %v1602_v39, %v6745_v12  ;;  %v1600_v35 = vmax.f32 %v1574_v8, 0.0  ;;  %v1585_v24 = vadd.f32 %v6840_v37, %v4935_v45  ;;  %v4967_v47 = vpop.f32.mrf.mxu1  ;;  %v1785_v18 = vpack.c.bf16 %v1613_v23, %v6886_v1 }
 0x3d8   : > { %v1747_v15 = vadd.f32 %v1731_v3, %v6748_v46  ;;  %v1729_v58 = vmax.f32 %v1703_v32, 0.0  ;;  %v1714_v29 = vadd.f32 %v6840_v37, %v4967_v47  ;;  %v1576_v55 = vpop.f32.mrf.mxu0  ;;  %v1793_v11 = vpack.c.bf16 %v1742_v36, %v1741_v27  ;;  %5071 = vmatpush3.bf16.msra.mxu1 %v6669_v10 }
 0x3d9   : > { %v1616_v53 = vadd.f32 %v1600_v35, %v6752_v60  ;;  %v1603_v19 = vmax.f32 %v1585_v24, 0.0  ;;  %v1577_v39 = vadd.f32 %v6840_v37, %v1576_v55  ;;  %v1705_v8 = vpop.f32.mrf.mxu1  ;;  %4992 = vmatprep.mubr.bf16.mxu0 %v1785_v18  ;;  %5072 = vmatprep.subr.bf16.mxu1 %v6690_v56  ;;  %v6930_v45 = vadd.f32 %v6878_v16, %v6705_v41 }
 0x3da   : > { %v1745_v3 = vadd.f32 %v1729_v58, %v6755_v63  ;;  %v1732_v32 = vmax.f32 %v1714_v29, 0.0  ;;  %v1706_v47 = vadd.f32 %v6840_v37, %v1705_v8  ;;  %5024 = vmatprep.mubr.bf16.mxu1 %v1793_v11  ;;  %4993 = vmatmul.mubr.bf16.gmra.mxu0 %v1786_v38  ;;  %v6936_v35 = vadd.f32 %v6882_v59, %v6711_v26 }
 0x3db   : > { %v1619_v24 = vadd.f32 %v1603_v19, %v6758_v52  ;;  %v1601_v18 = vmax.f32 %v1577_v39, 0.0  ;;  %5025 = vmatmul.mubr.bf16.gmra.mxu1 %v1794_v48  ;;  %5041 = vmatpush3.bf16.msra.mxu0 %v6690_v56  ;;  %v6942_v41 = vadd.f32 %v6886_v1, %v6717_v14  ;;  %v6945_v16 = vadd.f32 %v1741_v27, %v6721_v9 }
 0x3dc   : > { %v1748_v58 = vadd.f32 %v1732_v32, %v6765_v43  ;;  %v1730_v38 = vmax.f32 %v1706_v47, 0.0  ;;  %5073 = vmatpush3.bf16.msra.mxu1 %v6690_v56  ;;  %5042 = vmatprep.subr.bf16.mxu0 %v6725_v61  ;;  %v6951_v26 = vadd.f32 %v1615_v30, %v6730_v57  ;;  %v6954_v19 = vadd.f32 %v1744_v51, %v6733_v31 }
 0x3dd   : > { %v1617_v59 = vadd.f32 %v1601_v18, %v6768_v54  ;;  %v1788_v1 = vpack.c.bf16 %v1619_v24, %v1618_v42  ;;  %5074 = vmatprep.subr.bf16.mxu1 %v6725_v61  ;;  %v6959_v14 = vadd.f32 %v1613_v23, %v6738_v21  ;;  %v6962_v9 = vadd.f32 %v1742_v36, %v6741_v5 }
 0x3de   : > { %v1746_v27 = vadd.f32 %v1730_v38, %v6772_v50  ;;  %v1796_v48 = vpack.c.bf16 %v1748_v58, %v1747_v15  ;;  %v6966_v57 = vadd.f32 %v1618_v42, %v6745_v12  ;;  %v6969_v31 = vadd.f32 %v1747_v15, %v6748_v46 }
 0x3df   : > { %v1787_v30 = vpack.c.bf16 %v1617_v59, %v1616_v53  ;;  %5043 = vmatpush3.bf16.msra.mxu0 %v6725_v61  ;;  %v6973_v51 = vadd.f32 %v1616_v53, %v6752_v60  ;;  %v6976_v21 = vadd.f32 %v1745_v3, %v6755_v63  ;;  %v6979_v5 = vadd.f32 %v1619_v24, %v6758_v52 }
 0x3e0   : > { %v1795_v23 = vpack.c.bf16 %v1746_v27, %v1745_v3  ;;  %5075 = vmatpush3.bf16.msra.mxu1 %v6725_v61  ;;  %5044 = vmatprep.subr.bf16.mxu0 %v6761_v44  ;;  %v6984_v12 = vadd.f32 %v1748_v58, %v6765_v43  ;;  %v6987_v46 = vadd.f32 %v1617_v59, %v6768_v54 }
 0x3e1   : > { %4996 = vmatprep.mubr.bf16.mxu0 %v1787_v30  ;;  %5076 = vmatprep.subr.bf16.mxu1 %v6761_v44  ;;  %v6991_v60 = vadd.f32 %v1746_v27, %v6772_v50 }
 0x3e2   : > { %5028 = vmatprep.mubr.bf16.mxu1 %v1795_v23  ;;  %4997 = vmatmul.mubr.bf16.gmra.mxu0 %v1788_v1 }
 0x3e3   : > { %5029 = vmatmul.mubr.bf16.gmra.mxu1 %v1796_v48  ;;  %5045 = vmatpush3.bf16.msra.mxu0 %v6761_v44 }
 0x3e4   : > { %5077 = vmatpush3.bf16.msra.mxu1 %v6761_v44  ;;  %5046 = vmatprep.subr.bf16.mxu0 %v6776_v34 }
 0x3e5   : > { %5078 = vmatprep.subr.bf16.mxu1 %v6776_v34 }
 0x3e7   : > { %5047 = vmatpush3.bf16.msra.mxu0 %v6776_v34 }
 0x3e8   : > { %5079 = vmatpush3.bf16.msra.mxu1 %v6776_v34  ;;  %5096 = vmatprep.subr.bf16.mxu0 %v6602_v13 }
 0x3e9   : > { %5128 = vmatprep.subr.bf16.mxu1 %v6602_v13 }
 0x488   : > { %v4986_v63 = vpop.f32.mrf.mxu0  ;;  %v5018_v52 = vpop.f32.mrf.mxu1 }
 0x489   : > { %v1840_v43 = vadd.f32 %v6840_v37, %v4986_v63  ;;  %v1969_v54 = vadd.f32 %v6840_v37, %v5018_v52 }
 0x48a   : > { %v1831_v50 = vpop.f32.mrf.mxu0  ;;  %v1960_v36 = vpop.f32.mrf.mxu1 }
 0x48b   : > { %v1896_v42 = vmax.f32 %v1840_v43, 0.0  ;;  %v2025_v15 = vmax.f32 %v1969_v54, 0.0  ;;  %v1832_v29 = vadd.f32 %v6840_v37, %v1831_v50  ;;  %v1961_v55 = vadd.f32 %v6840_v37, %v1960_v36 }
 0x48c   : > { %v4987_v11 = vpop.f32.mrf.mxu0  ;;  %v5019_v53 = vpop.f32.mrf.mxu1 }
 0x48d   : > { %v1912_v39 = vadd.f32 %v1896_v42, %v6797_v7  ;;  %v2041_v8 = vadd.f32 %v2025_v15, %v6800_v28  ;;  %v1894_v3 = vmax.f32 %v1832_v29, 0.0  ;;  %v2023_v32 = vmax.f32 %v1961_v55, 0.0 }
 0x48e   : > { %v1843_v47 = vadd.f32 %v6840_v37, %v4987_v11  ;;  %v1972_v24 = vadd.f32 %v6840_v37, %v5019_v53  ;;  %v1834_v18 = vpop.f32.mrf.mxu0  ;;  %v1963_v58 = vpop.f32.mrf.mxu1 }
 0x48f   : > { %v1910_v38 = vadd.f32 %v1894_v3, %v6803_v2  ;;  %v2039_v59 = vadd.f32 %v2023_v32, %v6806_v33  ;;  %v1835_v1 = vadd.f32 %v6840_v37, %v1834_v18  ;;  %v1964_v27 = vadd.f32 %v6840_v37, %v1963_v58 }
 0x490   : > { %v1897_v48 = vmax.f32 %v1843_v47, 0.0  ;;  %v2026_v30 = vmax.f32 %v1972_v24, 0.0  ;;  %v7014_v23 = vadd.f32 %v1912_v39, %v6797_v7  ;;  %v7017_v63 = vadd.f32 %v2041_v8, %v6800_v28 }
 0x491   : > { %v1895_v52 = vmax.f32 %v1835_v1, 0.0  ;;  %v2024_v43 = vmax.f32 %v1964_v27, 0.0  ;;  %v7020_v54 = vadd.f32 %v1910_v38, %v6803_v2  ;;  %v7023_v50 = vadd.f32 %v2039_v59, %v6806_v33 }
 0x492   : > { %v1913_v36 = vadd.f32 %v1897_v48, %v6815_v49  ;;  %v2042_v42 = vadd.f32 %v2026_v30, %v6820_v40  ;;  %v4990_v15 = vpop.f32.mrf.mxu0 }
 0x493   : > { %v1911_v29 = vadd.f32 %v1895_v52, %v6823_v0  ;;  %v2040_v7 = vadd.f32 %v2024_v43, %v6830_v6  ;;  %v1856_v28 = vadd.f32 %v6840_v37, %v4990_v15  ;;  %v5022_v55 = vpop.f32.mrf.mxu1 }
 0x494   : > { %v2088_v11 = vpack.c.bf16 %v1913_v36, %v1912_v39  ;;  %v2096_v53 = vpack.c.bf16 %v2042_v42, %v2041_v8  ;;  %v1985_v2 = vadd.f32 %v6840_v37, %v5022_v55  ;;  %v1847_v3 = vpop.f32.mrf.mxu0  ;;  %v7032_v33 = vadd.f32 %v1913_v36, %v6815_v49 }
 0x495   : > { %v1900_v32 = vmax.f32 %v1856_v28, 0.0  ;;  %v1848_v47 = vadd.f32 %v6840_v37, %v1847_v3  ;;  %v1976_v24 = vpop.f32.mrf.mxu1  ;;  %v2087_v18 = vpack.c.bf16 %v1911_v29, %v1910_v38  ;;  %v2095_v58 = vpack.c.bf16 %v2040_v7, %v2039_v59 }
 0x496   : > { %v2029_v1 = vmax.f32 %v1985_v2, 0.0  ;;  %v1977_v27 = vadd.f32 %v6840_v37, %v1976_v24  ;;  %v4991_v48 = vpop.f32.mrf.mxu0  ;;  %v7037_v30 = vadd.f32 %v2042_v42, %v6820_v40  ;;  %v7040_v39 = vadd.f32 %v1911_v29, %v6823_v0  ;;  %v8456_v42 = vld [vmem:[#allocation16_spill] sm:$0xff] }
 0x497   : > { %v7043_v8 = vadd.f32 %v1900_v32, %v6847_v4  ;;  %v1898_v49 = vmax.f32 %v1848_v47, 0.0  ;;  %v1859_v52 = vadd.f32 %v6840_v37, %v4991_v48  ;;  %v5023_v43 = vpop.f32.mrf.mxu1  ;;  %5048 = vmatprep.mubr.bf16.mxu0 %v2087_v18  ;;  %5080 = vmatprep.mubr.bf16.mxu1 %v2095_v58  ;;  %v7047_v38 = vadd.f32 %v2040_v7, %v6830_v6  ;;  %v8457_v7 = vld [vmem:[#allocation26_spill] sm:$0xff]  ;;  %v8458_v32 = vld [vmem:[#allocation15_spill] sm:$0xff] }
 0x498   : > { %v7050_v59 = vadd.f32 %v2029_v1, %v6855_v25  ;;  %v2027_v40 = vmax.f32 %v1977_v27, 0.0  ;;  %v1988_v36 = vadd.f32 %v6840_v37, %v5023_v43  ;;  %v1850_v0 = vpop.f32.mrf.mxu0  ;;  %5049 = vmatmul.mubr.bf16.vlgmr.msra.gmra.mxu0 %v2088_v11  ;;  %5081 = vmatmul.mubr.bf16.vlgmr.msra.gmra.mxu1 %v2096_v53 }
 0x499   : > { %v1914_v15 = vadd.f32 %v1898_v49, %v8456_v42  ;;  %v1901_v29 = vmax.f32 %v1859_v52, 0.0  ;;  %v1851_v28 = vadd.f32 %v6840_v37, %v1850_v0  ;;  %v1979_v55 = vpop.f32.mrf.mxu1  ;;  %5097 = vmatpush3.bf16.msra.mxu0 %v6602_v13  ;;  %5129 = vmatpush3.bf16.msra.mxu1 %v6602_v13  ;;  %v7059_v6 = vadd.f32 %v7043_v8, %v6847_v4 }
 0x49a   : > { %v2043_v2 = vadd.f32 %v2027_v40, %v8457_v7  ;;  %v2030_v3 = vmax.f32 %v1988_v36, 0.0  ;;  %v1980_v11 = vadd.f32 %v6840_v37, %v1979_v55  ;;  %v4994_v53 = vpop.f32.mrf.mxu0  ;;  %5098 = vmatprep.subr.bf16.mxu0 %v8458_v32  ;;  %5130 = vmatprep.subr.bf16.mxu1 %v8458_v32  ;;  %v7067_v47 = vadd.f32 %v7050_v59, %v6855_v25 }
 0x49b   : > { %v1917_v13 = vadd.f32 %v1901_v29, %v6891_v20  ;;  %v1899_v24 = vmax.f32 %v1851_v28, 0.0  ;;  %v1872_v4 = vadd.f32 %v6840_v37, %v4994_v53  ;;  %v5026_v18 = vpop.f32.mrf.mxu1  ;;  %v7072_v58 = vadd.f32 %v1914_v15, %v8456_v42 }
 0x49c   : > { %v2046_v1 = vadd.f32 %v2030_v3, %v6896_v22  ;;  %v2028_v27 = vmax.f32 %v1980_v11, 0.0  ;;  %v2001_v48 = vadd.f32 %v6840_v37, %v5026_v18  ;;  %v1863_v49 = vpop.f32.mrf.mxu0  ;;  %v7077_v52 = vadd.f32 %v2043_v2, %v8457_v7  ;;  %v8460_v3 = vld [vmem:[#allocation25_spill] sm:$0xff] }
 0x49d   : > { %v1915_v25 = vadd.f32 %v1899_v24, %v6902_v62  ;;  %v1904_v43 = vmax.f32 %v1872_v4, 0.0  ;;  %v1864_v40 = vadd.f32 %v6840_v37, %v1863_v49  ;;  %v1992_v36 = vpop.f32.mrf.mxu1  ;;  %v2090_v0 = vpack.c.bf16 %v1917_v13, %v7043_v8  ;;  %5099 = vmatpush3.bf16.msra.mxu0 %v8458_v32  ;;  %5131 = vmatpush3.bf16.msra.mxu1 %v8458_v32 }
 0x49e   : > { %8459 = vst [vmem:[#allocation17_spill] sm:$0xff] %v7077_v52  ;;  %v2044_v42 = vadd.f32 %v2028_v27, %v6908_v17  ;;  %v2033_v29 = vmax.f32 %v2001_v48, 0.0  ;;  %v1993_v28 = vadd.f32 %v6840_v37, %v1992_v36  ;;  %v4995_v55 = vpop.f32.mrf.mxu0  ;;  %v2098_v7 = vpack.c.bf16 %v2046_v1, %v7050_v59  ;;  %5100 = vmatprep.subr.bf16.mxu0 %v8460_v3 }
 0x49f   : > { %5132 = vmatprep.subr.bf16.mxu1 %v8460_v3  ;;  %v7090_v11 = vadd.f32 %v1904_v43, %v6930_v45  ;;  %v1902_v8 = vmax.f32 %v1864_v40, 0.0  ;;  %v1875_v53 = vadd.f32 %v6840_v37, %v4995_v55  ;;  %v5027_v24 = vpop.f32.mrf.mxu1  ;;  %v2089_v32 = vpack.c.bf16 %v1915_v25, %v1914_v15 }
 0x4a0   : > { %v7094_v4 = vadd.f32 %v2033_v29, %v6936_v35  ;;  %v2031_v18 = vmax.f32 %v1993_v28, 0.0  ;;  %v2004_v27 = vadd.f32 %v6840_v37, %v5027_v24  ;;  %v1866_v48 = vpop.f32.mrf.mxu0  ;;  %v2097_v59 = vpack.c.bf16 %v2044_v42, %v2043_v2 }
 0x4a1   : > { %v7098_v49 = vadd.f32 %v1902_v8, %v6942_v41  ;;  %v1905_v36 = vmax.f32 %v1875_v53, 0.0  ;;  %v1867_v43 = vadd.f32 %v6840_v37, %v1866_v48  ;;  %v1995_v52 = vpop.f32.mrf.mxu1  ;;  %5052 = vmatprep.mubr.bf16.mxu0 %v2089_v32  ;;  %5101 = vmatpush3.bf16.msra.mxu0 %v8460_v3  ;;  %v7103_v15 = vadd.f32 %v1917_v13, %v6891_v20 }
 0x4a2   : > { %v2047_v40 = vadd.f32 %v2031_v18, %v6945_v16  ;;  %v2034_v29 = vmax.f32 %v2004_v27, 0.0  ;;  %v1996_v28 = vadd.f32 %v6840_v37, %v1995_v52  ;;  %5084 = vmatprep.mubr.bf16.mxu1 %v2097_v59  ;;  %v4998_v2 = vpop.f32.mrf.mxu0  ;;  %5053 = vmatmul.mubr.bf16.gmra.mxu0 %v2090_v0  ;;  %v7108_v55 = vadd.f32 %v2046_v1, %v6896_v22 }
 0x4a3   : > { %v1921_v8 = vadd.f32 %v1905_v36, %v6951_v26  ;;  %v1903_v53 = vmax.f32 %v1867_v43, 0.0  ;;  %v1888_v24 = vadd.f32 %v6840_v37, %v4998_v2  ;;  %v5030_v32 = vpop.f32.mrf.mxu1  ;;  %5085 = vmatmul.mubr.bf16.gmra.mxu1 %v2098_v7  ;;  %5102 = vmatprep.subr.bf16.mxu0 %v6669_v10  ;;  %v7114_v20 = vadd.f32 %v1915_v25, %v6902_v62 }
 0x4a4   : > { %v2050_v13 = vadd.f32 %v2034_v29, %v6954_v19  ;;  %v2032_v52 = vmax.f32 %v1996_v28, 0.0  ;;  %v2017_v0 = vadd.f32 %v6840_v37, %v5030_v32  ;;  %v1879_v18 = vpop.f32.mrf.mxu0  ;;  %5133 = vmatpush3.bf16.msra.mxu1 %v8460_v3  ;;  %v7120_v22 = vadd.f32 %v2044_v42, %v6908_v17 }
 0x4a5   : > { %v1919_v1 = vadd.f32 %v1903_v53, %v6959_v14  ;;  %v1908_v27 = vmax.f32 %v1888_v24, 0.0  ;;  %v1880_v7 = vadd.f32 %v6840_v37, %v1879_v18  ;;  %v2008_v48 = vpop.f32.mrf.mxu1  ;;  %v2092_v62 = vpack.c.bf16 %v1921_v8, %v7090_v11  ;;  %5134 = vmatprep.subr.bf16.mxu1 %v6669_v10  ;;  %5103 = vmatpush3.bf16.msra.mxu0 %v6669_v10 }
 0x4a6   : > { %v2048_v25 = vadd.f32 %v2032_v52, %v6962_v9  ;;  %v2037_v59 = vmax.f32 %v2017_v0, 0.0  ;;  %v2009_v3 = vadd.f32 %v6840_v37, %v2008_v48  ;;  %v4999_v36 = vpop.f32.mrf.mxu0  ;;  %v2100_v17 = vpack.c.bf16 %v2050_v13, %v7094_v4  ;;  %5104 = vmatprep.subr.bf16.mxu0 %v6690_v56 }
 0x4a7   : > { %v1924_v42 = vadd.f32 %v1908_v27, %v6966_v57  ;;  %v1906_v43 = vmax.f32 %v1880_v7, 0.0  ;;  %v1891_v29 = vadd.f32 %v6840_v37, %v4999_v36  ;;  %v5031_v28 = vpop.f32.mrf.mxu1  ;;  %v2091_v2 = vpack.c.bf16 %v1919_v1, %v7098_v49 }
 0x4a8   : > { %v2053_v53 = vadd.f32 %v2037_v59, %v6969_v31  ;;  %v2035_v24 = vmax.f32 %v2009_v3, 0.0  ;;  %v2020_v32 = vadd.f32 %v6840_v37, %v5031_v28  ;;  %v1882_v52 = vpop.f32.mrf.mxu0  ;;  %v2099_v0 = vpack.c.bf16 %v2048_v25, %v2047_v40  ;;  %5135 = vmatpush3.bf16.msra.mxu1 %v6669_v10 }
 0x4a9   : > { %v1922_v18 = vadd.f32 %v1906_v43, %v6973_v51  ;;  %v1909_v48 = vmax.f32 %v1891_v29, 0.0  ;;  %v1883_v27 = vadd.f32 %v6840_v37, %v1882_v52  ;;  %v2011_v7 = vpop.f32.mrf.mxu1  ;;  %5056 = vmatprep.mubr.bf16.mxu0 %v2091_v2  ;;  %5136 = vmatprep.subr.bf16.mxu1 %v6690_v56  ;;  %v7142_v36 = vadd.f32 %v7090_v11, %v6930_v45 }
 0x4aa   : > { %v2051_v59 = vadd.f32 %v2035_v24, %v6976_v21  ;;  %v2038_v3 = vmax.f32 %v2020_v32, 0.0  ;;  %v2012_v28 = vadd.f32 %v6840_v37, %v2011_v7  ;;  %5088 = vmatprep.mubr.bf16.mxu1 %v2099_v0  ;;  %5057 = vmatmul.mubr.bf16.gmra.mxu0 %v2092_v62  ;;  %v7148_v10 = vadd.f32 %v7094_v4, %v6936_v35 }
 0x4ab   : > { %v1925_v43 = vadd.f32 %v1909_v48, %v6979_v5  ;;  %v1907_v29 = vmax.f32 %v1883_v27, 0.0  ;;  %5089 = vmatmul.mubr.bf16.gmra.mxu1 %v2100_v17  ;;  %5105 = vmatpush3.bf16.msra.mxu0 %v6690_v56  ;;  %v7154_v45 = vadd.f32 %v7098_v49, %v6942_v41  ;;  %v7157_v11 = vadd.f32 %v2047_v40, %v6945_v16 }
 0x4ac   : > { %v2054_v2 = vadd.f32 %v2038_v3, %v6984_v12  ;;  %v2036_v62 = vmax.f32 %v2012_v28, 0.0  ;;  %5137 = vmatpush3.bf16.msra.mxu1 %v6690_v56  ;;  %5106 = vmatprep.subr.bf16.mxu0 %v6725_v61  ;;  %v7163_v35 = vadd.f32 %v1921_v8, %v6951_v26  ;;  %v7166_v4 = vadd.f32 %v2050_v13, %v6954_v19 }
 0x4ad   : > { %v1923_v17 = vadd.f32 %v1907_v29, %v6987_v46  ;;  %v2094_v41 = vpack.c.bf16 %v1925_v43, %v1924_v42  ;;  %5138 = vmatprep.subr.bf16.mxu1 %v6725_v61  ;;  %v7171_v16 = vadd.f32 %v1919_v1, %v6959_v14  ;;  %v7174_v49 = vadd.f32 %v2048_v25, %v6962_v9 }
 0x4ae   : > { %v2052_v56 = vadd.f32 %v2036_v62, %v6991_v60  ;;  %v2102_v40 = vpack.c.bf16 %v2054_v2, %v2053_v53  ;;  %v7178_v26 = vadd.f32 %v1924_v42, %v6966_v57  ;;  %v7181_v19 = vadd.f32 %v2053_v53, %v6969_v31 }
 0x4af   : > { %v2093_v8 = vpack.c.bf16 %v1923_v17, %v1922_v18  ;;  %5107 = vmatpush3.bf16.msra.mxu0 %v6725_v61  ;;  %v7185_v13 = vadd.f32 %v1922_v18, %v6973_v51  ;;  %v7188_v14 = vadd.f32 %v2051_v59, %v6976_v21  ;;  %v7191_v9 = vadd.f32 %v1925_v43, %v6979_v5 }
 0x4b0   : > { %v2101_v1 = vpack.c.bf16 %v2052_v56, %v2051_v59  ;;  %5139 = vmatpush3.bf16.msra.mxu1 %v6725_v61  ;;  %5108 = vmatprep.subr.bf16.mxu0 %v6761_v44  ;;  %v7196_v57 = vadd.f32 %v2054_v2, %v6984_v12  ;;  %v7199_v31 = vadd.f32 %v1923_v17, %v6987_v46  ;;  %v7211_v61 = vld [vmem:[#allocation7 + $0x38] sm:$0xff]  }
 0x4b1   : > { %5060 = vmatprep.mubr.bf16.mxu0 %v2093_v8  ;;  %5140 = vmatprep.subr.bf16.mxu1 %v6761_v44  ;;  %v7203_v51 = vadd.f32 %v2052_v56, %v6991_v60 }
 0x4b2   : > { %5092 = vmatprep.mubr.bf16.mxu1 %v2101_v1  ;;  %5061 = vmatmul.mubr.bf16.gmra.mxu0 %v2094_v41 }
 0x4b3   : > { %5093 = vmatmul.mubr.bf16.gmra.mxu1 %v2102_v40  ;;  %5109 = vmatpush3.bf16.msra.mxu0 %v6761_v44 }
 0x4b4   : > { %5141 = vmatpush3.bf16.msra.mxu1 %v6761_v44  ;;  %5110 = vmatprep.subr.bf16.mxu0 %v6776_v34 }
 0x4b5   : > { %5142 = vmatprep.subr.bf16.mxu1 %v6776_v34 }
 0x4b7   : > { %5111 = vmatpush3.bf16.msra.mxu0 %v6776_v34 }
 0x4b8   : > { %5143 = vmatpush3.bf16.msra.mxu1 %v6776_v34  ;;  %5160 = vmatprep.subr.bf16.mxu0 %v7211_v61 }
 0x4b9   : > { %5192 = vmatprep.subr.bf16.mxu1 %v7211_v61 }
 0x558   : > { %v5050_v21 = vpop.f32.mrf.mxu0  ;;  %v5082_v5 = vpop.f32.mrf.mxu1 }
 0x559   : > { %v2146_v12 = vadd.f32 %v6840_v37, %v5050_v21  ;;  %v2275_v44 = vadd.f32 %v6840_v37, %v5082_v5 }
 0x55a   : > { %v2137_v46 = vpop.f32.mrf.mxu0  ;;  %v2266_v60 = vpop.f32.mrf.mxu1 }
 0x55b   : > { %v2202_v25 = vmax.f32 %v2146_v12, 0.0  ;;  %v2331_v42 = vmax.f32 %v2275_v44, 0.0  ;;  %v2138_v53 = vadd.f32 %v6840_v37, %v2137_v46  ;;  %v2267_v34 = vadd.f32 %v6840_v37, %v2266_v60 }
 0x55c   : > { %v5051_v24 = vpop.f32.mrf.mxu0  ;;  %v5083_v32 = vpop.f32.mrf.mxu1 }
 0x55d   : > { %v2218_v52 = vadd.f32 %v2202_v25, %v7014_v23  ;;  %v2347_v0 = vadd.f32 %v2331_v42, %v7017_v63  ;;  %v2200_v18 = vmax.f32 %v2138_v53, 0.0  ;;  %v2329_v48 = vmax.f32 %v2267_v34, 0.0 }
 0x55e   : > { %v2149_v27 = vadd.f32 %v6840_v37, %v5051_v24  ;;  %v2278_v7 = vadd.f32 %v6840_v37, %v5083_v32  ;;  %v2140_v59 = vpop.f32.mrf.mxu0  ;;  %v2269_v3 = vpop.f32.mrf.mxu1 }
 0x55f   : > { %v2216_v28 = vadd.f32 %v2200_v18, %v7020_v54  ;;  %v2345_v43 = vadd.f32 %v2329_v48, %v7023_v50  ;;  %v2141_v29 = vadd.f32 %v6840_v37, %v2140_v59  ;;  %v2270_v2 = vadd.f32 %v6840_v37, %v2269_v3 }
 0x560   : > { %v2203_v62 = vmax.f32 %v2149_v27, 0.0  ;;  %v2332_v17 = vmax.f32 %v2278_v7, 0.0  ;;  %v7228_v41 = vadd.f32 %v2218_v52, %v7014_v23  ;;  %v7231_v56 = vadd.f32 %v2347_v0, %v7017_v63 }
 0x561   : > { %v2201_v40 = vmax.f32 %v2141_v29, 0.0  ;;  %v2330_v8 = vmax.f32 %v2270_v2, 0.0  ;;  %v7234_v1 = vadd.f32 %v2216_v28, %v7020_v54  ;;  %v7237_v21 = vadd.f32 %v2345_v43, %v7023_v50 }
 0x562   : > { %v2219_v5 = vadd.f32 %v2203_v62, %v7032_v33  ;;  %v2348_v12 = vadd.f32 %v2332_v17, %v7037_v30  ;;  %v5054_v44 = vpop.f32.mrf.mxu0 }
 0x563   : > { %v2217_v46 = vadd.f32 %v2201_v40, %v7040_v39  ;;  %v2346_v23 = vadd.f32 %v2330_v8, %v7047_v38  ;;  %v2162_v63 = vadd.f32 %v6840_v37, %v5054_v44  ;;  %v5086_v60 = vpop.f32.mrf.mxu1 }
 0x564   : > { %v2394_v25 = vpack.c.bf16 %v2219_v5, %v2218_v52  ;;  %v2402_v42 = vpack.c.bf16 %v2348_v12, %v2347_v0  ;;  %v2291_v54 = vadd.f32 %v6840_v37, %v5086_v60  ;;  %v2153_v53 = vpop.f32.mrf.mxu0  ;;  %v7246_v50 = vadd.f32 %v2219_v5, %v7032_v33  ;;  %v7277_v60 = vld [vmem:[#allocation7 + $0x30] sm:$0xff]  }
 0x565   : > { %v2206_v34 = vmax.f32 %v2162_v63, 0.0  ;;  %v2154_v24 = vadd.f32 %v6840_v37, %v2153_v53  ;;  %v2282_v32 = vpop.f32.mrf.mxu1  ;;  %v2393_v18 = vpack.c.bf16 %v2217_v46, %v2216_v28  ;;  %v2401_v48 = vpack.c.bf16 %v2346_v23, %v2345_v43 }
 0x566   : > { %v2335_v27 = vmax.f32 %v2291_v54, 0.0  ;;  %v2283_v7 = vadd.f32 %v6840_v37, %v2282_v32  ;;  %v5055_v59 = vpop.f32.mrf.mxu0  ;;  %v7251_v3 = vadd.f32 %v2348_v12, %v7037_v30  ;;  %v7254_v52 = vadd.f32 %v2217_v46, %v7040_v39  ;;  %v8461_v12 = vld [vmem:[#allocation17_spill] sm:$0xff] }
 0x567   : > { %v7257_v0 = vadd.f32 %v2206_v34, %v7059_v6  ;;  %v2204_v33 = vmax.f32 %v2154_v24, 0.0  ;;  %v2165_v29 = vadd.f32 %v6840_v37, %v5055_v59  ;;  %v5087_v2 = vpop.f32.mrf.mxu1  ;;  %5112 = vmatprep.mubr.bf16.mxu0 %v2393_v18  ;;  %5144 = vmatprep.mubr.bf16.mxu1 %v2401_v48  ;;  %v7261_v28 = vadd.f32 %v2346_v23, %v7047_v38 }
 0x568   : > { %v7264_v43 = vadd.f32 %v2335_v27, %v7067_v47  ;;  %v2333_v30 = vmax.f32 %v2283_v7, 0.0  ;;  %v2294_v62 = vadd.f32 %v6840_v37, %v5087_v2  ;;  %v2156_v39 = vpop.f32.mrf.mxu0  ;;  %5113 = vmatmul.mubr.bf16.vlgmr.msra.gmra.mxu0 %v2394_v25  ;;  %5145 = vmatmul.mubr.bf16.vlgmr.msra.gmra.mxu1 %v2402_v42 }
 0x569   : > { %v2220_v17 = vadd.f32 %v2204_v33, %v7072_v58  ;;  %v2207_v40 = vmax.f32 %v2165_v29, 0.0  ;;  %v2157_v8 = vadd.f32 %v6840_v37, %v2156_v39  ;;  %v2285_v5 = vpop.f32.mrf.mxu1  ;;  %5161 = vmatpush3.bf16.msra.mxu0 %v7211_v61  ;;  %5193 = vmatpush3.bf16.msra.mxu1 %v7211_v61  ;;  %v7273_v38 = vadd.f32 %v7257_v0, %v7059_v6 }
 0x56a   : > { %v2349_v44 = vadd.f32 %v2333_v30, %v8461_v12  ;;  %v2336_v46 = vmax.f32 %v2294_v62, 0.0  ;;  %v2286_v23 = vadd.f32 %v6840_v37, %v2285_v5  ;;  %v5058_v63 = vpop.f32.mrf.mxu0  ;;  %5162 = vmatprep.subr.bf16.mxu0 %v7277_v60  ;;  %5194 = vmatprep.subr.bf16.mxu1 %v7277_v60  ;;  %v7283_v25 = vadd.f32 %v7264_v43, %v7067_v47 }
 0x56b   : > { %v2223_v42 = vadd.f32 %v2207_v40, %v7103_v15  ;;  %v2205_v6 = vmax.f32 %v2157_v8, 0.0  ;;  %v2178_v54 = vadd.f32 %v6840_v37, %v5058_v63  ;;  %v5090_v53 = vpop.f32.mrf.mxu1  ;;  %v7288_v34 = vadd.f32 %v2220_v17, %v7072_v58  ;;  %v7303_v40 = vld [vmem:[#allocation7 + $0x28] sm:$0xff]  }
 0x56c   : > { %v2352_v24 = vadd.f32 %v2336_v46, %v7108_v55  ;;  %v2334_v32 = vmax.f32 %v2286_v23, 0.0  ;;  %v2307_v18 = vadd.f32 %v6840_v37, %v5090_v53  ;;  %v2169_v48 = vpop.f32.mrf.mxu0  ;;  %v7293_v27 = vadd.f32 %v2349_v44, %v8461_v12  ;;  %8462 = vst [vmem:[#allocation27_spill] sm:$0xff] %v7303_v40 }
 0x56d   : > { %v2221_v47 = vadd.f32 %v2205_v6, %v7114_v20  ;;  %v2210_v7 = vmax.f32 %v2178_v54, 0.0  ;;  %v2170_v59 = vadd.f32 %v6840_v37, %v2169_v48  ;;  %v2298_v33 = vpop.f32.mrf.mxu1  ;;  %v2396_v29 = vpack.c.bf16 %v2223_v42, %v7257_v0  ;;  %5163 = vmatpush3.bf16.msra.mxu0 %v7277_v60  ;;  %5195 = vmatpush3.bf16.msra.mxu1 %v7277_v60 }
 0x56e   : > { %v2350_v58 = vadd.f32 %v2334_v32, %v7120_v22  ;;  %v2339_v2 = vmax.f32 %v2307_v18, 0.0  ;;  %v2299_v30 = vadd.f32 %v6840_v37, %v2298_v33  ;;  %v5059_v62 = vpop.f32.mrf.mxu0  ;;  %v2404_v39 = vpack.c.bf16 %v2352_v24, %v7264_v43  ;;  %5164 = vmatprep.subr.bf16.mxu0 %v7303_v40  ;;  %5196 = vmatprep.subr.bf16.mxu1 %v7303_v40 }
 0x56f   : > { %v7308_v0 = vadd.f32 %v2210_v7, %v7142_v36  ;;  %v2208_v8 = vmax.f32 %v2170_v59, 0.0  ;;  %v2181_v5 = vadd.f32 %v6840_v37, %v5059_v62  ;;  %v5091_v12 = vpop.f32.mrf.mxu1  ;;  %v2395_v46 = vpack.c.bf16 %v2221_v47, %v2220_v17 }
 0x570   : > { %v7312_v23 = vadd.f32 %v2339_v2, %v7148_v10  ;;  %v2337_v63 = vmax.f32 %v2299_v30, 0.0  ;;  %v2310_v43 = vadd.f32 %v6840_v37, %v5091_v12  ;;  %v2172_v6 = vpop.f32.mrf.mxu0  ;;  %v2403_v54 = vpack.c.bf16 %v2350_v58, %v2349_v44 }
 0x571   : > { %v7316_v53 = vadd.f32 %v2208_v8, %v7154_v45  ;;  %v2211_v32 = vmax.f32 %v2181_v5, 0.0  ;;  %v2173_v18 = vadd.f32 %v6840_v37, %v2172_v6  ;;  %v2301_v48 = vpop.f32.mrf.mxu1  ;;  %5116 = vmatprep.mubr.bf16.mxu0 %v2395_v46  ;;  %5165 = vmatpush3.bf16.msra.mxu0 %v7303_v40  ;;  %v7321_v17 = vadd.f32 %v2223_v42, %v7103_v15  ;;  %v7334_v42 = vld [vmem:[#allocation7 + $0x20] sm:$0xff]  }
 0x572   : > { %v7324_v7 = vadd.f32 %v2337_v63, %v7157_v11  ;;  %v2340_v59 = vmax.f32 %v2310_v43, 0.0  ;;  %v2302_v33 = vadd.f32 %v6840_v37, %v2301_v48  ;;  %5148 = vmatprep.mubr.bf16.mxu1 %v2403_v54  ;;  %v5062_v44 = vpop.f32.mrf.mxu0  ;;  %5117 = vmatmul.mubr.bf16.gmra.mxu0 %v2396_v29  ;;  %v7328_v2 = vadd.f32 %v2352_v24, %v7108_v55  ;;  %v7344_v55 = vld [vmem:[%s8357_s4] ss:$0 sm:$0xff] }
 0x573   : > { %v7331_v30 = vadd.f32 %v2211_v32, %v7163_v35  ;;  %v2209_v62 = vmax.f32 %v2173_v18, 0.0  ;;  %v2194_v8 = vadd.f32 %v6840_v37, %v5062_v44  ;;  %v5094_v15 = vpop.f32.mrf.mxu1  ;;  %5149 = vmatmul.mubr.bf16.gmra.mxu1 %v2404_v39  ;;  %5166 = vmatprep.subr.bf16.mxu0 %v7334_v42  ;;  %v7338_v5 = vadd.f32 %v2221_v47, %v7114_v20  ;;  %v7360_v18 = vld [vmem:[#allocation7 + $0x18] sm:$0xff]  }
 0x574   : > { %v2356_v29 = vadd.f32 %v2340_v59, %v7166_v4  ;;  %v2338_v12 = vmax.f32 %v2302_v33, 0.0  ;;  %v2323_v24 = vadd.f32 %v7344_v55, %v5094_v15  ;;  %v2185_v37 = vpop.f32.mrf.mxu0  ;;  %5197 = vmatpush3.bf16.msra.mxu1 %v7303_v40  ;;  %v7349_v39 = vadd.f32 %v2350_v58, %v7120_v22 }
 0x575   : > { %v2225_v46 = vadd.f32 %v2209_v62, %v7171_v16  ;;  %v2214_v20 = vmax.f32 %v2194_v8, 0.0  ;;  %v2186_v47 = vadd.f32 %v7344_v55, %v2185_v37  ;;  %v2314_v63 = vpop.f32.mrf.mxu1  ;;  %v2398_v43 = vpack.c.bf16 %v7331_v30, %v7308_v0  ;;  %5198 = vmatprep.subr.bf16.mxu1 %v7334_v42  ;;  %5167 = vmatpush3.bf16.msra.mxu0 %v7334_v42 }
 0x576   : > { %v2354_v6 = vadd.f32 %v2338_v12, %v7174_v49  ;;  %v2343_v54 = vmax.f32 %v2323_v24, 0.0  ;;  %v2315_v32 = vadd.f32 %v7344_v55, %v2314_v63  ;;  %v5063_v22 = vpop.f32.mrf.mxu0  ;;  %v2406_v58 = vpack.c.bf16 %v2356_v29, %v7312_v23  ;;  %5168 = vmatprep.subr.bf16.mxu0 %v7360_v18 }
 0x577   : > { %v2230_v48 = vadd.f32 %v2214_v20, %v7178_v26  ;;  %v2212_v59 = vmax.f32 %v2186_v47, 0.0  ;;  %v2197_v33 = vadd.f32 %v7344_v55, %v5063_v22  ;;  %v5095_v44 = vpop.f32.mrf.mxu1  ;;  %v2397_v62 = vpack.c.bf16 %v2225_v46, %v7316_v53 }
 0x578   : > { %v2359_v8 = vadd.f32 %v2343_v54, %v7181_v19  ;;  %v2341_v15 = vmax.f32 %v2315_v32, 0.0  ;;  %v2326_v12 = vadd.f32 %v7344_v55, %v5095_v44  ;;  %v2188_v24 = vpop.f32.mrf.mxu0  ;;  %v2405_v37 = vpack.c.bf16 %v2354_v6, %v7324_v7  ;;  %5199 = vmatpush3.bf16.msra.mxu1 %v7334_v42 }
 0x579   : > { %v2228_v63 = vadd.f32 %v2212_v59, %v7185_v13  ;;  %v2215_v40 = vmax.f32 %v2197_v33, 0.0  ;;  %v2189_v20 = vadd.f32 %v7344_v55, %v2188_v24  ;;  %v2317_v47 = vpop.f32.mrf.mxu1  ;;  %5120 = vmatprep.mubr.bf16.mxu0 %v2397_v62  ;;  %5200 = vmatprep.subr.bf16.mxu1 %v7360_v18  ;;  %v7375_v54 = vadd.f32 %v7308_v0, %v7142_v36 }
 0x57a   : > { %v2357_v32 = vadd.f32 %v2341_v15, %v7188_v14  ;;  %v2344_v22 = vmax.f32 %v2326_v12, 0.0  ;;  %v2318_v44 = vadd.f32 %v7344_v55, %v2317_v47  ;;  %5152 = vmatprep.mubr.bf16.mxu1 %v2405_v37  ;;  %5121 = vmatmul.mubr.bf16.gmra.mxu0 %v2398_v43  ;;  %v7381_v59 = vadd.f32 %v7312_v23, %v7148_v10  ;;  %v7395_v10 = vld [vmem:[#allocation7 + $0x10] sm:$0xff]  }
 0x57b   : > { %v2231_v33 = vadd.f32 %v2215_v40, %v7191_v9  ;;  %v2213_v62 = vmax.f32 %v2189_v20, 0.0  ;;  %5153 = vmatmul.mubr.bf16.gmra.mxu1 %v2406_v58  ;;  %5169 = vmatpush3.bf16.msra.mxu0 %v7360_v18  ;;  %v7387_v36 = vadd.f32 %v7316_v53, %v7154_v45  ;;  %v7391_v0 = vadd.f32 %v7324_v7, %v7157_v11 }
 0x57c   : > { %v2360_v43 = vadd.f32 %v2344_v22, %v7196_v57  ;;  %v2342_v15 = vmax.f32 %v2318_v44, 0.0  ;;  %5201 = vmatpush3.bf16.msra.mxu1 %v7360_v18  ;;  %5170 = vmatprep.subr.bf16.mxu0 %v7395_v10  ;;  %v7400_v40 = vadd.f32 %v7331_v30, %v7163_v35  ;;  %v7403_v45 = vadd.f32 %v2356_v29, %v7166_v4 }
 0x57d   : > { %v2229_v23 = vadd.f32 %v2213_v62, %v7199_v31  ;;  %v2400_v11 = vpack.c.bf16 %v2231_v33, %v2230_v48  ;;  %5202 = vmatprep.subr.bf16.mxu1 %v7395_v10  ;;  %v7408_v53 = vadd.f32 %v2225_v46, %v7171_v16  ;;  %v7411_v7 = vadd.f32 %v2354_v6, %v7174_v49 }
 0x57e   : > { %v2358_v58 = vadd.f32 %v2342_v15, %v7203_v51  ;;  %v2408_v12 = vpack.c.bf16 %v2360_v43, %v2359_v8  ;;  %v7415_v35 = vadd.f32 %v2230_v48, %v7178_v26  ;;  %v7418_v4 = vadd.f32 %v2359_v8, %v7181_v19  ;;  %v7431_v26 = vld [vmem:[#allocation7 + $0x8] sm:$0xff]  }
 0x57f   : > { %v2399_v30 = vpack.c.bf16 %v2229_v23, %v2228_v63  ;;  %5171 = vmatpush3.bf16.msra.mxu0 %v7395_v10  ;;  %v7422_v29 = vadd.f32 %v2228_v63, %v7185_v13  ;;  %v7425_v16 = vadd.f32 %v2357_v32, %v7188_v14  ;;  %v7428_v49 = vadd.f32 %v2231_v33, %v7191_v9  ;;  %v7446_v14 = vld [vmem:[#allocation7] sm:$0xff]  }
 0x580   : > { %v2407_v46 = vpack.c.bf16 %v2358_v58, %v2357_v32  ;;  %5203 = vmatpush3.bf16.msra.mxu1 %v7395_v10  ;;  %5172 = vmatprep.subr.bf16.mxu0 %v7431_v26  ;;  %v7435_v19 = vadd.f32 %v2360_v43, %v7196_v57  ;;  %v7438_v6 = vadd.f32 %v2229_v23, %v7199_v31 }
 0x581   : > { %5124 = vmatprep.mubr.bf16.mxu0 %v2399_v30  ;;  %5204 = vmatprep.subr.bf16.mxu1 %v7431_v26  ;;  %v7442_v13 = vadd.f32 %v2358_v58, %v7203_v51 }
 0x582   : > { %5156 = vmatprep.mubr.bf16.mxu1 %v2407_v46  ;;  %5125 = vmatmul.mubr.bf16.gmra.mxu0 %v2400_v11 }
 0x583   : > { %5157 = vmatmul.mubr.bf16.gmra.mxu1 %v2408_v12  ;;  %5173 = vmatpush3.bf16.msra.mxu0 %v7431_v26 }
 0x584   : > { %5205 = vmatpush3.bf16.msra.mxu1 %v7431_v26  ;;  %5174 = vmatprep.subr.bf16.mxu0 %v7446_v14 }
 0x585   : > { %5206 = vmatprep.subr.bf16.mxu1 %v7446_v14 }
 0x587   : > { %5175 = vmatpush3.bf16.msra.mxu0 %v7446_v14 }
 0x588   : > { %5207 = vmatpush3.bf16.msra.mxu1 %v7446_v14  ;;  %5224 = vmatprep.subr.bf16.mxu0 %v7211_v61 }
 0x589   : > { %5256 = vmatprep.subr.bf16.mxu1 %v7211_v61 }
 0x628   : > { %v5114_v9 = vpop.f32.mrf.mxu0  ;;  %v5146_v57 = vpop.f32.mrf.mxu1 }
 0x629   : > { %v2452_v31 = vadd.f32 %v7344_v55, %v5114_v9  ;;  %v2581_v51 = vadd.f32 %v7344_v55, %v5146_v57 }
 0x62a   : > { %v2443_v48 = vpop.f32.mrf.mxu0  ;;  %v2572_v8 = vpop.f32.mrf.mxu1 }
 0x62b   : > { %v2508_v24 = vmax.f32 %v2452_v31, 0.0  ;;  %v2637_v37 = vmax.f32 %v2581_v51, 0.0  ;;  %v2444_v63 = vadd.f32 %v7344_v55, %v2443_v48  ;;  %v2573_v20 = vadd.f32 %v7344_v55, %v2572_v8 }
 0x62c   : > { %v5115_v47 = vpop.f32.mrf.mxu0  ;;  %v5147_v32 = vpop.f32.mrf.mxu1 }
 0x62d   : > { %v2524_v22 = vadd.f32 %v2508_v24, %v7228_v41  ;;  %v2653_v44 = vadd.f32 %v2637_v37, %v7231_v56  ;;  %v2506_v33 = vmax.f32 %v2444_v63, 0.0  ;;  %v2635_v62 = vmax.f32 %v2573_v20, 0.0 }
 0x62e   : > { %v2455_v43 = vadd.f32 %v7344_v55, %v5115_v47  ;;  %v2584_v15 = vadd.f32 %v7344_v55, %v5147_v32  ;;  %v2446_v23 = vpop.f32.mrf.mxu0  ;;  %v2575_v11 = vpop.f32.mrf.mxu1 }
 0x62f   : > { %v2522_v58 = vadd.f32 %v2506_v33, %v7234_v1  ;;  %v2651_v12 = vadd.f32 %v2635_v62, %v7237_v21  ;;  %v2447_v30 = vadd.f32 %v7344_v55, %v2446_v23  ;;  %v2576_v46 = vadd.f32 %v7344_v55, %v2575_v11 }
 0x630   : > { %v2509_v9 = vmax.f32 %v2455_v43, 0.0  ;;  %v2638_v57 = vmax.f32 %v2584_v15, 0.0  ;;  %v7467_v31 = vadd.f32 %v2524_v22, %v7228_v41  ;;  %v7470_v51 = vadd.f32 %v2653_v44, %v7231_v56 }
 0x631   : > { %v2507_v48 = vmax.f32 %v2447_v30, 0.0  ;;  %v2636_v8 = vmax.f32 %v2576_v46, 0.0  ;;  %v7473_v24 = vadd.f32 %v2522_v58, %v7234_v1  ;;  %v7476_v37 = vadd.f32 %v2651_v12, %v7237_v21 }
 0x632   : > { %v2525_v63 = vadd.f32 %v2509_v9, %v7246_v50  ;;  %v2654_v20 = vadd.f32 %v2638_v57, %v7251_v3  ;;  %v5118_v47 = vpop.f32.mrf.mxu0 }
 0x633   : > { %v2523_v32 = vadd.f32 %v2507_v48, %v7254_v52  ;;  %v2652_v41 = vadd.f32 %v2636_v8, %v7261_v28  ;;  %v2468_v56 = vadd.f32 %v7344_v55, %v5118_v47  ;;  %v5150_v33 = vpop.f32.mrf.mxu1 }
 0x634   : > { %v2700_v62 = vpack.c.bf16 %v2525_v63, %v2524_v22  ;;  %v2708_v43 = vpack.c.bf16 %v2654_v20, %v2653_v44  ;;  %v2597_v1 = vadd.f32 %v7344_v55, %v5150_v33  ;;  %v2459_v15 = vpop.f32.mrf.mxu0  ;;  %v7485_v21 = vadd.f32 %v2525_v63, %v7246_v50 }
 0x635   : > { %v2512_v23 = vmax.f32 %v2468_v56, 0.0  ;;  %v2460_v11 = vadd.f32 %v7344_v55, %v2459_v15  ;;  %v2588_v30 = vpop.f32.mrf.mxu1  ;;  %v2699_v46 = vpack.c.bf16 %v2523_v32, %v2522_v58  ;;  %v2707_v9 = vpack.c.bf16 %v2652_v41, %v2651_v12 }
 0x636   : > { %v2641_v57 = vmax.f32 %v2597_v1, 0.0  ;;  %v2589_v48 = vadd.f32 %v7344_v55, %v2588_v30  ;;  %v5119_v8 = vpop.f32.mrf.mxu0  ;;  %v7490_v47 = vadd.f32 %v2654_v20, %v7251_v3  ;;  %v7493_v22 = vadd.f32 %v2523_v32, %v7254_v52 }
 0x637   : > { %v7496_v44 = vadd.f32 %v2512_v23, %v7273_v38  ;;  %v2510_v50 = vmax.f32 %v2460_v11, 0.0  ;;  %v2471_v63 = vadd.f32 %v7344_v55, %v5119_v8  ;;  %v5151_v56 = vpop.f32.mrf.mxu1  ;;  %5176 = vmatprep.mubr.bf16.mxu0 %v2699_v46  ;;  %5208 = vmatprep.mubr.bf16.mxu1 %v2707_v9  ;;  %v7500_v58 = vadd.f32 %v2652_v41, %v7261_v28 }
 0x638   : > { %v7503_v12 = vadd.f32 %v2641_v57, %v7283_v25  ;;  %v2639_v3 = vmax.f32 %v2589_v48, 0.0  ;;  %v2600_v20 = vadd.f32 %v7344_v55, %v5151_v56  ;;  %v2462_v52 = vpop.f32.mrf.mxu0  ;;  %5177 = vmatmul.mubr.bf16.vlgmr.msra.gmra.mxu0 %v2700_v62  ;;  %5209 = vmatmul.mubr.bf16.vlgmr.msra.gmra.mxu1 %v2708_v43 }
 0x639   : > { %v2526_v32 = vadd.f32 %v2510_v50, %v7288_v34  ;;  %v2513_v33 = vmax.f32 %v2471_v63, 0.0  ;;  %v2463_v1 = vadd.f32 %v7344_v55, %v2462_v52  ;;  %v2591_v15 = vpop.f32.mrf.mxu1  ;;  %5225 = vmatpush3.bf16.msra.mxu0 %v7211_v61  ;;  %5257 = vmatpush3.bf16.msra.mxu1 %v7211_v61  ;;  %v7512_v28 = vadd.f32 %v7496_v44, %v7273_v38 }
 0x63a   : > { %v2655_v41 = vadd.f32 %v2639_v3, %v7293_v27  ;;  %v2642_v23 = vmax.f32 %v2600_v20, 0.0  ;;  %v2592_v62 = vadd.f32 %v7344_v55, %v2591_v15  ;;  %v5122_v43 = vpop.f32.mrf.mxu0  ;;  %5226 = vmatprep.subr.bf16.mxu0 %v7277_v60  ;;  %5258 = vmatprep.subr.bf16.mxu1 %v7277_v60  ;;  %v7520_v11 = vadd.f32 %v7503_v12, %v7283_v25 }
 0x63b   : > { %v2529_v61 = vadd.f32 %v2513_v33, %v7321_v17  ;;  %v2511_v30 = vmax.f32 %v2463_v1, 0.0  ;;  %v2484_v38 = vadd.f32 %v7344_v55, %v5122_v43  ;;  %v5154_v46 = vpop.f32.mrf.mxu1  ;;  %v7525_v9 = vadd.f32 %v2526_v32, %v7288_v34 }
 0x63c   : > { %v2658_v57 = vadd.f32 %v2642_v23, %v7328_v2  ;;  %v2640_v48 = vmax.f32 %v2592_v62, 0.0  ;;  %v2613_v8 = vadd.f32 %v7344_v55, %v5154_v46  ;;  %v2475_v50 = vpop.f32.mrf.mxu0  ;;  %v7530_v63 = vadd.f32 %v2655_v41, %v7293_v27  ;;  %v8464_v23 = vld [vmem:[#allocation27_spill] sm:$0xff] }
 0x63d   : > { %v2702_v25 = vpack.c.bf16 %v2529_v61, %v7496_v44  ;;  %v2527_v56 = vadd.f32 %v2511_v30, %v7338_v5  ;;  %v2516_v3 = vmax.f32 %v2484_v38, 0.0  ;;  %v2476_v20 = vadd.f32 %v7344_v55, %v2475_v50  ;;  %v2604_v52 = vpop.f32.mrf.mxu1  ;;  %5227 = vmatpush3.bf16.msra.mxu0 %v7277_v60  ;;  %5259 = vmatpush3.bf16.msra.mxu1 %v7277_v60 }
 0x63e   : > { %8463 = vst [vmem:[#allocation18_spill] sm:$0xff] %v7530_v63  ;;  %v2710_v34 = vpack.c.bf16 %v2658_v57, %v7503_v12  ;;  %v2656_v33 = vadd.f32 %v2640_v48, %v7349_v39  ;;  %v2645_v1 = vmax.f32 %v2613_v8, 0.0  ;;  %v2605_v27 = vadd.f32 %v7344_v55, %v2604_v52  ;;  %v5123_v15 = vpop.f32.mrf.mxu0  ;;  %5228 = vmatprep.subr.bf16.mxu0 %v8464_v23 }
 0x63f   : > { %5260 = vmatprep.subr.bf16.mxu1 %v8464_v23  ;;  %v7543_v44 = vadd.f32 %v2516_v3, %v7375_v54  ;;  %v2514_v62 = vmax.f32 %v2476_v20, 0.0  ;;  %v2487_v43 = vadd.f32 %v7344_v55, %v5123_v15  ;;  %v5155_v30 = vpop.f32.mrf.mxu1  ;;  %v2701_v60 = vpack.c.bf16 %v2527_v56, %v2526_v32 }
 0x640   : > { %v7547_v12 = vadd.f32 %v2645_v1, %v7381_v59  ;;  %v2643_v38 = vmax.f32 %v2605_v27, 0.0  ;;  %v2616_v46 = vadd.f32 %v7344_v55, %v5155_v30  ;;  %v2478_v48 = vpop.f32.mrf.mxu0  ;;  %v2709_v8 = vpack.c.bf16 %v2656_v33, %v2655_v41 }
 0x641   : > { %v7551_v50 = vadd.f32 %v2514_v62, %v7387_v36  ;;  %v2517_v52 = vmax.f32 %v2487_v43, 0.0  ;;  %v2479_v3 = vadd.f32 %v7344_v55, %v2478_v48  ;;  %v2607_v63 = vpop.f32.mrf.mxu1  ;;  %5180 = vmatprep.mubr.bf16.mxu0 %v2701_v60  ;;  %5229 = vmatpush3.bf16.msra.mxu0 %v8464_v23  ;;  %v7556_v32 = vadd.f32 %v2529_v61, %v7321_v17 }
 0x642   : > { %v2659_v20 = vadd.f32 %v2643_v38, %v7391_v0  ;;  %v2646_v1 = vmax.f32 %v2616_v46, 0.0  ;;  %v2608_v27 = vadd.f32 %v7344_v55, %v2607_v63  ;;  %5212 = vmatprep.mubr.bf16.mxu1 %v2709_v8  ;;  %v5126_v41 = vpop.f32.mrf.mxu0  ;;  %5181 = vmatmul.mubr.bf16.gmra.mxu0 %v2702_v25  ;;  %v7561_v15 = vadd.f32 %v2658_v57, %v7328_v2 }
 0x643   : > { %v2533_v62 = vadd.f32 %v2517_v52, %v7400_v40  ;;  %v2515_v43 = vmax.f32 %v2479_v3, 0.0  ;;  %v2500_v30 = vadd.f32 %v7344_v55, %v5126_v41  ;;  %v5158_v60 = vpop.f32.mrf.mxu1  ;;  %5213 = vmatmul.mubr.bf16.gmra.mxu1 %v2710_v34  ;;  %5230 = vmatprep.subr.bf16.mxu0 %v7334_v42  ;;  %v7567_v17 = vadd.f32 %v2527_v56, %v7338_v5 }
 0x644   : > { %v2662_v61 = vadd.f32 %v2646_v1, %v7403_v45  ;;  %v2644_v63 = vmax.f32 %v2608_v27, 0.0  ;;  %v2629_v25 = vadd.f32 %v7344_v55, %v5158_v60  ;;  %v2491_v38 = vpop.f32.mrf.mxu0  ;;  %5261 = vmatpush3.bf16.msra.mxu1 %v8464_v23  ;;  %v7573_v2 = vadd.f32 %v2656_v33, %v7349_v39 }
 0x645   : > { %v2704_v57 = vpack.c.bf16 %v2533_v62, %v7543_v44  ;;  %v2531_v34 = vadd.f32 %v2515_v43, %v7408_v53  ;;  %v2520_v46 = vmax.f32 %v2500_v30, 0.0  ;;  %v2492_v48 = vadd.f32 %v7344_v55, %v2491_v38  ;;  %v2620_v5 = vpop.f32.mrf.mxu1  ;;  %5262 = vmatprep.subr.bf16.mxu1 %v7334_v42  ;;  %5231 = vmatpush3.bf16.msra.mxu0 %v7334_v42 }
 0x646   : > { %v2712_v56 = vpack.c.bf16 %v2662_v61, %v7547_v12  ;;  %v2660_v8 = vadd.f32 %v2644_v63, %v7411_v7  ;;  %v2649_v23 = vmax.f32 %v2629_v25, 0.0  ;;  %v2621_v39 = vadd.f32 %v7344_v55, %v2620_v5  ;;  %v5127_v33 = vpop.f32.mrf.mxu0  ;;  %5232 = vmatprep.subr.bf16.mxu0 %v7360_v18 }
 0x647   : > { %v2536_v52 = vadd.f32 %v2520_v46, %v7415_v35  ;;  %v2518_v3 = vmax.f32 %v2492_v48, 0.0  ;;  %v2503_v1 = vadd.f32 %v7344_v55, %v5127_v33  ;;  %v5159_v27 = vpop.f32.mrf.mxu1  ;;  %v2703_v41 = vpack.c.bf16 %v2531_v34, %v7551_v50 }
 0x648   : > { %v2665_v43 = vadd.f32 %v2649_v23, %v7418_v4  ;;  %v2647_v30 = vmax.f32 %v2621_v39, 0.0  ;;  %v2632_v60 = vadd.f32 %v7344_v55, %v5159_v27  ;;  %v2494_v63 = vpop.f32.mrf.mxu0  ;;  %v2711_v25 = vpack.c.bf16 %v2660_v8, %v2659_v20  ;;  %5263 = vmatpush3.bf16.msra.mxu1 %v7334_v42 }
 0x649   : > { %v2534_v38 = vadd.f32 %v2518_v3, %v7422_v29  ;;  %v2521_v5 = vmax.f32 %v2503_v1, 0.0  ;;  %v2495_v46 = vadd.f32 %v7344_v55, %v2494_v63  ;;  %v2623_v48 = vpop.f32.mrf.mxu1  ;;  %5184 = vmatprep.mubr.bf16.mxu0 %v2703_v41  ;;  %5264 = vmatprep.subr.bf16.mxu1 %v7360_v18  ;;  %v7595_v33 = vadd.f32 %v7543_v44, %v7375_v54 }
 0x64a   : > { %v2663_v23 = vadd.f32 %v2647_v30, %v7425_v16  ;;  %v2650_v39 = vmax.f32 %v2632_v60, 0.0  ;;  %v2624_v27 = vadd.f32 %v7344_v55, %v2623_v48  ;;  %5216 = vmatprep.mubr.bf16.mxu1 %v2711_v25  ;;  %5185 = vmatmul.mubr.bf16.gmra.mxu0 %v2704_v57  ;;  %v7601_v42 = vadd.f32 %v7547_v12, %v7381_v59 }
 0x64b   : > { %v2537_v3 = vadd.f32 %v2521_v5, %v7428_v49  ;;  %v2519_v1 = vmax.f32 %v2495_v46, 0.0  ;;  %5217 = vmatmul.mubr.bf16.gmra.mxu1 %v2712_v56  ;;  %5233 = vmatpush3.bf16.msra.mxu0 %v7360_v18  ;;  %v7607_v54 = vadd.f32 %v7551_v50, %v7387_v36  ;;  %v7610_v44 = vadd.f32 %v2659_v20, %v7391_v0 }
 0x64c   : > { %v2666_v41 = vadd.f32 %v2650_v39, %v7435_v19  ;;  %v2648_v57 = vmax.f32 %v2624_v27, 0.0  ;;  %5265 = vmatpush3.bf16.msra.mxu1 %v7360_v18  ;;  %5234 = vmatprep.subr.bf16.mxu0 %v7395_v10  ;;  %v7616_v59 = vadd.f32 %v2533_v62, %v7400_v40  ;;  %v7619_v12 = vadd.f32 %v2662_v61, %v7403_v45 }
 0x64d   : > { %v2706_v56 = vpack.c.bf16 %v2537_v3, %v2536_v52  ;;  %v2535_v36 = vadd.f32 %v2519_v1, %v7438_v6  ;;  %5266 = vmatprep.subr.bf16.mxu1 %v7395_v10  ;;  %v7624_v0 = vadd.f32 %v2531_v34, %v7408_v53  ;;  %v7627_v50 = vadd.f32 %v2660_v8, %v7411_v7 }
 0x64e   : > { %v2714_v18 = vpack.c.bf16 %v2666_v41, %v2665_v43  ;;  %v2664_v20 = vadd.f32 %v2648_v57, %v7442_v13  ;;  %v7631_v40 = vadd.f32 %v2536_v52, %v7415_v35  ;;  %v7634_v45 = vadd.f32 %v2665_v43, %v7418_v4 }
 0x64f   : > { %v2705_v62 = vpack.c.bf16 %v2535_v36, %v2534_v38  ;;  %5235 = vmatpush3.bf16.msra.mxu0 %v7395_v10  ;;  %v7638_v61 = vadd.f32 %v2534_v38, %v7422_v29  ;;  %v7641_v53 = vadd.f32 %v2663_v23, %v7425_v16  ;;  %v7644_v7 = vadd.f32 %v2537_v3, %v7428_v49 }
 0x650   : > { %v2713_v34 = vpack.c.bf16 %v2664_v20, %v2663_v23  ;;  %5267 = vmatpush3.bf16.msra.mxu1 %v7395_v10  ;;  %5236 = vmatprep.subr.bf16.mxu0 %v7431_v26  ;;  %v7649_v35 = vadd.f32 %v2666_v41, %v7435_v19  ;;  %v7652_v4 = vadd.f32 %v2535_v36, %v7438_v6  ;;  %v7664_v10 = vld [vmem:[#allocation8 + $0x38] sm:$0xff]  }
 0x651   : > { %5188 = vmatprep.mubr.bf16.mxu0 %v2705_v62  ;;  %5268 = vmatprep.subr.bf16.mxu1 %v7431_v26  ;;  %v7656_v29 = vadd.f32 %v2664_v20, %v7442_v13 }
 0x652   : > { %5220 = vmatprep.mubr.bf16.mxu1 %v2713_v34  ;;  %5189 = vmatmul.mubr.bf16.gmra.mxu0 %v2706_v56 }
 0x653   : > { %5221 = vmatmul.mubr.bf16.gmra.mxu1 %v2714_v18  ;;  %5237 = vmatpush3.bf16.msra.mxu0 %v7431_v26 }
 0x654   : > { %5269 = vmatpush3.bf16.msra.mxu1 %v7431_v26  ;;  %5238 = vmatprep.subr.bf16.mxu0 %v7446_v14 }
 0x655   : > { %5270 = vmatprep.subr.bf16.mxu1 %v7446_v14 }
 0x657   : > { %5239 = vmatpush3.bf16.msra.mxu0 %v7446_v14 }
 0x658   : > { %5271 = vmatpush3.bf16.msra.mxu1 %v7446_v14  ;;  %5288 = vmatprep.subr.bf16.mxu0 %v7664_v10 }
 0x659   : > { %5320 = vmatprep.subr.bf16.mxu1 %v7664_v10 }
 0x6f8   : > { %v5178_v16 = vpop.f32.mrf.mxu0  ;;  %v5210_v49 = vpop.f32.mrf.mxu1 }
 0x6f9   : > { %v2758_v19 = vadd.f32 %v7344_v55, %v5178_v16  ;;  %v2887_v26 = vadd.f32 %v7344_v55, %v5210_v49 }
 0x6fa   : > { %v2749_v6 = vpop.f32.mrf.mxu0  ;;  %v2878_v13 = vpop.f32.mrf.mxu1 }
 0x6fb   : > { %v2814_v8 = vmax.f32 %v2758_v19, 0.0  ;;  %v2943_v52 = vmax.f32 %v2887_v26, 0.0  ;;  %v2750_v43 = vadd.f32 %v7344_v55, %v2749_v6  ;;  %v2879_v14 = vadd.f32 %v7344_v55, %v2878_v13 }
 0x6fc   : > { %v5179_v30 = vpop.f32.mrf.mxu0  ;;  %v5211_v60 = vpop.f32.mrf.mxu1 }
 0x6fd   : > { %v2830_v63 = vadd.f32 %v2814_v8, %v7467_v31  ;;  %v2959_v25 = vadd.f32 %v2943_v52, %v7470_v51  ;;  %v2812_v38 = vmax.f32 %v2750_v43, 0.0  ;;  %v2941_v5 = vmax.f32 %v2879_v14, 0.0 }
 0x6fe   : > { %v2761_v46 = vadd.f32 %v7344_v55, %v5179_v30  ;;  %v2890_v48 = vadd.f32 %v7344_v55, %v5211_v60  ;;  %v2752_v23 = vpop.f32.mrf.mxu0  ;;  %v2881_v39 = vpop.f32.mrf.mxu1 }
 0x6ff   : > { %v2828_v27 = vadd.f32 %v2812_v38, %v7473_v24  ;;  %v2957_v3 = vadd.f32 %v2941_v5, %v7476_v37  ;;  %v2753_v1 = vadd.f32 %v7344_v55, %v2752_v23  ;;  %v2882_v41 = vadd.f32 %v7344_v55, %v2881_v39  ;;  %v5466_v39 = vld [vmem:[#allocation8 + $0x30] sm:$0xff]  }
 0x700   : > { %v2815_v57 = vmax.f32 %v2761_v46, 0.0  ;;  %v2944_v56 = vmax.f32 %v2890_v48, 0.0  ;;  %v7681_v36 = vadd.f32 %v2830_v63, %v7467_v31  ;;  %v7684_v18 = vadd.f32 %v2959_v25, %v7470_v51 }
 0x701   : > { %v2813_v20 = vmax.f32 %v2753_v1, 0.0  ;;  %v2942_v62 = vmax.f32 %v2882_v41, 0.0  ;;  %v7687_v34 = vadd.f32 %v2828_v27, %v7473_v24  ;;  %v7690_v16 = vadd.f32 %v2957_v3, %v7476_v37 }
 0x702   : > { %v2831_v49 = vadd.f32 %v2815_v57, %v7485_v21  ;;  %v2960_v19 = vadd.f32 %v2944_v56, %v7490_v47  ;;  %v5182_v26 = vpop.f32.mrf.mxu0 }
 0x703   : > { %v2829_v6 = vadd.f32 %v2813_v20, %v7493_v22  ;;  %v2958_v31 = vadd.f32 %v2942_v62, %v7500_v58  ;;  %v2774_v51 = vadd.f32 %v7344_v55, %v5182_v26  ;;  %v5214_v13 = vpop.f32.mrf.mxu1  ;;  %v8465_v26 = vld [vmem:[#allocation18_spill] sm:$0xff] }
 0x704   : > { %v3006_v8 = vpack.c.bf16 %v2831_v49, %v2830_v63  ;;  %v3014_v52 = vpack.c.bf16 %v2960_v19, %v2959_v25  ;;  %v2903_v24 = vadd.f32 %v7344_v55, %v5214_v13  ;;  %v2765_v43 = vpop.f32.mrf.mxu0  ;;  %v7699_v37 = vadd.f32 %v2831_v49, %v7485_v21 }
 0x705   : > { %v2818_v14 = vmax.f32 %v2774_v51, 0.0  ;;  %v2766_v30 = vadd.f32 %v7344_v55, %v2765_v43  ;;  %v2894_v60 = vpop.f32.mrf.mxu1  ;;  %v3005_v38 = vpack.c.bf16 %v2829_v6, %v2828_v27  ;;  %v3013_v5 = vpack.c.bf16 %v2958_v31, %v2957_v3 }
 0x706   : > { %v2947_v46 = vmax.f32 %v2903_v24, 0.0  ;;  %v2895_v48 = vadd.f32 %v7344_v55, %v2894_v60  ;;  %v5183_v23 = vpop.f32.mrf.mxu0  ;;  %v7704_v63 = vadd.f32 %v2960_v19, %v7490_v47  ;;  %v7707_v25 = vadd.f32 %v2829_v6, %v7493_v22 }
 0x707   : > { %v7710_v21 = vadd.f32 %v2818_v14, %v7512_v28  ;;  %v2816_v1 = vmax.f32 %v2766_v30, 0.0  ;;  %v2777_v41 = vadd.f32 %v7344_v55, %v5183_v23  ;;  %v5215_v57 = vpop.f32.mrf.mxu1  ;;  %5240 = vmatprep.mubr.bf16.mxu0 %v3005_v38  ;;  %5272 = vmatprep.mubr.bf16.mxu1 %v3013_v5  ;;  %v7714_v27 = vadd.f32 %v2958_v31, %v7500_v58 }
 0x708   : > { %v7717_v3 = vadd.f32 %v2947_v46, %v7520_v11  ;;  %v2945_v47 = vmax.f32 %v2895_v48, 0.0  ;;  %v2906_v56 = vadd.f32 %v7344_v55, %v5215_v57  ;;  %v2768_v22 = vpop.f32.mrf.mxu0  ;;  %5241 = vmatmul.mubr.bf16.vlgmr.msra.gmra.mxu0 %v3006_v8  ;;  %5273 = vmatmul.mubr.bf16.vlgmr.msra.gmra.mxu1 %v3014_v52  ;;  %v5467_v8 = vld [vmem:[#allocation8 + $0x28] sm:$0xff]  }
 0x709   : > { %v2832_v20 = vadd.f32 %v2816_v1, %v7525_v9  ;;  %v2819_v62 = vmax.f32 %v2777_v41, 0.0  ;;  %v2769_v49 = vadd.f32 %v7344_v55, %v2768_v22  ;;  %v2897_v19 = vpop.f32.mrf.mxu1  ;;  %5289 = vmatpush3.bf16.msra.mxu0 %v7664_v10  ;;  %5321 = vmatpush3.bf16.msra.mxu1 %v7664_v10  ;;  %v7726_v58 = vadd.f32 %v7710_v21, %v7512_v28 }
 0x70a   : > { %v2961_v6 = vadd.f32 %v2945_v47, %v8465_v26  ;;  %v2948_v31 = vmax.f32 %v2906_v56, 0.0  ;;  %v2898_v51 = vadd.f32 %v7344_v55, %v2897_v19  ;;  %v5186_v13 = vpop.f32.mrf.mxu0  ;;  %5290 = vmatprep.subr.bf16.mxu0 %v5466_v39  ;;  %5322 = vmatprep.subr.bf16.mxu1 %v5466_v39  ;;  %v7732_v52 = vadd.f32 %v7717_v3, %v7520_v11 }
 0x70b   : > { %v2835_v24 = vadd.f32 %v2819_v62, %v7556_v32  ;;  %v2817_v10 = vmax.f32 %v2769_v49, 0.0  ;;  %v2790_v43 = vadd.f32 %v7344_v55, %v5186_v13  ;;  %v5218_v28 = vpop.f32.mrf.mxu1  ;;  %v7737_v14 = vadd.f32 %v2832_v20, %v7525_v9 }
 0x70c   : > { %v2964_v30 = vadd.f32 %v2948_v31, %v7561_v15  ;;  %v2946_v60 = vmax.f32 %v2898_v51, 0.0  ;;  %v2919_v38 = vadd.f32 %v7344_v55, %v5218_v28  ;;  %v2781_v5 = vpop.f32.mrf.mxu0  ;;  %v7742_v46 = vadd.f32 %v2961_v6, %v8465_v26  ;;  %v5468_v31 = vld [vmem:[#allocation8 + $0x20] sm:$0xff]  }
 0x70d   : > { %v3008_v11 = vpack.c.bf16 %v2835_v24, %v7710_v21  ;;  %v2833_v48 = vadd.f32 %v2817_v10, %v7567_v17  ;;  %v2822_v23 = vmax.f32 %v2790_v43, 0.0  ;;  %v2782_v1 = vadd.f32 %v7344_v55, %v2781_v5  ;;  %v2910_v41 = vpop.f32.mrf.mxu1  ;;  %5291 = vmatpush3.bf16.msra.mxu0 %v5466_v39  ;;  %5323 = vmatpush3.bf16.msra.mxu1 %v5466_v39 }
 0x70e   : > { %v3016_v9 = vpack.c.bf16 %v2964_v30, %v7717_v3  ;;  %v2962_v57 = vadd.f32 %v2946_v60, %v7573_v2  ;;  %v2951_v47 = vmax.f32 %v2919_v38, 0.0  ;;  %v2911_v56 = vadd.f32 %v7344_v55, %v2910_v41  ;;  %v5187_v22 = vpop.f32.mrf.mxu0  ;;  %5292 = vmatprep.subr.bf16.mxu0 %v5467_v8  ;;  %5324 = vmatprep.subr.bf16.mxu1 %v5467_v8  ;;  %v5469_v41 = vld [vmem:[#allocation8 + $0x18] sm:$0xff]  }
 0x70f   : > { %v7751_v21 = vadd.f32 %v2822_v23, %v7595_v33  ;;  %v2820_v62 = vmax.f32 %v2782_v1, 0.0  ;;  %v2793_v49 = vadd.f32 %v7344_v55, %v5187_v22  ;;  %v5219_v19 = vpop.f32.mrf.mxu1  ;;  %v3007_v26 = vpack.c.bf16 %v2833_v48, %v2832_v20 }
 0x710   : > { %v7755_v39 = vadd.f32 %v2951_v47, %v7601_v42  ;;  %v2949_v3 = vmax.f32 %v2911_v56, 0.0  ;;  %v2922_v51 = vadd.f32 %v7344_v55, %v5219_v19  ;;  %v2784_v13 = vpop.f32.mrf.mxu0  ;;  %v3015_v10 = vpack.c.bf16 %v2962_v57, %v2961_v6 }
 0x711   : > { %v7759_v43 = vadd.f32 %v2820_v62, %v7607_v54  ;;  %v2823_v28 = vmax.f32 %v2793_v49, 0.0  ;;  %v2785_v60 = vadd.f32 %v7344_v55, %v2784_v13  ;;  %v2913_v38 = vpop.f32.mrf.mxu1  ;;  %5244 = vmatprep.mubr.bf16.mxu0 %v3007_v26  ;;  %5293 = vmatpush3.bf16.msra.mxu0 %v5467_v8  ;;  %v7763_v20 = vadd.f32 %v2835_v24, %v7556_v32 }
 0x712   : > { %v7766_v5 = vadd.f32 %v2949_v3, %v7610_v44  ;;  %v2952_v23 = vmax.f32 %v2922_v51, 0.0  ;;  %v2914_v1 = vadd.f32 %v7344_v55, %v2913_v38  ;;  %5276 = vmatprep.mubr.bf16.mxu1 %v3015_v10  ;;  %v5190_v6 = vpop.f32.mrf.mxu0  ;;  %5245 = vmatmul.mubr.bf16.gmra.mxu0 %v3008_v11  ;;  %v7770_v47 = vadd.f32 %v2964_v30, %v7561_v15 }
 0x713   : > { %v2839_v56 = vadd.f32 %v2823_v28, %v7616_v59  ;;  %v2821_v22 = vmax.f32 %v2785_v60, 0.0  ;;  %v2806_v62 = vadd.f32 %v7344_v55, %v5190_v6  ;;  %v5222_v32 = vpop.f32.mrf.mxu1  ;;  %5277 = vmatmul.mubr.bf16.gmra.mxu1 %v3016_v9  ;;  %5294 = vmatprep.subr.bf16.mxu0 %v5468_v31  ;;  %v7775_v24 = vadd.f32 %v2833_v48, %v7567_v17 }
 0x714   : > { %v2968_v49 = vadd.f32 %v2952_v23, %v7619_v12  ;;  %v2950_v19 = vmax.f32 %v2914_v1, 0.0  ;;  %v2935_v11 = vadd.f32 %v7344_v55, %v5222_v32  ;;  %v2797_v26 = vpop.f32.mrf.mxu0  ;;  %5325 = vmatpush3.bf16.msra.mxu1 %v5467_v8  ;;  %v7780_v15 = vadd.f32 %v2962_v57, %v7573_v2 }
 0x715   : > { %v3010_v30 = vpack.c.bf16 %v2839_v56, %v7751_v21  ;;  %v2837_v3 = vadd.f32 %v2821_v22, %v7624_v0  ;;  %v2826_v51 = vmax.f32 %v2806_v62, 0.0  ;;  %v2798_v9 = vadd.f32 %v7344_v55, %v2797_v26  ;;  %v2926_v13 = vpop.f32.mrf.mxu1  ;;  %5326 = vmatprep.subr.bf16.mxu1 %v5468_v31  ;;  %5295 = vmatpush3.bf16.msra.mxu0 %v5468_v31 }
 0x716   : > { %v3018_v17 = vpack.c.bf16 %v2968_v49, %v7755_v39  ;;  %v2966_v48 = vadd.f32 %v2950_v19, %v7627_v50  ;;  %v2955_v10 = vmax.f32 %v2935_v11, 0.0  ;;  %v2927_v8 = vadd.f32 %v7344_v55, %v2926_v13  ;;  %v5191_v28 = vpop.f32.mrf.mxu0  ;;  %5296 = vmatprep.subr.bf16.mxu0 %v5469_v41 }
 0x717   : > { %v2842_v2 = vadd.f32 %v2826_v51, %v7631_v40  ;;  %v2824_v57 = vmax.f32 %v2798_v9, 0.0  ;;  %v2809_v60 = vadd.f32 %v7344_v55, %v5191_v28  ;;  %v5223_v38 = vpop.f32.mrf.mxu1  ;;  %v3009_v23 = vpack.c.bf16 %v2837_v3, %v7759_v43 }
 0x718   : > { %v2971_v1 = vadd.f32 %v2955_v10, %v7634_v45  ;;  %v2953_v6 = vmax.f32 %v2927_v8, 0.0  ;;  %v2938_v22 = vadd.f32 %v7344_v55, %v5223_v38  ;;  %v2800_v62 = vpop.f32.mrf.mxu0  ;;  %v3017_v32 = vpack.c.bf16 %v2966_v48, %v7766_v5  ;;  %5327 = vmatpush3.bf16.msra.mxu1 %v5468_v31 }
 0x719   : > { %v2840_v19 = vadd.f32 %v2824_v57, %v7638_v61  ;;  %v2827_v11 = vmax.f32 %v2809_v60, 0.0  ;;  %v2801_v26 = vadd.f32 %v7344_v55, %v2800_v62  ;;  %v2929_v51 = vpop.f32.mrf.mxu1  ;;  %5248 = vmatprep.mubr.bf16.mxu0 %v3009_v23  ;;  %5328 = vmatprep.subr.bf16.mxu1 %v5469_v41  ;;  %v7798_v9 = vadd.f32 %v7751_v21, %v7595_v33 }
 0x71a   : > { %v2969_v13 = vadd.f32 %v2953_v6, %v7641_v53  ;;  %v2956_v10 = vmax.f32 %v2938_v22, 0.0  ;;  %v2930_v8 = vadd.f32 %v7344_v55, %v2929_v51  ;;  %5280 = vmatprep.mubr.bf16.mxu1 %v3017_v32  ;;  %5249 = vmatmul.mubr.bf16.gmra.mxu0 %v3010_v30  ;;  %v7804_v31 = vadd.f32 %v7755_v39, %v7601_v42 }
 0x71b   : > { %v2843_v28 = vadd.f32 %v2827_v11, %v7644_v7  ;;  %v2825_v57 = vmax.f32 %v2801_v26, 0.0  ;;  %5281 = vmatmul.mubr.bf16.gmra.mxu1 %v3018_v17  ;;  %5297 = vmatpush3.bf16.msra.mxu0 %v5469_v41  ;;  %v7809_v33 = vadd.f32 %v7759_v43, %v7607_v54  ;;  %v7813_v21 = vadd.f32 %v7766_v5, %v7610_v44 }
 0x71c   : > { %v2972_v55 = vadd.f32 %v2956_v10, %v7649_v35  ;;  %v2954_v30 = vmax.f32 %v2930_v8, 0.0  ;;  %5329 = vmatpush3.bf16.msra.mxu1 %v5469_v41  ;;  %v7817_v42 = vadd.f32 %v2839_v56, %v7616_v59  ;;  %v7820_v39 = vadd.f32 %v2968_v49, %v7619_v12 }
 0x71d   : > { %v3012_v17 = vpack.c.bf16 %v2843_v28, %v2842_v2  ;;  %v2841_v60 = vadd.f32 %v2825_v57, %v7652_v4  ;;  %v7824_v54 = vadd.f32 %v2837_v3, %v7624_v0  ;;  %v7827_v43 = vadd.f32 %v2966_v48, %v7627_v50 }
 0x71e   : > { %v3020_v44 = vpack.c.bf16 %v2972_v55, %v2971_v1  ;;  %v2970_v5 = vadd.f32 %v2954_v30, %v7656_v29  ;;  %v7831_v41 = vadd.f32 %v2842_v2, %v7631_v40  ;;  %v7834_v59 = vadd.f32 %v2971_v1, %v7634_v45 }
 0x71f   : > { %v3011_v12 = vpack.c.bf16 %v2841_v60, %v2840_v19  ;;  %v7837_v56 = vadd.f32 %v2840_v19, %v7638_v61  ;;  %v7840_v49 = vadd.f32 %v2969_v13, %v7641_v53  ;;  %v7843_v0 = vadd.f32 %v2843_v28, %v7644_v7  ;;  %v5470_v61 = vld [vmem:[#allocation8 + $0x10] sm:$0xff]   ;;  %v5471_v53 = vld [vmem:[#allocation8 + $0x8] sm:$0xff]   ;;  %v5472_v7 = vld [vmem:[#allocation8] sm:$0xff]  }
 0x720   : > { %v3019_v50 = vpack.c.bf16 %v2970_v5, %v2969_v13  ;;  %v7846_v3 = vadd.f32 %v2972_v55, %v7649_v35  ;;  %v7849_v40 = vadd.f32 %v2841_v60, %v7652_v4  ;;  %v7852_v45 = vadd.f32 %v2970_v5, %v7656_v29  ;;  %5298 = vmatprep.subr.bf16.mxu0 %v5470_v61  ;;  %v7857_v29 = vld [vmem:[%s8357_s4] ss:$0 sm:$0xff] }
 0x721   : > { %5252 = vmatprep.mubr.bf16.mxu0 %v3011_v12  ;;  %5330 = vmatprep.subr.bf16.mxu1 %v5470_v61 }
 0x722   : > { %5284 = vmatprep.mubr.bf16.mxu1 %v3019_v50  ;;  %5253 = vmatmul.mubr.bf16.gmra.mxu0 %v3012_v17 }
 0x723   : > { %5285 = vmatmul.mubr.bf16.gmra.mxu1 %v3020_v44  ;;  %5299 = vmatpush3.bf16.msra.mxu0 %v5470_v61 }
 0x724   : > { %5331 = vmatpush3.bf16.msra.mxu1 %v5470_v61  ;;  %5300 = vmatprep.subr.bf16.mxu0 %v5471_v53 }
 0x725   : > { %5332 = vmatprep.subr.bf16.mxu1 %v5471_v53 }
 0x727   : > { %5301 = vmatpush3.bf16.msra.mxu0 %v5471_v53 }
 0x728   : > { %5333 = vmatpush3.bf16.msra.mxu1 %v5471_v53  ;;  %5302 = vmatprep.subr.bf16.mxu0 %v5472_v7 }
 0x729   : > { %5334 = vmatprep.subr.bf16.mxu1 %v5472_v7 }
 0x72b   : > { %5303 = vmatpush3.bf16.msra.mxu0 %v5472_v7 }
 0x72c   : > { %5335 = vmatpush3.bf16.msra.mxu1 %v5472_v7 }
 0x7c8   : > { %v5242_v35 = vpop.f32.mrf.mxu0  ;;  %v5274_v4 = vpop.f32.mrf.mxu1 }
 0x7c9   : > { %v3064_v48 = vadd.f32 %v7857_v29, %v5242_v35  ;;  %v3193_v2 = vadd.f32 %v7857_v29, %v5274_v4 }
 0x7ca   : > { %v3055_v38 = vpop.f32.mrf.mxu0  ;;  %v3184_v23 = vpop.f32.mrf.mxu1 }
 0x7cb   : > { %v3056_v1 = vadd.f32 %v7857_v29, %v3055_v38  ;;  %v3185_v6 = vadd.f32 %v7857_v29, %v3184_v23  ;;  %v3120_v32 = vmax.f32 %v3064_v48, 0.0  ;;  %v3249_v19 = vmax.f32 %v3193_v2, 0.0 }
 0x7cc   : > { %v5243_v22 = vpop.f32.mrf.mxu0  ;;  %v5275_v62 = vpop.f32.mrf.mxu1 }
 0x7cd   : > { %v3118_v11 = vmax.f32 %v3056_v1, 0.0  ;;  %v3067_v26 = vadd.f32 %v7857_v29, %v5243_v22  ;;  %v3196_v51 = vadd.f32 %v7857_v29, %v5275_v62  ;;  %v3247_v8 = vmax.f32 %v3185_v6, 0.0 }
 0x7ce   : > { %v3058_v13 = vpop.f32.mrf.mxu0  ;;  %v3187_v10 = vpop.f32.mrf.mxu1  ;;  %v3136_v17 = vadd.f32 %v3120_v32, %v7681_v36  ;;  %v3265_v5 = vadd.f32 %v3249_v19, %v7684_v18 }
 0x7cf   : > { %v3059_v28 = vadd.f32 %v7857_v29, %v3058_v13  ;;  %v3188_v57 = vadd.f32 %v7857_v29, %v3187_v10  ;;  %v3121_v55 = vmax.f32 %v3067_v26, 0.0  ;;  %v3250_v30 = vmax.f32 %v3196_v51, 0.0 }
 0x7d0   : > { %v3134_v12 = vadd.f32 %v3118_v11, %v7687_v34  ;;  %v3263_v7 = vadd.f32 %v3247_v8, %v7690_v16 }
 0x7d1   : > { %v3119_v60 = vmax.f32 %v3059_v28, 0.0  ;;  %v3248_v44 = vmax.f32 %v3188_v57, 0.0  ;;  %v3137_v50 = vadd.f32 %v3121_v55, %v7699_v37  ;;  %v3266_v61 = vadd.f32 %v3250_v30, %v7704_v63 }
 0x7d2   : > { %v5246_v53 = vpop.f32.mrf.mxu0 }
 0x7d3   : > { %v3135_v35 = vadd.f32 %v3119_v60, %v7707_v25  ;;  %v3264_v4 = vadd.f32 %v3248_v44, %v7714_v27  ;;  %v3080_v48 = vadd.f32 %v7857_v29, %v5246_v53  ;;  %v5278_v36 = vpop.f32.mrf.mxu1  ;;  %v3280_v2 = vpack.c.bf16 %v3137_v50, %v3136_v17 }
 0x7d4   : > { %v3433_v38 = vpack.c.bf16 %v3266_v61, %v3265_v5  ;;  %v3209_v18 = vadd.f32 %v7857_v29, %v5278_v36  ;;  %v3071_v23 = vpop.f32.mrf.mxu0 }
 0x7d5   : > { %v3072_v34 = vadd.f32 %v7857_v29, %v3071_v23  ;;  %v3200_v37 = vpop.f32.mrf.mxu1  ;;  %v3279_v1 = vpack.c.bf16 %v3135_v35, %v3134_v12  ;;  %v3432_v63 = vpack.c.bf16 %v3264_v4, %v3263_v7  ;;  %v3124_v22 = vmax.f32 %v3080_v48, 0.0 }
 0x7d6   : > { %v3201_v6 = vadd.f32 %v7857_v29, %v3200_v37  ;;  %v5247_v16 = vpop.f32.mrf.mxu0  ;;  %v3253_v62 = vmax.f32 %v3209_v18, 0.0 }
 0x7d7   : > { %v3083_v25 = vadd.f32 %v7857_v29, %v5247_v16  ;;  %v5279_v27 = vpop.f32.mrf.mxu1  ;;  %5304 = vmatprep.mubr.bf16.mxu0 %v3279_v1  ;;  %5336 = vmatprep.mubr.bf16.mxu1 %v3432_v63  ;;  %v3122_v11 = vmax.f32 %v3072_v34, 0.0  ;;  %v3140_v55 = vadd.f32 %v3124_v22, %v7726_v58 }
 0x7d8   : > { %v3212_v32 = vadd.f32 %v7857_v29, %v5279_v27  ;;  %v3074_v19 = vpop.f32.mrf.mxu0  ;;  %5305 = vmatmul.mubr.bf16.vlgmr.msra.gmra.mxu0 %v3280_v2  ;;  %5337 = vmatmul.mubr.bf16.vlgmr.msra.gmra.mxu1 %v3433_v38  ;;  %v3251_v10 = vmax.f32 %v3201_v6, 0.0  ;;  %v3269_v5 = vadd.f32 %v3253_v62, %v7732_v52 }
 0x7d9   : > { %v3125_v26 = vmax.f32 %v3083_v25, 0.0  ;;  %v3075_v51 = vadd.f32 %v7857_v29, %v3074_v19  ;;  %v3203_v13 = vpop.f32.mrf.mxu1  ;;  %v3138_v7 = vadd.f32 %v3122_v11, %v7737_v14 }
 0x7da   : > { %v3254_v8 = vmax.f32 %v3212_v32, 0.0  ;;  %v3204_v28 = vadd.f32 %v7857_v29, %v3203_v13  ;;  %v5250_v57 = vpop.f32.mrf.mxu0  ;;  %v3267_v48 = vadd.f32 %v3251_v10, %v7742_v46 }
 0x7db   : > { %v3141_v30 = vadd.f32 %v3125_v26, %v7763_v20  ;;  %v3123_v17 = vmax.f32 %v3075_v51, 0.0  ;;  %v3096_v60 = vadd.f32 %v7857_v29, %v5250_v57  ;;  %v5282_v44 = vpop.f32.mrf.mxu1 }
 0x7dc   : > { %v3270_v12 = vadd.f32 %v3254_v8, %v7770_v47  ;;  %v3252_v50 = vmax.f32 %v3204_v28, 0.0  ;;  %v3225_v61 = vadd.f32 %v7857_v29, %v5282_v44  ;;  %v3087_v53 = vpop.f32.mrf.mxu0 }
 0x7dd   : > { %v3282_v35 = vpack.c.bf16 %v3141_v30, %v3140_v55  ;;  %v3139_v4 = vadd.f32 %v3123_v17, %v7775_v24  ;;  %v3088_v58 = vadd.f32 %v7857_v29, %v3087_v53  ;;  %v3216_v20 = vpop.f32.mrf.mxu1  ;;  %v3128_v38 = vmax.f32 %v3096_v60, 0.0 }
 0x7de   : > { %v3435_v36 = vpack.c.bf16 %v3270_v12, %v3269_v5  ;;  %v3268_v2 = vadd.f32 %v3252_v50, %v7780_v15  ;;  %v3217_v52 = vadd.f32 %v7857_v29, %v3216_v20  ;;  %v5251_v47 = vpop.f32.mrf.mxu0  ;;  %v3257_v14 = vmax.f32 %v3225_v61, 0.0 }
 0x7df   : > { %v3099_v18 = vadd.f32 %v7857_v29, %v5251_v47  ;;  %v5283_v23 = vpop.f32.mrf.mxu1  ;;  %v3281_v34 = vpack.c.bf16 %v3139_v4, %v3138_v7  ;;  %v3126_v63 = vmax.f32 %v3088_v58, 0.0  ;;  %v3144_v62 = vadd.f32 %v3128_v38, %v7798_v9 }
 0x7e0   : > { %v3228_v37 = vadd.f32 %v7857_v29, %v5283_v23  ;;  %v3090_v24 = vpop.f32.mrf.mxu0  ;;  %v3434_v1 = vpack.c.bf16 %v3268_v2, %v3267_v48  ;;  %v3255_v15 = vmax.f32 %v3217_v52, 0.0  ;;  %v3273_v51 = vadd.f32 %v3257_v14, %v7804_v31 }
 0x7e1   : > { %v3129_v6 = vmax.f32 %v3099_v18, 0.0  ;;  %v3091_v46 = vadd.f32 %v7857_v29, %v3090_v24  ;;  %v3219_v16 = vpop.f32.mrf.mxu1  ;;  %5308 = vmatprep.mubr.bf16.mxu0 %v3281_v34  ;;  %v3142_v57 = vadd.f32 %v3126_v63, %v7809_v33 }
 0x7e2   : > { %v3258_v22 = vmax.f32 %v3228_v37, 0.0  ;;  %v3220_v25 = vadd.f32 %v7857_v29, %v3219_v16  ;;  %5340 = vmatprep.mubr.bf16.mxu1 %v3434_v1  ;;  %v5254_v27 = vpop.f32.mrf.mxu0  ;;  %5309 = vmatmul.mubr.bf16.gmra.mxu0 %v3282_v35  ;;  %v3271_v17 = vadd.f32 %v3255_v15, %v7813_v21 }
 0x7e3   : > { %v3145_v32 = vadd.f32 %v3129_v6, %v7817_v42  ;;  %v3127_v19 = vmax.f32 %v3091_v46, 0.0  ;;  %v3112_v11 = vadd.f32 %v7857_v29, %v5254_v27  ;;  %v5286_v26 = vpop.f32.mrf.mxu1  ;;  %5341 = vmatmul.mubr.bf16.gmra.mxu1 %v3435_v36 }
 0x7e4   : > { %v3274_v13 = vadd.f32 %v3258_v22, %v7820_v39  ;;  %v3256_v10 = vmax.f32 %v3220_v25, 0.0  ;;  %v3241_v8 = vadd.f32 %v7857_v29, %v5286_v26  ;;  %v3103_v28 = vpop.f32.mrf.mxu0 }
 0x7e5   : > { %v3284_v55 = vpack.c.bf16 %v3145_v32, %v3144_v62  ;;  %v3143_v9 = vadd.f32 %v3127_v19, %v7824_v54  ;;  %v3104_v42 = vadd.f32 %v7857_v29, %v3103_v28  ;;  %v3232_v30 = vpop.f32.mrf.mxu1  ;;  %v3132_v5 = vmax.f32 %v3112_v11, 0.0 }
 0x7e6   : > { %v3437_v60 = vpack.c.bf16 %v3274_v13, %v3273_v51  ;;  %v3272_v44 = vadd.f32 %v3256_v10, %v7827_v43  ;;  %v3233_v31 = vadd.f32 %v7857_v29, %v3232_v30  ;;  %v5255_v39 = vpop.f32.mrf.mxu0  ;;  %v3261_v33 = vmax.f32 %v3241_v8, 0.0 }
 0x7e7   : > { %v3115_v12 = vadd.f32 %v7857_v29, %v5255_v39  ;;  %v5287_v50 = vpop.f32.mrf.mxu1  ;;  %v3283_v61 = vpack.c.bf16 %v3143_v9, %v3142_v57  ;;  %v3130_v35 = vmax.f32 %v3104_v42, 0.0  ;;  %v3148_v36 = vadd.f32 %v3132_v5, %v7831_v41 }
 0x7e8   : > { %v3244_v53 = vadd.f32 %v7857_v29, %v5287_v50  ;;  %v3106_v54 = vpop.f32.mrf.mxu0  ;;  %v3436_v7 = vpack.c.bf16 %v3272_v44, %v3271_v17  ;;  %v3259_v43 = vmax.f32 %v3233_v31, 0.0  ;;  %v3277_v47 = vadd.f32 %v3261_v33, %v7834_v59 }
 0x7e9   : > { %v3133_v4 = vmax.f32 %v3115_v12, 0.0  ;;  %v3107_v21 = vadd.f32 %v7857_v29, %v3106_v54  ;;  %v3235_v58 = vpop.f32.mrf.mxu1  ;;  %5312 = vmatprep.mubr.bf16.mxu0 %v3283_v61  ;;  %v3146_v23 = vadd.f32 %v3130_v35, %v7837_v56  ;;  %v3537_v59 = vlaneseq  ;;  %v7928_v56 = vld [vmem:[%s8359_s6] ss:$0 sm:$0xff] }
 0x7ea   : > { %v3262_v20 = vmax.f32 %v3244_v53, 0.0  ;;  %v3236_v48 = vadd.f32 %v7857_v29, %v3235_v58  ;;  %5344 = vmatprep.mubr.bf16.mxu1 %v3436_v7  ;;  %5313 = vmatmul.mubr.bf16.gmra.mxu0 %v3284_v55  ;;  %v3275_v29 = vadd.f32 %v3259_v43, %v7840_v49 }
 0x7eb   : > { %v3149_v2 = vadd.f32 %v3133_v4, %v7843_v0  ;;  %v3131_v52 = vmax.f32 %v3107_v21, 0.0  ;;  %5345 = vmatmul.mubr.bf16.gmra.mxu1 %v3437_v60  ;;  %v7923_v0 = vand.u32 127, %v3537_v59 }
 0x7ec   : > { %v3278_v38 = vadd.f32 %v3262_v20, %v7846_v3  ;;  %v3260_v18 = vmax.f32 %v3236_v48, 0.0 }
 0x7ed   : > { %v3286_v34 = vpack.c.bf16 %v3149_v2, %v3148_v36  ;;  %v3147_v14 = vadd.f32 %v3131_v52, %v7849_v40  ;;  %vm3539_vm0 = vcmp.lt.s32.totalorder %v7923_v0, 8 }
 0x7ee   : > { %v3439_v37 = vpack.c.bf16 %v3278_v38, %v3277_v47  ;;  %v3276_v24 = vadd.f32 %v3260_v18, %v7852_v45 }
 0x7ef   : > { %v3285_v41 = vpack.c.bf16 %v3147_v14, %v3146_v23 }
 0x7f0   : > { %v3438_v1 = vpack.c.bf16 %v3276_v24, %v3275_v29 }
 0x7f1   : > { %5316 = vmatprep.mubr.bf16.mxu0 %v3285_v41 }
 0x7f2   : > { %5348 = vmatprep.mubr.bf16.mxu1 %v3438_v1  ;;  %5317 = vmatmul.mubr.bf16.gmra.mxu0 %v3286_v34 }
 0x7f3   : > { %5349 = vmatmul.mubr.bf16.gmra.mxu1 %v3439_v37 }
 0x898   : > { %v5306_v3 = vpop.f32.mrf.mxu0  ;;  %v5338_v40 = vpop.f32.mrf.mxu1 }
 0x899   : > { %v3378_v49 = vadd.f32 %v5306_v3, %v7928_v56  ;;  %v3483_v45 = vadd.f32 %v5338_v40, %v7928_v56 }
 0x89a   : > { %v3369_v63 = vpop.f32.mrf.mxu0  ;;  %v3474_v6 = vpop.f32.mrf.mxu1 }
 0x89b   : > { %v3370_v46 = vadd.f32 %v7928_v56, %v3369_v63  ;;  %v7936_v16 = vsel %vm3539_vm0, %v3483_v45, -1e+30  ;;  %v7940_v15 = vsel %vm3539_vm0, %v3378_v49, -1e+30  ;;  %v3475_v32 = vadd.f32 %v7928_v56, %v3474_v6 }
 0x89c   : > { %3816 = vmax.xlane.f32.xlu0 %v7936_v16  ;;  %v5339_v22 = vpop.f32.mrf.mxu1  ;;  %3560 = vmax.xlane.f32.xlu1 %v7940_v15  ;;  %v5307_v25 = vpop.f32.mrf.mxu0 }
 0x89d   : > { %v3381_v27 = vadd.f32 %v5307_v25, %v7928_v56  ;;  %v3486_v19 = vadd.f32 %v5339_v22, %v7928_v56  ;;  %v7953_v51 = vsel %vm3539_vm0, %v3370_v46, -1e+30  ;;  %v7965_v55 = vsel %vm3539_vm0, %v3475_v32, -1e+30 }
 0x89e   : > { %v3372_v62 = vpop.f32.mrf.mxu0  ;;  %v3477_v11 = vpop.f32.mrf.mxu1 }
 0x89f   : > { %v7949_v26 = vsel %vm3539_vm0, %v3381_v27, -1e+30  ;;  %v3373_v10 = vadd.f32 %v7928_v56, %v3372_v62  ;;  %v3478_v8 = vadd.f32 %v7928_v56, %v3477_v11  ;;  %v7961_v57 = vsel %vm3539_vm0, %v3486_v19, -1e+30 }
 0x8a0   : > { %3562 = vmax.xlane.f32.xlu1 %v7949_v26  ;;  %3556 = vmax.xlane.f32.xlu0 %v7953_v51 }
 0x8a1   : > { %v7973_v44 = vsel %vm3539_vm0, %v3478_v8, -1e+30  ;;  %v7977_v31 = vsel %vm3539_vm0, %v3373_v10, -1e+30 }
 0x8a2   : > { %v5310_v13 = vpop.f32.mrf.mxu0 }
 0x8a3   : > { %v5342_v28 = vpop.f32.mrf.mxu1  ;;  %v3394_v17 = vadd.f32 %v5310_v13, %v7928_v56 }
 0x8a4   : > { %v3385_v9 = vpop.f32.mrf.mxu0  ;;  %3818 = vmax.xlane.f32.xlu1 %v7961_v57  ;;  %3812 = vmax.xlane.f32.xlu0 %v7965_v55  ;;  %v3499_v12 = vadd.f32 %v5342_v28, %v7928_v56 }
 0x8a5   : > { %v3490_v42 = vpop.f32.mrf.mxu1  ;;  %v7989_v33 = vsel %vm3539_vm0, %v3394_v17, -1e+30  ;;  %v3386_v7 = vadd.f32 %v7928_v56, %v3385_v9 }
 0x8a6   : > { %v5311_v30 = vpop.f32.mrf.mxu0  ;;  %v8001_v21 = vsel %vm3539_vm0, %v3499_v12, -1e+30  ;;  %v3491_v20 = vadd.f32 %v7928_v56, %v3490_v42 }
 0x8a7   : > { %v3397_v60 = vadd.f32 %v5311_v30, %v7928_v56  ;;  %v5343_v39 = vpop.f32.mrf.mxu1  ;;  %v8013_v2 = vsel %vm3539_vm0, %v3386_v7, -1e+30 }
 0x8a8   : > { %v3388_v5 = vpop.f32.mrf.mxu0  ;;  %3814 = vmax.xlane.f32.xlu1 %v7973_v44  ;;  %3558 = vmax.xlane.f32.xlu0 %v7977_v31  ;;  %v3502_v50 = vadd.f32 %v5343_v39, %v7928_v56  ;;  %v8025_v34 = vsel %vm3539_vm0, %v3491_v20, -1e+30 }
 0x8a9   : > { %v7985_v61 = vsel %vm3539_vm0, %v3397_v60, -1e+30  ;;  %v3493_v53 = vpop.f32.mrf.mxu1  ;;  %v3389_v35 = vadd.f32 %v7928_v56, %v3388_v5 }
 0x8aa   : > { %v5314_v54 = vpop.f32.mrf.mxu0  ;;  %v7997_v4 = vsel %vm3539_vm0, %v3502_v50, -1e+30  ;;  %v3494_v48 = vadd.f32 %v7928_v56, %v3493_v53 }
 0x8ab   : > { %v5346_v58 = vpop.f32.mrf.mxu1  ;;  %v8009_v36 = vsel %vm3539_vm0, %v3389_v35, -1e+30  ;;  %v3410_v38 = vadd.f32 %v5314_v54, %v7928_v56 }
 0x8ac   : > { %3570 = vmax.xlane.f32.xlu1 %v7985_v61  ;;  %3568 = vmax.xlane.f32.xlu0 %v7989_v33  ;;  %v3401_v43 = vpop.f32.mrf.mxu0  ;;  %v8021_v23 = vsel %vm3539_vm0, %v3494_v48, -1e+30  ;;  %v3515_v37 = vadd.f32 %v5346_v58, %v7928_v56 }
 0x8ad   : > { %v3506_v52 = vpop.f32.mrf.mxu1  ;;  %v8037_v1 = vsel %vm3539_vm0, %v3410_v38, -1e+30  ;;  %v3402_v40 = vadd.f32 %v7928_v56, %v3401_v43 }
 0x8ae   : > { %v5315_v47 = vpop.f32.mrf.mxu0  ;;  %v8049_v63 = vsel %vm3539_vm0, %v3515_v37, -1e+30  ;;  %v3507_v22 = vadd.f32 %v7928_v56, %v3506_v52 }
 0x8af   : > { %v3413_v18 = vadd.f32 %v5315_v47, %v7928_v56  ;;  %v5347_v14 = vpop.f32.mrf.mxu1  ;;  %v8061_v62 = vsel %vm3539_vm0, %v3402_v40, -1e+30 }
 0x8b0   : > { %3826 = vmax.xlane.f32.xlu1 %v7997_v4  ;;  %3824 = vmax.xlane.f32.xlu0 %v8001_v21  ;;  %v3404_v29 = vpop.f32.mrf.mxu0  ;;  %v3518_v24 = vadd.f32 %v5347_v14, %v7928_v56  ;;  %v8073_v8 = vsel %vm3539_vm0, %v3507_v22, -1e+30 }
 0x8b1   : > { %v8033_v41 = vsel %vm3539_vm0, %v3413_v18, -1e+30  ;;  %v3509_v59 = vpop.f32.mrf.mxu1  ;;  %v3405_v49 = vadd.f32 %v7928_v56, %v3404_v29 }
 0x8b2   : > { %v5318_v3 = vpop.f32.mrf.mxu0  ;;  %v8045_v45 = vsel %vm3539_vm0, %v3518_v24, -1e+30  ;;  %v3510_v25 = vadd.f32 %v7928_v56, %v3509_v59 }
 0x8b3   : > { %v5350_v6 = vpop.f32.mrf.mxu1  ;;  %v8057_v27 = vsel %vm3539_vm0, %v3405_v49, -1e+30  ;;  %v3426_v11 = vadd.f32 %v5318_v3, %v7928_v56 }
 0x8b4   : > { %3566 = vmax.xlane.f32.xlu1 %v8009_v36  ;;  %3564 = vmax.xlane.f32.xlu0 %v8013_v2  ;;  %v3417_v46 = vpop.f32.mrf.mxu0  ;;  %v8069_v10 = vsel %vm3539_vm0, %v3510_v25, -1e+30  ;;  %v3531_v54 = vadd.f32 %v5350_v6, %v7928_v56 }
 0x8b5   : > { %v3522_v32 = vpop.f32.mrf.mxu1  ;;  %v3418_v42 = vadd.f32 %v7928_v56, %v3417_v46  ;;  %v8085_v60 = vsel %vm3539_vm0, %v3426_v11, -1e+30 }
 0x8b6   : > { %v5319_v19 = vpop.f32.mrf.mxu0  ;;  %v3523_v5 = vadd.f32 %v7928_v56, %v3522_v32  ;;  %v8119_v20 = vsel %vm3539_vm0, %v3531_v54, -1e+30 }
 0x8b7   : > { %v3429_v13 = vadd.f32 %v5319_v19, %v7928_v56  ;;  %v5351_v28 = vpop.f32.mrf.mxu1  ;;  %v8097_v53 = vsel %vm3539_vm0, %v3418_v42, -1e+30 }
 0x8b8   : > { %3822 = vmax.xlane.f32.xlu1 %v8021_v23  ;;  %3820 = vmax.xlane.f32.xlu0 %v8025_v34  ;;  %v3420_v9 = vpop.f32.mrf.mxu0  ;;  %v3534_v7 = vadd.f32 %v5351_v28, %v7928_v56  ;;  %v8109_v58 = vsel %vm3539_vm0, %v3523_v5, -1e+30 }
 0x8b9   : > { %v3421_v30 = vadd.f32 %v7928_v56, %v3420_v9  ;;  %v8081_v17 = vsel %vm3539_vm0, %v3429_v13, -1e+30  ;;  %v3525_v39 = vpop.f32.mrf.mxu1 }
 0x8ba   : > { %v3526_v12 = vadd.f32 %v7928_v56, %v3525_v39  ;;  %v8115_v43 = vsel %vm3539_vm0, %v3534_v7, -1e+30 }
 0x8bb   : > { %v8093_v50 = vsel %vm3539_vm0, %v3421_v30, -1e+30 }
 0x8bc   : > { %3578 = vmax.xlane.f32.xlu1 %v8033_v41  ;;  %3576 = vmax.xlane.f32.xlu0 %v8037_v1  ;;  %v8105_v35 = vsel %vm3539_vm0, %v3526_v12, -1e+30 }
 0x8c0   : > { %3834 = vmax.xlane.f32.xlu1 %v8045_v45  ;;  %3832 = vmax.xlane.f32.xlu0 %v8049_v63 }
 0x8c4   : > { %3574 = vmax.xlane.f32.xlu1 %v8057_v27  ;;  %3572 = vmax.xlane.f32.xlu0 %v8061_v62 }
 0x8c8   : > { %3830 = vmax.xlane.f32.xlu1 %v8069_v10  ;;  %3828 = vmax.xlane.f32.xlu0 %v8073_v8 }
 0x8cc   : > { %3586 = vmax.xlane.f32.xlu1 %v8081_v17  ;;  %3584 = vmax.xlane.f32.xlu0 %v8085_v60 }
 0x8d0   : > { %3582 = vmax.xlane.f32.xlu1 %v8093_v50  ;;  %3580 = vmax.xlane.f32.xlu0 %v8097_v53 }
 0x8d4   : > { %3838 = vmax.xlane.f32.xlu1 %v8105_v35  ;;  %3836 = vmax.xlane.f32.xlu0 %v8109_v58 }
 0x8d8   : > { %3842 = vmax.xlane.f32.xlu1 %v8115_v43  ;;  %3840 = vmax.xlane.f32.xlu0 %v8119_v20 }
 0x925   : > { %v3817_v56 = vpop.xlane.xlu0 %3816  ;;  %v3561_v48 = vpop.xlane.xlu1 %3560 }
 0x926   : > { %v8124_v52 = vsub.f32 %v7940_v15, %v3561_v48  ;;  %v8127_v47 = vsub.f32 %v7936_v16, %v3817_v56 }
 0x928   : > { %v3608_v38 = vmul.f32 1.442695, %v8124_v52  ;;  %v3864_v29 = vmul.f32 1.442695, %v8127_v47 }
 0x929   : > { %v3563_v18 = vpop.xlane.xlu1 %3562  ;;  %v3557_v14 = vpop.xlane.xlu0 %3556 }
 0x92a   : > { %v8131_v0 = vsub.f32 %v7949_v26, %v3563_v18  ;;  %5473 = vpow2.f32 %v3608_v38  ;;  %v8135_v37 = vsub.f32 %v7953_v51, %v3557_v14 }
 0x92c   : > { %v3610_v24 = vmul.f32 1.442695, %v8131_v0  ;;  %v3604_v26 = vmul.f32 1.442695, %v8135_v37 }
 0x92d   : > { %v3819_v15 = vpop.xlane.xlu1 %3818  ;;  %v3813_v59 = vpop.xlane.xlu0 %3812 }
 0x92e   : > { %5475 = vpow2.f32 %v3610_v24  ;;  %v8139_v16 = vsub.f32 %v7961_v57, %v3819_v15  ;;  %v8142_v3 = vsub.f32 %v7965_v55, %v3813_v59 }
 0x92f   : > { %5477 = vpow2.f32 %v3864_v29 }
 0x930   : > { %v3866_v40 = vmul.f32 1.442695, %v8139_v16  ;;  %v3860_v51 = vmul.f32 1.442695, %v8142_v3 }
 0x931   : > { %v3815_v49 = vpop.xlane.xlu1 %3814  ;;  %v3559_v6 = vpop.xlane.xlu0 %3558 }
 0x932   : > { %5479 = vpow2.f32 %v3866_v40  ;;  %v8148_v46 = vsub.f32 %v7973_v44, %v3815_v49  ;;  %v8151_v22 = vsub.f32 %v7977_v31, %v3559_v6 }
 0x933   : > { %5481 = vpow2.f32 %v3604_v26 }
 0x934   : > { %v3606_v57 = vmul.f32 1.442695, %v8151_v22  ;;  %5483 = vpow2.f32 %v3860_v51  ;;  %v3862_v32 = vmul.f32 1.442695, %v8148_v46 }
 0x935   : > { %v3571_v55 = vpop.xlane.xlu1 %3570  ;;  %v3569_v25 = vpop.xlane.xlu0 %3568 }
 0x936   : > { %v8156_v19 = vsub.f32 %v7985_v61, %v3571_v55  ;;  %v8159_v11 = vsub.f32 %v7989_v33, %v3569_v25  ;;  %5485 = vpow2.f32 %v3606_v57 }
 0x937   : > { %v5474_v44 = vpop.eup %5473  ;;  %5487 = vpow2.f32 %v3862_v32 }
 0x938   : > { %v3616_v13 = vmul.f32 1.442695, %v8159_v11  ;;  %3640 = vadd.xlane.f32.xlu0 %v5474_v44  ;;  %v3618_v9 = vmul.f32 1.442695, %v8156_v19 }
 0x939   : > { %v3827_v31 = vpop.xlane.xlu1 %3826  ;;  %v3825_v28 = vpop.xlane.xlu0 %3824 }
 0x93a   : > { %v8164_v42 = vsub.f32 %v7997_v4, %v3827_v31  ;;  %v8167_v30 = vsub.f32 %v8001_v21, %v3825_v28  ;;  %5489 = vpow2.f32 %v3616_v13 }
 0x93b   : > { %v5476_v61 = vpop.eup %5475  ;;  %5491 = vpow2.f32 %v3618_v9 }
 0x93c   : > { %v5478_v33 = vpop.eup %5477  ;;  %v3872_v39 = vmul.f32 1.442695, %v8167_v30  ;;  %3642 = vadd.xlane.f32.xlu1 %v5476_v61  ;;  %v3874_v54 = vmul.f32 1.442695, %v8164_v42 }
 0x93d   : > { %3896 = vadd.xlane.f32.xlu0 %v5478_v33  ;;  %v3567_v5 = vpop.xlane.xlu1 %3566  ;;  %v3565_v12 = vpop.xlane.xlu0 %3564 }
 0x93e   : > { %v8172_v7 = vsub.f32 %v8009_v36, %v3567_v5  ;;  %v8175_v4 = vsub.f32 %v8013_v2, %v3565_v12  ;;  %5493 = vpow2.f32 %v3872_v39 }
 0x93f   : > { %v5480_v21 = vpop.eup %5479  ;;  %5495 = vpow2.f32 %v3874_v54 }
 0x940   : > { %v5482_v56 = vpop.eup %5481  ;;  %v3612_v48 = vmul.f32 1.442695, %v8175_v4  ;;  %3898 = vadd.xlane.f32.xlu1 %v5480_v21  ;;  %v3614_v14 = vmul.f32 1.442695, %v8172_v7 }
 0x941   : > { %3636 = vadd.xlane.f32.xlu0 %v5482_v56  ;;  %v3823_v38 = vpop.xlane.xlu1 %3822  ;;  %v3821_v18 = vpop.xlane.xlu0 %3820 }
 0x942   : > { %v8180_v29 = vsub.f32 %v8021_v23, %v3823_v38  ;;  %v8183_v36 = vsub.f32 %v8025_v34, %v3821_v18  ;;  %v5484_v2 = vpop.eup %5483  ;;  %5497 = vpow2.f32 %v3612_v48 }
 0x943   : > { %v5486_v24 = vpop.eup %5485  ;;  %5499 = vpow2.f32 %v3614_v14 }
 0x944   : > { %v3868_v15 = vmul.f32 1.442695, %v8183_v36  ;;  %3638 = vadd.xlane.f32.xlu1 %v5486_v24  ;;  %v3870_v40 = vmul.f32 1.442695, %v8180_v29  ;;  %v5488_v34 = vpop.eup %5487 }
 0x945   : > { %3892 = vadd.xlane.f32.xlu0 %v5484_v2  ;;  %v3579_v59 = vpop.xlane.xlu1 %3578  ;;  %v3577_v26 = vpop.xlane.xlu0 %3576 }
 0x946   : > { %v8188_v49 = vsub.f32 %v8033_v41, %v3579_v59  ;;  %v8191_v23 = vsub.f32 %v8037_v1, %v3577_v26  ;;  %5501 = vpow2.f32 %v3868_v15 }
 0x947   : > { %v5490_v6 = vpop.eup %5489  ;;  %5503 = vpow2.f32 %v3870_v40 }
 0x948   : > { %v3624_v51 = vmul.f32 1.442695, %v8191_v23  ;;  %3894 = vadd.xlane.f32.xlu1 %v5488_v34  ;;  %v3626_v25 = vmul.f32 1.442695, %v8188_v49  ;;  %v5492_v1 = vpop.eup %5491 }
 0x949   : > { %3648 = vadd.xlane.f32.xlu0 %v5490_v6  ;;  %v3835_v57 = vpop.xlane.xlu1 %3834  ;;  %v3833_v55 = vpop.xlane.xlu0 %3832 }
 0x94a   : > { %v8196_v32 = vsub.f32 %v8045_v45, %v3835_v57  ;;  %v8199_v41 = vsub.f32 %v8049_v63, %v3833_v55  ;;  %5505 = vpow2.f32 %v3624_v51 }
 0x94b   : > { %v5494_v44 = vpop.eup %5493  ;;  %5507 = vpow2.f32 %v3626_v25 }
 0x94c   : > { %v3880_v13 = vmul.f32 1.442695, %v8199_v41  ;;  %3650 = vadd.xlane.f32.xlu1 %v5492_v1  ;;  %v3882_v9 = vmul.f32 1.442695, %v8196_v32  ;;  %v5496_v63 = vpop.eup %5495 }
 0x94d   : > { %3904 = vadd.xlane.f32.xlu0 %v5494_v44  ;;  %v3575_v31 = vpop.xlane.xlu1 %3574  ;;  %v3573_v28 = vpop.xlane.xlu0 %3572 }
 0x94e   : > { %v8204_v61 = vsub.f32 %v8057_v27, %v3575_v31  ;;  %v8207_v45 = vsub.f32 %v8061_v62, %v3573_v28  ;;  %5509 = vpow2.f32 %v3880_v13 }
 0x94f   : > { %v5498_v33 = vpop.eup %5497  ;;  %5511 = vpow2.f32 %v3882_v9 }
 0x950   : > { %v3620_v39 = vmul.f32 1.442695, %v8207_v45  ;;  %3906 = vadd.xlane.f32.xlu1 %v5496_v63  ;;  %v3622_v54 = vmul.f32 1.442695, %v8204_v61  ;;  %v5500_v62 = vpop.eup %5499 }
 0x951   : > { %3644 = vadd.xlane.f32.xlu0 %v5498_v33  ;;  %v3831_v5 = vpop.xlane.xlu1 %3830  ;;  %v3829_v12 = vpop.xlane.xlu0 %3828 }
 0x952   : > { %v8212_v21 = vsub.f32 %v8069_v10, %v3831_v5  ;;  %v8215_v27 = vsub.f32 %v8073_v8, %v3829_v12  ;;  %5513 = vpow2.f32 %v3620_v39 }
 0x953   : > { %v5502_v56 = vpop.eup %5501  ;;  %5515 = vpow2.f32 %v3622_v54 }
 0x954   : > { %v3876_v48 = vmul.f32 1.442695, %v8215_v27  ;;  %3646 = vadd.xlane.f32.xlu1 %v5500_v62  ;;  %v3878_v14 = vmul.f32 1.442695, %v8212_v21  ;;  %v5504_v8 = vpop.eup %5503 }
 0x955   : > { %3900 = vadd.xlane.f32.xlu0 %v5502_v56  ;;  %v3587_v38 = vpop.xlane.xlu1 %3586  ;;  %v3585_v18 = vpop.xlane.xlu0 %3584 }
 0x956   : > { %v8220_v2 = vsub.f32 %v8081_v17, %v3587_v38  ;;  %v8223_v10 = vsub.f32 %v8085_v60, %v3585_v18  ;;  %5517 = vpow2.f32 %v3876_v48 }
 0x957   : > { %v5506_v24 = vpop.eup %5505  ;;  %5519 = vpow2.f32 %v3878_v14 }
 0x958   : > { %v3632_v15 = vmul.f32 1.442695, %v8223_v10  ;;  %3902 = vadd.xlane.f32.xlu1 %v5504_v8  ;;  %v3634_v40 = vmul.f32 1.442695, %v8220_v2  ;;  %v5508_v60 = vpop.eup %5507 }
 0x959   : > { %3656 = vadd.xlane.f32.xlu0 %v5506_v24  ;;  %v3583_v59 = vpop.xlane.xlu1 %3582  ;;  %v3581_v26 = vpop.xlane.xlu0 %3580 }
 0x95a   : > { %v8228_v34 = vsub.f32 %v8093_v50, %v3583_v59  ;;  %v8231_v17 = vsub.f32 %v8097_v53, %v3581_v26  ;;  %5521 = vpow2.f32 %v3632_v15 }
 0x95b   : > { %v5510_v6 = vpop.eup %5509  ;;  %5523 = vpow2.f32 %v3634_v40 }
 0x95c   : > { %v3628_v51 = vmul.f32 1.442695, %v8231_v17  ;;  %3658 = vadd.xlane.f32.xlu1 %v5508_v60  ;;  %v3630_v25 = vmul.f32 1.442695, %v8228_v34  ;;  %v5512_v53 = vpop.eup %5511 }
 0x95d   : > { %3912 = vadd.xlane.f32.xlu0 %v5510_v6  ;;  %v3839_v57 = vpop.xlane.xlu1 %3838  ;;  %v3837_v55 = vpop.xlane.xlu0 %3836 }
 0x95e   : > { %v8236_v1 = vsub.f32 %v8105_v35, %v3839_v57  ;;  %v8239_v50 = vsub.f32 %v8109_v58, %v3837_v55  ;;  %5525 = vpow2.f32 %v3628_v51 }
 0x95f   : > { %v5514_v44 = vpop.eup %5513  ;;  %5527 = vpow2.f32 %v3630_v25 }
 0x960   : > { %v3884_v13 = vmul.f32 1.442695, %v8239_v50  ;;  %3914 = vadd.xlane.f32.xlu1 %v5512_v53  ;;  %v3886_v9 = vmul.f32 1.442695, %v8236_v1  ;;  %v5516_v35 = vpop.eup %5515 }
 0x961   : > { %3652 = vadd.xlane.f32.xlu0 %v5514_v44  ;;  %v3843_v31 = vpop.xlane.xlu1 %3842  ;;  %v3841_v28 = vpop.xlane.xlu0 %3840 }
 0x962   : > { %v8244_v63 = vsub.f32 %v8119_v20, %v3841_v28  ;;  %5529 = vpow2.f32 %v3884_v13  ;;  %v8247_v58 = vsub.f32 %v8115_v43, %v3843_v31 }
 0x963   : > { %v5518_v33 = vpop.eup %5517  ;;  %5531 = vpow2.f32 %v3886_v9 }
 0x964   : > { %v3888_v39 = vmul.f32 1.442695, %v8244_v63  ;;  %3654 = vadd.xlane.f32.xlu1 %v5516_v35  ;;  %v5520_v5 = vpop.eup %5519  ;;  %v3890_v12 = vmul.f32 1.442695, %v8247_v58 }
 0x965   : > { %3908 = vadd.xlane.f32.xlu0 %v5518_v33 }
 0x966   : > { %5533 = vpow2.f32 %v3888_v39 }
 0x967   : > { %v5522_v54 = vpop.eup %5521  ;;  %5535 = vpow2.f32 %v3890_v12 }
 0x968   : > { %3910 = vadd.xlane.f32.xlu1 %v5520_v5  ;;  %v5524_v20 = vpop.eup %5523 }
 0x969   : > { %3664 = vadd.xlane.f32.xlu0 %v5522_v54 }
 0x96b   : > { %v5526_v62 = vpop.eup %5525 }
 0x96c   : > { %3666 = vadd.xlane.f32.xlu1 %v5524_v20  ;;  %v5528_v43 = vpop.eup %5527 }
 0x96d   : > { %3660 = vadd.xlane.f32.xlu0 %v5526_v62 }
 0x96f   : > { %v5530_v56 = vpop.eup %5529 }
 0x970   : > { %3662 = vadd.xlane.f32.xlu1 %v5528_v43  ;;  %v5532_v48 = vpop.eup %5531 }
 0x971   : > { %3916 = vadd.xlane.f32.xlu0 %v5530_v56 }
 0x973   : > { %v5534_v38 = vpop.eup %5533 }
 0x974   : > { %3918 = vadd.xlane.f32.xlu1 %v5532_v48  ;;  %v5536_v18 = vpop.eup %5535 }
 0x975   : > { %3920 = vadd.xlane.f32.xlu0 %v5534_v38 }
 0x978   : > { %3922 = vadd.xlane.f32.xlu1 %v5536_v18 }
 0x9c1   : > { %v3641_v14 = vpop.xlane.xlu0 %3640 }
 0x9c2   : > { %5537 = vlog2.f32 %v3641_v14 }
 0x9c5   : > { %v3643_v8 = vpop.xlane.xlu1 %3642 }
 0x9c6   : > { %5539 = vlog2.f32 %v3643_v8  ;;  %v3897_v24 = vpop.xlane.xlu0 %3896 }
 0x9c7   : > { %5541 = vlog2.f32 %v3897_v24 }
 0x9c9   : > { %v3899_v15 = vpop.xlane.xlu1 %3898 }
 0x9ca   : > { %5543 = vlog2.f32 %v3899_v15  ;;  %v3637_v59 = vpop.xlane.xlu0 %3636 }
 0x9cb   : > { %5545 = vlog2.f32 %v3637_v59 }
 0x9cd   : > { %v3639_v26 = vpop.xlane.xlu1 %3638 }
 0x9ce   : > { %v3893_v40 = vpop.xlane.xlu0 %3892  ;;  %5547 = vlog2.f32 %v3639_v26 }
 0x9cf   : > { %v5538_v60 = vpop.eup %5537  ;;  %5549 = vlog2.f32 %v3893_v40 }
 0x9d0   : > { %v3673_v6 = vmul.f32 0.6931472, %v5538_v60 }
 0x9d1   : > { %v3895_v51 = vpop.xlane.xlu1 %3894 }
 0x9d2   : > { %v3649_v57 = vpop.xlane.xlu0 %3648  ;;  %5551 = vlog2.f32 %v3895_v51  ;;  %v3702_v44 = vsub.f32 %v8124_v52, %v3673_v6 }
 0x9d3   : > { %v5540_v55 = vpop.eup %5539  ;;  %5553 = vlog2.f32 %v3649_v57 }
 0x9d4   : > { %v5542_v25 = vpop.eup %5541  ;;  %v3675_v53 = vmul.f32 0.6931472, %v5540_v55 }
 0x9d5   : > { %v3929_v31 = vmul.f32 0.6931472, %v5542_v25  ;;  %v3651_v28 = vpop.xlane.xlu1 %3650 }
 0x9d6   : > { %v3703_v13 = vsub.f32 %v8131_v0, %v3675_v53  ;;  %v3905_v9 = vpop.xlane.xlu0 %3904  ;;  %5555 = vlog2.f32 %v3651_v28 }
 0x9d7   : > { %v5544_v35 = vpop.eup %5543  ;;  %5557 = vlog2.f32 %v3905_v9  ;;  %v3958_v12 = vsub.f32 %v8127_v47, %v3929_v31 }
 0x9d8   : > { %v5546_v33 = vpop.eup %5545  ;;  %v4305_v39 = vpack.c.bf16 %v3703_v13, %v3702_v44  ;;  %v3931_v5 = vmul.f32 0.6931472, %v5544_v35 }
 0x9d9   : > { %v3907_v0 = vpop.xlane.xlu1 %3906  ;;  %v3669_v20 = vmul.f32 0.6931472, %v5546_v33 }
 0x9da   : > { %4377 = vst [vmem:[%s8255_s12 + $0x8] sm:$0xff] %v4305_v39   ;;  %v3959_v52 = vsub.f32 %v8139_v16, %v3931_v5  ;;  %v3645_v54 = vpop.xlane.xlu0 %3644  ;;  %5559 = vlog2.f32 %v3907_v0 }
 0x9db   : > { %v5548_v62 = vpop.eup %5547  ;;  %5561 = vlog2.f32 %v3645_v54  ;;  %v3700_v14 = vsub.f32 %v8135_v37, %v3669_v20 }
 0x9dc   : > { %v4345_v43 = vpack.c.bf16 %v3959_v52, %v3958_v12  ;;  %v5550_v56 = vpop.eup %5549  ;;  %v3671_v48 = vmul.f32 0.6931472, %v5548_v62 }
 0x9dd   : > { %v3647_v38 = vpop.xlane.xlu1 %3646  ;;  %v3925_v47 = vmul.f32 0.6931472, %v5550_v56 }
 0x9de   : > { %4385 = vst [vmem:[%s8255_s12 + $0x48] sm:$0xff] %v4345_v43   ;;  %v3901_v18 = vpop.xlane.xlu0 %3900  ;;  %v3701_v8 = vsub.f32 %v8151_v22, %v3671_v48  ;;  %5563 = vlog2.f32 %v3647_v38 }
 0x9df   : > { %v5552_v16 = vpop.eup %5551  ;;  %5565 = vlog2.f32 %v3901_v18  ;;  %v3956_v60 = vsub.f32 %v8142_v3, %v3925_v47 }
 0x9e0   : > { %v5554_v24 = vpop.eup %5553  ;;  %v4300_v15 = vpack.c.bf16 %v3701_v8, %v3700_v14  ;;  %v3927_v59 = vmul.f32 0.6931472, %v5552_v16 }
 0x9e1   : > { %v3903_v26 = vpop.xlane.xlu1 %3902  ;;  %v3681_v51 = vmul.f32 0.6931472, %v5554_v24 }
 0x9e2   : > { %v3657_v40 = vpop.xlane.xlu0 %3656  ;;  %4301 = vst [vmem:[%s8255_s12] sm:$0xff] %v4300_v15   ;;  %v3957_v6 = vsub.f32 %v8148_v46, %v3927_v59  ;;  %5567 = vlog2.f32 %v3903_v26 }
 0x9e3   : > { %v5556_v37 = vpop.eup %5555  ;;  %5569 = vlog2.f32 %v3657_v40  ;;  %v3706_v44 = vsub.f32 %v8159_v11, %v3681_v51 }
 0x9e4   : > { %v5558_v22 = vpop.eup %5557  ;;  %v4340_v57 = vpack.c.bf16 %v3957_v6, %v3956_v60  ;;  %v3683_v55 = vmul.f32 0.6931472, %v5556_v37 }
 0x9e5   : > { %v3659_v25 = vpop.xlane.xlu1 %3658  ;;  %v3937_v31 = vmul.f32 0.6931472, %v5558_v22 }
 0x9e6   : > { %v3913_v53 = vpop.xlane.xlu0 %3912  ;;  %4384 = vst [vmem:[%s8255_s12 + $0x40] sm:$0xff] %v4340_v57   ;;  %v3707_v13 = vsub.f32 %v8156_v19, %v3683_v55  ;;  %5571 = vlog2.f32 %v3659_v25 }
 0x9e7   : > { %v5560_v3 = vpop.eup %5559  ;;  %5573 = vlog2.f32 %v3913_v53  ;;  %v3962_v39 = vsub.f32 %v8167_v30, %v3937_v31 }
 0x9e8   : > { %v5562_v46 = vpop.eup %5561  ;;  %v4315_v28 = vpack.c.bf16 %v3707_v13, %v3706_v44  ;;  %v3939_v9 = vmul.f32 0.6931472, %v5560_v3 }
 0x9e9   : > { %v3915_v35 = vpop.xlane.xlu1 %3914  ;;  %v3677_v12 = vmul.f32 0.6931472, %v5562_v46 }
 0x9ea   : > { %v3653_v33 = vpop.xlane.xlu0 %3652  ;;  %4379 = vst [vmem:[%s8255_s12 + $0x18] sm:$0xff] %v4315_v28   ;;  %v3963_v5 = vsub.f32 %v8164_v42, %v3939_v9  ;;  %5575 = vlog2.f32 %v3915_v35 }
 0x9eb   : > { %v5564_v11 = vpop.eup %5563  ;;  %5577 = vlog2.f32 %v3653_v33  ;;  %v3704_v62 = vsub.f32 %v8175_v4, %v3677_v12 }
 0x9ec   : > { %v5566_v19 = vpop.eup %5565  ;;  %v4355_v52 = vpack.c.bf16 %v3963_v5, %v3962_v39  ;;  %v3679_v0 = vmul.f32 0.6931472, %v5564_v11 }
 0x9ed   : > { %v3655_v54 = vpop.xlane.xlu1 %3654  ;;  %v3933_v56 = vmul.f32 0.6931472, %v5566_v19 }
 0x9ee   : > { %v3909_v20 = vpop.xlane.xlu0 %3908  ;;  %4387 = vst [vmem:[%s8255_s12 + $0x58] sm:$0xff] %v4355_v52   ;;  %v3705_v43 = vsub.f32 %v8172_v7, %v3679_v0  ;;  %5579 = vlog2.f32 %v3655_v54 }
 0x9ef   : > { %v5568_v30 = vpop.eup %5567  ;;  %5581 = vlog2.f32 %v3909_v20  ;;  %v3960_v8 = vsub.f32 %v8183_v36, %v3933_v56 }
 0x9f0   : > { %v5570_v42 = vpop.eup %5569  ;;  %v4310_v48 = vpack.c.bf16 %v3705_v43, %v3704_v62  ;;  %v3935_v38 = vmul.f32 0.6931472, %v5568_v30 }
 0x9f1   : > { %v3911_v18 = vpop.xlane.xlu1 %3910  ;;  %v3689_v16 = vmul.f32 0.6931472, %v5570_v42 }
 0x9f2   : > { %v3665_v14 = vpop.xlane.xlu0 %3664  ;;  %4378 = vst [vmem:[%s8255_s12 + $0x10] sm:$0xff] %v4310_v48   ;;  %v3961_v47 = vsub.f32 %v8180_v29, %v3935_v38  ;;  %5583 = vlog2.f32 %v3911_v18 }
 0x9f3   : > { %v5572_v4 = vpop.eup %5571  ;;  %5585 = vlog2.f32 %v3665_v14  ;;  %v3710_v40 = vsub.f32 %v8191_v23, %v3689_v16 }
 0x9f4   : > { %v5574_v7 = vpop.eup %5573  ;;  %v4350_v24 = vpack.c.bf16 %v3961_v47, %v3960_v8  ;;  %v3691_v15 = vmul.f32 0.6931472, %v5572_v4 }
 0x9f5   : > { %v3667_v59 = vpop.xlane.xlu1 %3666  ;;  %v3945_v6 = vmul.f32 0.6931472, %v5574_v7 }
 0x9f6   : > { %v3661_v26 = vpop.xlane.xlu0 %3660  ;;  %4386 = vst [vmem:[%s8255_s12 + $0x50] sm:$0xff] %v4350_v24   ;;  %v3711_v60 = vsub.f32 %v8188_v49, %v3691_v15  ;;  %5587 = vlog2.f32 %v3667_v59 }
 0x9f7   : > { %v5576_v36 = vpop.eup %5575  ;;  %5589 = vlog2.f32 %v3661_v26  ;;  %v3966_v55 = vsub.f32 %v8199_v41, %v3945_v6 }
 0x9f8   : > { %v5578_v29 = vpop.eup %5577  ;;  %v4325_v51 = vpack.c.bf16 %v3711_v60, %v3710_v40  ;;  %v3947_v37 = vmul.f32 0.6931472, %v5576_v36 }
 0x9f9   : > { %v3663_v22 = vpop.xlane.xlu1 %3662  ;;  %v3685_v53 = vmul.f32 0.6931472, %v5578_v29 }
 0x9fa   : > { %v3917_v57 = vpop.xlane.xlu0 %3916  ;;  %4381 = vst [vmem:[%s8255_s12 + $0x28] sm:$0xff] %v4325_v51   ;;  %v3967_v25 = vsub.f32 %v8196_v32, %v3947_v37  ;;  %5591 = vlog2.f32 %v3663_v22 }
 0x9fb   : > { %v5580_v23 = vpop.eup %5579  ;;  %5593 = vlog2.f32 %v3917_v57  ;;  %v3708_v46 = vsub.f32 %v8207_v45, %v3685_v53 }
 0x9fc   : > { %v5582_v49 = vpop.eup %5581  ;;  %v4365_v44 = vpack.c.bf16 %v3967_v25, %v3966_v55  ;;  %v3687_v13 = vmul.f32 0.6931472, %v5580_v23 }
 0x9fd   : > { %v3919_v31 = vpop.xlane.xlu1 %3918  ;;  %v3941_v9 = vmul.f32 0.6931472, %v5582_v49 }
 0x9fe   : > { %v3921_v3 = vpop.xlane.xlu0 %3920  ;;  %4389 = vst [vmem:[%s8255_s12 + $0x68] sm:$0xff] %v4365_v44   ;;  %v3709_v28 = vsub.f32 %v8204_v61, %v3687_v13  ;;  %5595 = vlog2.f32 %v3919_v31 }
 0x9ff   : > { %v5584_v41 = vpop.eup %5583  ;;  %5597 = vlog2.f32 %v3921_v3  ;;  %v3964_v5 = vsub.f32 %v8215_v27, %v3941_v9 }
 0xa00   : > { %v5586_v32 = vpop.eup %5585  ;;  %v4320_v35 = vpack.c.bf16 %v3709_v28, %v3708_v46  ;;  %v3943_v33 = vmul.f32 0.6931472, %v5584_v41 }
 0xa01   : > { %v3923_v39 = vpop.xlane.xlu1 %3922  ;;  %v3697_v11 = vmul.f32 0.6931472, %v5586_v32 }
 0xa02   : > { %4380 = vst [vmem:[%s8255_s12 + $0x20] sm:$0xff] %v4320_v35   ;;  %v3965_v12 = vsub.f32 %v8212_v21, %v3943_v33  ;;  %5599 = vlog2.f32 %v3923_v39 }
 0xa03   : > { %v5588_v45 = vpop.eup %5587  ;;  %v3714_v0 = vsub.f32 %v8223_v10, %v3697_v11 }
 0xa04   : > { %v5590_v19 = vpop.eup %5589  ;;  %v4360_v61 = vpack.c.bf16 %v3965_v12, %v3964_v5  ;;  %v3699_v52 = vmul.f32 0.6931472, %v5588_v45 }
 0xa05   : > { %v3693_v20 = vmul.f32 0.6931472, %v5590_v19 }
 0xa06   : > { %4388 = vst [vmem:[%s8255_s12 + $0x60] sm:$0xff] %v4360_v61   ;;  %v3715_v54 = vsub.f32 %v8220_v2, %v3699_v52 }
 0xa07   : > { %v5592_v62 = vpop.eup %5591  ;;  %v3712_v21 = vsub.f32 %v8231_v17, %v3693_v20 }
 0xa08   : > { %v5594_v43 = vpop.eup %5593  ;;  %v4335_v56 = vpack.c.bf16 %v3715_v54, %v3714_v0  ;;  %v3695_v27 = vmul.f32 0.6931472, %v5592_v62 }
 0xa09   : > { %v3949_v42 = vmul.f32 0.6931472, %v5594_v43 }
 0xa0a   : > { %4383 = vst [vmem:[%s8255_s12 + $0x38] sm:$0xff] %v4335_v56   ;;  %v3713_v30 = vsub.f32 %v8228_v34, %v3695_v27 }
 0xa0b   : > { %v5596_v48 = vpop.eup %5595  ;;  %v3968_v2 = vsub.f32 %v8239_v50, %v3949_v42 }
 0xa0c   : > { %v5598_v38 = vpop.eup %5597  ;;  %v4330_v18 = vpack.c.bf16 %v3713_v30, %v3712_v21  ;;  %v3951_v10 = vmul.f32 0.6931472, %v5596_v48 }
 0xa0d   : > { %v3953_v8 = vmul.f32 0.6931472, %v5598_v38 }
 0xa0e   : > { %4382 = vst [vmem:[%s8255_s12 + $0x30] sm:$0xff] %v4330_v18   ;;  %v3969_v14 = vsub.f32 %v8236_v1, %v3951_v10 }
 0xa0f   : > { %v5600_v47 = vpop.eup %5599  ;;  %v3970_v34 = vsub.f32 %v8244_v63, %v3953_v8 }
 0xa10   : > { %v4370_v16 = vpack.c.bf16 %v3969_v14, %v3968_v2  ;;  %v3955_v17 = vmul.f32 0.6931472, %v5600_v47 }
 0xa12   : > { %4390 = vst [vmem:[%s8255_s12 + $0x70] sm:$0xff] %v4370_v16   ;;  %v3971_v4 = vsub.f32 %v8247_v58, %v3955_v17 }
 0xa14   : > { %v4375_v1 = vpack.c.bf16 %v3971_v4, %v3970_v34 }
 0xa16   : > { %4391 = vst [vmem:[%s8255_s12 + $0x78] sm:$0xff] %v4375_v1  }
 0xa17   : > { %5739 = shalt.err (!%p5736_p10)
}
 0xa18   : > { %s5740_s22 = scalar_lea.hbm %s8307_s13, 2048  ;;  %s5744_s16 = scalar_lea.hbm %s8360_s7, 4096 }
 0xa19   : > { %p5741_p6 = scmp.ne.s32.totalorder %s8307_s13, %s5740_s22  ;;  %p5745_p3 = scmp.lt.s32.totalorder %s8307_s13, %s8360_s7 }
 0xa1a   : > { %p5746_p11 = scmp.lt.s32.totalorder %s5744_s16, %s5740_s22 }
 0xa1b   : > { %p5742_p4 = pnand %p5741_p6, %p8466_p1 }
 0xa1c   : > { %p5747_p5 = por %p5746_p11, %p5745_p3 }
 0xa1d   : > { %p5743_p8 = pneg %p5742_p4 }
 0xa1f   : > { %p5748_p7 = pnand %p5747_p5, %p5743_p8 }
 0xa21   : > { %5751 = shalt.err (!%p5748_p7)
}
 0xa22   : > { %s5807_s9 = smov 64   ;;  %s5808_s10 = smov 4  }
 0xa23   : > { %5366 = dma.vmem_to_hbm [thread:$0]  (%p8466_p1), %s8309_s30, 2048, %s8307_s13, %s4053_s15, %s5807_s9, %s5807_s9, %s5808_s10  }
 0xa24 PF: > { %s4081_s28 = sand.u32 1, %s5786_s24   ;;  %p8467_p12 = scmp.ne.s32.totalorder %s8399_s8, 0 }
 0xa25   : > { %p8468_p9 = scmp.ge.s32.totalorder %s5798_s27, 2  ;;  %s4082_s29 = scalar_lea.sflag [#allocation4], %s4081_s28 }
 0xa27   : > { %p5383_p13 = pnand %p8468_p9, %p8467_p12 }
 0xa29   : > { %p5384_p0 = pneg %p5383_p13 }
 0xa2b   : > { %5781 = dma.done.wait (%p5384_p0), %s4082_s29, 2048  }
 0xa2c   : > { %5783 = vsyncadd (%p5384_p0), %s4082_s29, 4294965248  ;;  %p22_p2 = scmp.ge.s32.totalorder %s5938_s14, 4   ;;  %s8469_s24 = smov %s5790_s25 }
 0xa2d   : > { %s8470_s25 = smov %s5794_s26  ;;  %s8471_s26 = smov %s5948_s17 }
 0xa2e   : > { %s8472_s27 = smov %s5938_s14  ;;  %24 = sbr.rel (!%p22_p2) target bundleno = 9 (0x9), region = 105 }
 0xa33   :  { %4087 = vsyncpa [#allocation3], 1 }
 0xa34   :  { %4089 = vsyncpa [#allocation3 + $0x1], 1 }
 0xa35   :  { %4090 = vsyncpa [#allocation6], 1 }
 0xa36   :  { %4091 = vsyncpa [#allocation9], 1 }
 0xa37   :  { %4092 = vsyncpa [#allocation4], 1 }
 0xa38   :  { %4094 = vsyncpa [#allocation4 + $0x1], 1 }

// kernel: tpu_custom_call.1
= control target key start
LH: loop header
LB: loop body
LE: loop exit
PB: predicated region body
PF: predicated region fallthrough
CT: control target
= control target key end

     0   :  { %s8353_s0 = inlined_call_operand.hbm [shape: bf16[512,128], index: 0, kind: input, shape index: {}]   ;;  %s8354_s1 = inlined_call_operand.hbm [shape: bf16[128,128], index: 1, kind: input, shape index: {}]   ;;  %s8355_s2 = inlined_call_operand.vmem [shape: f32[1,128], index: 2, kind: input, shape index: {}]   ;;  %s8356_s3 = inlined_call_operand.hbm [shape: bf16[128,128], index: 3, kind: input, shape index: {}]   ;;  %s8357_s4 = inlined_call_operand.vmem [shape: f32[1,128], index: 4, kind: input, shape index: {}]   ;;  %s8358_s5 = inlined_call_operand.hbm [shape: bf16[128,128], index: 5, kind: input, shape index: {}]   ;;  %s8359_s6 = inlined_call_operand.vmem [shape: f32[1,128], index: 6, kind: input, shape index: {}]   ;;  %s8360_s7 = inlined_call_operand.hbm [shape: bf16[512,128], index: 7, kind: output, shape index: {}]  }
   0x1   :  { %8397 = sst [smem:[#allocation34_spill]] %s8354_s1 }
   0x2   :  { %12 = vsyncpa [#allocation3], 0 }
   0x3   :  { %14 = vsyncpa [#allocation3 + $0x1], 0 }
   0x4   :  { %15 = vsyncpa [#allocation6], 0 }
   0x5   :  { %16 = vsyncpa [#allocation9], 0 }
   0x6   :  { %17 = vsyncpa [#allocation4], 0 }
   0x7   :  { %19 = vsyncpa [#allocation4 + $0x1], 0  ;;  %s5849_s24 = smov 0   ;;  %s5851_s25 = smov 0  }
   0x8   :  { %s5853_s26 = smov 0   ;;  %s5855_s27 = smov 0  }
   0x9 LB: > { %s5870_s28 = sadd.s32 4294967295, %s5798_s27   ;;  %s4168_s29 = sadd.s32 4294967294, %s5798_s27   ;;  %s5798_s27 = sphi %s5855_s27, %s8472_s27   ;;  %s5794_s26 = sphi %s5853_s26, %s8471_s26   ;;  %s5790_s25 = sphi %s5851_s25, %s8470_s25   ;;  %s5786_s24 = sphi %s5849_s24, %s8469_s24  }
   0xa   : > { %p45_p0 = scmp.ne.s32.totalorder %s5790_s25, %s5786_s24  ;;  %p8361_p1 = scmp.eq.s32.totalorder %s5870_s28, 0 }
   0xb   : > { %p195_p2 = scmp.eq.s32.totalorder %s5870_s28, 1  ;;  %p201_p3 = scmp.eq.s32.totalorder %s4168_s29, 1 }
   0xc   : > { %p5879_p4 = por %p8361_p1, %p45_p0  ;;  %p4169_p5 = scmp.ge.s32.totalorder %s5798_s27, 1 }
   0xd   : > { %p5884_p6 = por %p201_p3, %p45_p0  ;;  %p208_p7 = scmp.lt.s32.totalorder %s5798_s27, 3 }
   0xe   : > { %s8398_s30 = scalar_select %p5879_p4, 1, 0 }
   0xf   : > { %s8399_s8 = scalar_select %p5884_p6, 1, 0 }
  0x10   : > { %p5889_p8 = pnand %p4169_p5, %p208_p7  ;;  %s5800_s10 = smov [#allocation5]  }
  0x11   : > { %s220_s11 = sshll.u32 %s5800_s10, 4  ;;  %s5801_s13 = smov [#allocation7]   ;;  %s221_s11 = int_to_ptr.vmem [resolvable:$true] %s220_s11 }
  0x12   : > { %s8400_s9 = scalar_select %p5889_p8, 1, 0 }
  0x13   : > { %p5368_p9 = pneg %p5889_p8  ;;  %s236_s14 = sshll.u32 %s5801_s13, 4  ;;  %s237_s14 = int_to_ptr.vmem [resolvable:$true] %s236_s14 }
  0x14   : > { %s5802_s15 = smov [#allocation8]   ;;  %s5631_s17 = scalar_lea.vmem %s221_s11, 1024 }
  0x15   : > { %p5898_p11 = pnand %p5368_p9, %p8361_p1  ;;  %s252_s16 = sshll.u32 %s5802_s15, 4  ;;  %s253_s16 = int_to_ptr.vmem [resolvable:$true] %s252_s16 }
  0x16   : > { %p5632_p13 = scmp.ne.s32.totalorder %s221_s11, %s5631_s17  ;;  %p5639_p5 = scmp.lt.s32.totalorder %s221_s11, %s221_s11 }
  0x17   : > { %p5622_p12 = pneg %p5898_p11  ;;  %p5640_p7 = scmp.lt.s32.totalorder %s5631_s17, %s5631_s17 }
  0x19   : > { %p5634_p0 = pnand %p5632_p13, %p5622_p12  ;;  %p5641_p9 = por %p5640_p7, %p5639_p5 }
  0x1b   : > { %p5635_p3 = pneg %p5634_p0 }
  0x1d   : > { %p5642_p10 = pnand %p5641_p9, %p5635_p3 }
  0x1f   : > { %5645 = shalt.err (!%p5642_p10)
}
  0x20   : > { %s8362_s18 = smov 64   ;;  %s8363_s19 = smov 4  }
  0x21   : > { %s8402_s1 = sld [smem:[#allocation34_spill]]  ;;  %s5657_s22 = scalar_lea.vmem %s237_s14, 1024 }
  0x22   : > { %p5658_p13 = scmp.ne.s32.totalorder %s237_s14, %s5657_s22  ;;  %p5665_p3 = scmp.lt.s32.totalorder %s237_s14, %s237_s14 }
  0x23   : > { %p5666_p10 = scmp.lt.s32.totalorder %s5657_s22, %s5657_s22 }
  0x24   : > { %p5660_p0 = pnand %p5658_p13, %p5622_p12 }
  0x25   : > { %p5667_p7 = por %p5666_p10, %p5665_p3 }
  0x26   : > { %p5661_p5 = pneg %p5660_p0 }
  0x27   : > { %5371 = dma.hbm_to_vmem [thread:$0]  (!%p5898_p11), %s8402_s1, 1024, %s221_s11, [#allocation6], %s8362_s18, %s8362_s18, %s8363_s19  }
  0x28   : > { %p5668_p9 = pnand %p5667_p7, %p5661_p5 }
  0x2a   : > { %5671 = shalt.err (!%p5668_p9)
}
  0x2b   : > { %5374 = dma.hbm_to_vmem [thread:$0]  (!%p5898_p11), %s8356_s3, 1024, %s237_s14, [#allocation6], %s8362_s18, %s8362_s18, %s8363_s19  }
  0x2c   : > { %s5683_s10 = scalar_lea.vmem %s253_s16, 1024  ;;  %p5691_p3 = scmp.lt.s32.totalorder %s253_s16, %s253_s16 }
  0x2d   : > { %p5684_p1 = scmp.ne.s32.totalorder %s253_s16, %s5683_s10  ;;  %p5692_p5 = scmp.lt.s32.totalorder %s5683_s10, %s5683_s10 }
  0x2f   : > { %p5686_p13 = pnand %p5684_p1, %p5622_p12  ;;  %p5693_p10 = por %p5692_p5, %p5691_p3 }
  0x31   : > { %p5687_p0 = pneg %p5686_p13 }
  0x33   : > { %p5694_p7 = pnand %p5693_p10, %p5687_p0 }
  0x35   : > { %5697 = shalt.err (!%p5694_p7)
}
  0x36   : > { %5377 = dma.hbm_to_vmem [thread:$0]  (!%p5898_p11), %s8358_s5, 1024, %s253_s16, [#allocation9], %s8362_s18, %s8362_s18, %s8363_s19  }
  0x37   : > { %s5938_s14 = sadd.s32 1, %s5798_s27   ;;  %s32_s15 = sadd.s32 1, %s5794_s26 }
  0x38   : > { %s29_s12 = ssub.s32 %s5798_s27, %s5938_s14  ;;  %p39_p12 = scmp.ne.s32.totalorder %s5794_s26, %s5790_s25 }
  0x39   : > { %p30_p1 = scmp.eq.s32.totalorder %s29_s12, 0  ;;  %p40_p9 = scmp.eq.s32.totalorder %s5798_s27, 0 }
  0x3a   : > { %p5389_p13 = scmp.lt.s32.totalorder %s5798_s27, 2  ;;  %p5952_p3 = por %p195_p2, %p39_p12 }
  0x3b   : > { %s5948_s17 = scalar_select %p30_p1, %s5794_s26, %s32_s15  }
  0x3c   : > { %p41_p0 = por %p40_p9, %p39_p12  ;;  %s269_s21 = sand.u32 1, %s5794_s26  }
  0x3d   : > { %s8403_s20 = scalar_select %p5952_p3, 1, 0 }
  0x3e   : > { %s4263_s22 = sshll.u32 %s5798_s27, 11  ;;  %s4174_s16 = sshll.u32 %s269_s21, 7 }
  0x3f   : > { %s5961_s10 = scalar_lea.hbm %s8353_s0, %s4263_s22  ;;  %s273_s11 = scalar_lea.vmem [#allocation2], %s4174_s16 }
  0x40   : > { %s280_s13 = sshll.u32 %s273_s11, 4  ;;  %p5963_p11 = pnand %p5389_p13, %p41_p0  ;;  %s5967_s13 = int_to_ptr.vmem [resolvable:$true] %s280_s13 }
  0x41   : > { %s5969_s15 = scalar_lea.sflag [#allocation3], %s269_s21  ;;  %s5698_s18 = scalar_lea.hbm %s5961_s10, 2048 }
  0x42   : > { %p5699_p2 = scmp.ne.s32.totalorder %s5961_s10, %s5698_s18  ;;  %p5700_p5 = pneg %p5963_p11 }
  0x43   : > { %s5703_s16 = scalar_lea.hbm %s8353_s0, 4096  ;;  %p5704_p1 = scmp.lt.s32.totalorder %s5961_s10, %s8353_s0 }
  0x44   : > { %p5701_p10 = pnand %p5700_p5, %p5699_p2  ;;  %p5705_p12 = scmp.lt.s32.totalorder %s5703_s16, %s5698_s18 }
  0x46   : > { %p5702_p7 = pneg %p5701_p10  ;;  %p5706_p9 = por %p5705_p12, %p5704_p1 }
  0x48   : > { %p5707_p13 = pnand %p5706_p9, %p5702_p7 }
  0x4a   : > { %5710 = shalt.err (!%p5707_p13)
}
  0x4b   : > { %s5711_s21 = scalar_lea.vmem %s5967_s13, 2048  ;;  %s5805_s19 = smov [#allocation2]  }
  0x4c   : > { %p5712_p0 = scmp.ne.s32.totalorder %s5967_s13, %s5711_s21  ;;  %s5716_s1 = sshll.u32 %s5805_s19, 4  ;;  %s5717_s1 = int_to_ptr.vmem [resolvable:$false] %s5716_s1 }
  0x4d   : > { %s5718_s22 = scalar_lea.vmem %s5717_s1, 4096  ;;  %p5719_p10 = scmp.lt.s32.totalorder %s5967_s13, %s5717_s1 }
  0x4e   : > { %p5714_p6 = pnand %p5712_p0, %p5700_p5  ;;  %p5720_p3 = scmp.lt.s32.totalorder %s5718_s22, %s5711_s21 }
  0x50   : > { %p5715_p2 = pneg %p5714_p6  ;;  %p5721_p4 = por %p5720_p3, %p5719_p10 }
  0x52   : > { %p5722_p8 = pnand %p5721_p4, %p5715_p2 }
  0x54   : > { %5725 = shalt.err (!%p5722_p8)
}
  0x55   : > { %s8405_s18 = smov 4   ;;  %s8406_s23 = smov 64  }
  0x56   : > { %5381 = dma.hbm_to_vmem [thread:$0]  (!%p5963_p11), %s5961_s10, 2048, %s5967_s13, %s5969_s15, %s8406_s23, %s8406_s23, %s8405_s18  }
  0x57   : > { %p8407_p6 = scmp.ne.s32.totalorder %s8400_s9, 0 }
  0x59   : > { %292 = sbr.rel (%p8407_p6) target bundleno = 2596 (0xa24), region = 48 }
  0x5e   : > { %s5996_s19 = sand.u32 1, %s5790_s25   ;;  %p8408_p4 = scmp.ne.s32.totalorder %s8398_s30, 0 }
  0x5f   : > { %s4178_s1 = sshll.u32 %s5996_s19, 7  ;;  %s295_s16 = scalar_lea.sflag [#allocation3], %s5996_s19 }
  0x60   : > { %s6002_s12 = scalar_lea.vmem [#allocation2], %s4178_s1 }
  0x61   : > { %5769 = dma.done.wait (%p8408_p4), %s295_s16, 2048  }
  0x62   : > { %5771 = vsyncadd (%p8408_p4), %s295_s16, 4294965248  ;;  %p8409_p8 = scmp.eq.s32.totalorder %s5870_s28, 0 }
  0x64   : > { %5773 = dma.done.wait (%p8409_p8), [#allocation6], 2048   ;;  %p8410_p3 = pmov %p8409_p8 }
  0x66   : > { %5775 = vsyncadd (%p8410_p3), [#allocation6], 4294965248  ;;  %p8411_p11 = pmov %p8410_p3 }
  0x67   : > { %p8412_p5 = pmov %p8410_p3 }
  0x68   : > { %5777 = dma.done.wait (%p8411_p11), [#allocation9], 1024  }
  0x69   : > { %5779 = vsyncadd (%p8412_p5), [#allocation9], 4294966272  ;;  %v5433_v0 = vld [vmem:[#allocation5 + $0x38] sm:$0xff]   ;;  %v5434_v1 = vld [vmem:[#allocation5 + $0x30] sm:$0xff]   ;;  %s4053_s15 = scalar_lea.sflag [#allocation4], %s5996_s19  ;;  %p8466_p1 = scmp.ne.s32.totalorder %s8403_s20, 0 }
  0x6a   : > { %4712 = vmatprep.subr.bf16.mxu0 %v5433_v0  ;;  %4744 = vmatprep.subr.bf16.mxu1 %v5433_v0  ;;  %v5435_v2 = vld [vmem:[#allocation5 + $0x28] sm:$0xff]   ;;  %v5436_v3 = vld [vmem:[#allocation5 + $0x20] sm:$0xff]   ;;  %v5437_v6 = vld [vmem:[#allocation5 + $0x18] sm:$0xff]   ;;  %s5806_s29 = smov [#allocation10]  }
  0x6b   : > { %4713 = vmatpush3.bf16.msra.mxu0 %v5433_v0  ;;  %4745 = vmatpush3.bf16.msra.mxu1 %v5433_v0  ;;  %v5441_v4 = vld [vmem:[%s6002_s12] sm:$0xff]   ;;  %v5438_v7 = vld [vmem:[#allocation5 + $0x10] sm:$0xff]   ;;  %v5439_v8 = vld [vmem:[#allocation5 + $0x8] sm:$0xff]   ;;  %s5730_s11 = sshll.u32 %s5806_s29, 4  ;;  %s5731_s11 = int_to_ptr.vmem [resolvable:$false] %s5730_s11 }
  0x6c   : > { %4714 = vmatprep.subr.bf16.mxu0 %v5434_v1  ;;  %4746 = vmatprep.subr.bf16.mxu1 %v5434_v1  ;;  %v5442_v5 = vld [vmem:[%s6002_s12 + $0x40] sm:$0xff]   ;;  %v5443_v10 = vld [vmem:[%s6002_s12 + $0x8] sm:$0xff]   ;;  %v6020_v12 = vld [vmem:[#allocation7 + $0x38] sm:$0xff]   ;;  %s5732_s21 = scalar_lea.vmem %s5731_s11, 4096 }
  0x6d   : > { %4728 = vmatprep.mubr.bf16.mxu0 %v5441_v4  ;;  %4760 = vmatprep.mubr.bf16.mxu1 %v5442_v5  ;;  %v5440_v9 = vld [vmem:[#allocation5] sm:$0xff]   ;;  %v5444_v11 = vld [vmem:[%s6002_s12 + $0x48] sm:$0xff]   ;;  %v5445_v13 = vld [vmem:[%s6002_s12 + $0x10] sm:$0xff]  }
  0x6e   : > { %v5446_v14 = vld [vmem:[%s6002_s12 + $0x50] sm:$0xff]   ;;  %v6032_v16 = vld [vmem:[#allocation7 + $0x28] sm:$0xff]   ;;  %v5447_v17 = vld [vmem:[%s6002_s12 + $0x18] sm:$0xff]  }
  0x6f   : > { %4715 = vmatpush3.bf16.msra.mxu0 %v5434_v1  ;;  %4747 = vmatpush3.bf16.msra.mxu1 %v5434_v1  ;;  %v6024_v15 = vld [vmem:[#allocation7 + $0x30] sm:$0xff]   ;;  %v5448_v18 = vld [vmem:[%s6002_s12 + $0x58] sm:$0xff]   ;;  %v5449_v19 = vld [vmem:[%s6002_s12 + $0x20] sm:$0xff]  }
  0x70   : > { %4716 = vmatprep.subr.bf16.mxu0 %v5435_v2  ;;  %4748 = vmatprep.subr.bf16.mxu1 %v5435_v2  ;;  %v5450_v20 = vld [vmem:[%s6002_s12 + $0x60] sm:$0xff]   ;;  %v6048_v22 = vld [vmem:[#allocation7 + $0x18] sm:$0xff]   ;;  %v5451_v23 = vld [vmem:[%s6002_s12 + $0x28] sm:$0xff]  }
  0x71   : > { %v6042_v21 = vld [vmem:[#allocation7 + $0x20] sm:$0xff]   ;;  %v5452_v24 = vld [vmem:[%s6002_s12 + $0x68] sm:$0xff]   ;;  %v5453_v25 = vld [vmem:[%s6002_s12 + $0x30] sm:$0xff]  }
  0x72   : > { %v5454_v26 = vld [vmem:[%s6002_s12 + $0x70] sm:$0xff]   ;;  %v5455_v27 = vld [vmem:[%s6002_s12 + $0x38] sm:$0xff]   ;;  %v6068_v30 = vld [vmem:[#allocation7 + $0x8] sm:$0xff]  }
  0x73   : > { %4717 = vmatpush3.bf16.msra.mxu0 %v5435_v2  ;;  %4749 = vmatpush3.bf16.msra.mxu1 %v5435_v2  ;;  %v5456_v28 = vld [vmem:[%s6002_s12 + $0x78] sm:$0xff]   ;;  %v6062_v29 = vld [vmem:[#allocation7 + $0x10] sm:$0xff]   ;;  %v6074_v31 = vld [vmem:[#allocation7] sm:$0xff]   ;;  %s8255_s12 = scalar_lea.vmem [#allocation10], %s4178_s1  ;;  %s4296_s1 = sshll.u32 %s5870_s28, 11 }
  0x74   : > { %4718 = vmatprep.subr.bf16.mxu0 %v5436_v3  ;;  %4750 = vmatprep.subr.bf16.mxu1 %v5436_v3  ;;  %v6085_v36 = vld [vmem:[%s8355_s2] ss:$0 sm:$0xff]  ;;  %s4066_s30 = sshll.u32 %s8255_s12, 4  ;;  %s8307_s13 = scalar_lea.hbm %s8360_s7, %s4296_s1  ;;  %s8309_s30 = int_to_ptr.vmem [resolvable:$true] %s4066_s30 }
  0x75   : > { %s5726_s28 = scalar_lea.vmem %s8309_s30, 2048  ;;  %p5733_p13 = scmp.lt.s32.totalorder %s8309_s30, %s5731_s11 }
  0x76   : > { %p5727_p7 = scmp.ne.s32.totalorder %s8309_s30, %s5726_s28  ;;  %p5734_p0 = scmp.lt.s32.totalorder %s5732_s21, %s5726_s28 }
  0x77   : > { %4719 = vmatpush3.bf16.msra.mxu0 %v5436_v3  ;;  %4751 = vmatpush3.bf16.msra.mxu1 %v5436_v3 }
  0x78   : > { %4720 = vmatprep.subr.bf16.mxu0 %v5437_v6  ;;  %4752 = vmatprep.subr.bf16.mxu1 %v5437_v6  ;;  %p5728_p12 = pnand %p5727_p7, %p8466_p1  ;;  %p5735_p2 = por %p5734_p0, %p5733_p13 }
  0x7a   : > { %p5729_p9 = pneg %p5728_p12 }
  0x7b   : > { %4721 = vmatpush3.bf16.msra.mxu0 %v5437_v6  ;;  %4753 = vmatpush3.bf16.msra.mxu1 %v5437_v6 }
  0x7c   : > { %4722 = vmatprep.subr.bf16.mxu0 %v5438_v7  ;;  %4754 = vmatprep.subr.bf16.mxu1 %v5438_v7  ;;  %p5736_p10 = pnand %p5735_p2, %p5729_p9 }
  0x7f   : > { %4723 = vmatpush3.bf16.msra.mxu0 %v5438_v7  ;;  %4755 = vmatpush3.bf16.msra.mxu1 %v5438_v7 }
  0x80   : > { %4724 = vmatprep.subr.bf16.mxu0 %v5439_v8  ;;  %4756 = vmatprep.subr.bf16.mxu1 %v5439_v8 }
  0x83   : > { %4725 = vmatpush3.bf16.msra.mxu0 %v5439_v8  ;;  %4757 = vmatpush3.bf16.msra.mxu1 %v5439_v8 }
  0x84   : > { %4726 = vmatprep.subr.bf16.mxu0 %v5440_v9  ;;  %4758 = vmatprep.subr.bf16.mxu1 %v5440_v9 }
  0x87   : > { %4727 = vmatpush3.bf16.msra.mxu0 %v5440_v9  ;;  %4759 = vmatpush3.bf16.msra.mxu1 %v5440_v9 }
  0x88   : > { %4776 = vmatprep.subr.bf16.mxu0 %v6020_v12  ;;  %4808 = vmatprep.subr.bf16.mxu1 %v6020_v12 }
  0x8a   : > { %4729 = vmatmul.mubr.bf16.vlgmr.msra.gmra.mxu0 %v5443_v10  ;;  %4761 = vmatmul.mubr.bf16.vlgmr.msra.gmra.mxu1 %v5444_v11 }
  0x8b   : > { %4732 = vmatprep.mubr.bf16.mxu0 %v5445_v13  ;;  %4764 = vmatprep.mubr.bf16.mxu1 %v5446_v14 }
  0x8c   : > { %4777 = vmatpush3.bf16.msra.mxu0 %v6020_v12  ;;  %4809 = vmatpush3.bf16.msra.mxu1 %v6020_v12 }
  0x8d   : > { %4778 = vmatprep.subr.bf16.mxu0 %v6024_v15  ;;  %4810 = vmatprep.subr.bf16.mxu1 %v6024_v15 }
  0x90   : > { %4779 = vmatpush3.bf16.msra.mxu0 %v6024_v15  ;;  %4811 = vmatpush3.bf16.msra.mxu1 %v6024_v15 }
  0x91   : > { %4780 = vmatprep.subr.bf16.mxu0 %v6032_v16  ;;  %4812 = vmatprep.subr.bf16.mxu1 %v6032_v16 }
  0x92   : > { %4733 = vmatmul.mubr.bf16.gmra.mxu0 %v5447_v17  ;;  %4765 = vmatmul.mubr.bf16.gmra.mxu1 %v5448_v18 }
  0x93   : > { %4736 = vmatprep.mubr.bf16.mxu0 %v5449_v19  ;;  %4768 = vmatprep.mubr.bf16.mxu1 %v5450_v20 }
  0x94   : > { %4781 = vmatpush3.bf16.msra.mxu0 %v6032_v16  ;;  %4813 = vmatpush3.bf16.msra.mxu1 %v6032_v16 }
  0x95   : > { %4782 = vmatprep.subr.bf16.mxu0 %v6042_v21  ;;  %4814 = vmatprep.subr.bf16.mxu1 %v6042_v21 }
  0x98   : > { %4783 = vmatpush3.bf16.msra.mxu0 %v6042_v21  ;;  %4815 = vmatpush3.bf16.msra.mxu1 %v6042_v21 }
  0x99   : > { %4784 = vmatprep.subr.bf16.mxu0 %v6048_v22  ;;  %4816 = vmatprep.subr.bf16.mxu1 %v6048_v22 }
  0x9a   : > { %4737 = vmatmul.mubr.bf16.gmra.mxu0 %v5451_v23  ;;  %4769 = vmatmul.mubr.bf16.gmra.mxu1 %v5452_v24 }
  0x9b   : > { %4740 = vmatprep.mubr.bf16.mxu0 %v5453_v25  ;;  %4772 = vmatprep.mubr.bf16.mxu1 %v5454_v26 }
  0x9c   : > { %4785 = vmatpush3.bf16.msra.mxu0 %v6048_v22  ;;  %4817 = vmatpush3.bf16.msra.mxu1 %v6048_v22 }
  0x9d   : > { %4786 = vmatprep.subr.bf16.mxu0 %v6062_v29  ;;  %4818 = vmatprep.subr.bf16.mxu1 %v6062_v29 }
  0xa0   : > { %4787 = vmatpush3.bf16.msra.mxu0 %v6062_v29  ;;  %4819 = vmatpush3.bf16.msra.mxu1 %v6062_v29 }
  0xa1   : > { %4788 = vmatprep.subr.bf16.mxu0 %v6068_v30  ;;  %4820 = vmatprep.subr.bf16.mxu1 %v6068_v30 }
  0xa2   : > { %4741 = vmatmul.mubr.bf16.gmra.mxu0 %v5455_v27  ;;  %4773 = vmatmul.mubr.bf16.gmra.mxu1 %v5456_v28 }
  0xa4   : > { %4789 = vmatpush3.bf16.msra.mxu0 %v6068_v30  ;;  %4821 = vmatpush3.bf16.msra.mxu1 %v6068_v30 }
  0xa5   : > { %4790 = vmatprep.subr.bf16.mxu0 %v6074_v31  ;;  %4822 = vmatprep.subr.bf16.mxu1 %v6074_v31 }
  0xa8   : > { %4791 = vmatpush3.bf16.msra.mxu0 %v6074_v31  ;;  %4823 = vmatpush3.bf16.msra.mxu1 %v6074_v31 }
  0xa9   : > { %4840 = vmatprep.subr.bf16.mxu0 %v6020_v12  ;;  %4872 = vmatprep.subr.bf16.mxu1 %v6020_v12 }
 0x14a   : > { %v4730_v32 = vpop.f32.mrf.mxu0  ;;  %v4762_v33 = vpop.f32.mrf.mxu1 }
 0x14b   : > { %v584_v43 = vadd.f32 %v4730_v32, %v6085_v36  ;;  %v745_v44 = vadd.f32 %v4762_v33, %v6085_v36 }
 0x14c   : > { %v575_v34 = vpop.f32.mrf.mxu0  ;;  %v736_v35 = vpop.f32.mrf.mxu1 }
 0x14d   : > { %v576_v39 = vadd.f32 %v6085_v36, %v575_v34  ;;  %v737_v40 = vadd.f32 %v6085_v36, %v736_v35  ;;  %v6107_v57 = vmax.f32 %v584_v43, 0.0  ;;  %v6109_v58 = vmax.f32 %v745_v44, 0.0 }
 0x14e   : > { %v4731_v37 = vpop.f32.mrf.mxu0  ;;  %v4763_v38 = vpop.f32.mrf.mxu1 }
 0x14f   : > { %v587_v41 = vadd.f32 %v4731_v37, %v6085_v36  ;;  %v748_v42 = vadd.f32 %v4763_v38, %v6085_v36  ;;  %v6099_v53 = vmax.f32 %v576_v39, 0.0  ;;  %v6101_v54 = vmax.f32 %v737_v40, 0.0 }
 0x150   : > { %v578_v45 = vpop.f32.mrf.mxu0  ;;  %v739_v46 = vpop.f32.mrf.mxu1 }
 0x151   : > { %v579_v47 = vadd.f32 %v6085_v36, %v578_v45  ;;  %v740_v48 = vadd.f32 %v6085_v36, %v739_v46  ;;  %v6095_v49 = vmax.f32 %v587_v41, 0.0  ;;  %v6097_v50 = vmax.f32 %v748_v42, 0.0 }
 0x152   : > { %v4734_v51 = vpop.f32.mrf.mxu0  ;;  %v4766_v52 = vpop.f32.mrf.mxu1 }
 0x153   : > { %8413 = vst [vmem:[#allocation15_spill] sm:$0xff] %v6095_v49  ;;  %8414 = vst [vmem:[#allocation16_spill] sm:$0xff] %v6097_v50  ;;  %v6103_v55 = vmax.f32 %v579_v47, 0.0  ;;  %v6105_v56 = vmax.f32 %v740_v48, 0.0  ;;  %v600_v59 = vadd.f32 %v4734_v51, %v6085_v36  ;;  %v761_v60 = vadd.f32 %v4766_v52, %v6085_v36 }
 0x154   : > { %v591_v61 = vpop.f32.mrf.mxu0  ;;  %v752_v62 = vpop.f32.mrf.mxu1  ;;  %v816_v1 = vpack.c.bf16 %v6095_v49, %v6107_v57  ;;  %v824_v2 = vpack.c.bf16 %v6097_v50, %v6109_v58 }
 0x155   : > { %8415 = vst [vmem:[#allocation17_spill] sm:$0xff] %v6103_v55  ;;  %8416 = vst [vmem:[#allocation18_spill] sm:$0xff] %v6105_v56  ;;  %v815_v63 = vpack.c.bf16 %v6103_v55, %v6099_v53  ;;  %v823_v0 = vpack.c.bf16 %v6105_v56, %v6101_v54  ;;  %v592_v3 = vadd.f32 %v6085_v36, %v591_v61  ;;  %v6125_v9 = vmax.f32 %v600_v59, 0.0 }
 0x156   : > { %v753_v4 = vadd.f32 %v6085_v36, %v752_v62  ;;  %v4735_v5 = vpop.f32.mrf.mxu0  ;;  %v4767_v6 = vpop.f32.mrf.mxu1  ;;  %v6127_v10 = vmax.f32 %v761_v60, 0.0 }
 0x157   : > { %v603_v7 = vadd.f32 %v4735_v5, %v6085_v36  ;;  %v764_v8 = vadd.f32 %v4767_v6, %v6085_v36  ;;  %4792 = vmatprep.mubr.bf16.mxu0 %v815_v63  ;;  %4824 = vmatprep.mubr.bf16.mxu1 %v823_v0  ;;  %v6137_v20 = vmax.f32 %v592_v3, 0.0 }
 0x158   : > { %v594_v11 = vpop.f32.mrf.mxu0  ;;  %v755_v13 = vpop.f32.mrf.mxu1  ;;  %4793 = vmatmul.mubr.bf16.vlgmr.msra.gmra.mxu0 %v816_v1  ;;  %4825 = vmatmul.mubr.bf16.vlgmr.msra.gmra.mxu1 %v824_v2  ;;  %v6139_v23 = vmax.f32 %v753_v4, 0.0 }
 0x159   : > { %v6129_v14 = vmax.f32 %v603_v7, 0.0  ;;  %v6131_v17 = vmax.f32 %v764_v8, 0.0  ;;  %v595_v18 = vadd.f32 %v6085_v36, %v594_v11  ;;  %v756_v19 = vadd.f32 %v6085_v36, %v755_v13  ;;  %4841 = vmatpush3.bf16.msra.mxu0 %v6020_v12  ;;  %4873 = vmatpush3.bf16.msra.mxu1 %v6020_v12 }
 0x15a   : > { %v4738_v24 = vpop.f32.mrf.mxu0  ;;  %v4770_v25 = vpop.f32.mrf.mxu1  ;;  %4842 = vmatprep.subr.bf16.mxu0 %v6024_v15  ;;  %4874 = vmatprep.subr.bf16.mxu1 %v6024_v15 }
 0x15b   : > { %8417 = vst [vmem:[#allocation19_spill] sm:$0xff] %v6131_v17  ;;  %v6143_v26 = vmax.f32 %v595_v18, 0.0  ;;  %v6145_v27 = vmax.f32 %v756_v19, 0.0  ;;  %v616_v28 = vadd.f32 %v4738_v24, %v6085_v36  ;;  %v777_v32 = vadd.f32 %v4770_v25, %v6085_v36 }
 0x15c   : > { %v607_v33 = vpop.f32.mrf.mxu0  ;;  %v768_v34 = vpop.f32.mrf.mxu1  ;;  %v818_v37 = vpack.c.bf16 %v6129_v14, %v6125_v9  ;;  %v826_v38 = vpack.c.bf16 %v6131_v17, %v6127_v10 }
 0x15d   : > { %8418 = vst [vmem:[#allocation20_spill] sm:$0xff] %v6143_v26  ;;  %8419 = vst [vmem:[#allocation21_spill] sm:$0xff] %v6145_v27  ;;  %v608_v35 = vadd.f32 %v6085_v36, %v607_v33  ;;  %4843 = vmatpush3.bf16.msra.mxu0 %v6024_v15  ;;  %4875 = vmatpush3.bf16.msra.mxu1 %v6024_v15  ;;  %v769_v39 = vadd.f32 %v6085_v36, %v768_v34  ;;  %v6165_v46 = vmax.f32 %v616_v28, 0.0 }
 0x15e   : > { %v4739_v40 = vpop.f32.mrf.mxu0  ;;  %v4771_v41 = vpop.f32.mrf.mxu1  ;;  %v817_v42 = vpack.c.bf16 %v6143_v26, %v6137_v20  ;;  %v825_v43 = vpack.c.bf16 %v6145_v27, %v6139_v23  ;;  %4844 = vmatprep.subr.bf16.mxu0 %v6032_v16  ;;  %4876 = vmatprep.subr.bf16.mxu1 %v6032_v16  ;;  %v6167_v47 = vmax.f32 %v777_v32, 0.0 }
 0x15f   : > { %v619_v44 = vadd.f32 %v4739_v40, %v6085_v36  ;;  %v780_v45 = vadd.f32 %v4771_v41, %v6085_v36  ;;  %v6175_v62 = vmax.f32 %v608_v35, 0.0  ;;  %v6177_v63 = vmax.f32 %v769_v39, 0.0 }
 0x160   : > { %4796 = vmatprep.mubr.bf16.mxu0 %v817_v42  ;;  %4828 = vmatprep.mubr.bf16.mxu1 %v825_v43  ;;  %v610_v48 = vpop.f32.mrf.mxu0  ;;  %v771_v51 = vpop.f32.mrf.mxu1 }
 0x161   : > { %v6169_v52 = vmax.f32 %v619_v44, 0.0  ;;  %v6171_v59 = vmax.f32 %v780_v45, 0.0  ;;  %v611_v60 = vadd.f32 %v6085_v36, %v610_v48  ;;  %v772_v61 = vadd.f32 %v6085_v36, %v771_v51  ;;  %4797 = vmatmul.mubr.bf16.gmra.mxu0 %v818_v37  ;;  %4829 = vmatmul.mubr.bf16.gmra.mxu1 %v826_v38 }
 0x162   : > { %v4742_v0 = vpop.f32.mrf.mxu0  ;;  %v4774_v1 = vpop.f32.mrf.mxu1  ;;  %4845 = vmatpush3.bf16.msra.mxu0 %v6032_v16  ;;  %4877 = vmatpush3.bf16.msra.mxu1 %v6032_v16 }
 0x163   : > { %8420 = vst [vmem:[#allocation22_spill] sm:$0xff] %v6171_v59  ;;  %v6181_v2 = vmax.f32 %v611_v60, 0.0  ;;  %v6183_v3 = vmax.f32 %v772_v61, 0.0  ;;  %4846 = vmatprep.subr.bf16.mxu0 %v6042_v21  ;;  %4878 = vmatprep.subr.bf16.mxu1 %v6042_v21  ;;  %v632_v4 = vadd.f32 %v4742_v0, %v6085_v36  ;;  %v793_v5 = vadd.f32 %v4774_v1, %v6085_v36 }
 0x164   : > { %v623_v6 = vpop.f32.mrf.mxu0  ;;  %v784_v7 = vpop.f32.mrf.mxu1  ;;  %v820_v13 = vpack.c.bf16 %v6169_v52, %v6165_v46  ;;  %v828_v18 = vpack.c.bf16 %v6171_v59, %v6167_v47 }
 0x165   : > { %8421 = vst [vmem:[#allocation23_spill] sm:$0xff] %v6181_v2  ;;  %8422 = vst [vmem:[#allocation24_spill] sm:$0xff] %v6183_v3  ;;  %v624_v8 = vadd.f32 %v6085_v36, %v623_v6  ;;  %v785_v11 = vadd.f32 %v6085_v36, %v784_v7  ;;  %v819_v25 = vpack.c.bf16 %v6181_v2, %v6175_v62  ;;  %v6205_v34 = vmax.f32 %v632_v4, 0.0  ;;  %v6250_v4 = vld [vmem:[%s8357_s4] ss:$0 sm:$0xff] }
 0x166   : > { %v4743_v19 = vpop.f32.mrf.mxu0  ;;  %v4775_v24 = vpop.f32.mrf.mxu1  ;;  %v827_v28 = vpack.c.bf16 %v6183_v3, %v6177_v63  ;;  %4847 = vmatpush3.bf16.msra.mxu0 %v6042_v21  ;;  %4879 = vmatpush3.bf16.msra.mxu1 %v6042_v21  ;;  %v6207_v35 = vmax.f32 %v793_v5, 0.0 }
 0x167   : > { %v635_v32 = vadd.f32 %v4743_v19, %v6085_v36  ;;  %v796_v33 = vadd.f32 %v4775_v24, %v6085_v36  ;;  %4848 = vmatprep.subr.bf16.mxu0 %v6048_v22  ;;  %4880 = vmatprep.subr.bf16.mxu1 %v6048_v22  ;;  %v6209_v37 = vmax.f32 %v624_v8, 0.0  ;;  %v6211_v38 = vmax.f32 %v785_v11, 0.0 }
 0x168   : > { %4800 = vmatprep.mubr.bf16.mxu0 %v819_v25  ;;  %4832 = vmatprep.mubr.bf16.mxu1 %v827_v28  ;;  %v626_v39 = vpop.f32.mrf.mxu0  ;;  %v787_v40 = vpop.f32.mrf.mxu1 }
 0x169   : > { %v6213_v41 = vmax.f32 %v635_v32, 0.0  ;;  %v6215_v42 = vmax.f32 %v796_v33, 0.0  ;;  %v627_v43 = vadd.f32 %v6085_v36, %v626_v39  ;;  %v788_v44 = vadd.f32 %v6085_v36, %v787_v40  ;;  %4801 = vmatmul.mubr.bf16.gmra.mxu0 %v820_v13  ;;  %4833 = vmatmul.mubr.bf16.gmra.mxu1 %v828_v18 }
 0x16a   : > { %4849 = vmatpush3.bf16.msra.mxu0 %v6048_v22  ;;  %4881 = vmatpush3.bf16.msra.mxu1 %v6048_v22 }
 0x16b   : > { %v6221_v45 = vmax.f32 %v627_v43, 0.0  ;;  %v6223_v48 = vmax.f32 %v788_v44, 0.0  ;;  %4850 = vmatprep.subr.bf16.mxu0 %v6062_v29  ;;  %4882 = vmatprep.subr.bf16.mxu1 %v6062_v29  ;;  %v822_v60 = vpack.c.bf16 %v6213_v41, %v6205_v34  ;;  %v830_v61 = vpack.c.bf16 %v6215_v42, %v6207_v35 }
 0x16d   : > { %v821_v51 = vpack.c.bf16 %v6221_v45, %v6209_v37  ;;  %v829_v36 = vpack.c.bf16 %v6223_v48, %v6211_v38 }
 0x16e   : > { %4851 = vmatpush3.bf16.msra.mxu0 %v6062_v29  ;;  %4883 = vmatpush3.bf16.msra.mxu1 %v6062_v29 }
 0x16f   : > { %4804 = vmatprep.mubr.bf16.mxu0 %v821_v51  ;;  %4836 = vmatprep.mubr.bf16.mxu1 %v829_v36 }
 0x170   : > { %4852 = vmatprep.subr.bf16.mxu0 %v6068_v30  ;;  %4884 = vmatprep.subr.bf16.mxu1 %v6068_v30 }
 0x171   : > { %4805 = vmatmul.mubr.bf16.gmra.mxu0 %v822_v60  ;;  %4837 = vmatmul.mubr.bf16.gmra.mxu1 %v830_v61 }
 0x172   : > { %4853 = vmatpush3.bf16.msra.mxu0 %v6068_v30  ;;  %4885 = vmatpush3.bf16.msra.mxu1 %v6068_v30 }
 0x173   : > { %4854 = vmatprep.subr.bf16.mxu0 %v6074_v31  ;;  %4886 = vmatprep.subr.bf16.mxu1 %v6074_v31 }
 0x176   : > { %4855 = vmatpush3.bf16.msra.mxu0 %v6074_v31  ;;  %4887 = vmatpush3.bf16.msra.mxu1 %v6074_v31 }
 0x177   : > { %4904 = vmatprep.subr.bf16.mxu0 %v6020_v12  ;;  %4936 = vmatprep.subr.bf16.mxu1 %v6020_v12 }
 0x218   : > { %v4794_v0 = vpop.f32.mrf.mxu0  ;;  %v4826_v1 = vpop.f32.mrf.mxu1 }
 0x219   : > { %v922_v11 = vadd.f32 %v4794_v0, %v6250_v4  ;;  %v1051_v13 = vadd.f32 %v4826_v1, %v6250_v4 }
 0x21a   : > { %v913_v5 = vpop.f32.mrf.mxu0  ;;  %v1042_v6 = vpop.f32.mrf.mxu1 }
 0x21b   : > { %v914_v7 = vadd.f32 %v6250_v4, %v913_v5  ;;  %v1043_v8 = vadd.f32 %v6250_v4, %v1042_v6  ;;  %v978_v44 = vmax.f32 %v922_v11, 0.0  ;;  %v1107_v51 = vmax.f32 %v1051_v13, 0.0 }
 0x21c   : > { %v4795_v18 = vpop.f32.mrf.mxu0  ;;  %v4827_v19 = vpop.f32.mrf.mxu1 }
 0x21d   : > { %v976_v24 = vmax.f32 %v914_v7, 0.0  ;;  %v925_v25 = vadd.f32 %v4795_v18, %v6250_v4  ;;  %v1054_v28 = vadd.f32 %v4827_v19, %v6250_v4  ;;  %v1105_v39 = vmax.f32 %v1043_v8, 0.0 }
 0x21e   : > { %v916_v32 = vpop.f32.mrf.mxu0  ;;  %v1045_v33 = vpop.f32.mrf.mxu1 }
 0x21f   : > { %v917_v40 = vadd.f32 %v6250_v4, %v916_v32  ;;  %v1046_v43 = vadd.f32 %v6250_v4, %v1045_v33  ;;  %v979_v36 = vmax.f32 %v925_v25, 0.0  ;;  %v1108_v60 = vmax.f32 %v1054_v28, 0.0 }
 0x220   : > { %v6261_v6 = vadd.f32 %v976_v24, %v6099_v53  ;;  %v6270_v18 = vadd.f32 %v1105_v39, %v6101_v54  ;;  %v6280_v28 = vadd.f32 %v978_v44, %v6107_v57  ;;  %v6283_v32 = vadd.f32 %v1107_v51, %v6109_v58 }
 0x221   : > { %v977_v61 = vmax.f32 %v917_v40, 0.0  ;;  %v1106_v0 = vmax.f32 %v1046_v43, 0.0  ;;  %v4798_v1 = vpop.f32.mrf.mxu0  ;;  %v4830_v5 = vpop.f32.mrf.mxu1  ;;  %v6264_v7 = vadd.f32 %v979_v36, %v6095_v49  ;;  %v6267_v8 = vadd.f32 %v1108_v60, %v6097_v50 }
 0x222   : > { %v938_v19 = vadd.f32 %v4798_v1, %v6250_v4  ;;  %v1067_v33 = vadd.f32 %v4830_v5, %v6250_v4 }
 0x223   : > { %8423 = vst [vmem:[#allocation25_spill] sm:$0xff] %v6264_v7  ;;  %8424 = vst [vmem:[#allocation26_spill] sm:$0xff] %v6267_v8  ;;  %v6273_v11 = vadd.f32 %v977_v61, %v6103_v55  ;;  %v6276_v13 = vadd.f32 %v1106_v0, %v6105_v56  ;;  %v929_v25 = vpop.f32.mrf.mxu0  ;;  %v1058_v24 = vpop.f32.mrf.mxu1  ;;  %v1170_v44 = vpack.c.bf16 %v6264_v7, %v6280_v28 }
 0x224   : > { %v930_v39 = vadd.f32 %v6250_v4, %v929_v25  ;;  %v1059_v40 = vadd.f32 %v6250_v4, %v1058_v24  ;;  %v1178_v51 = vpack.c.bf16 %v6267_v8, %v6283_v32  ;;  %v982_v5 = vmax.f32 %v938_v19, 0.0 }
 0x225   : > { %8425 = vst [vmem:[#allocation27_spill] sm:$0xff] %v6273_v11  ;;  %8426 = vst [vmem:[#allocation28_spill] sm:$0xff] %v6276_v13  ;;  %v4799_v43 = vpop.f32.mrf.mxu0  ;;  %v4831_v36 = vpop.f32.mrf.mxu1  ;;  %v1169_v60 = vpack.c.bf16 %v6273_v11, %v6261_v6  ;;  %v1177_v61 = vpack.c.bf16 %v6276_v13, %v6270_v18  ;;  %v1111_v19 = vmax.f32 %v1067_v33, 0.0 }
 0x226   : > { %v941_v0 = vadd.f32 %v4799_v43, %v6250_v4  ;;  %v1070_v1 = vadd.f32 %v4831_v36, %v6250_v4  ;;  %v980_v50 = vmax.f32 %v930_v39, 0.0  ;;  %v1109_v7 = vmax.f32 %v1059_v40, 0.0 }
 0x227   : > { %v932_v25 = vpop.f32.mrf.mxu0  ;;  %v1061_v24 = vpop.f32.mrf.mxu1  ;;  %4856 = vmatprep.mubr.bf16.mxu0 %v1169_v60  ;;  %4888 = vmatprep.mubr.bf16.mxu1 %v1177_v61  ;;  %v6305_v60 = vadd.f32 %v982_v5, %v6125_v9 }
 0x228   : > { %v983_v56 = vmax.f32 %v941_v0, 0.0  ;;  %v1112_v11 = vmax.f32 %v1070_v1, 0.0  ;;  %v933_v55 = vadd.f32 %v6250_v4, %v932_v25  ;;  %v1062_v13 = vadd.f32 %v6250_v4, %v1061_v24  ;;  %4857 = vmatmul.mubr.bf16.vlgmr.msra.gmra.mxu0 %v1170_v44  ;;  %4889 = vmatmul.mubr.bf16.vlgmr.msra.gmra.mxu1 %v1178_v51 }
 0x229   : > { %v4802_v8 = vpop.f32.mrf.mxu0  ;;  %v4834_v49 = vpop.f32.mrf.mxu1  ;;  %4905 = vmatpush3.bf16.msra.mxu0 %v6020_v12  ;;  %4937 = vmatpush3.bf16.msra.mxu1 %v6020_v12 }
 0x22a   : > { %v981_v43 = vmax.f32 %v933_v55, 0.0  ;;  %v1110_v36 = vmax.f32 %v1062_v13, 0.0  ;;  %4906 = vmatprep.subr.bf16.mxu0 %v6024_v15  ;;  %4938 = vmatprep.subr.bf16.mxu1 %v6024_v15  ;;  %v6308_v61 = vadd.f32 %v983_v56, %v6129_v14  ;;  %v954_v39 = vadd.f32 %v4802_v8, %v6250_v4 }
 0x22b   : > { %v1083_v40 = vadd.f32 %v4834_v49, %v6250_v4  ;;  %v945_v44 = vpop.f32.mrf.mxu0  ;;  %v1074_v51 = vpop.f32.mrf.mxu1  ;;  %v6313_v33 = vadd.f32 %v1112_v11, %v6131_v17  ;;  %v6323_v56 = vadd.f32 %v980_v50, %v6137_v20  ;;  %v6326_v8 = vadd.f32 %v1109_v7, %v6139_v23 }
 0x22c   : > { %v6316_v55 = vadd.f32 %v981_v43, %v6143_v26  ;;  %v6319_v13 = vadd.f32 %v1110_v36, %v6145_v27  ;;  %v946_v0 = vadd.f32 %v6250_v4, %v945_v44  ;;  %v1075_v49 = vadd.f32 %v6250_v4, %v1074_v51 }
 0x22d   : > { %8427 = vst [vmem:[#allocation29_spill] sm:$0xff] %v6313_v33  ;;  %v4803_v1 = vpop.f32.mrf.mxu0  ;;  %v4835_v5 = vpop.f32.mrf.mxu1  ;;  %4907 = vmatpush3.bf16.msra.mxu0 %v6024_v15  ;;  %4939 = vmatpush3.bf16.msra.mxu1 %v6024_v15  ;;  %v6332_v11 = vadd.f32 %v1111_v19, %v6127_v10  ;;  %v986_v25 = vmax.f32 %v954_v39, 0.0  ;;  %v1115_v7 = vmax.f32 %v1083_v40, 0.0  ;;  %v1172_v39 = vpack.c.bf16 %v6308_v61, %v6305_v60 }
 0x22e   : > { %8428 = vst [vmem:[#allocation30_spill] sm:$0xff] %v6316_v55  ;;  %8429 = vst [vmem:[#allocation31_spill] sm:$0xff] %v6319_v13  ;;  %v957_v24 = vadd.f32 %v4803_v1, %v6250_v4  ;;  %v1086_v50 = vadd.f32 %v4835_v5, %v6250_v4  ;;  %4908 = vmatprep.subr.bf16.mxu0 %v6032_v16  ;;  %4940 = vmatprep.subr.bf16.mxu1 %v6032_v16  ;;  %v984_v43 = vmax.f32 %v946_v0, 0.0 }
 0x22f   : > { %v948_v36 = vpop.f32.mrf.mxu0  ;;  %v1077_v44 = vpop.f32.mrf.mxu1  ;;  %v1171_v51 = vpack.c.bf16 %v6316_v55, %v6323_v56  ;;  %v1179_v15 = vpack.c.bf16 %v6319_v13, %v6326_v8  ;;  %v1180_v1 = vpack.c.bf16 %v6313_v33, %v6332_v11  ;;  %v1113_v5 = vmax.f32 %v1075_v49, 0.0 }
 0x230   : > { %v987_v19 = vmax.f32 %v957_v24, 0.0  ;;  %v1116_v27 = vmax.f32 %v1086_v50, 0.0  ;;  %v949_v40 = vadd.f32 %v6250_v4, %v948_v36  ;;  %v1078_v0 = vadd.f32 %v6250_v4, %v1077_v44 }
 0x231   : > { %4860 = vmatprep.mubr.bf16.mxu0 %v1171_v51  ;;  %4892 = vmatprep.mubr.bf16.mxu1 %v1179_v15  ;;  %v4806_v26 = vpop.f32.mrf.mxu0  ;;  %v4838_v55 = vpop.f32.mrf.mxu1  ;;  %v6349_v17 = vadd.f32 %v986_v25, %v6165_v46  ;;  %v6352_v24 = vadd.f32 %v1115_v7, %v6167_v47  ;;  %v6355_v13 = vadd.f32 %v984_v43, %v6175_v62 }
 0x232   : > { %4861 = vmatmul.mubr.bf16.gmra.mxu0 %v1172_v39  ;;  %v985_v49 = vmax.f32 %v949_v40, 0.0  ;;  %v1114_v50 = vmax.f32 %v1078_v0, 0.0  ;;  %4893 = vmatmul.mubr.bf16.gmra.mxu1 %v1180_v1  ;;  %v6359_v44 = vadd.f32 %v987_v19, %v6169_v52  ;;  %v6366_v7 = vadd.f32 %v1113_v5, %v6177_v63 }
 0x233   : > { %v961_v36 = vpop.f32.mrf.mxu0  ;;  %v1090_v33 = vpop.f32.mrf.mxu1  ;;  %4909 = vmatpush3.bf16.msra.mxu0 %v6032_v16  ;;  %4941 = vmatpush3.bf16.msra.mxu1 %v6032_v16  ;;  %v6369_v43 = vadd.f32 %v1116_v27, %v6171_v59  ;;  %v970_v16 = vadd.f32 %v4806_v26, %v6250_v4 }
 0x234   : > { %v962_v25 = vadd.f32 %v6250_v4, %v961_v36  ;;  %v1091_v51 = vadd.f32 %v6250_v4, %v1090_v33  ;;  %4910 = vmatprep.subr.bf16.mxu0 %v6042_v21  ;;  %v6372_v15 = vadd.f32 %v985_v49, %v6181_v2  ;;  %v6375_v19 = vadd.f32 %v1114_v50, %v6183_v3 }
 0x235   : > { %v4807_v39 = vpop.f32.mrf.mxu0  ;;  %v4839_v1 = vpop.f32.mrf.mxu1  ;;  %4942 = vmatprep.subr.bf16.mxu1 %v6042_v21  ;;  %v1099_v33 = vadd.f32 %v4838_v55, %v6250_v4 }
 0x236   : > { %8430 = vst [vmem:[#allocation32_spill] sm:$0xff] %v6372_v15  ;;  %8431 = vst [vmem:[#allocation33_spill] sm:$0xff] %v6375_v19  ;;  %v988_v40 = vmax.f32 %v962_v25, 0.0  ;;  %v1117_v5 = vmax.f32 %v1091_v51, 0.0  ;;  %v973_v0 = vadd.f32 %v4807_v39, %v6250_v4  ;;  %v1102_v27 = vadd.f32 %v4839_v1, %v6250_v4 }
 0x237   : > { %v964_v36 = vpop.f32.mrf.mxu0  ;;  %v1093_v49 = vpop.f32.mrf.mxu1  ;;  %v1173_v50 = vpack.c.bf16 %v6372_v15, %v6355_v13  ;;  %v1181_v3 = vpack.c.bf16 %v6375_v19, %v6366_v7  ;;  %4911 = vmatpush3.bf16.msra.mxu0 %v6042_v21  ;;  %v1174_v25 = vpack.c.bf16 %v6359_v44, %v6349_v17  ;;  %4943 = vmatpush3.bf16.msra.mxu1 %v6042_v21  ;;  %v990_v15 = vmax.f32 %v970_v16, 0.0 }
 0x238   : > { %v965_v26 = vadd.f32 %v6250_v4, %v964_v36  ;;  %v1094_v55 = vadd.f32 %v6250_v4, %v1093_v49  ;;  %v991_v51 = vmax.f32 %v973_v0, 0.0  ;;  %v1120_v39 = vmax.f32 %v1102_v27, 0.0  ;;  %4912 = vmatprep.subr.bf16.mxu0 %v6048_v22  ;;  %4944 = vmatprep.subr.bf16.mxu1 %v6048_v22 }
 0x239   : > { %4864 = vmatprep.mubr.bf16.mxu0 %v1173_v50  ;;  %4896 = vmatprep.mubr.bf16.mxu1 %v1181_v3  ;;  %v1182_v1 = vpack.c.bf16 %v6369_v43, %v6352_v24  ;;  %v1119_v36 = vmax.f32 %v1099_v33, 0.0  ;;  %v6396_v49 = vadd.f32 %v988_v40, %v6209_v37  ;;  %v6399_v59 = vadd.f32 %v1117_v5, %v6211_v38  ;;  %v8432_v50 = vld [vmem:[#allocation15_spill] sm:$0xff] }
 0x23a   : > { %v989_v19 = vmax.f32 %v965_v26, 0.0  ;;  %v1118_v2 = vmax.f32 %v1094_v55, 0.0  ;;  %4865 = vmatmul.mubr.bf16.gmra.mxu0 %v1174_v25  ;;  %v6403_v21 = vadd.f32 %v991_v51, %v6213_v41  ;;  %v6414_v33 = vadd.f32 %v1120_v39, %v6215_v42  ;;  %v8433_v26 = vld [vmem:[#allocation25_spill] sm:$0xff]  ;;  %v8435_v25 = vld [vmem:[#allocation26_spill] sm:$0xff]  ;;  %v8437_v39 = vld [vmem:[#allocation27_spill] sm:$0xff] }
 0x23b   : > { %4897 = vmatmul.mubr.bf16.gmra.mxu1 %v1182_v1  ;;  %4913 = vmatpush3.bf16.msra.mxu0 %v6048_v22  ;;  %v1006_v40 = vadd.f32 %v990_v15, %v6205_v34  ;;  %v1135_v5 = vadd.f32 %v1119_v36, %v6207_v35  ;;  %v1155_v15 = vadd.f32 %v6283_v32, %v6109_v58  ;;  %v8439_v58 = vld [vmem:[#allocation28_spill] sm:$0xff] }
 0x23c   : > { %v6406_v3 = vadd.f32 %v989_v19, %v6221_v45  ;;  %v6409_v16 = vadd.f32 %v1118_v2, %v6223_v48  ;;  %4945 = vmatpush3.bf16.msra.mxu1 %v6048_v22  ;;  %4914 = vmatprep.subr.bf16.mxu0 %v6062_v29  ;;  %v1153_v27 = vadd.f32 %v6270_v18, %v6101_v54 }
 0x23d   : > { %4946 = vmatprep.subr.bf16.mxu1 %v6062_v29  ;;  %v1176_v22 = vpack.c.bf16 %v6403_v21, %v1006_v40  ;;  %v1184_v0 = vpack.c.bf16 %v6414_v33, %v1135_v5  ;;  %v6448_v55 = vadd.f32 %v8433_v26, %v8432_v50  ;;  %v6468_v54 = vadd.f32 %v6332_v11, %v6127_v10  ;;  %v8442_v10 = vld [vmem:[#allocation20_spill] sm:$0xff]  ;;  %v8443_v11 = vld [vmem:[#allocation30_spill] sm:$0xff] }
 0x23e   : > { %v1175_v19 = vpack.c.bf16 %v6406_v3, %v6396_v49  ;;  %v1183_v2 = vpack.c.bf16 %v6409_v16, %v6399_v59  ;;  %v6476_v18 = vadd.f32 %v6326_v8, %v6139_v23 }
 0x23f   : > { %4915 = vmatpush3.bf16.msra.mxu0 %v6062_v29 }
 0x240   : > { %4868 = vmatprep.mubr.bf16.mxu0 %v1175_v19  ;;  %4900 = vmatprep.mubr.bf16.mxu1 %v1183_v2  ;;  %v6480_v19 = vadd.f32 %v6308_v61, %v6129_v14  ;;  %v6498_v14 = vadd.f32 %v6349_v17, %v6165_v46  ;;  %v6502_v61 = vadd.f32 %v6352_v24, %v6167_v47  ;;  %v8446_v17 = vld [vmem:[#allocation22_spill] sm:$0xff] }
 0x241   : > { %4947 = vmatpush3.bf16.msra.mxu1 %v6062_v29  ;;  %4916 = vmatprep.subr.bf16.mxu0 %v6068_v30  ;;  %v1139_v29 = vadd.f32 %v6280_v28, %v6107_v57  ;;  %v8438_v28 = vld [vmem:[#allocation18_spill] sm:$0xff]  ;;  %v6518_v46 = vadd.f32 %v6369_v43, %v8446_v17  ;;  %v6534_v43 = vadd.f32 %v1135_v5, %v6207_v35 }
 0x242   : > { %4869 = vmatmul.mubr.bf16.gmra.mxu0 %v1176_v22  ;;  %4948 = vmatprep.subr.bf16.mxu1 %v6068_v30  ;;  %v6460_v32 = vadd.f32 %v8439_v58, %v8438_v28  ;;  %v6488_v22 = vadd.f32 %v8443_v11, %v8442_v10  ;;  %v8447_v58 = vld [vmem:[#allocation23_spill] sm:$0xff] }
 0x243   : > { %4901 = vmatmul.mubr.bf16.gmra.mxu1 %v1184_v0  ;;  %4917 = vmatpush3.bf16.msra.mxu0 %v6068_v30 }
 0x244   : > { %4918 = vmatprep.subr.bf16.mxu0 %v6074_v31 }
 0x245   : > { %4949 = vmatpush3.bf16.msra.mxu1 %v6068_v30  ;;  %v1137_v30 = vadd.f32 %v6261_v6, %v6099_v53  ;;  %v6464_v53 = vadd.f32 %v6305_v60, %v6125_v9  ;;  %v6472_v6 = vadd.f32 %v6323_v56, %v6137_v20  ;;  %v8440_v9 = vld [vmem:[#allocation19_spill] sm:$0xff]  ;;  %v8441_v60 = vld [vmem:[#allocation29_spill] sm:$0xff] }
 0x246   : > { %4950 = vmatprep.subr.bf16.mxu1 %v6074_v31  ;;  %v6484_v2 = vadd.f32 %v8441_v60, %v8440_v9  ;;  %v8444_v20 = vld [vmem:[#allocation21_spill] sm:$0xff]  ;;  %v8445_v56 = vld [vmem:[#allocation31_spill] sm:$0xff] }
 0x247   : > { %4919 = vmatpush3.bf16.msra.mxu0 %v6074_v31  ;;  %v6492_v0 = vadd.f32 %v8445_v56, %v8444_v20 }
 0x248   : > { %4968 = vmatprep.subr.bf16.mxu0 %v6020_v12 }
 0x249   : > { %4951 = vmatpush3.bf16.msra.mxu1 %v6074_v31  ;;  %v8434_v31 = vld [vmem:[#allocation16_spill] sm:$0xff] }
 0x24a   : > { %5000 = vmatprep.subr.bf16.mxu1 %v6020_v12  ;;  %v6452_v51 = vadd.f32 %v8435_v25, %v8434_v31  ;;  %v8436_v12 = vld [vmem:[#allocation17_spill] sm:$0xff]  ;;  %v6506_v31 = vadd.f32 %v6355_v13, %v6175_v62  ;;  %v6510_v25 = vadd.f32 %v6366_v7, %v6177_v63  ;;  %v8449_v7 = vld [vmem:[#allocation24_spill] sm:$0xff] }
 0x24b   : > { %v6456_v57 = vadd.f32 %v8437_v39, %v8436_v12  ;;  %v6514_v12 = vadd.f32 %v6359_v44, %v6169_v52  ;;  %v6531_v44 = vadd.f32 %v1006_v40, %v6205_v34  ;;  %v6544_v34 = vadd.f32 %v6399_v59, %v6211_v38 }
 0x2e8   : > { %v4858_v1 = vpop.f32.mrf.mxu0  ;;  %v4890_v36 = vpop.f32.mrf.mxu1 }
 0x2e9   : > { %v1228_v23 = vadd.f32 %v4858_v1, %v6250_v4  ;;  %v1357_v8 = vadd.f32 %v4890_v36, %v6250_v4  ;;  %v8448_v1 = vld [vmem:[#allocation32_spill] sm:$0xff]  ;;  %v8450_v36 = vld [vmem:[#allocation33_spill] sm:$0xff] }
 0x2ea   : > { %v1219_v50 = vpop.f32.mrf.mxu0  ;;  %v1348_v26 = vpop.f32.mrf.mxu1  ;;  %v6524_v63 = vadd.f32 %v8448_v1, %v8447_v58  ;;  %v6528_v52 = vadd.f32 %v8450_v36, %v8449_v7  ;;  %v6560_v58 = vadd.f32 %v6403_v21, %v6213_v41  ;;  %v6571_v7 = vadd.f32 %v6406_v3, %v6221_v45 }
 0x2eb   : > { %v1284_v47 = vmax.f32 %v1228_v23, 0.0  ;;  %v1413_v24 = vmax.f32 %v1357_v8, 0.0  ;;  %v1220_v39 = vadd.f32 %v6250_v4, %v1219_v50  ;;  %v1349_v28 = vadd.f32 %v6250_v4, %v1348_v26 }
 0x2ec   : > { %v4859_v62 = vpop.f32.mrf.mxu0  ;;  %v4891_v13 = vpop.f32.mrf.mxu1  ;;  %v6540_v50 = vadd.f32 %v6396_v49, %v6209_v37 }
 0x2ed   : > { %v1300_v9 = vadd.f32 %v1284_v47, %v1139_v29  ;;  %v1429_v60 = vadd.f32 %v1413_v24, %v1155_v15  ;;  %v1282_v10 = vmax.f32 %v1220_v39, 0.0  ;;  %v1411_v11 = vmax.f32 %v1349_v28, 0.0 }
 0x2ee   : > { %v1231_v20 = vadd.f32 %v4859_v62, %v6250_v4  ;;  %v1360_v56 = vadd.f32 %v4891_v13, %v6250_v4  ;;  %v1222_v23 = vpop.f32.mrf.mxu0  ;;  %v1351_v8 = vpop.f32.mrf.mxu1 }
 0x2ef   : > { %v1298_v35 = vadd.f32 %v1282_v10, %v1137_v30  ;;  %v1427_v40 = vadd.f32 %v1411_v11, %v1153_v27  ;;  %v1223_v5 = vadd.f32 %v6250_v4, %v1222_v23  ;;  %v1352_v26 = vadd.f32 %v6250_v4, %v1351_v8 }
 0x2f0   : > { %v1285_v17 = vmax.f32 %v1231_v20, 0.0  ;;  %v1414_v47 = vmax.f32 %v1360_v56, 0.0  ;;  %v6548_v24 = vadd.f32 %v1300_v9, %v1139_v29  ;;  %v6550_v39 = vadd.f32 %v1429_v60, %v1155_v15 }
 0x2f1   : > { %v1283_v28 = vmax.f32 %v1223_v5, 0.0  ;;  %v1412_v62 = vmax.f32 %v1352_v26, 0.0  ;;  %v6552_v37 = vadd.f32 %v1298_v35, %v1137_v30  ;;  %v6554_v49 = vadd.f32 %v1427_v40, %v1153_v27 }
 0x2f2   : > { %v1301_v59 = vadd.f32 %v1285_v17, %v6448_v55  ;;  %v1430_v38 = vadd.f32 %v1414_v47, %v6452_v51  ;;  %v4862_v13 = vpop.f32.mrf.mxu0  ;;  %v6564_v29 = vadd.f32 %v6414_v33, %v6215_v42  ;;  %v4894_v1 = vpop.f32.mrf.mxu1 }
 0x2f3   : > { %v1299_v15 = vadd.f32 %v1283_v28, %v6456_v57  ;;  %v1428_v30 = vadd.f32 %v1412_v62, %v6460_v32  ;;  %v1244_v27 = vadd.f32 %v4862_v13, %v6250_v4  ;;  %v1373_v41 = vadd.f32 %v4894_v1, %v6250_v4  ;;  %v6602_v13 = vld [vmem:[#allocation7 + $0x38] sm:$0xff]   ;;  %v6612_v1 = vld [vmem:[#allocation7 + $0x30] sm:$0xff]  }
 0x2f4   : > { %v1476_v36 = vpack.c.bf16 %v1301_v59, %v1300_v9  ;;  %v1484_v10 = vpack.c.bf16 %v1430_v38, %v1429_v60  ;;  %v1235_v21 = vpop.f32.mrf.mxu0  ;;  %v6575_v11 = vadd.f32 %v1301_v59, %v6448_v55  ;;  %v1364_v20 = vpop.f32.mrf.mxu1  ;;  %v6580_v45 = vadd.f32 %v1430_v38, %v6452_v51  ;;  %8451 = vst [vmem:[#allocation15_spill] sm:$0xff] %v6612_v1 }
 0x2f5   : > { %v1288_v42 = vmax.f32 %v1244_v27, 0.0  ;;  %v1236_v33 = vadd.f32 %v6250_v4, %v1235_v21  ;;  %v1475_v56 = vpack.c.bf16 %v1299_v15, %v1298_v35  ;;  %v1483_v23 = vpack.c.bf16 %v1428_v30, %v1427_v40 }
 0x2f6   : > { %v1417_v8 = vmax.f32 %v1373_v41, 0.0  ;;  %v1365_v5 = vadd.f32 %v6250_v4, %v1364_v20  ;;  %v4863_v26 = vpop.f32.mrf.mxu0  ;;  %v6583_v3 = vadd.f32 %v1299_v15, %v6456_v57  ;;  %v4895_v17 = vpop.f32.mrf.mxu1  ;;  %v6590_v35 = vadd.f32 %v1428_v30, %v6460_v32 }
 0x2f7   : > { %v6586_v9 = vadd.f32 %v1288_v42, %v6464_v53  ;;  %v1286_v55 = vmax.f32 %v1236_v33, 0.0  ;;  %v1247_v60 = vadd.f32 %v4863_v26, %v6250_v4  ;;  %4920 = vmatprep.mubr.bf16.mxu0 %v1475_v56  ;;  %4952 = vmatprep.mubr.bf16.mxu1 %v1483_v23  ;;  %v1376_v47 = vadd.f32 %v4895_v17, %v6250_v4 }
 0x2f8   : > { %v6593_v40 = vadd.f32 %v1417_v8, %v6468_v54  ;;  %v1415_v51 = vmax.f32 %v1365_v5, 0.0  ;;  %v1238_v57 = vpop.f32.mrf.mxu0  ;;  %4921 = vmatmul.mubr.bf16.vlgmr.msra.gmra.mxu0 %v1476_v36  ;;  %4953 = vmatmul.mubr.bf16.vlgmr.msra.gmra.mxu1 %v1484_v10  ;;  %v6598_v28 = vadd.f32 %v6409_v16, %v6223_v48  ;;  %v1367_v32 = vpop.f32.mrf.mxu1 }
 0x2f9   : > { %v1302_v62 = vadd.f32 %v1286_v55, %v6472_v6  ;;  %v1289_v59 = vmax.f32 %v1247_v60, 0.0  ;;  %v1239_v38 = vadd.f32 %v6250_v4, %v1238_v57  ;;  %4969 = vmatpush3.bf16.msra.mxu0 %v6602_v13  ;;  %5001 = vmatpush3.bf16.msra.mxu1 %v6602_v13  ;;  %v6608_v15 = vadd.f32 %v6586_v9, %v6464_v53  ;;  %v6638_v57 = vld [vmem:[#allocation7 + $0x28] sm:$0xff]  }
 0x2fa   : > { %v1431_v30 = vadd.f32 %v1415_v51, %v6476_v18  ;;  %v1418_v48 = vmax.f32 %v1376_v47, 0.0  ;;  %v1368_v16 = vadd.f32 %v6250_v4, %v1367_v32  ;;  %v4866_v27 = vpop.f32.mrf.mxu0  ;;  %4970 = vmatprep.subr.bf16.mxu0 %v6612_v1  ;;  %5002 = vmatprep.subr.bf16.mxu1 %v6612_v1  ;;  %v6618_v36 = vadd.f32 %v6593_v40, %v6468_v54 }
 0x2fb   : > { %v1305_v10 = vadd.f32 %v1289_v59, %v6480_v19  ;;  %v1287_v53 = vmax.f32 %v1239_v38, 0.0  ;;  %v1260_v41 = vadd.f32 %v4866_v27, %v6250_v4  ;;  %v4898_v21 = vpop.f32.mrf.mxu1  ;;  %v6623_v42 = vadd.f32 %v1302_v62, %v6472_v6  ;;  %8452 = vst [vmem:[#allocation25_spill] sm:$0xff] %v6638_v57 }
 0x2fc   : > { %v1434_v33 = vadd.f32 %v1418_v48, %v6484_v2  ;;  %v1416_v20 = vmax.f32 %v1368_v16, 0.0  ;;  %v1389_v56 = vadd.f32 %v4898_v21, %v6250_v4  ;;  %v1251_v23 = vpop.f32.mrf.mxu0  ;;  %v6628_v8 = vadd.f32 %v1431_v30, %v6476_v18 }
 0x2fd   : > { %v1303_v54 = vadd.f32 %v1287_v53, %v6488_v22  ;;  %v1292_v5 = vmax.f32 %v1260_v41, 0.0  ;;  %v1252_v26 = vadd.f32 %v6250_v4, %v1251_v23  ;;  %v1380_v55 = vpop.f32.mrf.mxu1  ;;  %v1478_v60 = vpack.c.bf16 %v1305_v10, %v6586_v9  ;;  %4971 = vmatpush3.bf16.msra.mxu0 %v6612_v1  ;;  %5003 = vmatpush3.bf16.msra.mxu1 %v6612_v1 }
 0x2fe   : > { %v1432_v6 = vadd.f32 %v1416_v20, %v6492_v0  ;;  %v1421_v17 = vmax.f32 %v1389_v56, 0.0  ;;  %v1381_v51 = vadd.f32 %v6250_v4, %v1380_v55  ;;  %v4867_v47 = vpop.f32.mrf.mxu0  ;;  %v1486_v18 = vpack.c.bf16 %v1434_v33, %v6593_v40  ;;  %4972 = vmatprep.subr.bf16.mxu0 %v6638_v57  ;;  %5004 = vmatprep.subr.bf16.mxu1 %v6638_v57 }
 0x2ff   : > { %v6643_v9 = vadd.f32 %v1292_v5, %v6498_v14  ;;  %v1290_v59 = vmax.f32 %v1252_v26, 0.0  ;;  %v1263_v38 = vadd.f32 %v4867_v47, %v6250_v4  ;;  %v4899_v32 = vpop.f32.mrf.mxu1  ;;  %v1477_v48 = vpack.c.bf16 %v1303_v54, %v1302_v62 }
 0x300   : > { %v6647_v16 = vadd.f32 %v1421_v17, %v6502_v61  ;;  %v1419_v27 = vmax.f32 %v1381_v51, 0.0  ;;  %v1392_v40 = vadd.f32 %v4899_v32, %v6250_v4  ;;  %v1254_v53 = vpop.f32.mrf.mxu0  ;;  %v1485_v41 = vpack.c.bf16 %v1432_v6, %v1431_v30 }
 0x301   : > { %v6651_v21 = vadd.f32 %v1290_v59, %v6506_v31  ;;  %v1293_v20 = vmax.f32 %v1263_v38, 0.0  ;;  %v1255_v56 = vadd.f32 %v6250_v4, %v1254_v53  ;;  %v1383_v23 = vpop.f32.mrf.mxu1  ;;  %4924 = vmatprep.mubr.bf16.mxu0 %v1477_v48  ;;  %4973 = vmatpush3.bf16.msra.mxu0 %v6638_v57  ;;  %v6656_v62 = vadd.f32 %v1305_v10, %v6480_v19  ;;  %v6669_v10 = vld [vmem:[#allocation7 + $0x20] sm:$0xff]  }
 0x302   : > { %v6659_v5 = vadd.f32 %v1419_v27, %v6510_v25  ;;  %v1422_v26 = vmax.f32 %v1392_v40, 0.0  ;;  %v1384_v55 = vadd.f32 %v6250_v4, %v1383_v23  ;;  %4956 = vmatprep.mubr.bf16.mxu1 %v1485_v41  ;;  %v4870_v30 = vpop.f32.mrf.mxu0  ;;  %4925 = vmatmul.mubr.bf16.gmra.mxu0 %v1478_v60  ;;  %v6663_v17 = vadd.f32 %v1434_v33, %v6484_v2 }
 0x303   : > { %v6666_v51 = vadd.f32 %v1293_v20, %v6514_v12  ;;  %v1291_v47 = vmax.f32 %v1255_v56, 0.0  ;;  %v1276_v59 = vadd.f32 %v4870_v30, %v6250_v4  ;;  %v4902_v19 = vpop.f32.mrf.mxu1  ;;  %4957 = vmatmul.mubr.bf16.gmra.mxu1 %v1486_v18  ;;  %4974 = vmatprep.subr.bf16.mxu0 %v6669_v10  ;;  %v6673_v38 = vadd.f32 %v1303_v54, %v6488_v22  ;;  %v6690_v56 = vld [vmem:[#allocation7 + $0x18] sm:$0xff]  }
 0x304   : > { %v1438_v60 = vadd.f32 %v1422_v26, %v6518_v46  ;;  %v1420_v32 = vmax.f32 %v1384_v55, 0.0  ;;  %v1405_v2 = vadd.f32 %v4902_v19, %v6250_v4  ;;  %v1267_v33 = vpop.f32.mrf.mxu0  ;;  %5005 = vmatpush3.bf16.msra.mxu1 %v6638_v57  ;;  %v6679_v48 = vadd.f32 %v1432_v6, %v6492_v0 }
 0x305   : > { %v1307_v18 = vadd.f32 %v1291_v47, %v6524_v63  ;;  %v1296_v27 = vmax.f32 %v1276_v59, 0.0  ;;  %v1268_v40 = vadd.f32 %v6250_v4, %v1267_v33  ;;  %v1396_v53 = vpop.f32.mrf.mxu1  ;;  %v1480_v22 = vpack.c.bf16 %v6666_v51, %v6643_v9  ;;  %5006 = vmatprep.subr.bf16.mxu1 %v6669_v10  ;;  %4975 = vmatpush3.bf16.msra.mxu0 %v6669_v10 }
 0x306   : > { %v1436_v54 = vadd.f32 %v1420_v32, %v6528_v52  ;;  %v1425_v41 = vmax.f32 %v1405_v2, 0.0  ;;  %v1397_v20 = vadd.f32 %v6250_v4, %v1396_v53  ;;  %v4871_v0 = vpop.f32.mrf.mxu0  ;;  %v1488_v6 = vpack.c.bf16 %v1438_v60, %v6647_v16  ;;  %4976 = vmatprep.subr.bf16.mxu0 %v6690_v56 }
 0x307   : > { %v1312_v23 = vadd.f32 %v1296_v27, %v6531_v44  ;;  %v1294_v26 = vmax.f32 %v1268_v40, 0.0  ;;  %v1279_v55 = vadd.f32 %v4871_v0, %v6250_v4  ;;  %v4903_v30 = vpop.f32.mrf.mxu1  ;;  %v1479_v47 = vpack.c.bf16 %v1307_v18, %v6651_v21 }
 0x308   : > { %v1441_v59 = vadd.f32 %v1425_v41, %v6534_v43  ;;  %v1423_v19 = vmax.f32 %v1397_v20, 0.0  ;;  %v1408_v32 = vadd.f32 %v4903_v30, %v6250_v4  ;;  %v1270_v2 = vpop.f32.mrf.mxu0  ;;  %v1487_v33 = vpack.c.bf16 %v1436_v54, %v6659_v5  ;;  %5007 = vmatpush3.bf16.msra.mxu1 %v6669_v10 }
 0x309   : > { %v1310_v53 = vadd.f32 %v1294_v26, %v6540_v50  ;;  %v1297_v57 = vmax.f32 %v1279_v55, 0.0  ;;  %v1271_v27 = vadd.f32 %v6250_v4, %v1270_v2  ;;  %v1399_v40 = vpop.f32.mrf.mxu1  ;;  %4928 = vmatprep.mubr.bf16.mxu0 %v1479_v47  ;;  %5008 = vmatprep.subr.bf16.mxu1 %v6690_v56  ;;  %v6705_v41 = vadd.f32 %v6643_v9, %v6498_v14 }
 0x30a   : > { %v1439_v20 = vadd.f32 %v1423_v19, %v6544_v34  ;;  %v1426_v0 = vmax.f32 %v1408_v32, 0.0  ;;  %v1400_v30 = vadd.f32 %v6250_v4, %v1399_v40  ;;  %4960 = vmatprep.mubr.bf16.mxu1 %v1487_v33  ;;  %4929 = vmatmul.mubr.bf16.gmra.mxu0 %v1480_v22  ;;  %v6711_v26 = vadd.f32 %v6647_v16, %v6502_v61  ;;  %v6725_v61 = vld [vmem:[#allocation7 + $0x10] sm:$0xff]  }
 0x30b   : > { %v1313_v55 = vadd.f32 %v1297_v57, %v6560_v58  ;;  %v1295_v47 = vmax.f32 %v1271_v27, 0.0  ;;  %4961 = vmatmul.mubr.bf16.gmra.mxu1 %v1488_v6  ;;  %4977 = vmatpush3.bf16.msra.mxu0 %v6690_v56  ;;  %v6717_v14 = vadd.f32 %v6651_v21, %v6506_v31  ;;  %v6721_v9 = vadd.f32 %v6659_v5, %v6510_v25 }
 0x30c   : > { %v1442_v22 = vadd.f32 %v1426_v0, %v6564_v29  ;;  %v1424_v19 = vmax.f32 %v1400_v30, 0.0  ;;  %5009 = vmatpush3.bf16.msra.mxu1 %v6690_v56  ;;  %4978 = vmatprep.subr.bf16.mxu0 %v6725_v61  ;;  %v6730_v57 = vadd.f32 %v6666_v51, %v6514_v12  ;;  %v6733_v31 = vadd.f32 %v1438_v60, %v6518_v46 }
 0x30d   : > { %v1311_v16 = vadd.f32 %v1295_v47, %v6571_v7  ;;  %v1482_v25 = vpack.c.bf16 %v1313_v55, %v1312_v23  ;;  %5010 = vmatprep.subr.bf16.mxu1 %v6725_v61  ;;  %v6738_v21 = vadd.f32 %v1307_v18, %v6524_v63  ;;  %v6741_v5 = vadd.f32 %v1436_v54, %v6528_v52 }
 0x30e   : > { %v1440_v6 = vadd.f32 %v1424_v19, %v6598_v28  ;;  %v1490_v32 = vpack.c.bf16 %v1442_v22, %v1441_v59  ;;  %v6745_v12 = vadd.f32 %v1312_v23, %v6531_v44  ;;  %v6748_v46 = vadd.f32 %v1441_v59, %v6534_v43  ;;  %v6761_v44 = vld [vmem:[#allocation7 + $0x8] sm:$0xff]  }
 0x30f   : > { %v1481_v51 = vpack.c.bf16 %v1311_v16, %v1310_v53  ;;  %4979 = vmatpush3.bf16.msra.mxu0 %v6725_v61  ;;  %v6752_v60 = vadd.f32 %v1310_v53, %v6540_v50  ;;  %v6755_v63 = vadd.f32 %v1439_v20, %v6544_v34  ;;  %v6758_v52 = vadd.f32 %v1313_v55, %v6560_v58  ;;  %v6776_v34 = vld [vmem:[#allocation7] sm:$0xff]  }
 0x310   : > { %v1489_v18 = vpack.c.bf16 %v1440_v6, %v1439_v20  ;;  %5011 = vmatpush3.bf16.msra.mxu1 %v6725_v61  ;;  %4980 = vmatprep.subr.bf16.mxu0 %v6761_v44  ;;  %v6765_v43 = vadd.f32 %v1442_v22, %v6564_v29  ;;  %v6768_v54 = vadd.f32 %v1311_v16, %v6571_v7 }
 0x311   : > { %4932 = vmatprep.mubr.bf16.mxu0 %v1481_v51  ;;  %5012 = vmatprep.subr.bf16.mxu1 %v6761_v44  ;;  %v6772_v50 = vadd.f32 %v1440_v6, %v6598_v28 }
 0x312   : > { %4964 = vmatprep.mubr.bf16.mxu1 %v1489_v18  ;;  %4933 = vmatmul.mubr.bf16.gmra.mxu0 %v1482_v25 }
 0x313   : > { %4965 = vmatmul.mubr.bf16.gmra.mxu1 %v1490_v32  ;;  %4981 = vmatpush3.bf16.msra.mxu0 %v6761_v44 }
 0x314   : > { %5013 = vmatpush3.bf16.msra.mxu1 %v6761_v44  ;;  %4982 = vmatprep.subr.bf16.mxu0 %v6776_v34 }
 0x315   : > { %5014 = vmatprep.subr.bf16.mxu1 %v6776_v34 }
 0x317   : > { %4983 = vmatpush3.bf16.msra.mxu0 %v6776_v34 }
 0x318   : > { %5015 = vmatpush3.bf16.msra.mxu1 %v6776_v34  ;;  %5032 = vmatprep.subr.bf16.mxu0 %v6602_v13 }
 0x319   : > { %5064 = vmatprep.subr.bf16.mxu1 %v6602_v13 }
 0x3b8   : > { %v4922_v58 = vpop.f32.mrf.mxu0  ;;  %v4954_v29 = vpop.f32.mrf.mxu1 }
 0x3b9   : > { %v1534_v7 = vadd.f32 %v4922_v58, %v6250_v4  ;;  %v1663_v28 = vadd.f32 %v4954_v29, %v6250_v4 }
 0x3ba   : > { %v1525_v23 = vpop.f32.mrf.mxu0  ;;  %v1654_v59 = vpop.f32.mrf.mxu1 }
 0x3bb   : > { %v1590_v2 = vmax.f32 %v1534_v7, 0.0  ;;  %v1719_v33 = vmax.f32 %v1663_v28, 0.0  ;;  %v1526_v53 = vadd.f32 %v6250_v4, %v1525_v23  ;;  %v1655_v27 = vadd.f32 %v6250_v4, %v1654_v59 }
 0x3bc   : > { %v4923_v40 = vpop.f32.mrf.mxu0  ;;  %v4955_v20 = vpop.f32.mrf.mxu1 }
 0x3bd   : > { %v1606_v0 = vadd.f32 %v1590_v2, %v6548_v24  ;;  %v1735_v30 = vadd.f32 %v1719_v33, %v6550_v39  ;;  %v1588_v55 = vmax.f32 %v1526_v53, 0.0  ;;  %v1717_v47 = vmax.f32 %v1655_v27, 0.0 }
 0x3be   : > { %v1537_v22 = vadd.f32 %v4923_v40, %v6250_v4  ;;  %v1666_v19 = vadd.f32 %v4955_v20, %v6250_v4  ;;  %v1528_v16 = vpop.f32.mrf.mxu0  ;;  %v1657_v25 = vpop.f32.mrf.mxu1 }
 0x3bf   : > { %v1604_v6 = vadd.f32 %v1588_v55, %v6552_v37  ;;  %v1733_v32 = vadd.f32 %v1717_v47, %v6554_v49  ;;  %v1529_v51 = vadd.f32 %v6250_v4, %v1528_v16  ;;  %v1658_v18 = vadd.f32 %v6250_v4, %v1657_v25 }
 0x3c0   : > { %v1591_v58 = vmax.f32 %v1537_v22, 0.0  ;;  %v1720_v29 = vmax.f32 %v1666_v19, 0.0  ;;  %v6797_v7 = vadd.f32 %v1606_v0, %v6548_v24  ;;  %v6800_v28 = vadd.f32 %v1735_v30, %v6550_v39 }
 0x3c1   : > { %v1589_v23 = vmax.f32 %v1529_v51, 0.0  ;;  %v1718_v59 = vmax.f32 %v1658_v18, 0.0  ;;  %v6803_v2 = vadd.f32 %v1604_v6, %v6552_v37  ;;  %v6806_v33 = vadd.f32 %v1733_v32, %v6554_v49 }
 0x3c2   : > { %v1607_v53 = vadd.f32 %v1591_v58, %v6575_v11  ;;  %v1736_v27 = vadd.f32 %v1720_v29, %v6580_v45  ;;  %v4926_v40 = vpop.f32.mrf.mxu0 }
 0x3c3   : > { %v1605_v20 = vadd.f32 %v1589_v23, %v6583_v3  ;;  %v1734_v24 = vadd.f32 %v1718_v59, %v6590_v35  ;;  %v1550_v39 = vadd.f32 %v4926_v40, %v6250_v4  ;;  %v4958_v55 = vpop.f32.mrf.mxu1 }
 0x3c4   : > { %v1782_v47 = vpack.c.bf16 %v1607_v53, %v1606_v0  ;;  %v1790_v22 = vpack.c.bf16 %v1736_v27, %v1735_v30  ;;  %v1679_v37 = vadd.f32 %v4958_v55, %v6250_v4  ;;  %v1541_v19 = vpop.f32.mrf.mxu0  ;;  %v6815_v49 = vadd.f32 %v1607_v53, %v6575_v11 }
 0x3c5   : > { %v1594_v16 = vmax.f32 %v1550_v39, 0.0  ;;  %v1542_v25 = vadd.f32 %v6250_v4, %v1541_v19  ;;  %v1670_v51 = vpop.f32.mrf.mxu1  ;;  %v1781_v18 = vpack.c.bf16 %v1605_v20, %v1604_v6  ;;  %v1789_v58 = vpack.c.bf16 %v1734_v24, %v1733_v32 }
 0x3c6   : > { %v1723_v29 = vmax.f32 %v1679_v37, 0.0  ;;  %v1671_v23 = vadd.f32 %v6250_v4, %v1670_v51  ;;  %v4927_v59 = vpop.f32.mrf.mxu0  ;;  %v6820_v40 = vadd.f32 %v1736_v27, %v6580_v45  ;;  %v6823_v0 = vadd.f32 %v1605_v20, %v6583_v3  ;;  %v6840_v37 = vld [vmem:[%s8357_s4] ss:$0 sm:$0xff] }
 0x3c7   : > { %v6826_v30 = vadd.f32 %v1594_v16, %v6608_v15  ;;  %v1592_v11 = vmax.f32 %v1542_v25, 0.0  ;;  %v1553_v53 = vadd.f32 %v4927_v59, %v6250_v4  ;;  %v4959_v39 = vpop.f32.mrf.mxu1  ;;  %4984 = vmatprep.mubr.bf16.mxu0 %v1781_v18  ;;  %5016 = vmatprep.mubr.bf16.mxu1 %v1789_v58  ;;  %v6830_v6 = vadd.f32 %v1734_v24, %v6590_v35 }
 0x3c8   : > { %v6833_v32 = vadd.f32 %v1723_v29, %v6618_v36  ;;  %v1721_v45 = vmax.f32 %v1671_v23, 0.0  ;;  %v1682_v27 = vadd.f32 %v4959_v39, %v6250_v4  ;;  %v1544_v3 = vpop.f32.mrf.mxu0  ;;  %4985 = vmatmul.mubr.bf16.vlgmr.msra.gmra.mxu0 %v1782_v47  ;;  %5017 = vmatmul.mubr.bf16.vlgmr.msra.gmra.mxu1 %v1790_v22 }
 0x3c9   : > { %v1608_v20 = vadd.f32 %v1592_v11, %v6623_v42  ;;  %v1595_v55 = vmax.f32 %v1553_v53, 0.0  ;;  %v1545_v35 = vadd.f32 %v6840_v37, %v1544_v3  ;;  %v1673_v24 = vpop.f32.mrf.mxu1  ;;  %5033 = vmatpush3.bf16.msra.mxu0 %v6602_v13  ;;  %5065 = vmatpush3.bf16.msra.mxu1 %v6602_v13  ;;  %v6847_v4 = vadd.f32 %v6826_v30, %v6608_v15 }
 0x3ca   : > { %v1737_v47 = vadd.f32 %v1721_v45, %v6628_v8  ;;  %v1724_v22 = vmax.f32 %v1682_v27, 0.0  ;;  %v1674_v19 = vadd.f32 %v6840_v37, %v1673_v24  ;;  %v4930_v16 = vpop.f32.mrf.mxu0  ;;  %5034 = vmatprep.subr.bf16.mxu0 %v6612_v1  ;;  %5066 = vmatprep.subr.bf16.mxu1 %v6612_v1  ;;  %v6855_v25 = vadd.f32 %v6833_v32, %v6618_v36 }
 0x3cb   : > { %v1611_v51 = vadd.f32 %v1595_v55, %v6656_v62  ;;  %v1593_v18 = vmax.f32 %v1545_v35, 0.0  ;;  %v1566_v15 = vadd.f32 %v6840_v37, %v4930_v16  ;;  %v4962_v58 = vpop.f32.mrf.mxu1  ;;  %v6860_v29 = vadd.f32 %v1608_v20, %v6623_v42 }
 0x3cc   : > { %v1740_v23 = vadd.f32 %v1724_v22, %v6663_v17  ;;  %v1722_v59 = vmax.f32 %v1674_v19, 0.0  ;;  %v1695_v11 = vadd.f32 %v6840_v37, %v4962_v58  ;;  %v1557_v53 = vpop.f32.mrf.mxu0  ;;  %v6865_v39 = vadd.f32 %v1737_v47, %v6628_v8  ;;  %v8455_v19 = vld [vmem:[#allocation25_spill] sm:$0xff] }
 0x3cd   : > { %8453 = vst [vmem:[#allocation16_spill] sm:$0xff] %v6860_v29  ;;  %v1609_v36 = vadd.f32 %v1593_v18, %v6673_v38  ;;  %v1598_v45 = vmax.f32 %v1566_v15, 0.0  ;;  %v1558_v27 = vadd.f32 %v6840_v37, %v1557_v53  ;;  %v1686_v3 = vpop.f32.mrf.mxu1  ;;  %v1784_v55 = vpack.c.bf16 %v1611_v51, %v6826_v30  ;;  %5035 = vmatpush3.bf16.msra.mxu0 %v6612_v1 }
 0x3ce   : > { %8454 = vst [vmem:[#allocation26_spill] sm:$0xff] %v6865_v39  ;;  %5067 = vmatpush3.bf16.msra.mxu1 %v6612_v1  ;;  %v1738_v42 = vadd.f32 %v1722_v59, %v6679_v48  ;;  %v1727_v35 = vmax.f32 %v1695_v11, 0.0  ;;  %v1687_v24 = vadd.f32 %v6840_v37, %v1686_v3  ;;  %v4931_v22 = vpop.f32.mrf.mxu0  ;;  %v1792_v8 = vpack.c.bf16 %v1740_v23, %v6833_v32 }
 0x3cf   : > { %5036 = vmatprep.subr.bf16.mxu0 %v8455_v19  ;;  %5068 = vmatprep.subr.bf16.mxu1 %v8455_v19  ;;  %v6878_v16 = vadd.f32 %v1598_v45, %v6705_v41  ;;  %v1596_v30 = vmax.f32 %v1558_v27, 0.0  ;;  %v1569_v18 = vadd.f32 %v6840_v37, %v4931_v22  ;;  %v4963_v15 = vpop.f32.mrf.mxu1  ;;  %v1783_v58 = vpack.c.bf16 %v1609_v36, %v1608_v20 }
 0x3d0   : > { %v6882_v59 = vadd.f32 %v1727_v35, %v6711_v26  ;;  %v1725_v11 = vmax.f32 %v1687_v24, 0.0  ;;  %v1698_v53 = vadd.f32 %v6840_v37, %v4963_v15  ;;  %v1560_v3 = vpop.f32.mrf.mxu0  ;;  %v1791_v32 = vpack.c.bf16 %v1738_v42, %v1737_v47 }
 0x3d1   : > { %v6886_v1 = vadd.f32 %v1596_v30, %v6717_v14  ;;  %v1599_v39 = vmax.f32 %v1569_v18, 0.0  ;;  %v1561_v45 = vadd.f32 %v6840_v37, %v1560_v3  ;;  %v1689_v29 = vpop.f32.mrf.mxu1  ;;  %4988 = vmatprep.mubr.bf16.mxu0 %v1783_v58  ;;  %5037 = vmatpush3.bf16.msra.mxu0 %v8455_v19  ;;  %v6891_v20 = vadd.f32 %v1611_v51, %v6656_v62 }
 0x3d2   : > { %v1741_v27 = vadd.f32 %v1725_v11, %v6721_v9  ;;  %v1728_v35 = vmax.f32 %v1698_v53, 0.0  ;;  %v1690_v24 = vadd.f32 %v6840_v37, %v1689_v29  ;;  %5020 = vmatprep.mubr.bf16.mxu1 %v1791_v32  ;;  %v4934_v47 = vpop.f32.mrf.mxu0  ;;  %4989 = vmatmul.mubr.bf16.gmra.mxu0 %v1784_v55  ;;  %v6896_v22 = vadd.f32 %v1740_v23, %v6663_v17 }
 0x3d3   : > { %v1615_v30 = vadd.f32 %v1599_v39, %v6730_v57  ;;  %v1597_v18 = vmax.f32 %v1561_v45, 0.0  ;;  %v1582_v15 = vadd.f32 %v6840_v37, %v4934_v47  ;;  %v4966_v58 = vpop.f32.mrf.mxu1  ;;  %5021 = vmatmul.mubr.bf16.gmra.mxu1 %v1792_v8  ;;  %5038 = vmatprep.subr.bf16.mxu0 %v6669_v10  ;;  %v6902_v62 = vadd.f32 %v1609_v36, %v6673_v38 }
 0x3d4   : > { %v1744_v51 = vadd.f32 %v1728_v35, %v6733_v31  ;;  %v1726_v29 = vmax.f32 %v1690_v24, 0.0  ;;  %v1711_v55 = vadd.f32 %v6840_v37, %v4966_v58  ;;  %v1573_v11 = vpop.f32.mrf.mxu0  ;;  %5069 = vmatpush3.bf16.msra.mxu1 %v8455_v19  ;;  %v6908_v17 = vadd.f32 %v1738_v42, %v6679_v48 }
 0x3d5   : > { %v1613_v23 = vadd.f32 %v1597_v18, %v6738_v21  ;;  %v1602_v39 = vmax.f32 %v1582_v15, 0.0  ;;  %v1574_v8 = vadd.f32 %v6840_v37, %v1573_v11  ;;  %v1702_v53 = vpop.f32.mrf.mxu1  ;;  %v1786_v38 = vpack.c.bf16 %v1615_v30, %v6878_v16  ;;  %5070 = vmatprep.subr.bf16.mxu1 %v6669_v10  ;;  %5039 = vmatpush3.bf16.msra.mxu0 %v6669_v10 }
 0x3d6   : > { %v1742_v36 = vadd.f32 %v1726_v29, %v6741_v5  ;;  %v1731_v3 = vmax.f32 %v1711_v55, 0.0  ;;  %v1703_v32 = vadd.f32 %v6840_v37, %v1702_v53  ;;  %v4935_v45 = vpop.f32.mrf.mxu0  ;;  %v1794_v48 = vpack.c.bf16 %v1744_v51, %v6882_v59  ;;  %5040 = vmatprep.subr.bf16.mxu0 %v6690_v56 }
 0x3d7   : > { %v1618_v42 = vadd.f32 %v1602_v39, %v6745_v12  ;;  %v1600_v35 = vmax.f32 %v1574_v8, 0.0  ;;  %v1585_v24 = vadd.f32 %v6840_v37, %v4935_v45  ;;  %v4967_v47 = vpop.f32.mrf.mxu1  ;;  %v1785_v18 = vpack.c.bf16 %v1613_v23, %v6886_v1 }
 0x3d8   : > { %v1747_v15 = vadd.f32 %v1731_v3, %v6748_v46  ;;  %v1729_v58 = vmax.f32 %v1703_v32, 0.0  ;;  %v1714_v29 = vadd.f32 %v6840_v37, %v4967_v47  ;;  %v1576_v55 = vpop.f32.mrf.mxu0  ;;  %v1793_v11 = vpack.c.bf16 %v1742_v36, %v1741_v27  ;;  %5071 = vmatpush3.bf16.msra.mxu1 %v6669_v10 }
 0x3d9   : > { %v1616_v53 = vadd.f32 %v1600_v35, %v6752_v60  ;;  %v1603_v19 = vmax.f32 %v1585_v24, 0.0  ;;  %v1577_v39 = vadd.f32 %v6840_v37, %v1576_v55  ;;  %v1705_v8 = vpop.f32.mrf.mxu1  ;;  %4992 = vmatprep.mubr.bf16.mxu0 %v1785_v18  ;;  %5072 = vmatprep.subr.bf16.mxu1 %v6690_v56  ;;  %v6930_v45 = vadd.f32 %v6878_v16, %v6705_v41 }
 0x3da   : > { %v1745_v3 = vadd.f32 %v1729_v58, %v6755_v63  ;;  %v1732_v32 = vmax.f32 %v1714_v29, 0.0  ;;  %v1706_v47 = vadd.f32 %v6840_v37, %v1705_v8  ;;  %5024 = vmatprep.mubr.bf16.mxu1 %v1793_v11  ;;  %4993 = vmatmul.mubr.bf16.gmra.mxu0 %v1786_v38  ;;  %v6936_v35 = vadd.f32 %v6882_v59, %v6711_v26 }
 0x3db   : > { %v1619_v24 = vadd.f32 %v1603_v19, %v6758_v52  ;;  %v1601_v18 = vmax.f32 %v1577_v39, 0.0  ;;  %5025 = vmatmul.mubr.bf16.gmra.mxu1 %v1794_v48  ;;  %5041 = vmatpush3.bf16.msra.mxu0 %v6690_v56  ;;  %v6942_v41 = vadd.f32 %v6886_v1, %v6717_v14  ;;  %v6945_v16 = vadd.f32 %v1741_v27, %v6721_v9 }
 0x3dc   : > { %v1748_v58 = vadd.f32 %v1732_v32, %v6765_v43  ;;  %v1730_v38 = vmax.f32 %v1706_v47, 0.0  ;;  %5073 = vmatpush3.bf16.msra.mxu1 %v6690_v56  ;;  %5042 = vmatprep.subr.bf16.mxu0 %v6725_v61  ;;  %v6951_v26 = vadd.f32 %v1615_v30, %v6730_v57  ;;  %v6954_v19 = vadd.f32 %v1744_v51, %v6733_v31 }
 0x3dd   : > { %v1617_v59 = vadd.f32 %v1601_v18, %v6768_v54  ;;  %v1788_v1 = vpack.c.bf16 %v1619_v24, %v1618_v42  ;;  %5074 = vmatprep.subr.bf16.mxu1 %v6725_v61  ;;  %v6959_v14 = vadd.f32 %v1613_v23, %v6738_v21  ;;  %v6962_v9 = vadd.f32 %v1742_v36, %v6741_v5 }
 0x3de   : > { %v1746_v27 = vadd.f32 %v1730_v38, %v6772_v50  ;;  %v1796_v48 = vpack.c.bf16 %v1748_v58, %v1747_v15  ;;  %v6966_v57 = vadd.f32 %v1618_v42, %v6745_v12  ;;  %v6969_v31 = vadd.f32 %v1747_v15, %v6748_v46 }
 0x3df   : > { %v1787_v30 = vpack.c.bf16 %v1617_v59, %v1616_v53  ;;  %5043 = vmatpush3.bf16.msra.mxu0 %v6725_v61  ;;  %v6973_v51 = vadd.f32 %v1616_v53, %v6752_v60  ;;  %v6976_v21 = vadd.f32 %v1745_v3, %v6755_v63  ;;  %v6979_v5 = vadd.f32 %v1619_v24, %v6758_v52 }
 0x3e0   : > { %v1795_v23 = vpack.c.bf16 %v1746_v27, %v1745_v3  ;;  %5075 = vmatpush3.bf16.msra.mxu1 %v6725_v61  ;;  %5044 = vmatprep.subr.bf16.mxu0 %v6761_v44  ;;  %v6984_v12 = vadd.f32 %v1748_v58, %v6765_v43  ;;  %v6987_v46 = vadd.f32 %v1617_v59, %v6768_v54 }
 0x3e1   : > { %4996 = vmatprep.mubr.bf16.mxu0 %v1787_v30  ;;  %5076 = vmatprep.subr.bf16.mxu1 %v6761_v44  ;;  %v6991_v60 = vadd.f32 %v1746_v27, %v6772_v50 }
 0x3e2   : > { %5028 = vmatprep.mubr.bf16.mxu1 %v1795_v23  ;;  %4997 = vmatmul.mubr.bf16.gmra.mxu0 %v1788_v1 }
 0x3e3   : > { %5029 = vmatmul.mubr.bf16.gmra.mxu1 %v1796_v48  ;;  %5045 = vmatpush3.bf16.msra.mxu0 %v6761_v44 }
 0x3e4   : > { %5077 = vmatpush3.bf16.msra.mxu1 %v6761_v44  ;;  %5046 = vmatprep.subr.bf16.mxu0 %v6776_v34 }
 0x3e5   : > { %5078 = vmatprep.subr.bf16.mxu1 %v6776_v34 }
 0x3e7   : > { %5047 = vmatpush3.bf16.msra.mxu0 %v6776_v34 }
 0x3e8   : > { %5079 = vmatpush3.bf16.msra.mxu1 %v6776_v34  ;;  %5096 = vmatprep.subr.bf16.mxu0 %v6602_v13 }
 0x3e9   : > { %5128 = vmatprep.subr.bf16.mxu1 %v6602_v13 }
 0x488   : > { %v4986_v63 = vpop.f32.mrf.mxu0  ;;  %v5018_v52 = vpop.f32.mrf.mxu1 }
 0x489   : > { %v1840_v43 = vadd.f32 %v6840_v37, %v4986_v63  ;;  %v1969_v54 = vadd.f32 %v6840_v37, %v5018_v52 }
 0x48a   : > { %v1831_v50 = vpop.f32.mrf.mxu0  ;;  %v1960_v36 = vpop.f32.mrf.mxu1 }
 0x48b   : > { %v1896_v42 = vmax.f32 %v1840_v43, 0.0  ;;  %v2025_v15 = vmax.f32 %v1969_v54, 0.0  ;;  %v1832_v29 = vadd.f32 %v6840_v37, %v1831_v50  ;;  %v1961_v55 = vadd.f32 %v6840_v37, %v1960_v36 }
 0x48c   : > { %v4987_v11 = vpop.f32.mrf.mxu0  ;;  %v5019_v53 = vpop.f32.mrf.mxu1 }
 0x48d   : > { %v1912_v39 = vadd.f32 %v1896_v42, %v6797_v7  ;;  %v2041_v8 = vadd.f32 %v2025_v15, %v6800_v28  ;;  %v1894_v3 = vmax.f32 %v1832_v29, 0.0  ;;  %v2023_v32 = vmax.f32 %v1961_v55, 0.0 }
 0x48e   : > { %v1843_v47 = vadd.f32 %v6840_v37, %v4987_v11  ;;  %v1972_v24 = vadd.f32 %v6840_v37, %v5019_v53  ;;  %v1834_v18 = vpop.f32.mrf.mxu0  ;;  %v1963_v58 = vpop.f32.mrf.mxu1 }
 0x48f   : > { %v1910_v38 = vadd.f32 %v1894_v3, %v6803_v2  ;;  %v2039_v59 = vadd.f32 %v2023_v32, %v6806_v33  ;;  %v1835_v1 = vadd.f32 %v6840_v37, %v1834_v18  ;;  %v1964_v27 = vadd.f32 %v6840_v37, %v1963_v58 }
 0x490   : > { %v1897_v48 = vmax.f32 %v1843_v47, 0.0  ;;  %v2026_v30 = vmax.f32 %v1972_v24, 0.0  ;;  %v7014_v23 = vadd.f32 %v1912_v39, %v6797_v7  ;;  %v7017_v63 = vadd.f32 %v2041_v8, %v6800_v28 }
 0x491   : > { %v1895_v52 = vmax.f32 %v1835_v1, 0.0  ;;  %v2024_v43 = vmax.f32 %v1964_v27, 0.0  ;;  %v7020_v54 = vadd.f32 %v1910_v38, %v6803_v2  ;;  %v7023_v50 = vadd.f32 %v2039_v59, %v6806_v33 }
 0x492   : > { %v1913_v36 = vadd.f32 %v1897_v48, %v6815_v49  ;;  %v2042_v42 = vadd.f32 %v2026_v30, %v6820_v40  ;;  %v4990_v15 = vpop.f32.mrf.mxu0 }
 0x493   : > { %v1911_v29 = vadd.f32 %v1895_v52, %v6823_v0  ;;  %v2040_v7 = vadd.f32 %v2024_v43, %v6830_v6  ;;  %v1856_v28 = vadd.f32 %v6840_v37, %v4990_v15  ;;  %v5022_v55 = vpop.f32.mrf.mxu1 }
 0x494   : > { %v2088_v11 = vpack.c.bf16 %v1913_v36, %v1912_v39  ;;  %v2096_v53 = vpack.c.bf16 %v2042_v42, %v2041_v8  ;;  %v1985_v2 = vadd.f32 %v6840_v37, %v5022_v55  ;;  %v1847_v3 = vpop.f32.mrf.mxu0  ;;  %v7032_v33 = vadd.f32 %v1913_v36, %v6815_v49 }
 0x495   : > { %v1900_v32 = vmax.f32 %v1856_v28, 0.0  ;;  %v1848_v47 = vadd.f32 %v6840_v37, %v1847_v3  ;;  %v1976_v24 = vpop.f32.mrf.mxu1  ;;  %v2087_v18 = vpack.c.bf16 %v1911_v29, %v1910_v38  ;;  %v2095_v58 = vpack.c.bf16 %v2040_v7, %v2039_v59 }
 0x496   : > { %v2029_v1 = vmax.f32 %v1985_v2, 0.0  ;;  %v1977_v27 = vadd.f32 %v6840_v37, %v1976_v24  ;;  %v4991_v48 = vpop.f32.mrf.mxu0  ;;  %v7037_v30 = vadd.f32 %v2042_v42, %v6820_v40  ;;  %v7040_v39 = vadd.f32 %v1911_v29, %v6823_v0  ;;  %v8456_v42 = vld [vmem:[#allocation16_spill] sm:$0xff] }
 0x497   : > { %v7043_v8 = vadd.f32 %v1900_v32, %v6847_v4  ;;  %v1898_v49 = vmax.f32 %v1848_v47, 0.0  ;;  %v1859_v52 = vadd.f32 %v6840_v37, %v4991_v48  ;;  %v5023_v43 = vpop.f32.mrf.mxu1  ;;  %5048 = vmatprep.mubr.bf16.mxu0 %v2087_v18  ;;  %5080 = vmatprep.mubr.bf16.mxu1 %v2095_v58  ;;  %v7047_v38 = vadd.f32 %v2040_v7, %v6830_v6  ;;  %v8457_v7 = vld [vmem:[#allocation26_spill] sm:$0xff]  ;;  %v8458_v32 = vld [vmem:[#allocation15_spill] sm:$0xff] }
 0x498   : > { %v7050_v59 = vadd.f32 %v2029_v1, %v6855_v25  ;;  %v2027_v40 = vmax.f32 %v1977_v27, 0.0  ;;  %v1988_v36 = vadd.f32 %v6840_v37, %v5023_v43  ;;  %v1850_v0 = vpop.f32.mrf.mxu0  ;;  %5049 = vmatmul.mubr.bf16.vlgmr.msra.gmra.mxu0 %v2088_v11  ;;  %5081 = vmatmul.mubr.bf16.vlgmr.msra.gmra.mxu1 %v2096_v53 }
 0x499   : > { %v1914_v15 = vadd.f32 %v1898_v49, %v8456_v42  ;;  %v1901_v29 = vmax.f32 %v1859_v52, 0.0  ;;  %v1851_v28 = vadd.f32 %v6840_v37, %v1850_v0  ;;  %v1979_v55 = vpop.f32.mrf.mxu1  ;;  %5097 = vmatpush3.bf16.msra.mxu0 %v6602_v13  ;;  %5129 = vmatpush3.bf16.msra.mxu1 %v6602_v13  ;;  %v7059_v6 = vadd.f32 %v7043_v8, %v6847_v4 }
 0x49a   : > { %v2043_v2 = vadd.f32 %v2027_v40, %v8457_v7  ;;  %v2030_v3 = vmax.f32 %v1988_v36, 0.0  ;;  %v1980_v11 = vadd.f32 %v6840_v37, %v1979_v55  ;;  %v4994_v53 = vpop.f32.mrf.mxu0  ;;  %5098 = vmatprep.subr.bf16.mxu0 %v8458_v32  ;;  %5130 = vmatprep.subr.bf16.mxu1 %v8458_v32  ;;  %v7067_v47 = vadd.f32 %v7050_v59, %v6855_v25 }
 0x49b   : > { %v1917_v13 = vadd.f32 %v1901_v29, %v6891_v20  ;;  %v1899_v24 = vmax.f32 %v1851_v28, 0.0  ;;  %v1872_v4 = vadd.f32 %v6840_v37, %v4994_v53  ;;  %v5026_v18 = vpop.f32.mrf.mxu1  ;;  %v7072_v58 = vadd.f32 %v1914_v15, %v8456_v42 }
 0x49c   : > { %v2046_v1 = vadd.f32 %v2030_v3, %v6896_v22  ;;  %v2028_v27 = vmax.f32 %v1980_v11, 0.0  ;;  %v2001_v48 = vadd.f32 %v6840_v37, %v5026_v18  ;;  %v1863_v49 = vpop.f32.mrf.mxu0  ;;  %v7077_v52 = vadd.f32 %v2043_v2, %v8457_v7  ;;  %v8460_v3 = vld [vmem:[#allocation25_spill] sm:$0xff] }
 0x49d   : > { %v1915_v25 = vadd.f32 %v1899_v24, %v6902_v62  ;;  %v1904_v43 = vmax.f32 %v1872_v4, 0.0  ;;  %v1864_v40 = vadd.f32 %v6840_v37, %v1863_v49  ;;  %v1992_v36 = vpop.f32.mrf.mxu1  ;;  %v2090_v0 = vpack.c.bf16 %v1917_v13, %v7043_v8  ;;  %5099 = vmatpush3.bf16.msra.mxu0 %v8458_v32  ;;  %5131 = vmatpush3.bf16.msra.mxu1 %v8458_v32 }
 0x49e   : > { %8459 = vst [vmem:[#allocation17_spill] sm:$0xff] %v7077_v52  ;;  %v2044_v42 = vadd.f32 %v2028_v27, %v6908_v17  ;;  %v2033_v29 = vmax.f32 %v2001_v48, 0.0  ;;  %v1993_v28 = vadd.f32 %v6840_v37, %v1992_v36  ;;  %v4995_v55 = vpop.f32.mrf.mxu0  ;;  %v2098_v7 = vpack.c.bf16 %v2046_v1, %v7050_v59  ;;  %5100 = vmatprep.subr.bf16.mxu0 %v8460_v3 }
 0x49f   : > { %5132 = vmatprep.subr.bf16.mxu1 %v8460_v3  ;;  %v7090_v11 = vadd.f32 %v1904_v43, %v6930_v45  ;;  %v1902_v8 = vmax.f32 %v1864_v40, 0.0  ;;  %v1875_v53 = vadd.f32 %v6840_v37, %v4995_v55  ;;  %v5027_v24 = vpop.f32.mrf.mxu1  ;;  %v2089_v32 = vpack.c.bf16 %v1915_v25, %v1914_v15 }
 0x4a0   : > { %v7094_v4 = vadd.f32 %v2033_v29, %v6936_v35  ;;  %v2031_v18 = vmax.f32 %v1993_v28, 0.0  ;;  %v2004_v27 = vadd.f32 %v6840_v37, %v5027_v24  ;;  %v1866_v48 = vpop.f32.mrf.mxu0  ;;  %v2097_v59 = vpack.c.bf16 %v2044_v42, %v2043_v2 }
 0x4a1   : > { %v7098_v49 = vadd.f32 %v1902_v8, %v6942_v41  ;;  %v1905_v36 = vmax.f32 %v1875_v53, 0.0  ;;  %v1867_v43 = vadd.f32 %v6840_v37, %v1866_v48  ;;  %v1995_v52 = vpop.f32.mrf.mxu1  ;;  %5052 = vmatprep.mubr.bf16.mxu0 %v2089_v32  ;;  %5101 = vmatpush3.bf16.msra.mxu0 %v8460_v3  ;;  %v7103_v15 = vadd.f32 %v1917_v13, %v6891_v20 }
 0x4a2   : > { %v2047_v40 = vadd.f32 %v2031_v18, %v6945_v16  ;;  %v2034_v29 = vmax.f32 %v2004_v27, 0.0  ;;  %v1996_v28 = vadd.f32 %v6840_v37, %v1995_v52  ;;  %5084 = vmatprep.mubr.bf16.mxu1 %v2097_v59  ;;  %v4998_v2 = vpop.f32.mrf.mxu0  ;;  %5053 = vmatmul.mubr.bf16.gmra.mxu0 %v2090_v0  ;;  %v7108_v55 = vadd.f32 %v2046_v1, %v6896_v22 }
 0x4a3   : > { %v1921_v8 = vadd.f32 %v1905_v36, %v6951_v26  ;;  %v1903_v53 = vmax.f32 %v1867_v43, 0.0  ;;  %v1888_v24 = vadd.f32 %v6840_v37, %v4998_v2  ;;  %v5030_v32 = vpop.f32.mrf.mxu1  ;;  %5085 = vmatmul.mubr.bf16.gmra.mxu1 %v2098_v7  ;;  %5102 = vmatprep.subr.bf16.mxu0 %v6669_v10  ;;  %v7114_v20 = vadd.f32 %v1915_v25, %v6902_v62 }
 0x4a4   : > { %v2050_v13 = vadd.f32 %v2034_v29, %v6954_v19  ;;  %v2032_v52 = vmax.f32 %v1996_v28, 0.0  ;;  %v2017_v0 = vadd.f32 %v6840_v37, %v5030_v32  ;;  %v1879_v18 = vpop.f32.mrf.mxu0  ;;  %5133 = vmatpush3.bf16.msra.mxu1 %v8460_v3  ;;  %v7120_v22 = vadd.f32 %v2044_v42, %v6908_v17 }
 0x4a5   : > { %v1919_v1 = vadd.f32 %v1903_v53, %v6959_v14  ;;  %v1908_v27 = vmax.f32 %v1888_v24, 0.0  ;;  %v1880_v7 = vadd.f32 %v6840_v37, %v1879_v18  ;;  %v2008_v48 = vpop.f32.mrf.mxu1  ;;  %v2092_v62 = vpack.c.bf16 %v1921_v8, %v7090_v11  ;;  %5134 = vmatprep.subr.bf16.mxu1 %v6669_v10  ;;  %5103 = vmatpush3.bf16.msra.mxu0 %v6669_v10 }
 0x4a6   : > { %v2048_v25 = vadd.f32 %v2032_v52, %v6962_v9  ;;  %v2037_v59 = vmax.f32 %v2017_v0, 0.0  ;;  %v2009_v3 = vadd.f32 %v6840_v37, %v2008_v48  ;;  %v4999_v36 = vpop.f32.mrf.mxu0  ;;  %v2100_v17 = vpack.c.bf16 %v2050_v13, %v7094_v4  ;;  %5104 = vmatprep.subr.bf16.mxu0 %v6690_v56 }
 0x4a7   : > { %v1924_v42 = vadd.f32 %v1908_v27, %v6966_v57  ;;  %v1906_v43 = vmax.f32 %v1880_v7, 0.0  ;;  %v1891_v29 = vadd.f32 %v6840_v37, %v4999_v36  ;;  %v5031_v28 = vpop.f32.mrf.mxu1  ;;  %v2091_v2 = vpack.c.bf16 %v1919_v1, %v7098_v49 }
 0x4a8   : > { %v2053_v53 = vadd.f32 %v2037_v59, %v6969_v31  ;;  %v2035_v24 = vmax.f32 %v2009_v3, 0.0  ;;  %v2020_v32 = vadd.f32 %v6840_v37, %v5031_v28  ;;  %v1882_v52 = vpop.f32.mrf.mxu0  ;;  %v2099_v0 = vpack.c.bf16 %v2048_v25, %v2047_v40  ;;  %5135 = vmatpush3.bf16.msra.mxu1 %v6669_v10 }
 0x4a9   : > { %v1922_v18 = vadd.f32 %v1906_v43, %v6973_v51  ;;  %v1909_v48 = vmax.f32 %v1891_v29, 0.0  ;;  %v1883_v27 = vadd.f32 %v6840_v37, %v1882_v52  ;;  %v2011_v7 = vpop.f32.mrf.mxu1  ;;  %5056 = vmatprep.mubr.bf16.mxu0 %v2091_v2  ;;  %5136 = vmatprep.subr.bf16.mxu1 %v6690_v56  ;;  %v7142_v36 = vadd.f32 %v7090_v11, %v6930_v45 }
 0x4aa   : > { %v2051_v59 = vadd.f32 %v2035_v24, %v6976_v21  ;;  %v2038_v3 = vmax.f32 %v2020_v32, 0.0  ;;  %v2012_v28 = vadd.f32 %v6840_v37, %v2011_v7  ;;  %5088 = vmatprep.mubr.bf16.mxu1 %v2099_v0  ;;  %5057 = vmatmul.mubr.bf16.gmra.mxu0 %v2092_v62  ;;  %v7148_v10 = vadd.f32 %v7094_v4, %v6936_v35 }
 0x4ab   : > { %v1925_v43 = vadd.f32 %v1909_v48, %v6979_v5  ;;  %v1907_v29 = vmax.f32 %v1883_v27, 0.0  ;;  %5089 = vmatmul.mubr.bf16.gmra.mxu1 %v2100_v17  ;;  %5105 = vmatpush3.bf16.msra.mxu0 %v6690_v56  ;;  %v7154_v45 = vadd.f32 %v7098_v49, %v6942_v41  ;;  %v7157_v11 = vadd.f32 %v2047_v40, %v6945_v16 }
 0x4ac   : > { %v2054_v2 = vadd.f32 %v2038_v3, %v6984_v12  ;;  %v2036_v62 = vmax.f32 %v2012_v28, 0.0  ;;  %5137 = vmatpush3.bf16.msra.mxu1 %v6690_v56  ;;  %5106 = vmatprep.subr.bf16.mxu0 %v6725_v61  ;;  %v7163_v35 = vadd.f32 %v1921_v8, %v6951_v26  ;;  %v7166_v4 = vadd.f32 %v2050_v13, %v6954_v19 }
 0x4ad   : > { %v1923_v17 = vadd.f32 %v1907_v29, %v6987_v46  ;;  %v2094_v41 = vpack.c.bf16 %v1925_v43, %v1924_v42  ;;  %5138 = vmatprep.subr.bf16.mxu1 %v6725_v61  ;;  %v7171_v16 = vadd.f32 %v1919_v1, %v6959_v14  ;;  %v7174_v49 = vadd.f32 %v2048_v25, %v6962_v9 }
 0x4ae   : > { %v2052_v56 = vadd.f32 %v2036_v62, %v6991_v60  ;;  %v2102_v40 = vpack.c.bf16 %v2054_v2, %v2053_v53  ;;  %v7178_v26 = vadd.f32 %v1924_v42, %v6966_v57  ;;  %v7181_v19 = vadd.f32 %v2053_v53, %v6969_v31 }
 0x4af   : > { %v2093_v8 = vpack.c.bf16 %v1923_v17, %v1922_v18  ;;  %5107 = vmatpush3.bf16.msra.mxu0 %v6725_v61  ;;  %v7185_v13 = vadd.f32 %v1922_v18, %v6973_v51  ;;  %v7188_v14 = vadd.f32 %v2051_v59, %v6976_v21  ;;  %v7191_v9 = vadd.f32 %v1925_v43, %v6979_v5 }
 0x4b0   : > { %v2101_v1 = vpack.c.bf16 %v2052_v56, %v2051_v59  ;;  %5139 = vmatpush3.bf16.msra.mxu1 %v6725_v61  ;;  %5108 = vmatprep.subr.bf16.mxu0 %v6761_v44  ;;  %v7196_v57 = vadd.f32 %v2054_v2, %v6984_v12  ;;  %v7199_v31 = vadd.f32 %v1923_v17, %v6987_v46  ;;  %v7211_v61 = vld [vmem:[#allocation7 + $0x38] sm:$0xff]  }
 0x4b1   : > { %5060 = vmatprep.mubr.bf16.mxu0 %v2093_v8  ;;  %5140 = vmatprep.subr.bf16.mxu1 %v6761_v44  ;;  %v7203_v51 = vadd.f32 %v2052_v56, %v6991_v60 }
 0x4b2   : > { %5092 = vmatprep.mubr.bf16.mxu1 %v2101_v1  ;;  %5061 = vmatmul.mubr.bf16.gmra.mxu0 %v2094_v41 }
 0x4b3   : > { %5093 = vmatmul.mubr.bf16.gmra.mxu1 %v2102_v40  ;;  %5109 = vmatpush3.bf16.msra.mxu0 %v6761_v44 }
 0x4b4   : > { %5141 = vmatpush3.bf16.msra.mxu1 %v6761_v44  ;;  %5110 = vmatprep.subr.bf16.mxu0 %v6776_v34 }
 0x4b5   : > { %5142 = vmatprep.subr.bf16.mxu1 %v6776_v34 }
 0x4b7   : > { %5111 = vmatpush3.bf16.msra.mxu0 %v6776_v34 }
 0x4b8   : > { %5143 = vmatpush3.bf16.msra.mxu1 %v6776_v34  ;;  %5160 = vmatprep.subr.bf16.mxu0 %v7211_v61 }
 0x4b9   : > { %5192 = vmatprep.subr.bf16.mxu1 %v7211_v61 }
 0x558   : > { %v5050_v21 = vpop.f32.mrf.mxu0  ;;  %v5082_v5 = vpop.f32.mrf.mxu1 }
 0x559   : > { %v2146_v12 = vadd.f32 %v6840_v37, %v5050_v21  ;;  %v2275_v44 = vadd.f32 %v6840_v37, %v5082_v5 }
 0x55a   : > { %v2137_v46 = vpop.f32.mrf.mxu0  ;;  %v2266_v60 = vpop.f32.mrf.mxu1 }
 0x55b   : > { %v2202_v25 = vmax.f32 %v2146_v12, 0.0  ;;  %v2331_v42 = vmax.f32 %v2275_v44, 0.0  ;;  %v2138_v53 = vadd.f32 %v6840_v37, %v2137_v46  ;;  %v2267_v34 = vadd.f32 %v6840_v37, %v2266_v60 }
 0x55c   : > { %v5051_v24 = vpop.f32.mrf.mxu0  ;;  %v5083_v32 = vpop.f32.mrf.mxu1 }
 0x55d   : > { %v2218_v52 = vadd.f32 %v2202_v25, %v7014_v23  ;;  %v2347_v0 = vadd.f32 %v2331_v42, %v7017_v63  ;;  %v2200_v18 = vmax.f32 %v2138_v53, 0.0  ;;  %v2329_v48 = vmax.f32 %v2267_v34, 0.0 }
 0x55e   : > { %v2149_v27 = vadd.f32 %v6840_v37, %v5051_v24  ;;  %v2278_v7 = vadd.f32 %v6840_v37, %v5083_v32  ;;  %v2140_v59 = vpop.f32.mrf.mxu0  ;;  %v2269_v3 = vpop.f32.mrf.mxu1 }
 0x55f   : > { %v2216_v28 = vadd.f32 %v2200_v18, %v7020_v54  ;;  %v2345_v43 = vadd.f32 %v2329_v48, %v7023_v50  ;;  %v2141_v29 = vadd.f32 %v6840_v37, %v2140_v59  ;;  %v2270_v2 = vadd.f32 %v6840_v37, %v2269_v3 }
 0x560   : > { %v2203_v62 = vmax.f32 %v2149_v27, 0.0  ;;  %v2332_v17 = vmax.f32 %v2278_v7, 0.0  ;;  %v7228_v41 = vadd.f32 %v2218_v52, %v7014_v23  ;;  %v7231_v56 = vadd.f32 %v2347_v0, %v7017_v63 }
 0x561   : > { %v2201_v40 = vmax.f32 %v2141_v29, 0.0  ;;  %v2330_v8 = vmax.f32 %v2270_v2, 0.0  ;;  %v7234_v1 = vadd.f32 %v2216_v28, %v7020_v54  ;;  %v7237_v21 = vadd.f32 %v2345_v43, %v7023_v50 }
 0x562   : > { %v2219_v5 = vadd.f32 %v2203_v62, %v7032_v33  ;;  %v2348_v12 = vadd.f32 %v2332_v17, %v7037_v30  ;;  %v5054_v44 = vpop.f32.mrf.mxu0 }
 0x563   : > { %v2217_v46 = vadd.f32 %v2201_v40, %v7040_v39  ;;  %v2346_v23 = vadd.f32 %v2330_v8, %v7047_v38  ;;  %v2162_v63 = vadd.f32 %v6840_v37, %v5054_v44  ;;  %v5086_v60 = vpop.f32.mrf.mxu1 }
 0x564   : > { %v2394_v25 = vpack.c.bf16 %v2219_v5, %v2218_v52  ;;  %v2402_v42 = vpack.c.bf16 %v2348_v12, %v2347_v0  ;;  %v2291_v54 = vadd.f32 %v6840_v37, %v5086_v60  ;;  %v2153_v53 = vpop.f32.mrf.mxu0  ;;  %v7246_v50 = vadd.f32 %v2219_v5, %v7032_v33  ;;  %v7277_v60 = vld [vmem:[#allocation7 + $0x30] sm:$0xff]  }
 0x565   : > { %v2206_v34 = vmax.f32 %v2162_v63, 0.0  ;;  %v2154_v24 = vadd.f32 %v6840_v37, %v2153_v53  ;;  %v2282_v32 = vpop.f32.mrf.mxu1  ;;  %v2393_v18 = vpack.c.bf16 %v2217_v46, %v2216_v28  ;;  %v2401_v48 = vpack.c.bf16 %v2346_v23, %v2345_v43 }
 0x566   : > { %v2335_v27 = vmax.f32 %v2291_v54, 0.0  ;;  %v2283_v7 = vadd.f32 %v6840_v37, %v2282_v32  ;;  %v5055_v59 = vpop.f32.mrf.mxu0  ;;  %v7251_v3 = vadd.f32 %v2348_v12, %v7037_v30  ;;  %v7254_v52 = vadd.f32 %v2217_v46, %v7040_v39  ;;  %v8461_v12 = vld [vmem:[#allocation17_spill] sm:$0xff] }
 0x567   : > { %v7257_v0 = vadd.f32 %v2206_v34, %v7059_v6  ;;  %v2204_v33 = vmax.f32 %v2154_v24, 0.0  ;;  %v2165_v29 = vadd.f32 %v6840_v37, %v5055_v59  ;;  %v5087_v2 = vpop.f32.mrf.mxu1  ;;  %5112 = vmatprep.mubr.bf16.mxu0 %v2393_v18  ;;  %5144 = vmatprep.mubr.bf16.mxu1 %v2401_v48  ;;  %v7261_v28 = vadd.f32 %v2346_v23, %v7047_v38 }
 0x568   : > { %v7264_v43 = vadd.f32 %v2335_v27, %v7067_v47  ;;  %v2333_v30 = vmax.f32 %v2283_v7, 0.0  ;;  %v2294_v62 = vadd.f32 %v6840_v37, %v5087_v2  ;;  %v2156_v39 = vpop.f32.mrf.mxu0  ;;  %5113 = vmatmul.mubr.bf16.vlgmr.msra.gmra.mxu0 %v2394_v25  ;;  %5145 = vmatmul.mubr.bf16.vlgmr.msra.gmra.mxu1 %v2402_v42 }
 0x569   : > { %v2220_v17 = vadd.f32 %v2204_v33, %v7072_v58  ;;  %v2207_v40 = vmax.f32 %v2165_v29, 0.0  ;;  %v2157_v8 = vadd.f32 %v6840_v37, %v2156_v39  ;;  %v2285_v5 = vpop.f32.mrf.mxu1  ;;  %5161 = vmatpush3.bf16.msra.mxu0 %v7211_v61  ;;  %5193 = vmatpush3.bf16.msra.mxu1 %v7211_v61  ;;  %v7273_v38 = vadd.f32 %v7257_v0, %v7059_v6 }
 0x56a   : > { %v2349_v44 = vadd.f32 %v2333_v30, %v8461_v12  ;;  %v2336_v46 = vmax.f32 %v2294_v62, 0.0  ;;  %v2286_v23 = vadd.f32 %v6840_v37, %v2285_v5  ;;  %v5058_v63 = vpop.f32.mrf.mxu0  ;;  %5162 = vmatprep.subr.bf16.mxu0 %v7277_v60  ;;  %5194 = vmatprep.subr.bf16.mxu1 %v7277_v60  ;;  %v7283_v25 = vadd.f32 %v7264_v43, %v7067_v47 }
 0x56b   : > { %v2223_v42 = vadd.f32 %v2207_v40, %v7103_v15  ;;  %v2205_v6 = vmax.f32 %v2157_v8, 0.0  ;;  %v2178_v54 = vadd.f32 %v6840_v37, %v5058_v63  ;;  %v5090_v53 = vpop.f32.mrf.mxu1  ;;  %v7288_v34 = vadd.f32 %v2220_v17, %v7072_v58  ;;  %v7303_v40 = vld [vmem:[#allocation7 + $0x28] sm:$0xff]  }
 0x56c   : > { %v2352_v24 = vadd.f32 %v2336_v46, %v7108_v55  ;;  %v2334_v32 = vmax.f32 %v2286_v23, 0.0  ;;  %v2307_v18 = vadd.f32 %v6840_v37, %v5090_v53  ;;  %v2169_v48 = vpop.f32.mrf.mxu0  ;;  %v7293_v27 = vadd.f32 %v2349_v44, %v8461_v12  ;;  %8462 = vst [vmem:[#allocation27_spill] sm:$0xff] %v7303_v40 }
 0x56d   : > { %v2221_v47 = vadd.f32 %v2205_v6, %v7114_v20  ;;  %v2210_v7 = vmax.f32 %v2178_v54, 0.0  ;;  %v2170_v59 = vadd.f32 %v6840_v37, %v2169_v48  ;;  %v2298_v33 = vpop.f32.mrf.mxu1  ;;  %v2396_v29 = vpack.c.bf16 %v2223_v42, %v7257_v0  ;;  %5163 = vmatpush3.bf16.msra.mxu0 %v7277_v60  ;;  %5195 = vmatpush3.bf16.msra.mxu1 %v7277_v60 }
 0x56e   : > { %v2350_v58 = vadd.f32 %v2334_v32, %v7120_v22  ;;  %v2339_v2 = vmax.f32 %v2307_v18, 0.0  ;;  %v2299_v30 = vadd.f32 %v6840_v37, %v2298_v33  ;;  %v5059_v62 = vpop.f32.mrf.mxu0  ;;  %v2404_v39 = vpack.c.bf16 %v2352_v24, %v7264_v43  ;;  %5164 = vmatprep.subr.bf16.mxu0 %v7303_v40  ;;  %5196 = vmatprep.subr.bf16.mxu1 %v7303_v40 }
 0x56f   : > { %v7308_v0 = vadd.f32 %v2210_v7, %v7142_v36  ;;  %v2208_v8 = vmax.f32 %v2170_v59, 0.0  ;;  %v2181_v5 = vadd.f32 %v6840_v37, %v5059_v62  ;;  %v5091_v12 = vpop.f32.mrf.mxu1  ;;  %v2395_v46 = vpack.c.bf16 %v2221_v47, %v2220_v17 }
 0x570   : > { %v7312_v23 = vadd.f32 %v2339_v2, %v7148_v10  ;;  %v2337_v63 = vmax.f32 %v2299_v30, 0.0  ;;  %v2310_v43 = vadd.f32 %v6840_v37, %v5091_v12  ;;  %v2172_v6 = vpop.f32.mrf.mxu0  ;;  %v2403_v54 = vpack.c.bf16 %v2350_v58, %v2349_v44 }
 0x571   : > { %v7316_v53 = vadd.f32 %v2208_v8, %v7154_v45  ;;  %v2211_v32 = vmax.f32 %v2181_v5, 0.0  ;;  %v2173_v18 = vadd.f32 %v6840_v37, %v2172_v6  ;;  %v2301_v48 = vpop.f32.mrf.mxu1  ;;  %5116 = vmatprep.mubr.bf16.mxu0 %v2395_v46  ;;  %5165 = vmatpush3.bf16.msra.mxu0 %v7303_v40  ;;  %v7321_v17 = vadd.f32 %v2223_v42, %v7103_v15  ;;  %v7334_v42 = vld [vmem:[#allocation7 + $0x20] sm:$0xff]  }
 0x572   : > { %v7324_v7 = vadd.f32 %v2337_v63, %v7157_v11  ;;  %v2340_v59 = vmax.f32 %v2310_v43, 0.0  ;;  %v2302_v33 = vadd.f32 %v6840_v37, %v2301_v48  ;;  %5148 = vmatprep.mubr.bf16.mxu1 %v2403_v54  ;;  %v5062_v44 = vpop.f32.mrf.mxu0  ;;  %5117 = vmatmul.mubr.bf16.gmra.mxu0 %v2396_v29  ;;  %v7328_v2 = vadd.f32 %v2352_v24, %v7108_v55  ;;  %v7344_v55 = vld [vmem:[%s8357_s4] ss:$0 sm:$0xff] }
 0x573   : > { %v7331_v30 = vadd.f32 %v2211_v32, %v7163_v35  ;;  %v2209_v62 = vmax.f32 %v2173_v18, 0.0  ;;  %v2194_v8 = vadd.f32 %v6840_v37, %v5062_v44  ;;  %v5094_v15 = vpop.f32.mrf.mxu1  ;;  %5149 = vmatmul.mubr.bf16.gmra.mxu1 %v2404_v39  ;;  %5166 = vmatprep.subr.bf16.mxu0 %v7334_v42  ;;  %v7338_v5 = vadd.f32 %v2221_v47, %v7114_v20  ;;  %v7360_v18 = vld [vmem:[#allocation7 + $0x18] sm:$0xff]  }
 0x574   : > { %v2356_v29 = vadd.f32 %v2340_v59, %v7166_v4  ;;  %v2338_v12 = vmax.f32 %v2302_v33, 0.0  ;;  %v2323_v24 = vadd.f32 %v7344_v55, %v5094_v15  ;;  %v2185_v37 = vpop.f32.mrf.mxu0  ;;  %5197 = vmatpush3.bf16.msra.mxu1 %v7303_v40  ;;  %v7349_v39 = vadd.f32 %v2350_v58, %v7120_v22 }
 0x575   : > { %v2225_v46 = vadd.f32 %v2209_v62, %v7171_v16  ;;  %v2214_v20 = vmax.f32 %v2194_v8, 0.0  ;;  %v2186_v47 = vadd.f32 %v7344_v55, %v2185_v37  ;;  %v2314_v63 = vpop.f32.mrf.mxu1  ;;  %v2398_v43 = vpack.c.bf16 %v7331_v30, %v7308_v0  ;;  %5198 = vmatprep.subr.bf16.mxu1 %v7334_v42  ;;  %5167 = vmatpush3.bf16.msra.mxu0 %v7334_v42 }
 0x576   : > { %v2354_v6 = vadd.f32 %v2338_v12, %v7174_v49  ;;  %v2343_v54 = vmax.f32 %v2323_v24, 0.0  ;;  %v2315_v32 = vadd.f32 %v7344_v55, %v2314_v63  ;;  %v5063_v22 = vpop.f32.mrf.mxu0  ;;  %v2406_v58 = vpack.c.bf16 %v2356_v29, %v7312_v23  ;;  %5168 = vmatprep.subr.bf16.mxu0 %v7360_v18 }
 0x577   : > { %v2230_v48 = vadd.f32 %v2214_v20, %v7178_v26  ;;  %v2212_v59 = vmax.f32 %v2186_v47, 0.0  ;;  %v2197_v33 = vadd.f32 %v7344_v55, %v5063_v22  ;;  %v5095_v44 = vpop.f32.mrf.mxu1  ;;  %v2397_v62 = vpack.c.bf16 %v2225_v46, %v7316_v53 }
 0x578   : > { %v2359_v8 = vadd.f32 %v2343_v54, %v7181_v19  ;;  %v2341_v15 = vmax.f32 %v2315_v32, 0.0  ;;  %v2326_v12 = vadd.f32 %v7344_v55, %v5095_v44  ;;  %v2188_v24 = vpop.f32.mrf.mxu0  ;;  %v2405_v37 = vpack.c.bf16 %v2354_v6, %v7324_v7  ;;  %5199 = vmatpush3.bf16.msra.mxu1 %v7334_v42 }
 0x579   : > { %v2228_v63 = vadd.f32 %v2212_v59, %v7185_v13  ;;  %v2215_v40 = vmax.f32 %v2197_v33, 0.0  ;;  %v2189_v20 = vadd.f32 %v7344_v55, %v2188_v24  ;;  %v2317_v47 = vpop.f32.mrf.mxu1  ;;  %5120 = vmatprep.mubr.bf16.mxu0 %v2397_v62  ;;  %5200 = vmatprep.subr.bf16.mxu1 %v7360_v18  ;;  %v7375_v54 = vadd.f32 %v7308_v0, %v7142_v36 }
 0x57a   : > { %v2357_v32 = vadd.f32 %v2341_v15, %v7188_v14  ;;  %v2344_v22 = vmax.f32 %v2326_v12, 0.0  ;;  %v2318_v44 = vadd.f32 %v7344_v55, %v2317_v47  ;;  %5152 = vmatprep.mubr.bf16.mxu1 %v2405_v37  ;;  %5121 = vmatmul.mubr.bf16.gmra.mxu0 %v2398_v43  ;;  %v7381_v59 = vadd.f32 %v7312_v23, %v7148_v10  ;;  %v7395_v10 = vld [vmem:[#allocation7 + $0x10] sm:$0xff]  }
 0x57b   : > { %v2231_v33 = vadd.f32 %v2215_v40, %v7191_v9  ;;  %v2213_v62 = vmax.f32 %v2189_v20, 0.0  ;;  %5153 = vmatmul.mubr.bf16.gmra.mxu1 %v2406_v58  ;;  %5169 = vmatpush3.bf16.msra.mxu0 %v7360_v18  ;;  %v7387_v36 = vadd.f32 %v7316_v53, %v7154_v45  ;;  %v7391_v0 = vadd.f32 %v7324_v7, %v7157_v11 }
 0x57c   : > { %v2360_v43 = vadd.f32 %v2344_v22, %v7196_v57  ;;  %v2342_v15 = vmax.f32 %v2318_v44, 0.0  ;;  %5201 = vmatpush3.bf16.msra.mxu1 %v7360_v18  ;;  %5170 = vmatprep.subr.bf16.mxu0 %v7395_v10  ;;  %v7400_v40 = vadd.f32 %v7331_v30, %v7163_v35  ;;  %v7403_v45 = vadd.f32 %v2356_v29, %v7166_v4 }
 0x57d   : > { %v2229_v23 = vadd.f32 %v2213_v62, %v7199_v31  ;;  %v2400_v11 = vpack.c.bf16 %v2231_v33, %v2230_v48  ;;  %5202 = vmatprep.subr.bf16.mxu1 %v7395_v10  ;;  %v7408_v53 = vadd.f32 %v2225_v46, %v7171_v16  ;;  %v7411_v7 = vadd.f32 %v2354_v6, %v7174_v49 }
 0x57e   : > { %v2358_v58 = vadd.f32 %v2342_v15, %v7203_v51  ;;  %v2408_v12 = vpack.c.bf16 %v2360_v43, %v2359_v8  ;;  %v7415_v35 = vadd.f32 %v2230_v48, %v7178_v26  ;;  %v7418_v4 = vadd.f32 %v2359_v8, %v7181_v19  ;;  %v7431_v26 = vld [vmem:[#allocation7 + $0x8] sm:$0xff]  }
 0x57f   : > { %v2399_v30 = vpack.c.bf16 %v2229_v23, %v2228_v63  ;;  %5171 = vmatpush3.bf16.msra.mxu0 %v7395_v10  ;;  %v7422_v29 = vadd.f32 %v2228_v63, %v7185_v13  ;;  %v7425_v16 = vadd.f32 %v2357_v32, %v7188_v14  ;;  %v7428_v49 = vadd.f32 %v2231_v33, %v7191_v9  ;;  %v7446_v14 = vld [vmem:[#allocation7] sm:$0xff]  }
 0x580   : > { %v2407_v46 = vpack.c.bf16 %v2358_v58, %v2357_v32  ;;  %5203 = vmatpush3.bf16.msra.mxu1 %v7395_v10  ;;  %5172 = vmatprep.subr.bf16.mxu0 %v7431_v26  ;;  %v7435_v19 = vadd.f32 %v2360_v43, %v7196_v57  ;;  %v7438_v6 = vadd.f32 %v2229_v23, %v7199_v31 }
 0x581   : > { %5124 = vmatprep.mubr.bf16.mxu0 %v2399_v30  ;;  %5204 = vmatprep.subr.bf16.mxu1 %v7431_v26  ;;  %v7442_v13 = vadd.f32 %v2358_v58, %v7203_v51 }
 0x582   : > { %5156 = vmatprep.mubr.bf16.mxu1 %v2407_v46  ;;  %5125 = vmatmul.mubr.bf16.gmra.mxu0 %v2400_v11 }
 0x583   : > { %5157 = vmatmul.mubr.bf16.gmra.mxu1 %v2408_v12  ;;  %5173 = vmatpush3.bf16.msra.mxu0 %v7431_v26 }
 0x584   : > { %5205 = vmatpush3.bf16.msra.mxu1 %v7431_v26  ;;  %5174 = vmatprep.subr.bf16.mxu0 %v7446_v14 }
 0x585   : > { %5206 = vmatprep.subr.bf16.mxu1 %v7446_v14 }
 0x587   : > { %5175 = vmatpush3.bf16.msra.mxu0 %v7446_v14 }
 0x588   : > { %5207 = vmatpush3.bf16.msra.mxu1 %v7446_v14  ;;  %5224 = vmatprep.subr.bf16.mxu0 %v7211_v61 }
 0x589   : > { %5256 = vmatprep.subr.bf16.mxu1 %v7211_v61 }
 0x628   : > { %v5114_v9 = vpop.f32.mrf.mxu0  ;;  %v5146_v57 = vpop.f32.mrf.mxu1 }
 0x629   : > { %v2452_v31 = vadd.f32 %v7344_v55, %v5114_v9  ;;  %v2581_v51 = vadd.f32 %v7344_v55, %v5146_v57 }
 0x62a   : > { %v2443_v48 = vpop.f32.mrf.mxu0  ;;  %v2572_v8 = vpop.f32.mrf.mxu1 }
 0x62b   : > { %v2508_v24 = vmax.f32 %v2452_v31, 0.0  ;;  %v2637_v37 = vmax.f32 %v2581_v51, 0.0  ;;  %v2444_v63 = vadd.f32 %v7344_v55, %v2443_v48  ;;  %v2573_v20 = vadd.f32 %v7344_v55, %v2572_v8 }
 0x62c   : > { %v5115_v47 = vpop.f32.mrf.mxu0  ;;  %v5147_v32 = vpop.f32.mrf.mxu1 }
 0x62d   : > { %v2524_v22 = vadd.f32 %v2508_v24, %v7228_v41  ;;  %v2653_v44 = vadd.f32 %v2637_v37, %v7231_v56  ;;  %v2506_v33 = vmax.f32 %v2444_v63, 0.0  ;;  %v2635_v62 = vmax.f32 %v2573_v20, 0.0 }
 0x62e   : > { %v2455_v43 = vadd.f32 %v7344_v55, %v5115_v47  ;;  %v2584_v15 = vadd.f32 %v7344_v55, %v5147_v32  ;;  %v2446_v23 = vpop.f32.mrf.mxu0  ;;  %v2575_v11 = vpop.f32.mrf.mxu1 }
 0x62f   : > { %v2522_v58 = vadd.f32 %v2506_v33, %v7234_v1  ;;  %v2651_v12 = vadd.f32 %v2635_v62, %v7237_v21  ;;  %v2447_v30 = vadd.f32 %v7344_v55, %v2446_v23  ;;  %v2576_v46 = vadd.f32 %v7344_v55, %v2575_v11 }
 0x630   : > { %v2509_v9 = vmax.f32 %v2455_v43, 0.0  ;;  %v2638_v57 = vmax.f32 %v2584_v15, 0.0  ;;  %v7467_v31 = vadd.f32 %v2524_v22, %v7228_v41  ;;  %v7470_v51 = vadd.f32 %v2653_v44, %v7231_v56 }
 0x631   : > { %v2507_v48 = vmax.f32 %v2447_v30, 0.0  ;;  %v2636_v8 = vmax.f32 %v2576_v46, 0.0  ;;  %v7473_v24 = vadd.f32 %v2522_v58, %v7234_v1  ;;  %v7476_v37 = vadd.f32 %v2651_v12, %v7237_v21 }
 0x632   : > { %v2525_v63 = vadd.f32 %v2509_v9, %v7246_v50  ;;  %v2654_v20 = vadd.f32 %v2638_v57, %v7251_v3  ;;  %v5118_v47 = vpop.f32.mrf.mxu0 }
 0x633   : > { %v2523_v32 = vadd.f32 %v2507_v48, %v7254_v52  ;;  %v2652_v41 = vadd.f32 %v2636_v8, %v7261_v28  ;;  %v2468_v56 = vadd.f32 %v7344_v55, %v5118_v47  ;;  %v5150_v33 = vpop.f32.mrf.mxu1 }
 0x634   : > { %v2700_v62 = vpack.c.bf16 %v2525_v63, %v2524_v22  ;;  %v2708_v43 = vpack.c.bf16 %v2654_v20, %v2653_v44  ;;  %v2597_v1 = vadd.f32 %v7344_v55, %v5150_v33  ;;  %v2459_v15 = vpop.f32.mrf.mxu0  ;;  %v7485_v21 = vadd.f32 %v2525_v63, %v7246_v50 }
 0x635   : > { %v2512_v23 = vmax.f32 %v2468_v56, 0.0  ;;  %v2460_v11 = vadd.f32 %v7344_v55, %v2459_v15  ;;  %v2588_v30 = vpop.f32.mrf.mxu1  ;;  %v2699_v46 = vpack.c.bf16 %v2523_v32, %v2522_v58  ;;  %v2707_v9 = vpack.c.bf16 %v2652_v41, %v2651_v12 }
 0x636   : > { %v2641_v57 = vmax.f32 %v2597_v1, 0.0  ;;  %v2589_v48 = vadd.f32 %v7344_v55, %v2588_v30  ;;  %v5119_v8 = vpop.f32.mrf.mxu0  ;;  %v7490_v47 = vadd.f32 %v2654_v20, %v7251_v3  ;;  %v7493_v22 = vadd.f32 %v2523_v32, %v7254_v52 }
 0x637   : > { %v7496_v44 = vadd.f32 %v2512_v23, %v7273_v38  ;;  %v2510_v50 = vmax.f32 %v2460_v11, 0.0  ;;  %v2471_v63 = vadd.f32 %v7344_v55, %v5119_v8  ;;  %v5151_v56 = vpop.f32.mrf.mxu1  ;;  %5176 = vmatprep.mubr.bf16.mxu0 %v2699_v46  ;;  %5208 = vmatprep.mubr.bf16.mxu1 %v2707_v9  ;;  %v7500_v58 = vadd.f32 %v2652_v41, %v7261_v28 }
 0x638   : > { %v7503_v12 = vadd.f32 %v2641_v57, %v7283_v25  ;;  %v2639_v3 = vmax.f32 %v2589_v48, 0.0  ;;  %v2600_v20 = vadd.f32 %v7344_v55, %v5151_v56  ;;  %v2462_v52 = vpop.f32.mrf.mxu0  ;;  %5177 = vmatmul.mubr.bf16.vlgmr.msra.gmra.mxu0 %v2700_v62  ;;  %5209 = vmatmul.mubr.bf16.vlgmr.msra.gmra.mxu1 %v2708_v43 }
 0x639   : > { %v2526_v32 = vadd.f32 %v2510_v50, %v7288_v34  ;;  %v2513_v33 = vmax.f32 %v2471_v63, 0.0  ;;  %v2463_v1 = vadd.f32 %v7344_v55, %v2462_v52  ;;  %v2591_v15 = vpop.f32.mrf.mxu1  ;;  %5225 = vmatpush3.bf16.msra.mxu0 %v7211_v61  ;;  %5257 = vmatpush3.bf16.msra.mxu1 %v7211_v61  ;;  %v7512_v28 = vadd.f32 %v7496_v44, %v7273_v38 }
 0x63a   : > { %v2655_v41 = vadd.f32 %v2639_v3, %v7293_v27  ;;  %v2642_v23 = vmax.f32 %v2600_v20, 0.0  ;;  %v2592_v62 = vadd.f32 %v7344_v55, %v2591_v15  ;;  %v5122_v43 = vpop.f32.mrf.mxu0  ;;  %5226 = vmatprep.subr.bf16.mxu0 %v7277_v60  ;;  %5258 = vmatprep.subr.bf16.mxu1 %v7277_v60  ;;  %v7520_v11 = vadd.f32 %v7503_v12, %v7283_v25 }
 0x63b   : > { %v2529_v61 = vadd.f32 %v2513_v33, %v7321_v17  ;;  %v2511_v30 = vmax.f32 %v2463_v1, 0.0  ;;  %v2484_v38 = vadd.f32 %v7344_v55, %v5122_v43  ;;  %v5154_v46 = vpop.f32.mrf.mxu1  ;;  %v7525_v9 = vadd.f32 %v2526_v32, %v7288_v34 }
 0x63c   : > { %v2658_v57 = vadd.f32 %v2642_v23, %v7328_v2  ;;  %v2640_v48 = vmax.f32 %v2592_v62, 0.0  ;;  %v2613_v8 = vadd.f32 %v7344_v55, %v5154_v46  ;;  %v2475_v50 = vpop.f32.mrf.mxu0  ;;  %v7530_v63 = vadd.f32 %v2655_v41, %v7293_v27  ;;  %v8464_v23 = vld [vmem:[#allocation27_spill] sm:$0xff] }
 0x63d   : > { %v2702_v25 = vpack.c.bf16 %v2529_v61, %v7496_v44  ;;  %v2527_v56 = vadd.f32 %v2511_v30, %v7338_v5  ;;  %v2516_v3 = vmax.f32 %v2484_v38, 0.0  ;;  %v2476_v20 = vadd.f32 %v7344_v55, %v2475_v50  ;;  %v2604_v52 = vpop.f32.mrf.mxu1  ;;  %5227 = vmatpush3.bf16.msra.mxu0 %v7277_v60  ;;  %5259 = vmatpush3.bf16.msra.mxu1 %v7277_v60 }
 0x63e   : > { %8463 = vst [vmem:[#allocation18_spill] sm:$0xff] %v7530_v63  ;;  %v2710_v34 = vpack.c.bf16 %v2658_v57, %v7503_v12  ;;  %v2656_v33 = vadd.f32 %v2640_v48, %v7349_v39  ;;  %v2645_v1 = vmax.f32 %v2613_v8, 0.0  ;;  %v2605_v27 = vadd.f32 %v7344_v55, %v2604_v52  ;;  %v5123_v15 = vpop.f32.mrf.mxu0  ;;  %5228 = vmatprep.subr.bf16.mxu0 %v8464_v23 }
 0x63f   : > { %5260 = vmatprep.subr.bf16.mxu1 %v8464_v23  ;;  %v7543_v44 = vadd.f32 %v2516_v3, %v7375_v54  ;;  %v2514_v62 = vmax.f32 %v2476_v20, 0.0  ;;  %v2487_v43 = vadd.f32 %v7344_v55, %v5123_v15  ;;  %v5155_v30 = vpop.f32.mrf.mxu1  ;;  %v2701_v60 = vpack.c.bf16 %v2527_v56, %v2526_v32 }
 0x640   : > { %v7547_v12 = vadd.f32 %v2645_v1, %v7381_v59  ;;  %v2643_v38 = vmax.f32 %v2605_v27, 0.0  ;;  %v2616_v46 = vadd.f32 %v7344_v55, %v5155_v30  ;;  %v2478_v48 = vpop.f32.mrf.mxu0  ;;  %v2709_v8 = vpack.c.bf16 %v2656_v33, %v2655_v41 }
 0x641   : > { %v7551_v50 = vadd.f32 %v2514_v62, %v7387_v36  ;;  %v2517_v52 = vmax.f32 %v2487_v43, 0.0  ;;  %v2479_v3 = vadd.f32 %v7344_v55, %v2478_v48  ;;  %v2607_v63 = vpop.f32.mrf.mxu1  ;;  %5180 = vmatprep.mubr.bf16.mxu0 %v2701_v60  ;;  %5229 = vmatpush3.bf16.msra.mxu0 %v8464_v23  ;;  %v7556_v32 = vadd.f32 %v2529_v61, %v7321_v17 }
 0x642   : > { %v2659_v20 = vadd.f32 %v2643_v38, %v7391_v0  ;;  %v2646_v1 = vmax.f32 %v2616_v46, 0.0  ;;  %v2608_v27 = vadd.f32 %v7344_v55, %v2607_v63  ;;  %5212 = vmatprep.mubr.bf16.mxu1 %v2709_v8  ;;  %v5126_v41 = vpop.f32.mrf.mxu0  ;;  %5181 = vmatmul.mubr.bf16.gmra.mxu0 %v2702_v25  ;;  %v7561_v15 = vadd.f32 %v2658_v57, %v7328_v2 }
 0x643   : > { %v2533_v62 = vadd.f32 %v2517_v52, %v7400_v40  ;;  %v2515_v43 = vmax.f32 %v2479_v3, 0.0  ;;  %v2500_v30 = vadd.f32 %v7344_v55, %v5126_v41  ;;  %v5158_v60 = vpop.f32.mrf.mxu1  ;;  %5213 = vmatmul.mubr.bf16.gmra.mxu1 %v2710_v34  ;;  %5230 = vmatprep.subr.bf16.mxu0 %v7334_v42  ;;  %v7567_v17 = vadd.f32 %v2527_v56, %v7338_v5 }
 0x644   : > { %v2662_v61 = vadd.f32 %v2646_v1, %v7403_v45  ;;  %v2644_v63 = vmax.f32 %v2608_v27, 0.0  ;;  %v2629_v25 = vadd.f32 %v7344_v55, %v5158_v60  ;;  %v2491_v38 = vpop.f32.mrf.mxu0  ;;  %5261 = vmatpush3.bf16.msra.mxu1 %v8464_v23  ;;  %v7573_v2 = vadd.f32 %v2656_v33, %v7349_v39 }
 0x645   : > { %v2704_v57 = vpack.c.bf16 %v2533_v62, %v7543_v44  ;;  %v2531_v34 = vadd.f32 %v2515_v43, %v7408_v53  ;;  %v2520_v46 = vmax.f32 %v2500_v30, 0.0  ;;  %v2492_v48 = vadd.f32 %v7344_v55, %v2491_v38  ;;  %v2620_v5 = vpop.f32.mrf.mxu1  ;;  %5262 = vmatprep.subr.bf16.mxu1 %v7334_v42  ;;  %5231 = vmatpush3.bf16.msra.mxu0 %v7334_v42 }
 0x646   : > { %v2712_v56 = vpack.c.bf16 %v2662_v61, %v7547_v12  ;;  %v2660_v8 = vadd.f32 %v2644_v63, %v7411_v7  ;;  %v2649_v23 = vmax.f32 %v2629_v25, 0.0  ;;  %v2621_v39 = vadd.f32 %v7344_v55, %v2620_v5  ;;  %v5127_v33 = vpop.f32.mrf.mxu0  ;;  %5232 = vmatprep.subr.bf16.mxu0 %v7360_v18 }
 0x647   : > { %v2536_v52 = vadd.f32 %v2520_v46, %v7415_v35  ;;  %v2518_v3 = vmax.f32 %v2492_v48, 0.0  ;;  %v2503_v1 = vadd.f32 %v7344_v55, %v5127_v33  ;;  %v5159_v27 = vpop.f32.mrf.mxu1  ;;  %v2703_v41 = vpack.c.bf16 %v2531_v34, %v7551_v50 }
 0x648   : > { %v2665_v43 = vadd.f32 %v2649_v23, %v7418_v4  ;;  %v2647_v30 = vmax.f32 %v2621_v39, 0.0  ;;  %v2632_v60 = vadd.f32 %v7344_v55, %v5159_v27  ;;  %v2494_v63 = vpop.f32.mrf.mxu0  ;;  %v2711_v25 = vpack.c.bf16 %v2660_v8, %v2659_v20  ;;  %5263 = vmatpush3.bf16.msra.mxu1 %v7334_v42 }
 0x649   : > { %v2534_v38 = vadd.f32 %v2518_v3, %v7422_v29  ;;  %v2521_v5 = vmax.f32 %v2503_v1, 0.0  ;;  %v2495_v46 = vadd.f32 %v7344_v55, %v2494_v63  ;;  %v2623_v48 = vpop.f32.mrf.mxu1  ;;  %5184 = vmatprep.mubr.bf16.mxu0 %v2703_v41  ;;  %5264 = vmatprep.subr.bf16.mxu1 %v7360_v18  ;;  %v7595_v33 = vadd.f32 %v7543_v44, %v7375_v54 }
 0x64a   : > { %v2663_v23 = vadd.f32 %v2647_v30, %v7425_v16  ;;  %v2650_v39 = vmax.f32 %v2632_v60, 0.0  ;;  %v2624_v27 = vadd.f32 %v7344_v55, %v2623_v48  ;;  %5216 = vmatprep.mubr.bf16.mxu1 %v2711_v25  ;;  %5185 = vmatmul.mubr.bf16.gmra.mxu0 %v2704_v57  ;;  %v7601_v42 = vadd.f32 %v7547_v12, %v7381_v59 }
 0x64b   : > { %v2537_v3 = vadd.f32 %v2521_v5, %v7428_v49  ;;  %v2519_v1 = vmax.f32 %v2495_v46, 0.0  ;;  %5217 = vmatmul.mubr.bf16.gmra.mxu1 %v2712_v56  ;;  %5233 = vmatpush3.bf16.msra.mxu0 %v7360_v18  ;;  %v7607_v54 = vadd.f32 %v7551_v50, %v7387_v36  ;;  %v7610_v44 = vadd.f32 %v2659_v20, %v7391_v0 }
 0x64c   : > { %v2666_v41 = vadd.f32 %v2650_v39, %v7435_v19  ;;  %v2648_v57 = vmax.f32 %v2624_v27, 0.0  ;;  %5265 = vmatpush3.bf16.msra.mxu1 %v7360_v18  ;;  %5234 = vmatprep.subr.bf16.mxu0 %v7395_v10  ;;  %v7616_v59 = vadd.f32 %v2533_v62, %v7400_v40  ;;  %v7619_v12 = vadd.f32 %v2662_v61, %v7403_v45 }
 0x64d   : > { %v2706_v56 = vpack.c.bf16 %v2537_v3, %v2536_v52  ;;  %v2535_v36 = vadd.f32 %v2519_v1, %v7438_v6  ;;  %5266 = vmatprep.subr.bf16.mxu1 %v7395_v10  ;;  %v7624_v0 = vadd.f32 %v2531_v34, %v7408_v53  ;;  %v7627_v50 = vadd.f32 %v2660_v8, %v7411_v7 }
 0x64e   : > { %v2714_v18 = vpack.c.bf16 %v2666_v41, %v2665_v43  ;;  %v2664_v20 = vadd.f32 %v2648_v57, %v7442_v13  ;;  %v7631_v40 = vadd.f32 %v2536_v52, %v7415_v35  ;;  %v7634_v45 = vadd.f32 %v2665_v43, %v7418_v4 }
 0x64f   : > { %v2705_v62 = vpack.c.bf16 %v2535_v36, %v2534_v38  ;;  %5235 = vmatpush3.bf16.msra.mxu0 %v7395_v10  ;;  %v7638_v61 = vadd.f32 %v2534_v38, %v7422_v29  ;;  %v7641_v53 = vadd.f32 %v2663_v23, %v7425_v16  ;;  %v7644_v7 = vadd.f32 %v2537_v3, %v7428_v49 }
 0x650   : > { %v2713_v34 = vpack.c.bf16 %v2664_v20, %v2663_v23  ;;  %5267 = vmatpush3.bf16.msra.mxu1 %v7395_v10  ;;  %5236 = vmatprep.subr.bf16.mxu0 %v7431_v26  ;;  %v7649_v35 = vadd.f32 %v2666_v41, %v7435_v19  ;;  %v7652_v4 = vadd.f32 %v2535_v36, %v7438_v6  ;;  %v7664_v10 = vld [vmem:[#allocation8 + $0x38] sm:$0xff]  }
 0x651   : > { %5188 = vmatprep.mubr.bf16.mxu0 %v2705_v62  ;;  %5268 = vmatprep.subr.bf16.mxu1 %v7431_v26  ;;  %v7656_v29 = vadd.f32 %v2664_v20, %v7442_v13 }
 0x652   : > { %5220 = vmatprep.mubr.bf16.mxu1 %v2713_v34  ;;  %5189 = vmatmul.mubr.bf16.gmra.mxu0 %v2706_v56 }
 0x653   : > { %5221 = vmatmul.mubr.bf16.gmra.mxu1 %v2714_v18  ;;  %5237 = vmatpush3.bf16.msra.mxu0 %v7431_v26 }
 0x654   : > { %5269 = vmatpush3.bf16.msra.mxu1 %v7431_v26  ;;  %5238 = vmatprep.subr.bf16.mxu0 %v7446_v14 }
 0x655   : > { %5270 = vmatprep.subr.bf16.mxu1 %v7446_v14 }
 0x657   : > { %5239 = vmatpush3.bf16.msra.mxu0 %v7446_v14 }
 0x658   : > { %5271 = vmatpush3.bf16.msra.mxu1 %v7446_v14  ;;  %5288 = vmatprep.subr.bf16.mxu0 %v7664_v10 }
 0x659   : > { %5320 = vmatprep.subr.bf16.mxu1 %v7664_v10 }
 0x6f8   : > { %v5178_v16 = vpop.f32.mrf.mxu0  ;;  %v5210_v49 = vpop.f32.mrf.mxu1 }
 0x6f9   : > { %v2758_v19 = vadd.f32 %v7344_v55, %v5178_v16  ;;  %v2887_v26 = vadd.f32 %v7344_v55, %v5210_v49 }
 0x6fa   : > { %v2749_v6 = vpop.f32.mrf.mxu0  ;;  %v2878_v13 = vpop.f32.mrf.mxu1 }
 0x6fb   : > { %v2814_v8 = vmax.f32 %v2758_v19, 0.0  ;;  %v2943_v52 = vmax.f32 %v2887_v26, 0.0  ;;  %v2750_v43 = vadd.f32 %v7344_v55, %v2749_v6  ;;  %v2879_v14 = vadd.f32 %v7344_v55, %v2878_v13 }
 0x6fc   : > { %v5179_v30 = vpop.f32.mrf.mxu0  ;;  %v5211_v60 = vpop.f32.mrf.mxu1 }
 0x6fd   : > { %v2830_v63 = vadd.f32 %v2814_v8, %v7467_v31  ;;  %v2959_v25 = vadd.f32 %v2943_v52, %v7470_v51  ;;  %v2812_v38 = vmax.f32 %v2750_v43, 0.0  ;;  %v2941_v5 = vmax.f32 %v2879_v14, 0.0 }
 0x6fe   : > { %v2761_v46 = vadd.f32 %v7344_v55, %v5179_v30  ;;  %v2890_v48 = vadd.f32 %v7344_v55, %v5211_v60  ;;  %v2752_v23 = vpop.f32.mrf.mxu0  ;;  %v2881_v39 = vpop.f32.mrf.mxu1 }
 0x6ff   : > { %v2828_v27 = vadd.f32 %v2812_v38, %v7473_v24  ;;  %v2957_v3 = vadd.f32 %v2941_v5, %v7476_v37  ;;  %v2753_v1 = vadd.f32 %v7344_v55, %v2752_v23  ;;  %v2882_v41 = vadd.f32 %v7344_v55, %v2881_v39  ;;  %v5466_v39 = vld [vmem:[#allocation8 + $0x30] sm:$0xff]  }
 0x700   : > { %v2815_v57 = vmax.f32 %v2761_v46, 0.0  ;;  %v2944_v56 = vmax.f32 %v2890_v48, 0.0  ;;  %v7681_v36 = vadd.f32 %v2830_v63, %v7467_v31  ;;  %v7684_v18 = vadd.f32 %v2959_v25, %v7470_v51 }
 0x701   : > { %v2813_v20 = vmax.f32 %v2753_v1, 0.0  ;;  %v2942_v62 = vmax.f32 %v2882_v41, 0.0  ;;  %v7687_v34 = vadd.f32 %v2828_v27, %v7473_v24  ;;  %v7690_v16 = vadd.f32 %v2957_v3, %v7476_v37 }
 0x702   : > { %v2831_v49 = vadd.f32 %v2815_v57, %v7485_v21  ;;  %v2960_v19 = vadd.f32 %v2944_v56, %v7490_v47  ;;  %v5182_v26 = vpop.f32.mrf.mxu0 }
 0x703   : > { %v2829_v6 = vadd.f32 %v2813_v20, %v7493_v22  ;;  %v2958_v31 = vadd.f32 %v2942_v62, %v7500_v58  ;;  %v2774_v51 = vadd.f32 %v7344_v55, %v5182_v26  ;;  %v5214_v13 = vpop.f32.mrf.mxu1  ;;  %v8465_v26 = vld [vmem:[#allocation18_spill] sm:$0xff] }
 0x704   : > { %v3006_v8 = vpack.c.bf16 %v2831_v49, %v2830_v63  ;;  %v3014_v52 = vpack.c.bf16 %v2960_v19, %v2959_v25  ;;  %v2903_v24 = vadd.f32 %v7344_v55, %v5214_v13  ;;  %v2765_v43 = vpop.f32.mrf.mxu0  ;;  %v7699_v37 = vadd.f32 %v2831_v49, %v7485_v21 }
 0x705   : > { %v2818_v14 = vmax.f32 %v2774_v51, 0.0  ;;  %v2766_v30 = vadd.f32 %v7344_v55, %v2765_v43  ;;  %v2894_v60 = vpop.f32.mrf.mxu1  ;;  %v3005_v38 = vpack.c.bf16 %v2829_v6, %v2828_v27  ;;  %v3013_v5 = vpack.c.bf16 %v2958_v31, %v2957_v3 }
 0x706   : > { %v2947_v46 = vmax.f32 %v2903_v24, 0.0  ;;  %v2895_v48 = vadd.f32 %v7344_v55, %v2894_v60  ;;  %v5183_v23 = vpop.f32.mrf.mxu0  ;;  %v7704_v63 = vadd.f32 %v2960_v19, %v7490_v47  ;;  %v7707_v25 = vadd.f32 %v2829_v6, %v7493_v22 }
 0x707   : > { %v7710_v21 = vadd.f32 %v2818_v14, %v7512_v28  ;;  %v2816_v1 = vmax.f32 %v2766_v30, 0.0  ;;  %v2777_v41 = vadd.f32 %v7344_v55, %v5183_v23  ;;  %v5215_v57 = vpop.f32.mrf.mxu1  ;;  %5240 = vmatprep.mubr.bf16.mxu0 %v3005_v38  ;;  %5272 = vmatprep.mubr.bf16.mxu1 %v3013_v5  ;;  %v7714_v27 = vadd.f32 %v2958_v31, %v7500_v58 }
 0x708   : > { %v7717_v3 = vadd.f32 %v2947_v46, %v7520_v11  ;;  %v2945_v47 = vmax.f32 %v2895_v48, 0.0  ;;  %v2906_v56 = vadd.f32 %v7344_v55, %v5215_v57  ;;  %v2768_v22 = vpop.f32.mrf.mxu0  ;;  %5241 = vmatmul.mubr.bf16.vlgmr.msra.gmra.mxu0 %v3006_v8  ;;  %5273 = vmatmul.mubr.bf16.vlgmr.msra.gmra.mxu1 %v3014_v52  ;;  %v5467_v8 = vld [vmem:[#allocation8 + $0x28] sm:$0xff]  }
 0x709   : > { %v2832_v20 = vadd.f32 %v2816_v1, %v7525_v9  ;;  %v2819_v62 = vmax.f32 %v2777_v41, 0.0  ;;  %v2769_v49 = vadd.f32 %v7344_v55, %v2768_v22  ;;  %v2897_v19 = vpop.f32.mrf.mxu1  ;;  %5289 = vmatpush3.bf16.msra.mxu0 %v7664_v10  ;;  %5321 = vmatpush3.bf16.msra.mxu1 %v7664_v10  ;;  %v7726_v58 = vadd.f32 %v7710_v21, %v7512_v28 }
 0x70a   : > { %v2961_v6 = vadd.f32 %v2945_v47, %v8465_v26  ;;  %v2948_v31 = vmax.f32 %v2906_v56, 0.0  ;;  %v2898_v51 = vadd.f32 %v7344_v55, %v2897_v19  ;;  %v5186_v13 = vpop.f32.mrf.mxu0  ;;  %5290 = vmatprep.subr.bf16.mxu0 %v5466_v39  ;;  %5322 = vmatprep.subr.bf16.mxu1 %v5466_v39  ;;  %v7732_v52 = vadd.f32 %v7717_v3, %v7520_v11 }
 0x70b   : > { %v2835_v24 = vadd.f32 %v2819_v62, %v7556_v32  ;;  %v2817_v10 = vmax.f32 %v2769_v49, 0.0  ;;  %v2790_v43 = vadd.f32 %v7344_v55, %v5186_v13  ;;  %v5218_v28 = vpop.f32.mrf.mxu1  ;;  %v7737_v14 = vadd.f32 %v2832_v20, %v7525_v9 }
 0x70c   : > { %v2964_v30 = vadd.f32 %v2948_v31, %v7561_v15  ;;  %v2946_v60 = vmax.f32 %v2898_v51, 0.0  ;;  %v2919_v38 = vadd.f32 %v7344_v55, %v5218_v28  ;;  %v2781_v5 = vpop.f32.mrf.mxu0  ;;  %v7742_v46 = vadd.f32 %v2961_v6, %v8465_v26  ;;  %v5468_v31 = vld [vmem:[#allocation8 + $0x20] sm:$0xff]  }
 0x70d   : > { %v3008_v11 = vpack.c.bf16 %v2835_v24, %v7710_v21  ;;  %v2833_v48 = vadd.f32 %v2817_v10, %v7567_v17  ;;  %v2822_v23 = vmax.f32 %v2790_v43, 0.0  ;;  %v2782_v1 = vadd.f32 %v7344_v55, %v2781_v5  ;;  %v2910_v41 = vpop.f32.mrf.mxu1  ;;  %5291 = vmatpush3.bf16.msra.mxu0 %v5466_v39  ;;  %5323 = vmatpush3.bf16.msra.mxu1 %v5466_v39 }
 0x70e   : > { %v3016_v9 = vpack.c.bf16 %v2964_v30, %v7717_v3  ;;  %v2962_v57 = vadd.f32 %v2946_v60, %v7573_v2  ;;  %v2951_v47 = vmax.f32 %v2919_v38, 0.0  ;;  %v2911_v56 = vadd.f32 %v7344_v55, %v2910_v41  ;;  %v5187_v22 = vpop.f32.mrf.mxu0  ;;  %5292 = vmatprep.subr.bf16.mxu0 %v5467_v8  ;;  %5324 = vmatprep.subr.bf16.mxu1 %v5467_v8  ;;  %v5469_v41 = vld [vmem:[#allocation8 + $0x18] sm:$0xff]  }
 0x70f   : > { %v7751_v21 = vadd.f32 %v2822_v23, %v7595_v33  ;;  %v2820_v62 = vmax.f32 %v2782_v1, 0.0  ;;  %v2793_v49 = vadd.f32 %v7344_v55, %v5187_v22  ;;  %v5219_v19 = vpop.f32.mrf.mxu1  ;;  %v3007_v26 = vpack.c.bf16 %v2833_v48, %v2832_v20 }
 0x710   : > { %v7755_v39 = vadd.f32 %v2951_v47, %v7601_v42  ;;  %v2949_v3 = vmax.f32 %v2911_v56, 0.0  ;;  %v2922_v51 = vadd.f32 %v7344_v55, %v5219_v19  ;;  %v2784_v13 = vpop.f32.mrf.mxu0  ;;  %v3015_v10 = vpack.c.bf16 %v2962_v57, %v2961_v6 }
 0x711   : > { %v7759_v43 = vadd.f32 %v2820_v62, %v7607_v54  ;;  %v2823_v28 = vmax.f32 %v2793_v49, 0.0  ;;  %v2785_v60 = vadd.f32 %v7344_v55, %v2784_v13  ;;  %v2913_v38 = vpop.f32.mrf.mxu1  ;;  %5244 = vmatprep.mubr.bf16.mxu0 %v3007_v26  ;;  %5293 = vmatpush3.bf16.msra.mxu0 %v5467_v8  ;;  %v7763_v20 = vadd.f32 %v2835_v24, %v7556_v32 }
 0x712   : > { %v7766_v5 = vadd.f32 %v2949_v3, %v7610_v44  ;;  %v2952_v23 = vmax.f32 %v2922_v51, 0.0  ;;  %v2914_v1 = vadd.f32 %v7344_v55, %v2913_v38  ;;  %5276 = vmatprep.mubr.bf16.mxu1 %v3015_v10  ;;  %v5190_v6 = vpop.f32.mrf.mxu0  ;;  %5245 = vmatmul.mubr.bf16.gmra.mxu0 %v3008_v11  ;;  %v7770_v47 = vadd.f32 %v2964_v30, %v7561_v15 }
 0x713   : > { %v2839_v56 = vadd.f32 %v2823_v28, %v7616_v59  ;;  %v2821_v22 = vmax.f32 %v2785_v60, 0.0  ;;  %v2806_v62 = vadd.f32 %v7344_v55, %v5190_v6  ;;  %v5222_v32 = vpop.f32.mrf.mxu1  ;;  %5277 = vmatmul.mubr.bf16.gmra.mxu1 %v3016_v9  ;;  %5294 = vmatprep.subr.bf16.mxu0 %v5468_v31  ;;  %v7775_v24 = vadd.f32 %v2833_v48, %v7567_v17 }
 0x714   : > { %v2968_v49 = vadd.f32 %v2952_v23, %v7619_v12  ;;  %v2950_v19 = vmax.f32 %v2914_v1, 0.0  ;;  %v2935_v11 = vadd.f32 %v7344_v55, %v5222_v32  ;;  %v2797_v26 = vpop.f32.mrf.mxu0  ;;  %5325 = vmatpush3.bf16.msra.mxu1 %v5467_v8  ;;  %v7780_v15 = vadd.f32 %v2962_v57, %v7573_v2 }
 0x715   : > { %v3010_v30 = vpack.c.bf16 %v2839_v56, %v7751_v21  ;;  %v2837_v3 = vadd.f32 %v2821_v22, %v7624_v0  ;;  %v2826_v51 = vmax.f32 %v2806_v62, 0.0  ;;  %v2798_v9 = vadd.f32 %v7344_v55, %v2797_v26  ;;  %v2926_v13 = vpop.f32.mrf.mxu1  ;;  %5326 = vmatprep.subr.bf16.mxu1 %v5468_v31  ;;  %5295 = vmatpush3.bf16.msra.mxu0 %v5468_v31 }
 0x716   : > { %v3018_v17 = vpack.c.bf16 %v2968_v49, %v7755_v39  ;;  %v2966_v48 = vadd.f32 %v2950_v19, %v7627_v50  ;;  %v2955_v10 = vmax.f32 %v2935_v11, 0.0  ;;  %v2927_v8 = vadd.f32 %v7344_v55, %v2926_v13  ;;  %v5191_v28 = vpop.f32.mrf.mxu0  ;;  %5296 = vmatprep.subr.bf16.mxu0 %v5469_v41 }
 0x717   : > { %v2842_v2 = vadd.f32 %v2826_v51, %v7631_v40  ;;  %v2824_v57 = vmax.f32 %v2798_v9, 0.0  ;;  %v2809_v60 = vadd.f32 %v7344_v55, %v5191_v28  ;;  %v5223_v38 = vpop.f32.mrf.mxu1  ;;  %v3009_v23 = vpack.c.bf16 %v2837_v3, %v7759_v43 }
 0x718   : > { %v2971_v1 = vadd.f32 %v2955_v10, %v7634_v45  ;;  %v2953_v6 = vmax.f32 %v2927_v8, 0.0  ;;  %v2938_v22 = vadd.f32 %v7344_v55, %v5223_v38  ;;  %v2800_v62 = vpop.f32.mrf.mxu0  ;;  %v3017_v32 = vpack.c.bf16 %v2966_v48, %v7766_v5  ;;  %5327 = vmatpush3.bf16.msra.mxu1 %v5468_v31 }
 0x719   : > { %v2840_v19 = vadd.f32 %v2824_v57, %v7638_v61  ;;  %v2827_v11 = vmax.f32 %v2809_v60, 0.0  ;;  %v2801_v26 = vadd.f32 %v7344_v55, %v2800_v62  ;;  %v2929_v51 = vpop.f32.mrf.mxu1  ;;  %5248 = vmatprep.mubr.bf16.mxu0 %v3009_v23  ;;  %5328 = vmatprep.subr.bf16.mxu1 %v5469_v41  ;;  %v7798_v9 = vadd.f32 %v7751_v21, %v7595_v33 }
 0x71a   : > { %v2969_v13 = vadd.f32 %v2953_v6, %v7641_v53  ;;  %v2956_v10 = vmax.f32 %v2938_v22, 0.0  ;;  %v2930_v8 = vadd.f32 %v7344_v55, %v2929_v51  ;;  %5280 = vmatprep.mubr.bf16.mxu1 %v3017_v32  ;;  %5249 = vmatmul.mubr.bf16.gmra.mxu0 %v3010_v30  ;;  %v7804_v31 = vadd.f32 %v7755_v39, %v7601_v42 }
 0x71b   : > { %v2843_v28 = vadd.f32 %v2827_v11, %v7644_v7  ;;  %v2825_v57 = vmax.f32 %v2801_v26, 0.0  ;;  %5281 = vmatmul.mubr.bf16.gmra.mxu1 %v3018_v17  ;;  %5297 = vmatpush3.bf16.msra.mxu0 %v5469_v41  ;;  %v7809_v33 = vadd.f32 %v7759_v43, %v7607_v54  ;;  %v7813_v21 = vadd.f32 %v7766_v5, %v7610_v44 }
 0x71c   : > { %v2972_v55 = vadd.f32 %v2956_v10, %v7649_v35  ;;  %v2954_v30 = vmax.f32 %v2930_v8, 0.0  ;;  %5329 = vmatpush3.bf16.msra.mxu1 %v5469_v41  ;;  %v7817_v42 = vadd.f32 %v2839_v56, %v7616_v59  ;;  %v7820_v39 = vadd.f32 %v2968_v49, %v7619_v12 }
 0x71d   : > { %v3012_v17 = vpack.c.bf16 %v2843_v28, %v2842_v2  ;;  %v2841_v60 = vadd.f32 %v2825_v57, %v7652_v4  ;;  %v7824_v54 = vadd.f32 %v2837_v3, %v7624_v0  ;;  %v7827_v43 = vadd.f32 %v2966_v48, %v7627_v50 }
 0x71e   : > { %v3020_v44 = vpack.c.bf16 %v2972_v55, %v2971_v1  ;;  %v2970_v5 = vadd.f32 %v2954_v30, %v7656_v29  ;;  %v7831_v41 = vadd.f32 %v2842_v2, %v7631_v40  ;;  %v7834_v59 = vadd.f32 %v2971_v1, %v7634_v45 }
 0x71f   : > { %v3011_v12 = vpack.c.bf16 %v2841_v60, %v2840_v19  ;;  %v7837_v56 = vadd.f32 %v2840_v19, %v7638_v61  ;;  %v7840_v49 = vadd.f32 %v2969_v13, %v7641_v53  ;;  %v7843_v0 = vadd.f32 %v2843_v28, %v7644_v7  ;;  %v5470_v61 = vld [vmem:[#allocation8 + $0x10] sm:$0xff]   ;;  %v5471_v53 = vld [vmem:[#allocation8 + $0x8] sm:$0xff]   ;;  %v5472_v7 = vld [vmem:[#allocation8] sm:$0xff]  }
 0x720   : > { %v3019_v50 = vpack.c.bf16 %v2970_v5, %v2969_v13  ;;  %v7846_v3 = vadd.f32 %v2972_v55, %v7649_v35  ;;  %v7849_v40 = vadd.f32 %v2841_v60, %v7652_v4  ;;  %v7852_v45 = vadd.f32 %v2970_v5, %v7656_v29  ;;  %5298 = vmatprep.subr.bf16.mxu0 %v5470_v61  ;;  %v7857_v29 = vld [vmem:[%s8357_s4] ss:$0 sm:$0xff] }
 0x721   : > { %5252 = vmatprep.mubr.bf16.mxu0 %v3011_v12  ;;  %5330 = vmatprep.subr.bf16.mxu1 %v5470_v61 }
 0x722   : > { %5284 = vmatprep.mubr.bf16.mxu1 %v3019_v50  ;;  %5253 = vmatmul.mubr.bf16.gmra.mxu0 %v3012_v17 }
 0x723   : > { %5285 = vmatmul.mubr.bf16.gmra.mxu1 %v3020_v44  ;;  %5299 = vmatpush3.bf16.msra.mxu0 %v5470_v61 }
 0x724   : > { %5331 = vmatpush3.bf16.msra.mxu1 %v5470_v61  ;;  %5300 = vmatprep.subr.bf16.mxu0 %v5471_v53 }
 0x725   : > { %5332 = vmatprep.subr.bf16.mxu1 %v5471_v53 }
 0x727   : > { %5301 = vmatpush3.bf16.msra.mxu0 %v5471_v53 }
 0x728   : > { %5333 = vmatpush3.bf16.msra.mxu1 %v5471_v53  ;;  %5302 = vmatprep.subr.bf16.mxu0 %v5472_v7 }
 0x729   : > { %5334 = vmatprep.subr.bf16.mxu1 %v5472_v7 }
 0x72b   : > { %5303 = vmatpush3.bf16.msra.mxu0 %v5472_v7 }
 0x72c   : > { %5335 = vmatpush3.bf16.msra.mxu1 %v5472_v7 }
 0x7c8   : > { %v5242_v35 = vpop.f32.mrf.mxu0  ;;  %v5274_v4 = vpop.f32.mrf.mxu1 }
 0x7c9   : > { %v3064_v48 = vadd.f32 %v7857_v29, %v5242_v35  ;;  %v3193_v2 = vadd.f32 %v7857_v29, %v5274_v4 }
 0x7ca   : > { %v3055_v38 = vpop.f32.mrf.mxu0  ;;  %v3184_v23 = vpop.f32.mrf.mxu1 }
 0x7cb   : > { %v3056_v1 = vadd.f32 %v7857_v29, %v3055_v38  ;;  %v3185_v6 = vadd.f32 %v7857_v29, %v3184_v23  ;;  %v3120_v32 = vmax.f32 %v3064_v48, 0.0  ;;  %v3249_v19 = vmax.f32 %v3193_v2, 0.0 }
 0x7cc   : > { %v5243_v22 = vpop.f32.mrf.mxu0  ;;  %v5275_v62 = vpop.f32.mrf.mxu1 }
 0x7cd   : > { %v3118_v11 = vmax.f32 %v3056_v1, 0.0  ;;  %v3067_v26 = vadd.f32 %v7857_v29, %v5243_v22  ;;  %v3196_v51 = vadd.f32 %v7857_v29, %v5275_v62  ;;  %v3247_v8 = vmax.f32 %v3185_v6, 0.0 }
 0x7ce   : > { %v3058_v13 = vpop.f32.mrf.mxu0  ;;  %v3187_v10 = vpop.f32.mrf.mxu1  ;;  %v3136_v17 = vadd.f32 %v3120_v32, %v7681_v36  ;;  %v3265_v5 = vadd.f32 %v3249_v19, %v7684_v18 }
 0x7cf   : > { %v3059_v28 = vadd.f32 %v7857_v29, %v3058_v13  ;;  %v3188_v57 = vadd.f32 %v7857_v29, %v3187_v10  ;;  %v3121_v55 = vmax.f32 %v3067_v26, 0.0  ;;  %v3250_v30 = vmax.f32 %v3196_v51, 0.0 }
 0x7d0   : > { %v3134_v12 = vadd.f32 %v3118_v11, %v7687_v34  ;;  %v3263_v7 = vadd.f32 %v3247_v8, %v7690_v16 }
 0x7d1   : > { %v3119_v60 = vmax.f32 %v3059_v28, 0.0  ;;  %v3248_v44 = vmax.f32 %v3188_v57, 0.0  ;;  %v3137_v50 = vadd.f32 %v3121_v55, %v7699_v37  ;;  %v3266_v61 = vadd.f32 %v3250_v30, %v7704_v63 }
 0x7d2   : > { %v5246_v53 = vpop.f32.mrf.mxu0 }
 0x7d3   : > { %v3135_v35 = vadd.f32 %v3119_v60, %v7707_v25  ;;  %v3264_v4 = vadd.f32 %v3248_v44, %v7714_v27  ;;  %v3080_v48 = vadd.f32 %v7857_v29, %v5246_v53  ;;  %v5278_v36 = vpop.f32.mrf.mxu1  ;;  %v3280_v2 = vpack.c.bf16 %v3137_v50, %v3136_v17 }
 0x7d4   : > { %v3433_v38 = vpack.c.bf16 %v3266_v61, %v3265_v5  ;;  %v3209_v18 = vadd.f32 %v7857_v29, %v5278_v36  ;;  %v3071_v23 = vpop.f32.mrf.mxu0 }
 0x7d5   : > { %v3072_v34 = vadd.f32 %v7857_v29, %v3071_v23  ;;  %v3200_v37 = vpop.f32.mrf.mxu1  ;;  %v3279_v1 = vpack.c.bf16 %v3135_v35, %v3134_v12  ;;  %v3432_v63 = vpack.c.bf16 %v3264_v4, %v3263_v7  ;;  %v3124_v22 = vmax.f32 %v3080_v48, 0.0 }
 0x7d6   : > { %v3201_v6 = vadd.f32 %v7857_v29, %v3200_v37  ;;  %v5247_v16 = vpop.f32.mrf.mxu0  ;;  %v3253_v62 = vmax.f32 %v3209_v18, 0.0 }
 0x7d7   : > { %v3083_v25 = vadd.f32 %v7857_v29, %v5247_v16  ;;  %v5279_v27 = vpop.f32.mrf.mxu1  ;;  %5304 = vmatprep.mubr.bf16.mxu0 %v3279_v1  ;;  %5336 = vmatprep.mubr.bf16.mxu1 %v3432_v63  ;;  %v3122_v11 = vmax.f32 %v3072_v34, 0.0  ;;  %v3140_v55 = vadd.f32 %v3124_v22, %v7726_v58 }
 0x7d8   : > { %v3212_v32 = vadd.f32 %v7857_v29, %v5279_v27  ;;  %v3074_v19 = vpop.f32.mrf.mxu0  ;;  %5305 = vmatmul.mubr.bf16.vlgmr.msra.gmra.mxu0 %v3280_v2  ;;  %5337 = vmatmul.mubr.bf16.vlgmr.msra.gmra.mxu1 %v3433_v38  ;;  %v3251_v10 = vmax.f32 %v3201_v6, 0.0  ;;  %v3269_v5 = vadd.f32 %v3253_v62, %v7732_v52 }
 0x7d9   : > { %v3125_v26 = vmax.f32 %v3083_v25, 0.0  ;;  %v3075_v51 = vadd.f32 %v7857_v29, %v3074_v19  ;;  %v3203_v13 = vpop.f32.mrf.mxu1  ;;  %v3138_v7 = vadd.f32 %v3122_v11, %v7737_v14 }
 0x7da   : > { %v3254_v8 = vmax.f32 %v3212_v32, 0.0  ;;  %v3204_v28 = vadd.f32 %v7857_v29, %v3203_v13  ;;  %v5250_v57 = vpop.f32.mrf.mxu0  ;;  %v3267_v48 = vadd.f32 %v3251_v10, %v7742_v46 }
 0x7db   : > { %v3141_v30 = vadd.f32 %v3125_v26, %v7763_v20  ;;  %v3123_v17 = vmax.f32 %v3075_v51, 0.0  ;;  %v3096_v60 = vadd.f32 %v7857_v29, %v5250_v57  ;;  %v5282_v44 = vpop.f32.mrf.mxu1 }
 0x7dc   : > { %v3270_v12 = vadd.f32 %v3254_v8, %v7770_v47  ;;  %v3252_v50 = vmax.f32 %v3204_v28, 0.0  ;;  %v3225_v61 = vadd.f32 %v7857_v29, %v5282_v44  ;;  %v3087_v53 = vpop.f32.mrf.mxu0 }
 0x7dd   : > { %v3282_v35 = vpack.c.bf16 %v3141_v30, %v3140_v55  ;;  %v3139_v4 = vadd.f32 %v3123_v17, %v7775_v24  ;;  %v3088_v58 = vadd.f32 %v7857_v29, %v3087_v53  ;;  %v3216_v20 = vpop.f32.mrf.mxu1  ;;  %v3128_v38 = vmax.f32 %v3096_v60, 0.0 }
 0x7de   : > { %v3435_v36 = vpack.c.bf16 %v3270_v12, %v3269_v5  ;;  %v3268_v2 = vadd.f32 %v3252_v50, %v7780_v15  ;;  %v3217_v52 = vadd.f32 %v7857_v29, %v3216_v20  ;;  %v5251_v47 = vpop.f32.mrf.mxu0  ;;  %v3257_v14 = vmax.f32 %v3225_v61, 0.0 }
 0x7df   : > { %v3099_v18 = vadd.f32 %v7857_v29, %v5251_v47  ;;  %v5283_v23 = vpop.f32.mrf.mxu1  ;;  %v3281_v34 = vpack.c.bf16 %v3139_v4, %v3138_v7  ;;  %v3126_v63 = vmax.f32 %v3088_v58, 0.0  ;;  %v3144_v62 = vadd.f32 %v3128_v38, %v7798_v9 }
 0x7e0   : > { %v3228_v37 = vadd.f32 %v7857_v29, %v5283_v23  ;;  %v3090_v24 = vpop.f32.mrf.mxu0  ;;  %v3434_v1 = vpack.c.bf16 %v3268_v2, %v3267_v48  ;;  %v3255_v15 = vmax.f32 %v3217_v52, 0.0  ;;  %v3273_v51 = vadd.f32 %v3257_v14, %v7804_v31 }
 0x7e1   : > { %v3129_v6 = vmax.f32 %v3099_v18, 0.0  ;;  %v3091_v46 = vadd.f32 %v7857_v29, %v3090_v24  ;;  %v3219_v16 = vpop.f32.mrf.mxu1  ;;  %5308 = vmatprep.mubr.bf16.mxu0 %v3281_v34  ;;  %v3142_v57 = vadd.f32 %v3126_v63, %v7809_v33 }
 0x7e2   : > { %v3258_v22 = vmax.f32 %v3228_v37, 0.0  ;;  %v3220_v25 = vadd.f32 %v7857_v29, %v3219_v16  ;;  %5340 = vmatprep.mubr.bf16.mxu1 %v3434_v1  ;;  %v5254_v27 = vpop.f32.mrf.mxu0  ;;  %5309 = vmatmul.mubr.bf16.gmra.mxu0 %v3282_v35  ;;  %v3271_v17 = vadd.f32 %v3255_v15, %v7813_v21 }
 0x7e3   : > { %v3145_v32 = vadd.f32 %v3129_v6, %v7817_v42  ;;  %v3127_v19 = vmax.f32 %v3091_v46, 0.0  ;;  %v3112_v11 = vadd.f32 %v7857_v29, %v5254_v27  ;;  %v5286_v26 = vpop.f32.mrf.mxu1  ;;  %5341 = vmatmul.mubr.bf16.gmra.mxu1 %v3435_v36 }
 0x7e4   : > { %v3274_v13 = vadd.f32 %v3258_v22, %v7820_v39  ;;  %v3256_v10 = vmax.f32 %v3220_v25, 0.0  ;;  %v3241_v8 = vadd.f32 %v7857_v29, %v5286_v26  ;;  %v3103_v28 = vpop.f32.mrf.mxu0 }
 0x7e5   : > { %v3284_v55 = vpack.c.bf16 %v3145_v32, %v3144_v62  ;;  %v3143_v9 = vadd.f32 %v3127_v19, %v7824_v54  ;;  %v3104_v42 = vadd.f32 %v7857_v29, %v3103_v28  ;;  %v3232_v30 = vpop.f32.mrf.mxu1  ;;  %v3132_v5 = vmax.f32 %v3112_v11, 0.0 }
 0x7e6   : > { %v3437_v60 = vpack.c.bf16 %v3274_v13, %v3273_v51  ;;  %v3272_v44 = vadd.f32 %v3256_v10, %v7827_v43  ;;  %v3233_v31 = vadd.f32 %v7857_v29, %v3232_v30  ;;  %v5255_v39 = vpop.f32.mrf.mxu0  ;;  %v3261_v33 = vmax.f32 %v3241_v8, 0.0 }
 0x7e7   : > { %v3115_v12 = vadd.f32 %v7857_v29, %v5255_v39  ;;  %v5287_v50 = vpop.f32.mrf.mxu1  ;;  %v3283_v61 = vpack.c.bf16 %v3143_v9, %v3142_v57  ;;  %v3130_v35 = vmax.f32 %v3104_v42, 0.0  ;;  %v3148_v36 = vadd.f32 %v3132_v5, %v7831_v41 }
 0x7e8   : > { %v3244_v53 = vadd.f32 %v7857_v29, %v5287_v50  ;;  %v3106_v54 = vpop.f32.mrf.mxu0  ;;  %v3436_v7 = vpack.c.bf16 %v3272_v44, %v3271_v17  ;;  %v3259_v43 = vmax.f32 %v3233_v31, 0.0  ;;  %v3277_v47 = vadd.f32 %v3261_v33, %v7834_v59 }
 0x7e9   : > { %v3133_v4 = vmax.f32 %v3115_v12, 0.0  ;;  %v3107_v21 = vadd.f32 %v7857_v29, %v3106_v54  ;;  %v3235_v58 = vpop.f32.mrf.mxu1  ;;  %5312 = vmatprep.mubr.bf16.mxu0 %v3283_v61  ;;  %v3146_v23 = vadd.f32 %v3130_v35, %v7837_v56  ;;  %v3537_v59 = vlaneseq  ;;  %v7928_v56 = vld [vmem:[%s8359_s6] ss:$0 sm:$0xff] }
 0x7ea   : > { %v3262_v20 = vmax.f32 %v3244_v53, 0.0  ;;  %v3236_v48 = vadd.f32 %v7857_v29, %v3235_v58  ;;  %5344 = vmatprep.mubr.bf16.mxu1 %v3436_v7  ;;  %5313 = vmatmul.mubr.bf16.gmra.mxu0 %v3284_v55  ;;  %v3275_v29 = vadd.f32 %v3259_v43, %v7840_v49 }
 0x7eb   : > { %v3149_v2 = vadd.f32 %v3133_v4, %v7843_v0  ;;  %v3131_v52 = vmax.f32 %v3107_v21, 0.0  ;;  %5345 = vmatmul.mubr.bf16.gmra.mxu1 %v3437_v60  ;;  %v7923_v0 = vand.u32 127, %v3537_v59 }
 0x7ec   : > { %v3278_v38 = vadd.f32 %v3262_v20, %v7846_v3  ;;  %v3260_v18 = vmax.f32 %v3236_v48, 0.0 }
 0x7ed   : > { %v3286_v34 = vpack.c.bf16 %v3149_v2, %v3148_v36  ;;  %v3147_v14 = vadd.f32 %v3131_v52, %v7849_v40  ;;  %vm3539_vm0 = vcmp.lt.s32.totalorder %v7923_v0, 8 }
 0x7ee   : > { %v3439_v37 = vpack.c.bf16 %v3278_v38, %v3277_v47  ;;  %v3276_v24 = vadd.f32 %v3260_v18, %v7852_v45 }
 0x7ef   : > { %v3285_v41 = vpack.c.bf16 %v3147_v14, %v3146_v23 }
 0x7f0   : > { %v3438_v1 = vpack.c.bf16 %v3276_v24, %v3275_v29 }
 0x7f1   : > { %5316 = vmatprep.mubr.bf16.mxu0 %v3285_v41 }
 0x7f2   : > { %5348 = vmatprep.mubr.bf16.mxu1 %v3438_v1  ;;  %5317 = vmatmul.mubr.bf16.gmra.mxu0 %v3286_v34 }
 0x7f3   : > { %5349 = vmatmul.mubr.bf16.gmra.mxu1 %v3439_v37 }
 0x898   : > { %v5306_v3 = vpop.f32.mrf.mxu0  ;;  %v5338_v40 = vpop.f32.mrf.mxu1 }
 0x899   : > { %v3378_v49 = vadd.f32 %v5306_v3, %v7928_v56  ;;  %v3483_v45 = vadd.f32 %v5338_v40, %v7928_v56 }
 0x89a   : > { %v3369_v63 = vpop.f32.mrf.mxu0  ;;  %v3474_v6 = vpop.f32.mrf.mxu1 }
 0x89b   : > { %v3370_v46 = vadd.f32 %v7928_v56, %v3369_v63  ;;  %v7936_v16 = vsel %vm3539_vm0, %v3483_v45, -1e+30  ;;  %v7940_v15 = vsel %vm3539_vm0, %v3378_v49, -1e+30  ;;  %v3475_v32 = vadd.f32 %v7928_v56, %v3474_v6 }
 0x89c   : > { %3816 = vmax.xlane.f32.xlu0 %v7936_v16  ;;  %v5339_v22 = vpop.f32.mrf.mxu1  ;;  %3560 = vmax.xlane.f32.xlu1 %v7940_v15  ;;  %v5307_v25 = vpop.f32.mrf.mxu0 }
 0x89d   : > { %v3381_v27 = vadd.f32 %v5307_v25, %v7928_v56  ;;  %v3486_v19 = vadd.f32 %v5339_v22, %v7928_v56  ;;  %v7953_v51 = vsel %vm3539_vm0, %v3370_v46, -1e+30  ;;  %v7965_v55 = vsel %vm3539_vm0, %v3475_v32, -1e+30 }
 0x89e   : > { %v3372_v62 = vpop.f32.mrf.mxu0  ;;  %v3477_v11 = vpop.f32.mrf.mxu1 }
 0x89f   : > { %v7949_v26 = vsel %vm3539_vm0, %v3381_v27, -1e+30  ;;  %v3373_v10 = vadd.f32 %v7928_v56, %v3372_v62  ;;  %v3478_v8 = vadd.f32 %v7928_v56, %v3477_v11  ;;  %v7961_v57 = vsel %vm3539_vm0, %v3486_v19, -1e+30 }
 0x8a0   : > { %3562 = vmax.xlane.f32.xlu1 %v7949_v26  ;;  %3556 = vmax.xlane.f32.xlu0 %v7953_v51 }
 0x8a1   : > { %v7973_v44 = vsel %vm3539_vm0, %v3478_v8, -1e+30  ;;  %v7977_v31 = vsel %vm3539_vm0, %v3373_v10, -1e+30 }
 0x8a2   : > { %v5310_v13 = vpop.f32.mrf.mxu0 }
 0x8a3   : > { %v5342_v28 = vpop.f32.mrf.mxu1  ;;  %v3394_v17 = vadd.f32 %v5310_v13, %v7928_v56 }
 0x8a4   : > { %v3385_v9 = vpop.f32.mrf.mxu0  ;;  %3818 = vmax.xlane.f32.xlu1 %v7961_v57  ;;  %3812 = vmax.xlane.f32.xlu0 %v7965_v55  ;;  %v3499_v12 = vadd.f32 %v5342_v28, %v7928_v56 }
 0x8a5   : > { %v3490_v42 = vpop.f32.mrf.mxu1  ;;  %v7989_v33 = vsel %vm3539_vm0, %v3394_v17, -1e+30  ;;  %v3386_v7 = vadd.f32 %v7928_v56, %v3385_v9 }
 0x8a6   : > { %v5311_v30 = vpop.f32.mrf.mxu0  ;;  %v8001_v21 = vsel %vm3539_vm0, %v3499_v12, -1e+30  ;;  %v3491_v20 = vadd.f32 %v7928_v56, %v3490_v42 }
 0x8a7   : > { %v3397_v60 = vadd.f32 %v5311_v30, %v7928_v56  ;;  %v5343_v39 = vpop.f32.mrf.mxu1  ;;  %v8013_v2 = vsel %vm3539_vm0, %v3386_v7, -1e+30 }
 0x8a8   : > { %v3388_v5 = vpop.f32.mrf.mxu0  ;;  %3814 = vmax.xlane.f32.xlu1 %v7973_v44  ;;  %3558 = vmax.xlane.f32.xlu0 %v7977_v31  ;;  %v3502_v50 = vadd.f32 %v5343_v39, %v7928_v56  ;;  %v8025_v34 = vsel %vm3539_vm0, %v3491_v20, -1e+30 }
 0x8a9   : > { %v7985_v61 = vsel %vm3539_vm0, %v3397_v60, -1e+30  ;;  %v3493_v53 = vpop.f32.mrf.mxu1  ;;  %v3389_v35 = vadd.f32 %v7928_v56, %v3388_v5 }
 0x8aa   : > { %v5314_v54 = vpop.f32.mrf.mxu0  ;;  %v7997_v4 = vsel %vm3539_vm0, %v3502_v50, -1e+30  ;;  %v3494_v48 = vadd.f32 %v7928_v56, %v3493_v53 }
 0x8ab   : > { %v5346_v58 = vpop.f32.mrf.mxu1  ;;  %v8009_v36 = vsel %vm3539_vm0, %v3389_v35, -1e+30  ;;  %v3410_v38 = vadd.f32 %v5314_v54, %v7928_v56 }
 0x8ac   : > { %3570 = vmax.xlane.f32.xlu1 %v7985_v61  ;;  %3568 = vmax.xlane.f32.xlu0 %v7989_v33  ;;  %v3401_v43 = vpop.f32.mrf.mxu0  ;;  %v8021_v23 = vsel %vm3539_vm0, %v3494_v48, -1e+30  ;;  %v3515_v37 = vadd.f32 %v5346_v58, %v7928_v56 }
 0x8ad   : > { %v3506_v52 = vpop.f32.mrf.mxu1  ;;  %v8037_v1 = vsel %vm3539_vm0, %v3410_v38, -1e+30  ;;  %v3402_v40 = vadd.f32 %v7928_v56, %v3401_v43 }
 0x8ae   : > { %v5315_v47 = vpop.f32.mrf.mxu0  ;;  %v8049_v63 = vsel %vm3539_vm0, %v3515_v37, -1e+30  ;;  %v3507_v22 = vadd.f32 %v7928_v56, %v3506_v52 }
 0x8af   : > { %v3413_v18 = vadd.f32 %v5315_v47, %v7928_v56  ;;  %v5347_v14 = vpop.f32.mrf.mxu1  ;;  %v8061_v62 = vsel %vm3539_vm0, %v3402_v40, -1e+30 }
 0x8b0   : > { %3826 = vmax.xlane.f32.xlu1 %v7997_v4  ;;  %3824 = vmax.xlane.f32.xlu0 %v8001_v21  ;;  %v3404_v29 = vpop.f32.mrf.mxu0  ;;  %v3518_v24 = vadd.f32 %v5347_v14, %v7928_v56  ;;  %v8073_v8 = vsel %vm3539_vm0, %v3507_v22, -1e+30 }
 0x8b1   : > { %v8033_v41 = vsel %vm3539_vm0, %v3413_v18, -1e+30  ;;  %v3509_v59 = vpop.f32.mrf.mxu1  ;;  %v3405_v49 = vadd.f32 %v7928_v56, %v3404_v29 }
 0x8b2   : > { %v5318_v3 = vpop.f32.mrf.mxu0  ;;  %v8045_v45 = vsel %vm3539_vm0, %v3518_v24, -1e+30  ;;  %v3510_v25 = vadd.f32 %v7928_v56, %v3509_v59 }
 0x8b3   : > { %v5350_v6 = vpop.f32.mrf.mxu1  ;;  %v8057_v27 = vsel %vm3539_vm0, %v3405_v49, -1e+30  ;;  %v3426_v11 = vadd.f32 %v5318_v3, %v7928_v56 }
 0x8b4   : > { %3566 = vmax.xlane.f32.xlu1 %v8009_v36  ;;  %3564 = vmax.xlane.f32.xlu0 %v8013_v2  ;;  %v3417_v46 = vpop.f32.mrf.mxu0  ;;  %v8069_v10 = vsel %vm3539_vm0, %v3510_v25, -1e+30  ;;  %v3531_v54 = vadd.f32 %v5350_v6, %v7928_v56 }
 0x8b5   : > { %v3522_v32 = vpop.f32.mrf.mxu1  ;;  %v3418_v42 = vadd.f32 %v7928_v56, %v3417_v46  ;;  %v8085_v60 = vsel %vm3539_vm0, %v3426_v11, -1e+30 }
 0x8b6   : > { %v5319_v19 = vpop.f32.mrf.mxu0  ;;  %v3523_v5 = vadd.f32 %v7928_v56, %v3522_v32  ;;  %v8119_v20 = vsel %vm3539_vm0, %v3531_v54, -1e+30 }
 0x8b7   : > { %v3429_v13 = vadd.f32 %v5319_v19, %v7928_v56  ;;  %v5351_v28 = vpop.f32.mrf.mxu1  ;;  %v8097_v53 = vsel %vm3539_vm0, %v3418_v42, -1e+30 }
 0x8b8   : > { %3822 = vmax.xlane.f32.xlu1 %v8021_v23  ;;  %3820 = vmax.xlane.f32.xlu0 %v8025_v34  ;;  %v3420_v9 = vpop.f32.mrf.mxu0  ;;  %v3534_v7 = vadd.f32 %v5351_v28, %v7928_v56  ;;  %v8109_v58 = vsel %vm3539_vm0, %v3523_v5, -1e+30 }
 0x8b9   : > { %v3421_v30 = vadd.f32 %v7928_v56, %v3420_v9  ;;  %v8081_v17 = vsel %vm3539_vm0, %v3429_v13, -1e+30  ;;  %v3525_v39 = vpop.f32.mrf.mxu1 }
 0x8ba   : > { %v3526_v12 = vadd.f32 %v7928_v56, %v3525_v39  ;;  %v8115_v43 = vsel %vm3539_vm0, %v3534_v7, -1e+30 }
 0x8bb   : > { %v8093_v50 = vsel %vm3539_vm0, %v3421_v30, -1e+30 }
 0x8bc   : > { %3578 = vmax.xlane.f32.xlu1 %v8033_v41  ;;  %3576 = vmax.xlane.f32.xlu0 %v8037_v1  ;;  %v8105_v35 = vsel %vm3539_vm0, %v3526_v12, -1e+30 }
 0x8c0   : > { %3834 = vmax.xlane.f32.xlu1 %v8045_v45  ;;  %3832 = vmax.xlane.f32.xlu0 %v8049_v63 }
 0x8c4   : > { %3574 = vmax.xlane.f32.xlu1 %v8057_v27  ;;  %3572 = vmax.xlane.f32.xlu0 %v8061_v62 }
 0x8c8   : > { %3830 = vmax.xlane.f32.xlu1 %v8069_v10  ;;  %3828 = vmax.xlane.f32.xlu0 %v8073_v8 }
 0x8cc   : > { %3586 = vmax.xlane.f32.xlu1 %v8081_v17  ;;  %3584 = vmax.xlane.f32.xlu0 %v8085_v60 }
 0x8d0   : > { %3582 = vmax.xlane.f32.xlu1 %v8093_v50  ;;  %3580 = vmax.xlane.f32.xlu0 %v8097_v53 }
 0x8d4   : > { %3838 = vmax.xlane.f32.xlu1 %v8105_v35  ;;  %3836 = vmax.xlane.f32.xlu0 %v8109_v58 }
 0x8d8   : > { %3842 = vmax.xlane.f32.xlu1 %v8115_v43  ;;  %3840 = vmax.xlane.f32.xlu0 %v8119_v20 }
 0x925   : > { %v3817_v56 = vpop.xlane.xlu0 %3816  ;;  %v3561_v48 = vpop.xlane.xlu1 %3560 }
 0x926   : > { %v8124_v52 = vsub.f32 %v7940_v15, %v3561_v48  ;;  %v8127_v47 = vsub.f32 %v7936_v16, %v3817_v56 }
 0x928   : > { %v3608_v38 = vmul.f32 1.442695, %v8124_v52  ;;  %v3864_v29 = vmul.f32 1.442695, %v8127_v47 }
 0x929   : > { %v3563_v18 = vpop.xlane.xlu1 %3562  ;;  %v3557_v14 = vpop.xlane.xlu0 %3556 }
 0x92a   : > { %v8131_v0 = vsub.f32 %v7949_v26, %v3563_v18  ;;  %5473 = vpow2.f32 %v3608_v38  ;;  %v8135_v37 = vsub.f32 %v7953_v51, %v3557_v14 }
 0x92c   : > { %v3610_v24 = vmul.f32 1.442695, %v8131_v0  ;;  %v3604_v26 = vmul.f32 1.442695, %v8135_v37 }
 0x92d   : > { %v3819_v15 = vpop.xlane.xlu1 %3818  ;;  %v3813_v59 = vpop.xlane.xlu0 %3812 }
 0x92e   : > { %5475 = vpow2.f32 %v3610_v24  ;;  %v8139_v16 = vsub.f32 %v7961_v57, %v3819_v15  ;;  %v8142_v3 = vsub.f32 %v7965_v55, %v3813_v59 }
 0x92f   : > { %5477 = vpow2.f32 %v3864_v29 }
 0x930   : > { %v3866_v40 = vmul.f32 1.442695, %v8139_v16  ;;  %v3860_v51 = vmul.f32 1.442695, %v8142_v3 }
 0x931   : > { %v3815_v49 = vpop.xlane.xlu1 %3814  ;;  %v3559_v6 = vpop.xlane.xlu0 %3558 }
 0x932   : > { %5479 = vpow2.f32 %v3866_v40  ;;  %v8148_v46 = vsub.f32 %v7973_v44, %v3815_v49  ;;  %v8151_v22 = vsub.f32 %v7977_v31, %v3559_v6 }
 0x933   : > { %5481 = vpow2.f32 %v3604_v26 }
 0x934   : > { %v3606_v57 = vmul.f32 1.442695, %v8151_v22  ;;  %5483 = vpow2.f32 %v3860_v51  ;;  %v3862_v32 = vmul.f32 1.442695, %v8148_v46 }
 0x935   : > { %v3571_v55 = vpop.xlane.xlu1 %3570  ;;  %v3569_v25 = vpop.xlane.xlu0 %3568 }
 0x936   : > { %v8156_v19 = vsub.f32 %v7985_v61, %v3571_v55  ;;  %v8159_v11 = vsub.f32 %v7989_v33, %v3569_v25  ;;  %5485 = vpow2.f32 %v3606_v57 }
 0x937   : > { %v5474_v44 = vpop.eup %5473  ;;  %5487 = vpow2.f32 %v3862_v32 }
 0x938   : > { %v3616_v13 = vmul.f32 1.442695, %v8159_v11  ;;  %3640 = vadd.xlane.f32.xlu0 %v5474_v44  ;;  %v3618_v9 = vmul.f32 1.442695, %v8156_v19 }
 0x939   : > { %v3827_v31 = vpop.xlane.xlu1 %3826  ;;  %v3825_v28 = vpop.xlane.xlu0 %3824 }
 0x93a   : > { %v8164_v42 = vsub.f32 %v7997_v4, %v3827_v31  ;;  %v8167_v30 = vsub.f32 %v8001_v21, %v3825_v28  ;;  %5489 = vpow2.f32 %v3616_v13 }
 0x93b   : > { %v5476_v61 = vpop.eup %5475  ;;  %5491 = vpow2.f32 %v3618_v9 }
 0x93c   : > { %v5478_v33 = vpop.eup %5477  ;;  %v3872_v39 = vmul.f32 1.442695, %v8167_v30  ;;  %3642 = vadd.xlane.f32.xlu1 %v5476_v61  ;;  %v3874_v54 = vmul.f32 1.442695, %v8164_v42 }
 0x93d   : > { %3896 = vadd.xlane.f32.xlu0 %v5478_v33  ;;  %v3567_v5 = vpop.xlane.xlu1 %3566  ;;  %v3565_v12 = vpop.xlane.xlu0 %3564 }
 0x93e   : > { %v8172_v7 = vsub.f32 %v8009_v36, %v3567_v5  ;;  %v8175_v4 = vsub.f32 %v8013_v2, %v3565_v12  ;;  %5493 = vpow2.f32 %v3872_v39 }
 0x93f   : > { %v5480_v21 = vpop.eup %5479  ;;  %5495 = vpow2.f32 %v3874_v54 }
 0x940   : > { %v5482_v56 = vpop.eup %5481  ;;  %v3612_v48 = vmul.f32 1.442695, %v8175_v4  ;;  %3898 = vadd.xlane.f32.xlu1 %v5480_v21  ;;  %v3614_v14 = vmul.f32 1.442695, %v8172_v7 }
 0x941   : > { %3636 = vadd.xlane.f32.xlu0 %v5482_v56  ;;  %v3823_v38 = vpop.xlane.xlu1 %3822  ;;  %v3821_v18 = vpop.xlane.xlu0 %3820 }
 0x942   : > { %v8180_v29 = vsub.f32 %v8021_v23, %v3823_v38  ;;  %v8183_v36 = vsub.f32 %v8025_v34, %v3821_v18  ;;  %v5484_v2 = vpop.eup %5483  ;;  %5497 = vpow2.f32 %v3612_v48 }
 0x943   : > { %v5486_v24 = vpop.eup %5485  ;;  %5499 = vpow2.f32 %v3614_v14 }
 0x944   : > { %v3868_v15 = vmul.f32 1.442695, %v8183_v36  ;;  %3638 = vadd.xlane.f32.xlu1 %v5486_v24  ;;  %v3870_v40 = vmul.f32 1.442695, %v8180_v29  ;;  %v5488_v34 = vpop.eup %5487 }
 0x945   : > { %3892 = vadd.xlane.f32.xlu0 %v5484_v2  ;;  %v3579_v59 = vpop.xlane.xlu1 %3578  ;;  %v3577_v26 = vpop.xlane.xlu0 %3576 }
 0x946   : > { %v8188_v49 = vsub.f32 %v8033_v41, %v3579_v59  ;;  %v8191_v23 = vsub.f32 %v8037_v1, %v3577_v26  ;;  %5501 = vpow2.f32 %v3868_v15 }
 0x947   : > { %v5490_v6 = vpop.eup %5489  ;;  %5503 = vpow2.f32 %v3870_v40 }
 0x948   : > { %v3624_v51 = vmul.f32 1.442695, %v8191_v23  ;;  %3894 = vadd.xlane.f32.xlu1 %v5488_v34  ;;  %v3626_v25 = vmul.f32 1.442695, %v8188_v49  ;;  %v5492_v1 = vpop.eup %5491 }
 0x949   : > { %3648 = vadd.xlane.f32.xlu0 %v5490_v6  ;;  %v3835_v57 = vpop.xlane.xlu1 %3834  ;;  %v3833_v55 = vpop.xlane.xlu0 %3832 }
 0x94a   : > { %v8196_v32 = vsub.f32 %v8045_v45, %v3835_v57  ;;  %v8199_v41 = vsub.f32 %v8049_v63, %v3833_v55  ;;  %5505 = vpow2.f32 %v3624_v51 }
 0x94b   : > { %v5494_v44 = vpop.eup %5493  ;;  %5507 = vpow2.f32 %v3626_v25 }
 0x94c   : > { %v3880_v13 = vmul.f32 1.442695, %v8199_v41  ;;  %3650 = vadd.xlane.f32.xlu1 %v5492_v1  ;;  %v3882_v9 = vmul.f32 1.442695, %v8196_v32  ;;  %v5496_v63 = vpop.eup %5495 }
 0x94d   : > { %3904 = vadd.xlane.f32.xlu0 %v5494_v44  ;;  %v3575_v31 = vpop.xlane.xlu1 %3574  ;;  %v3573_v28 = vpop.xlane.xlu0 %3572 }
 0x94e   : > { %v8204_v61 = vsub.f32 %v8057_v27, %v3575_v31  ;;  %v8207_v45 = vsub.f32 %v8061_v62, %v3573_v28  ;;  %5509 = vpow2.f32 %v3880_v13 }
 0x94f   : > { %v5498_v33 = vpop.eup %5497  ;;  %5511 = vpow2.f32 %v3882_v9 }
 0x950   : > { %v3620_v39 = vmul.f32 1.442695, %v8207_v45  ;;  %3906 = vadd.xlane.f32.xlu1 %v5496_v63  ;;  %v3622_v54 = vmul.f32 1.442695, %v8204_v61  ;;  %v5500_v62 = vpop.eup %5499 }
 0x951   : > { %3644 = vadd.xlane.f32.xlu0 %v5498_v33  ;;  %v3831_v5 = vpop.xlane.xlu1 %3830  ;;  %v3829_v12 = vpop.xlane.xlu0 %3828 }
 0x952   : > { %v8212_v21 = vsub.f32 %v8069_v10, %v3831_v5  ;;  %v8215_v27 = vsub.f32 %v8073_v8, %v3829_v12  ;;  %5513 = vpow2.f32 %v3620_v39 }
 0x953   : > { %v5502_v56 = vpop.eup %5501  ;;  %5515 = vpow2.f32 %v3622_v54 }
 0x954   : > { %v3876_v48 = vmul.f32 1.442695, %v8215_v27  ;;  %3646 = vadd.xlane.f32.xlu1 %v5500_v62  ;;  %v3878_v14 = vmul.f32 1.442695, %v8212_v21  ;;  %v5504_v8 = vpop.eup %5503 }
 0x955   : > { %3900 = vadd.xlane.f32.xlu0 %v5502_v56  ;;  %v3587_v38 = vpop.xlane.xlu1 %3586  ;;  %v3585_v18 = vpop.xlane.xlu0 %3584 }
 0x956   : > { %v8220_v2 = vsub.f32 %v8081_v17, %v3587_v38  ;;  %v8223_v10 = vsub.f32 %v8085_v60, %v3585_v18  ;;  %5517 = vpow2.f32 %v3876_v48 }
 0x957   : > { %v5506_v24 = vpop.eup %5505  ;;  %5519 = vpow2.f32 %v3878_v14 }
 0x958   : > { %v3632_v15 = vmul.f32 1.442695, %v8223_v10  ;;  %3902 = vadd.xlane.f32.xlu1 %v5504_v8  ;;  %v3634_v40 = vmul.f32 1.442695, %v8220_v2  ;;  %v5508_v60 = vpop.eup %5507 }
 0x959   : > { %3656 = vadd.xlane.f32.xlu0 %v5506_v24  ;;  %v3583_v59 = vpop.xlane.xlu1 %3582  ;;  %v3581_v26 = vpop.xlane.xlu0 %3580 }
 0x95a   : > { %v8228_v34 = vsub.f32 %v8093_v50, %v3583_v59  ;;  %v8231_v17 = vsub.f32 %v8097_v53, %v3581_v26  ;;  %5521 = vpow2.f32 %v3632_v15 }
 0x95b   : > { %v5510_v6 = vpop.eup %5509  ;;  %5523 = vpow2.f32 %v3634_v40 }
 0x95c   : > { %v3628_v51 = vmul.f32 1.442695, %v8231_v17  ;;  %3658 = vadd.xlane.f32.xlu1 %v5508_v60  ;;  %v3630_v25 = vmul.f32 1.442695, %v8228_v34  ;;  %v5512_v53 = vpop.eup %5511 }
 0x95d   : > { %3912 = vadd.xlane.f32.xlu0 %v5510_v6  ;;  %v3839_v57 = vpop.xlane.xlu1 %3838  ;;  %v3837_v55 = vpop.xlane.xlu0 %3836 }
 0x95e   : > { %v8236_v1 = vsub.f32 %v8105_v35, %v3839_v57  ;;  %v8239_v50 = vsub.f32 %v8109_v58, %v3837_v55  ;;  %5525 = vpow2.f32 %v3628_v51 }
 0x95f   : > { %v5514_v44 = vpop.eup %5513  ;;  %5527 = vpow2.f32 %v3630_v25 }
 0x960   : > { %v3884_v13 = vmul.f32 1.442695, %v8239_v50  ;;  %3914 = vadd.xlane.f32.xlu1 %v5512_v53  ;;  %v3886_v9 = vmul.f32 1.442695, %v8236_v1  ;;  %v5516_v35 = vpop.eup %5515 }
 0x961   : > { %3652 = vadd.xlane.f32.xlu0 %v5514_v44  ;;  %v3843_v31 = vpop.xlane.xlu1 %3842  ;;  %v3841_v28 = vpop.xlane.xlu0 %3840 }
 0x962   : > { %v8244_v63 = vsub.f32 %v8119_v20, %v3841_v28  ;;  %5529 = vpow2.f32 %v3884_v13  ;;  %v8247_v58 = vsub.f32 %v8115_v43, %v3843_v31 }
 0x963   : > { %v5518_v33 = vpop.eup %5517  ;;  %5531 = vpow2.f32 %v3886_v9 }
 0x964   : > { %v3888_v39 = vmul.f32 1.442695, %v8244_v63  ;;  %3654 = vadd.xlane.f32.xlu1 %v5516_v35  ;;  %v5520_v5 = vpop.eup %5519  ;;  %v3890_v12 = vmul.f32 1.442695, %v8247_v58 }
 0x965   : > { %3908 = vadd.xlane.f32.xlu0 %v5518_v33 }
 0x966   : > { %5533 = vpow2.f32 %v3888_v39 }
 0x967   : > { %v5522_v54 = vpop.eup %5521  ;;  %5535 = vpow2.f32 %v3890_v12 }
 0x968   : > { %3910 = vadd.xlane.f32.xlu1 %v5520_v5  ;;  %v5524_v20 = vpop.eup %5523 }
 0x969   : > { %3664 = vadd.xlane.f32.xlu0 %v5522_v54 }
 0x96b   : > { %v5526_v62 = vpop.eup %5525 }
 0x96c   : > { %3666 = vadd.xlane.f32.xlu1 %v5524_v20  ;;  %v5528_v43 = vpop.eup %5527 }
 0x96d   : > { %3660 = vadd.xlane.f32.xlu0 %v5526_v62 }
 0x96f   : > { %v5530_v56 = vpop.eup %5529 }
 0x970   : > { %3662 = vadd.xlane.f32.xlu1 %v5528_v43  ;;  %v5532_v48 = vpop.eup %5531 }
 0x971   : > { %3916 = vadd.xlane.f32.xlu0 %v5530_v56 }
 0x973   : > { %v5534_v38 = vpop.eup %5533 }
 0x974   : > { %3918 = vadd.xlane.f32.xlu1 %v5532_v48  ;;  %v5536_v18 = vpop.eup %5535 }
 0x975   : > { %3920 = vadd.xlane.f32.xlu0 %v5534_v38 }
 0x978   : > { %3922 = vadd.xlane.f32.xlu1 %v5536_v18 }
 0x9c1   : > { %v3641_v14 = vpop.xlane.xlu0 %3640 }
 0x9c2   : > { %5537 = vlog2.f32 %v3641_v14 }
 0x9c5   : > { %v3643_v8 = vpop.xlane.xlu1 %3642 }
 0x9c6   : > { %5539 = vlog2.f32 %v3643_v8  ;;  %v3897_v24 = vpop.xlane.xlu0 %3896 }
 0x9c7   : > { %5541 = vlog2.f32 %v3897_v24 }
 0x9c9   : > { %v3899_v15 = vpop.xlane.xlu1 %3898 }
 0x9ca   : > { %5543 = vlog2.f32 %v3899_v15  ;;  %v3637_v59 = vpop.xlane.xlu0 %3636 }
 0x9cb   : > { %5545 = vlog2.f32 %v3637_v59 }
 0x9cd   : > { %v3639_v26 = vpop.xlane.xlu1 %3638 }
 0x9ce   : > { %v3893_v40 = vpop.xlane.xlu0 %3892  ;;  %5547 = vlog2.f32 %v3639_v26 }
 0x9cf   : > { %v5538_v60 = vpop.eup %5537  ;;  %5549 = vlog2.f32 %v3893_v40 }
 0x9d0   : > { %v3673_v6 = vmul.f32 0.6931472, %v5538_v60 }
 0x9d1   : > { %v3895_v51 = vpop.xlane.xlu1 %3894 }
 0x9d2   : > { %v3649_v57 = vpop.xlane.xlu0 %3648  ;;  %5551 = vlog2.f32 %v3895_v51  ;;  %v3702_v44 = vsub.f32 %v8124_v52, %v3673_v6 }
 0x9d3   : > { %v5540_v55 = vpop.eup %5539  ;;  %5553 = vlog2.f32 %v3649_v57 }
 0x9d4   : > { %v5542_v25 = vpop.eup %5541  ;;  %v3675_v53 = vmul.f32 0.6931472, %v5540_v55 }
 0x9d5   : > { %v3929_v31 = vmul.f32 0.6931472, %v5542_v25  ;;  %v3651_v28 = vpop.xlane.xlu1 %3650 }
 0x9d6   : > { %v3703_v13 = vsub.f32 %v8131_v0, %v3675_v53  ;;  %v3905_v9 = vpop.xlane.xlu0 %3904  ;;  %5555 = vlog2.f32 %v3651_v28 }
 0x9d7   : > { %v5544_v35 = vpop.eup %5543  ;;  %5557 = vlog2.f32 %v3905_v9  ;;  %v3958_v12 = vsub.f32 %v8127_v47, %v3929_v31 }
 0x9d8   : > { %v5546_v33 = vpop.eup %5545  ;;  %v4305_v39 = vpack.c.bf16 %v3703_v13, %v3702_v44  ;;  %v3931_v5 = vmul.f32 0.6931472, %v5544_v35 }
 0x9d9   : > { %v3907_v0 = vpop.xlane.xlu1 %3906  ;;  %v3669_v20 = vmul.f32 0.6931472, %v5546_v33 }
 0x9da   : > { %4377 = vst [vmem:[%s8255_s12 + $0x8] sm:$0xff] %v4305_v39   ;;  %v3959_v52 = vsub.f32 %v8139_v16, %v3931_v5  ;;  %v3645_v54 = vpop.xlane.xlu0 %3644  ;;  %5559 = vlog2.f32 %v3907_v0 }
 0x9db   : > { %v5548_v62 = vpop.eup %5547  ;;  %5561 = vlog2.f32 %v3645_v54  ;;  %v3700_v14 = vsub.f32 %v8135_v37, %v3669_v20 }
 0x9dc   : > { %v4345_v43 = vpack.c.bf16 %v3959_v52, %v3958_v12  ;;  %v5550_v56 = vpop.eup %5549  ;;  %v3671_v48 = vmul.f32 0.6931472, %v5548_v62 }
 0x9dd   : > { %v3647_v38 = vpop.xlane.xlu1 %3646  ;;  %v3925_v47 = vmul.f32 0.6931472, %v5550_v56 }
 0x9de   : > { %4385 = vst [vmem:[%s8255_s12 + $0x48] sm:$0xff] %v4345_v43   ;;  %v3901_v18 = vpop.xlane.xlu0 %3900  ;;  %v3701_v8 = vsub.f32 %v8151_v22, %v3671_v48  ;;  %5563 = vlog2.f32 %v3647_v38 }
 0x9df   : > { %v5552_v16 = vpop.eup %5551  ;;  %5565 = vlog2.f32 %v3901_v18  ;;  %v3956_v60 = vsub.f32 %v8142_v3, %v3925_v47 }
 0x9e0   : > { %v5554_v24 = vpop.eup %5553  ;;  %v4300_v15 = vpack.c.bf16 %v3701_v8, %v3700_v14  ;;  %v3927_v59 = vmul.f32 0.6931472, %v5552_v16 }
 0x9e1   : > { %v3903_v26 = vpop.xlane.xlu1 %3902  ;;  %v3681_v51 = vmul.f32 0.6931472, %v5554_v24 }
 0x9e2   : > { %v3657_v40 = vpop.xlane.xlu0 %3656  ;;  %4301 = vst [vmem:[%s8255_s12] sm:$0xff] %v4300_v15   ;;  %v3957_v6 = vsub.f32 %v8148_v46, %v3927_v59  ;;  %5567 = vlog2.f32 %v3903_v26 }
 0x9e3   : > { %v5556_v37 = vpop.eup %5555  ;;  %5569 = vlog2.f32 %v3657_v40  ;;  %v3706_v44 = vsub.f32 %v8159_v11, %v3681_v51 }
 0x9e4   : > { %v5558_v22 = vpop.eup %5557  ;;  %v4340_v57 = vpack.c.bf16 %v3957_v6, %v3956_v60  ;;  %v3683_v55 = vmul.f32 0.6931472, %v5556_v37 }
 0x9e5   : > { %v3659_v25 = vpop.xlane.xlu1 %3658  ;;  %v3937_v31 = vmul.f32 0.6931472, %v5558_v22 }
 0x9e6   : > { %v3913_v53 = vpop.xlane.xlu0 %3912  ;;  %4384 = vst [vmem:[%s8255_s12 + $0x40] sm:$0xff] %v4340_v57   ;;  %v3707_v13 = vsub.f32 %v8156_v19, %v3683_v55  ;;  %5571 = vlog2.f32 %v3659_v25 }
 0x9e7   : > { %v5560_v3 = vpop.eup %5559  ;;  %5573 = vlog2.f32 %v3913_v53  ;;  %v3962_v39 = vsub.f32 %v8167_v30, %v3937_v31 }
 0x9e8   : > { %v5562_v46 = vpop.eup %5561  ;;  %v4315_v28 = vpack.c.bf16 %v3707_v13, %v3706_v44  ;;  %v3939_v9 = vmul.f32 0.6931472, %v5560_v3 }
 0x9e9   : > { %v3915_v35 = vpop.xlane.xlu1 %3914  ;;  %v3677_v12 = vmul.f32 0.6931472, %v5562_v46 }
 0x9ea   : > { %v3653_v33 = vpop.xlane.xlu0 %3652  ;;  %4379 = vst [vmem:[%s8255_s12 + $0x18] sm:$0xff] %v4315_v28   ;;  %v3963_v5 = vsub.f32 %v8164_v42, %v3939_v9  ;;  %5575 = vlog2.f32 %v3915_v35 }
 0x9eb   : > { %v5564_v11 = vpop.eup %5563  ;;  %5577 = vlog2.f32 %v3653_v33  ;;  %v3704_v62 = vsub.f32 %v8175_v4, %v3677_v12 }
 0x9ec   : > { %v5566_v19 = vpop.eup %5565  ;;  %v4355_v52 = vpack.c.bf16 %v3963_v5, %v3962_v39  ;;  %v3679_v0 = vmul.f32 0.6931472, %v5564_v11 }
 0x9ed   : > { %v3655_v54 = vpop.xlane.xlu1 %3654  ;;  %v3933_v56 = vmul.f32 0.6931472, %v5566_v19 }
 0x9ee   : > { %v3909_v20 = vpop.xlane.xlu0 %3908  ;;  %4387 = vst [vmem:[%s8255_s12 + $0x58] sm:$0xff] %v4355_v52   ;;  %v3705_v43 = vsub.f32 %v8172_v7, %v3679_v0  ;;  %5579 = vlog2.f32 %v3655_v54 }
 0x9ef   : > { %v5568_v30 = vpop.eup %5567  ;;  %5581 = vlog2.f32 %v3909_v20  ;;  %v3960_v8 = vsub.f32 %v8183_v36, %v3933_v56 }
 0x9f0   : > { %v5570_v42 = vpop.eup %5569  ;;  %v4310_v48 = vpack.c.bf16 %v3705_v43, %v3704_v62  ;;  %v3935_v38 = vmul.f32 0.6931472, %v5568_v30 }
 0x9f1   : > { %v3911_v18 = vpop.xlane.xlu1 %3910  ;;  %v3689_v16 = vmul.f32 0.6931472, %v5570_v42 }
 0x9f2   : > { %v3665_v14 = vpop.xlane.xlu0 %3664  ;;  %4378 = vst [vmem:[%s8255_s12 + $0x10] sm:$0xff] %v4310_v48   ;;  %v3961_v47 = vsub.f32 %v8180_v29, %v3935_v38  ;;  %5583 = vlog2.f32 %v3911_v18 }
 0x9f3   : > { %v5572_v4 = vpop.eup %5571  ;;  %5585 = vlog2.f32 %v3665_v14  ;;  %v3710_v40 = vsub.f32 %v8191_v23, %v3689_v16 }
 0x9f4   : > { %v5574_v7 = vpop.eup %5573  ;;  %v4350_v24 = vpack.c.bf16 %v3961_v47, %v3960_v8  ;;  %v3691_v15 = vmul.f32 0.6931472, %v5572_v4 }
 0x9f5   : > { %v3667_v59 = vpop.xlane.xlu1 %3666  ;;  %v3945_v6 = vmul.f32 0.6931472, %v5574_v7 }
 0x9f6   : > { %v3661_v26 = vpop.xlane.xlu0 %3660  ;;  %4386 = vst [vmem:[%s8255_s12 + $0x50] sm:$0xff] %v4350_v24   ;;  %v3711_v60 = vsub.f32 %v8188_v49, %v3691_v15  ;;  %5587 = vlog2.f32 %v3667_v59 }
 0x9f7   : > { %v5576_v36 = vpop.eup %5575  ;;  %5589 = vlog2.f32 %v3661_v26  ;;  %v3966_v55 = vsub.f32 %v8199_v41, %v3945_v6 }
 0x9f8   : > { %v5578_v29 = vpop.eup %5577  ;;  %v4325_v51 = vpack.c.bf16 %v3711_v60, %v3710_v40  ;;  %v3947_v37 = vmul.f32 0.6931472, %v5576_v36 }
 0x9f9   : > { %v3663_v22 = vpop.xlane.xlu1 %3662  ;;  %v3685_v53 = vmul.f32 0.6931472, %v5578_v29 }
 0x9fa   : > { %v3917_v57 = vpop.xlane.xlu0 %3916  ;;  %4381 = vst [vmem:[%s8255_s12 + $0x28] sm:$0xff] %v4325_v51   ;;  %v3967_v25 = vsub.f32 %v8196_v32, %v3947_v37  ;;  %5591 = vlog2.f32 %v3663_v22 }
 0x9fb   : > { %v5580_v23 = vpop.eup %5579  ;;  %5593 = vlog2.f32 %v3917_v57  ;;  %v3708_v46 = vsub.f32 %v8207_v45, %v3685_v53 }
 0x9fc   : > { %v5582_v49 = vpop.eup %5581  ;;  %v4365_v44 = vpack.c.bf16 %v3967_v25, %v3966_v55  ;;  %v3687_v13 = vmul.f32 0.6931472, %v5580_v23 }
 0x9fd   : > { %v3919_v31 = vpop.xlane.xlu1 %3918  ;;  %v3941_v9 = vmul.f32 0.6931472, %v5582_v49 }
 0x9fe   : > { %v3921_v3 = vpop.xlane.xlu0 %3920  ;;  %4389 = vst [vmem:[%s8255_s12 + $0x68] sm:$0xff] %v4365_v44   ;;  %v3709_v28 = vsub.f32 %v8204_v61, %v3687_v13  ;;  %5595 = vlog2.f32 %v3919_v31 }
 0x9ff   : > { %v5584_v41 = vpop.eup %5583  ;;  %5597 = vlog2.f32 %v3921_v3  ;;  %v3964_v5 = vsub.f32 %v8215_v27, %v3941_v9 }
 0xa00   : > { %v5586_v32 = vpop.eup %5585  ;;  %v4320_v35 = vpack.c.bf16 %v3709_v28, %v3708_v46  ;;  %v3943_v33 = vmul.f32 0.6931472, %v5584_v41 }
 0xa01   : > { %v3923_v39 = vpop.xlane.xlu1 %3922  ;;  %v3697_v11 = vmul.f32 0.6931472, %v5586_v32 }
 0xa02   : > { %4380 = vst [vmem:[%s8255_s12 + $0x20] sm:$0xff] %v4320_v35   ;;  %v3965_v12 = vsub.f32 %v8212_v21, %v3943_v33  ;;  %5599 = vlog2.f32 %v3923_v39 }
 0xa03   : > { %v5588_v45 = vpop.eup %5587  ;;  %v3714_v0 = vsub.f32 %v8223_v10, %v3697_v11 }
 0xa04   : > { %v5590_v19 = vpop.eup %5589  ;;  %v4360_v61 = vpack.c.bf16 %v3965_v12, %v3964_v5  ;;  %v3699_v52 = vmul.f32 0.6931472, %v5588_v45 }
 0xa05   : > { %v3693_v20 = vmul.f32 0.6931472, %v5590_v19 }
 0xa06   : > { %4388 = vst [vmem:[%s8255_s12 + $0x60] sm:$0xff] %v4360_v61   ;;  %v3715_v54 = vsub.f32 %v8220_v2, %v3699_v52 }
 0xa07   : > { %v5592_v62 = vpop.eup %5591  ;;  %v3712_v21 = vsub.f32 %v8231_v17, %v3693_v20 }
 0xa08   : > { %v5594_v43 = vpop.eup %5593  ;;  %v4335_v56 = vpack.c.bf16 %v3715_v54, %v3714_v0  ;;  %v3695_v27 = vmul.f32 0.6931472, %v5592_v62 }
 0xa09   : > { %v3949_v42 = vmul.f32 0.6931472, %v5594_v43 }
 0xa0a   : > { %4383 = vst [vmem:[%s8255_s12 + $0x38] sm:$0xff] %v4335_v56   ;;  %v3713_v30 = vsub.f32 %v8228_v34, %v3695_v27 }
 0xa0b   : > { %v5596_v48 = vpop.eup %5595  ;;  %v3968_v2 = vsub.f32 %v8239_v50, %v3949_v42 }
 0xa0c   : > { %v5598_v38 = vpop.eup %5597  ;;  %v4330_v18 = vpack.c.bf16 %v3713_v30, %v3712_v21  ;;  %v3951_v10 = vmul.f32 0.6931472, %v5596_v48 }
 0xa0d   : > { %v3953_v8 = vmul.f32 0.6931472, %v5598_v38 }
 0xa0e   : > { %4382 = vst [vmem:[%s8255_s12 + $0x30] sm:$0xff] %v4330_v18   ;;  %v3969_v14 = vsub.f32 %v8236_v1, %v3951_v10 }
 0xa0f   : > { %v5600_v47 = vpop.eup %5599  ;;  %v3970_v34 = vsub.f32 %v8244_v63, %v3953_v8 }
 0xa10   : > { %v4370_v16 = vpack.c.bf16 %v3969_v14, %v3968_v2  ;;  %v3955_v17 = vmul.f32 0.6931472, %v5600_v47 }
 0xa12   : > { %4390 = vst [vmem:[%s8255_s12 + $0x70] sm:$0xff] %v4370_v16   ;;  %v3971_v4 = vsub.f32 %v8247_v58, %v3955_v17 }
 0xa14   : > { %v4375_v1 = vpack.c.bf16 %v3971_v4, %v3970_v34 }
 0xa16   : > { %4391 = vst [vmem:[%s8255_s12 + $0x78] sm:$0xff] %v4375_v1  }
 0xa17   : > { %5739 = shalt.err (!%p5736_p10)
}
 0xa18   : > { %s5740_s22 = scalar_lea.hbm %s8307_s13, 2048  ;;  %s5744_s16 = scalar_lea.hbm %s8360_s7, 4096 }
 0xa19   : > { %p5741_p6 = scmp.ne.s32.totalorder %s8307_s13, %s5740_s22  ;;  %p5745_p3 = scmp.lt.s32.totalorder %s8307_s13, %s8360_s7 }
 0xa1a   : > { %p5746_p11 = scmp.lt.s32.totalorder %s5744_s16, %s5740_s22 }
 0xa1b   : > { %p5742_p4 = pnand %p5741_p6, %p8466_p1 }
 0xa1c   : > { %p5747_p5 = por %p5746_p11, %p5745_p3 }
 0xa1d   : > { %p5743_p8 = pneg %p5742_p4 }
 0xa1f   : > { %p5748_p7 = pnand %p5747_p5, %p5743_p8 }
 0xa21   : > { %5751 = shalt.err (!%p5748_p7)
}
 0xa22   : > { %s5807_s9 = smov 64   ;;  %s5808_s10 = smov 4  }
 0xa23   : > { %5366 = dma.vmem_to_hbm [thread:$0]  (%p8466_p1), %s8309_s30, 2048, %s8307_s13, %s4053_s15, %s5807_s9, %s5807_s9, %s5808_s10  }
 0xa24 PF: > { %s4081_s28 = sand.u32 1, %s5786_s24   ;;  %p8467_p12 = scmp.ne.s32.totalorder %s8399_s8, 0 }
 0xa25   : > { %p8468_p9 = scmp.ge.s32.totalorder %s5798_s27, 2  ;;  %s4082_s29 = scalar_lea.sflag [#allocation4], %s4081_s28 }
 0xa27   : > { %p5383_p13 = pnand %p8468_p9, %p8467_p12 }
 0xa29   : > { %p5384_p0 = pneg %p5383_p13 }
 0xa2b   : > { %5781 = dma.done.wait (%p5384_p0), %s4082_s29, 2048  }
 0xa2c   : > { %5783 = vsyncadd (%p5384_p0), %s4082_s29, 4294965248  ;;  %p22_p2 = scmp.ge.s32.totalorder %s5938_s14, 4   ;;  %s8469_s24 = smov %s5790_s25 }
 0xa2d   : > { %s8470_s25 = smov %s5794_s26  ;;  %s8471_s26 = smov %s5948_s17 }
 0xa2e   : > { %s8472_s27 = smov %s5938_s14  ;;  %24 = sbr.rel (!%p22_p2) target bundleno = 9 (0x9), region = 105 }
 0xa33   :  { %4087 = vsyncpa [#allocation3], 1 }
 0xa34   :  { %4089 = vsyncpa [#allocation3 + $0x1], 1 }
 0xa35   :  { %4090 = vsyncpa [#allocation6], 1 }
 0xa36   :  { %4091 = vsyncpa [#allocation9], 1 }
 0xa37   :  { %4092 = vsyncpa [#allocation4], 1 }
 0xa38   :  { %4094 = vsyncpa [#allocation4 + $0x1], 1 }

</bundles_post_ra>
